<compile_context>
chip_gen: v5e
topology: v5e:2x2
jax: 0.10.0
libtpu: 0.0.40
codegen_flags: <defaults>
</compile_context>

<pallas_src>
import functools

import jax
import jax.numpy as jnp
from jax.experimental import pallas as pl
from jax.experimental.pallas import tpu as pltpu

POWER_ITERATIONS = 1      # SpectralNorm default
L2_EPS = 1e-12            # l2normalize eps (matches weather_gan.l2normalize)

assert POWER_ITERATIONS >= 1


# ---------------------------------------------------------------------------
# Kernel 1: power iteration  -> sigma, updated u, updated v
# ---------------------------------------------------------------------------
def _spectral_norm_kernel(w_ref, u_ref, sigma_ref, u_out_ref, v_out_ref):
    w = w_ref[...]                       # (Cout, K) f32 == weight_bar.view(height, -1)
    u = u_ref[...]                       # (Cout, 1) f32
    # Exact f32 on VPU/XLU (no MXU rounding); matrices are tiny at this size.
    for _ in range(POWER_ITERATIONS):
        v = jnp.sum(w * u, axis=0, keepdims=True)                      # (1, K)   = W^T u
        v = v / (jnp.sqrt(jnp.sum(v * v, keepdims=True)) + L2_EPS)     # l2normalize
        wv = jnp.sum(w * v, axis=1, keepdims=True)                     # (Cout,1) = W v
        u = wv / (jnp.sqrt(jnp.sum(wv * wv, keepdims=True)) + L2_EPS)  # l2normalize
    sigma_ref[...] = jnp.sum(u * wv, keepdims=True)                    # (1,1) = u . (W v)
    u_out_ref[...] = u
    v_out_ref[...] = v


# ---------------------------------------------------------------------------
# Kernel 2: spectrally-normalized 3x3 SAME conv, one im2col matmul per tile
# ---------------------------------------------------------------------------
def _conv3x3_kernel(x_ref, w_ref, b_ref, valid_ref, o_ref, lhs_ref, *, width):
    """x_ref:    (M, Cin) bf16, rows ordered (n, h, w); M = nb*H*W
    w_ref:    (K_pad, Cout_pad) bf16 im2col weight, 1/sigma already folded in
    b_ref:    (1, Cout_pad) f32
    valid_ref:(M, 9) f32 0/1 tap validity (zeros image-border contributions)
    o_ref:    (M, Cout_pad) f32 (128-lane dense -> unmasked stores)
    lhs_ref:  (M, K_pad) bf16 VMEM scratch holding the im2col patches."""
    m, cin = x_ref.shape
    k9 = 9 * cin
    k_pad = lhs_ref.shape[1]
    x = x_ref[...]                              # bf16 streamed from HBM
    zero = jnp.zeros_like(x)
    t = 0
    for kh in range(3):
        for kw in range(3):
            # Output row r=(n,h,w) reads input row r+s with s=(kh-1)*W+(kw-1);
            # rows whose (h+kh-1, w+kw-1) falls outside the image are zeroed by
            # the validity mask, so the flat shift is exact.
            s = (kh - 1) * width + (kw - 1)
            if s == 0:
                tap = x
            elif s > 0:
                tap = jnp.concatenate(
                    [x[s:, :], jnp.zeros((s, cin), x.dtype)], axis=0)
            else:
                tap = jnp.concatenate(
                    [jnp.zeros((-s, cin), x.dtype), x[:m + s, :]], axis=0)
            ok = valid_ref[:, t:t + 1] > 0.5                     # (M, 1) bool
            lhs_ref[:, t * cin:(t + 1) * cin] = jnp.where(ok, tap, zero)
            t += 1
    if k_pad > k9:                                               # zero K padding lanes
        lhs_ref[:, k9:] = jnp.zeros((m, k_pad - k9), lhs_ref.dtype)
    acc = jnp.dot(lhs_ref[...], w_ref[...],
                  preferred_element_type=jnp.float32)            # (M, Cout_pad) f32
    o_ref[...] = acc + b_ref[...]                                # bias add stays f32


def _pick_nb(n, hw):
    """Images per grid step: smallest divisor of n with nb*H*W a multiple of 256
    (fills MXU rows on v6e/v7x, >=128 on v5e) while keeping the most grid steps
    for pipelining / megacore sharding."""
    for nb in range(1, n + 1):
        if n % nb == 0 and (nb * hw) % 256 == 0:
            return nb
    return n


def _tap_validity(nb, h, w):
    """(nb*H*W, 9) f32 mask; column t=kh*3+kw is 1 where the tap stays inside
    the image (encodes the SAME zero-padding)."""
    hh = jnp.arange(h)[:, None]
    ww = jnp.arange(w)[None, :]
    cols = []
    for kh in range(3):
        for kw in range(3):
            ok = ((hh + kh - 1 >= 0) & (hh + kh - 1 < h) &
                  (ww + kw - 1 >= 0) & (ww + kw - 1 < w))
            cols.append(ok.reshape(h * w, 1))
    valid_hw = jnp.concatenate(cols, axis=1).astype(jnp.float32)   # (H*W, 9)
    return jnp.tile(valid_hw, (nb, 1))                             # (nb*H*W, 9)


@jax.jit
def spectral_norm_conv_forward(x_nchw, params):
    """Forward of SpectralNorm(nn.Conv2d(Cin, Cout, 3, padding=1)).

    Returns (y_nchw, u_new, v_new, sigma).  PyTorch mutates the u/v buffers in
    place; here the updated power-iteration state is returned functionally.
    """
    w_bar = params["w_bar"].astype(jnp.float32)                  # (Cout, Cin, 3, 3)
    bias = params["bias"].astype(jnp.float32)                    # (Cout,)
    u0 = params["u"].astype(jnp.float32)                         # (Cout,)
    n, cin, h, w = x_nchw.shape
    cout = w_bar.shape[0]
    k = cin * 9

    # ---- SpectralNorm._update_u_v (Pallas kernel 1) -----------------------
    vmem = pl.BlockSpec(memory_space=pltpu.MemorySpace.VMEM)
    sigma, u_new, v_new = pl.pallas_call(
        _spectral_norm_kernel,
        out_shape=(jax.ShapeDtypeStruct((1, 1), jnp.float32),
                   jax.ShapeDtypeStruct((cout, 1), jnp.float32),
                   jax.ShapeDtypeStruct((1, k), jnp.float32)),
        in_specs=[vmem, vmem],
        out_specs=(vmem, vmem, vmem),
    )(w_bar.reshape(cout, k), u0.reshape(cout, 1))

    # ---- wrapped Conv2d with weight_bar / sigma (Pallas kernel 2) ----------
    # Wrapper-side layout plumbing (one pass each, no extra sigma round trip):
    #  * x: NCHW -> (N*H*W, Cin) rows ordered (n,h,w), bf16 cast fused in.
    #  * weight: (Cout,Cin,3,3) -> im2col (9*Cin, Cout), 1/sigma folded in f32,
    #    then bf16 + zero-pad to (K_pad, Cout_pad) with Cout_pad % 128 == 0.
    xb = jnp.transpose(x_nchw, (0, 2, 3, 1)).reshape(n * h * w, cin)
    xb = xb.astype(jnp.bfloat16)

    cout_p = ((cout + 127) // 128) * 128
    k_p = ((k + 127) // 128) * 128
    wk = jnp.transpose(w_bar, (2, 3, 1, 0)).reshape(k, cout)     # rows (kh, kw, ci)
    wk = wk / sigma[0, 0]                                        # fold 1/sigma (f32)
    wmat = jnp.zeros((k_p, cout_p), jnp.bfloat16).at[:k, :cout].set(
        wk.astype(jnp.bfloat16))
    bmat = jnp.zeros((1, cout_p), jnp.float32).at[:, :cout].set(bias.reshape(1, cout))

    nb = _pick_nb(n, h * w)          # images per grid step (nb=1 -> M=256 here)
    m_blk = nb * h * w
    grid = (n // nb,)
    valid = _tap_validity(nb, h, w)                              # (m_blk, 9) f32

    # VMEM budget: double-buffered inputs/outputs + single lhs scratch.
    blk_bytes = (m_blk * cin * 2 + k_p * cout_p * 2 + cout_p * 4
                 + m_blk * 9 * 4 + m_blk * cout_p * 4)
    vmem_limit = int(min(48 << 20, max(16 << 20, 4 * (2 * blk_bytes + m_blk * k_p * 2))))

    flops = 2 * (n * h * w) * k_p * cout_p
    bytes_accessed = (xb.size * 2 + wmat.size * 2 + bmat.size * 4
                      + valid.size * 4 + (n * h * w) * cout_p * 4)

    y_flat = pl.pallas_call(
        functools.partial(_conv3x3_kernel, width=w),
        grid=grid,
        out_shape=jax.ShapeDtypeStruct((n * h * w, cout_p), jnp.float32),
        in_specs=[
            pl.BlockSpec((m_blk, cin), lambda i: (i, 0)),
            pl.BlockSpec((k_p, cout_p), lambda i: (0, 0)),
            pl.BlockSpec((1, cout_p), lambda i: (0, 0)),
            pl.BlockSpec((m_blk, 9), lambda i: (0, 0)),
        ],
        out_specs=pl.BlockSpec((m_blk, cout_p), lambda i: (i, 0)),
        scratch_shapes=[pltpu.VMEM((m_blk, k_p), jnp.bfloat16)],
        compiler_params=pltpu.CompilerParams(
            dimension_semantics=("parallel",),
            vmem_limit_bytes=vmem_limit),
        cost_estimate=pl.CostEstimate(flops=flops, transcendentals=0,
                                      bytes_accessed=bytes_accessed),
    )(xb, wmat, bmat, valid)

    y = jnp.transpose(y_flat[:, :cout].reshape(n, h, w, cout), (0, 3, 1, 2))
    return y, u_new.reshape(cout), v_new.reshape(k), sigma.reshape(())


# ---------------------------------------------------------------------------
# Pure-JAX/XLA reference for correctness checking
# ---------------------------------------------------------------------------
def _l2normalize(v, eps=L2_EPS):
    return v / (jnp.linalg.norm(v) + eps)


def reference_forward(x_nchw, params):
    w_bar = params["w_bar"].astype(jnp.float32)
    bias = params["bias"].astype(jnp.float32)
    u = params["u"].astype(jnp.float32)
    cout = w_bar.shape[0]
    w_mat = w_bar.reshape(cout, -1)
    v = None
    for _ in range(POWER_ITERATIONS):
        v = _l2normalize(w_mat.T @ u)
        u = _l2normalize(w_mat @ v)
    sigma = u @ (w_mat @ v)
    y = jax.lax.conv_general_dilated(
        x_nchw.astype(jnp.float32), w_bar / sigma, window_strides=(1, 1),
        padding="SAME", dimension_numbers=("NCHW", "OIHW", "NCHW"))
    y = y + bias.reshape(1, -1, 1, 1)
    return y, u, v, sigma


if __name__ == "__main__":
    key = jax.random.PRNGKey(0)
    N, Cin, H, W, Cout = 2, 4, 16, 16, 8
    ks = jax.random.split(key, 4)
    x = jax.random.normal(ks[0], (N, Cin, H, W), jnp.float32)
    w_bar = 0.1 * jax.random.normal(ks[1], (Cout, Cin, 3, 3), jnp.float32)  # weight_bar
    bias = 0.1 * jax.random.normal(ks[2], (Cout,), jnp.float32)
    u0 = jax.random.normal(ks[3], (Cout,), jnp.float32)
    u0 = u0 / (jnp.linalg.norm(u0) + L2_EPS)      # SpectralNorm._make_params: l2normalize(u)
    params = dict(w_bar=w_bar, bias=bias, u=u0)

    y, u_new, v_new, sigma = spectral_norm_conv_forward(x, params)
    y = jax.block_until_ready(y)
    assert y.shape == (N, Cout, H, W), y.shape

    y_r, u_r, v_r, s_r = reference_forward(x, params)
    err_y = float(jnp.max(jnp.abs(y - y_r)))
    err_u = float(jnp.max(jnp.abs(u_new - u_r)))
    err_v = float(jnp.max(jnp.abs(v_new - v_r)))
    err_s = float(jnp.abs(sigma - s_r))
    # The conv uses bf16 MXU operands (x and weight/sigma) with f32 accumulation
    # -> ~1e-2-scale slack on y; the power-iteration path is exact f32.
    if not (err_y < 5e-2 and err_u < 1e-4 and err_v < 1e-4 and err_s < 1e-4):
        raise AssertionError(
            f"kernel/reference mismatch: y={err_y} u={err_u} v={err_v} sigma={err_s}")
    print("KERNEL_OK")
</pallas_src>

<mosaic_0001>
module attributes {stable_mosaic.version = 11 : i64} {
  func.func @_spectral_norm_kernel(%arg0: memref<8x36xf32, #tpu.memory_space<vmem>>, %arg1: memref<8x1xf32, #tpu.memory_space<vmem>>, %arg2: memref<1x1xf32, #tpu.memory_space<vmem>>, %arg3: memref<8x1xf32, #tpu.memory_space<vmem>>, %arg4: memref<1x36xf32, #tpu.memory_space<vmem>>) attributes {dimension_semantics = [], scalar_prefetch = 0 : i64, scratch_operands = 0 : i64, tpu.core_type = #tpu.core_type<tc>} {
    %c0 = arith.constant 0 : index
    %c0_0 = arith.constant 0 : index
    %0 = vector.load %arg0[%c0, %c0_0] : memref<8x36xf32, #tpu.memory_space<vmem>>, vector<8x36xf32>
    %c0_1 = arith.constant 0 : index
    %c0_2 = arith.constant 0 : index
    %1 = vector.load %arg1[%c0_1, %c0_2] : memref<8x1xf32, #tpu.memory_space<vmem>>, vector<8x1xf32>
    %2 = vector.broadcast %1 : vector<8x1xf32> to vector<8x36xf32>
    %3 = arith.mulf %0, %2 : vector<8x36xf32>
    %cst = arith.constant dense<0.000000e+00> : vector<36xf32>
    %4 = vector.multi_reduction <add>, %3, %cst [0] : vector<8x36xf32> to vector<36xf32>
    %5 = vector.shape_cast %4 : vector<36xf32> to vector<1x36xf32>
    %6 = arith.mulf %5, %5 : vector<1x36xf32>
    %7 = vector.shape_cast %6 : vector<1x36xf32> to vector<1x1x36xf32>
    %cst_3 = arith.constant dense<0.000000e+00> : vector<1xf32>
    %8 = vector.multi_reduction <add>, %7, %cst_3 [1, 2] : vector<1x1x36xf32> to vector<1xf32>
    %9 = vector.shape_cast %8 : vector<1xf32> to vector<1x1x1xf32>
    %10 = vector.extract %9[0, 0, 0] : f32 from vector<1x1x1xf32>
    %11 = vector.broadcast %10 : f32 to vector<1x1xf32>
    %12 = math.sqrt %11 : vector<1x1xf32>
    %cst_4 = arith.constant 9.99999996E-13 : f32
    %13 = vector.broadcast %cst_4 : f32 to vector<1x1xf32>
    %14 = arith.addf %12, %13 : vector<1x1xf32>
    %15 = vector.broadcast %14 : vector<1x1xf32> to vector<1x36xf32>
    %16 = arith.divf %5, %15 : vector<1x36xf32>
    %17 = vector.broadcast %16 : vector<1x36xf32> to vector<8x36xf32>
    %18 = arith.mulf %0, %17 : vector<8x36xf32>
    %cst_5 = arith.constant dense<0.000000e+00> : vector<8xf32>
    %19 = vector.multi_reduction <add>, %18, %cst_5 [1] : vector<8x36xf32> to vector<8xf32>
    %20 = vector.shape_cast %19 : vector<8xf32> to vector<8x1xf32>
    %21 = arith.mulf %20, %20 : vector<8x1xf32>
    %22 = vector.shape_cast %21 : vector<8x1xf32> to vector<1x8x1xf32>
    %cst_6 = arith.constant dense<0.000000e+00> : vector<1xf32>
    %23 = vector.multi_reduction <add>, %22, %cst_6 [1, 2] : vector<1x8x1xf32> to vector<1xf32>
    %24 = vector.shape_cast %23 : vector<1xf32> to vector<1x1x1xf32>
    %25 = vector.extract %24[0, 0, 0] : f32 from vector<1x1x1xf32>
    %26 = vector.broadcast %25 : f32 to vector<1x1xf32>
    %27 = math.sqrt %26 : vector<1x1xf32>
    %cst_7 = arith.constant 9.99999996E-13 : f32
    %28 = vector.broadcast %cst_7 : f32 to vector<1x1xf32>
    %29 = arith.addf %27, %28 : vector<1x1xf32>
    %30 = vector.broadcast %29 : vector<1x1xf32> to vector<8x1xf32>
    %31 = arith.divf %20, %30 : vector<8x1xf32>
    %32 = arith.mulf %31, %20 : vector<8x1xf32>
    %33 = vector.shape_cast %32 : vector<8x1xf32> to vector<1x8x1xf32>
    %cst_8 = arith.constant dense<0.000000e+00> : vector<1xf32>
    %34 = vector.multi_reduction <add>, %33, %cst_8 [1, 2] : vector<1x8x1xf32> to vector<1xf32>
    %35 = vector.shape_cast %34 : vector<1xf32> to vector<1x1x1xf32>
    %36 = vector.extract %35[0, 0, 0] : f32 from vector<1x1x1xf32>
    %37 = vector.broadcast %36 : f32 to vector<1x1xf32>
    %c0_9 = arith.constant 0 : index
    %c0_10 = arith.constant 0 : index
    %38 = vector.load %arg2[%c0_9, %c0_10] : memref<1x1xf32, #tpu.memory_space<vmem>>, vector<1x1xf32>
    tpu.vector_store %arg2[%c0_9, %c0_10], %37 {strides = array<i32>} : memref<1x1xf32, #tpu.memory_space<vmem>>, vector<1x1xf32>,
    %c0_11 = arith.constant 0 : index
    %c0_12 = arith.constant 0 : index
    %39 = vector.load %arg3[%c0_11, %c0_12] : memref<8x1xf32, #tpu.memory_space<vmem>>, vector<8x1xf32>
    tpu.vector_store %arg3[%c0_11, %c0_12], %31 {strides = array<i32>} : memref<8x1xf32, #tpu.memory_space<vmem>>, vector<8x1xf32>,
    %c0_13 = arith.constant 0 : index
    %c0_14 = arith.constant 0 : index
    %40 = vector.load %arg4[%c0_13, %c0_14] : memref<1x36xf32, #tpu.memory_space<vmem>>, vector<1x36xf32>
    tpu.vector_store %arg4[%c0_13, %c0_14], %16 {strides = array<i32>} : memref<1x36xf32, #tpu.memory_space<vmem>>, vector<1x36xf32>,
    return
  }
}

module attributes {stable_mosaic.version = 11 : i64} {
  func.func @_conv3x3_kernel(%arg0: i32, %arg1: memref<256x4xbf16, #tpu.memory_space<vmem>>, %arg2: memref<128x128xbf16, #tpu.memory_space<vmem>>, %arg3: memref<1x128xf32, #tpu.memory_space<vmem>>, %arg4: memref<256x9xf32, #tpu.memory_space<vmem>>, %arg5: memref<256x128xf32, #tpu.memory_space<vmem>>, %arg6: memref<256x128xbf16, #tpu.memory_space<vmem>>) attributes {dimension_semantics = [#tpu.dimension_semantics<parallel>], iteration_bounds = array<i64: 2>, scalar_prefetch = 0 : i64, scratch_operands = 1 : i64, tpu.core_type = #tpu.core_type<tc>, window_params = [{transform_indices = @transform_0, window_bounds = array<i64: 256, 4>}, {pipeline_mode = #tpu.pipeline_mode<synchronous>, transform_indices = @transform_1, window_bounds = array<i64: 128, 128>}, {pipeline_mode = #tpu.pipeline_mode<synchronous>, transform_indices = @transform_2, window_bounds = array<i64: 1, 128>}, {pipeline_mode = #tpu.pipeline_mode<synchronous>, transform_indices = @transform_3, window_bounds = array<i64: 256, 9>}, {transform_indices = @transform_4, window_bounds = array<i64: 256, 128>}]} {
    %c0 = arith.constant 0 : index
    %c0_0 = arith.constant 0 : index
    %0 = vector.load %arg1[%c0, %c0_0] : memref<256x4xbf16, #tpu.memory_space<vmem>>, vector<256x4xbf16>
    %cst = arith.constant 0.000000e+00 : bf16
    %1 = vector.broadcast %cst : bf16 to vector<256x4xbf16>
    %cst_1 = arith.constant 0.000000e+00 : bf16
    %2 = vector.broadcast %cst_1 : bf16 to vector<17x4xbf16>
    %3 = vector.extract_strided_slice %0 {offsets = [0, 0], sizes = [239, 4], strides = [1, 1]} : vector<256x4xbf16> to vector<239x4xbf16>
    %4 = tpu.concatenate %2, %3 in 0 : vector<17x4xbf16>, vector<239x4xbf16> -> vector<256x4xbf16>
    %c0_2 = arith.constant 0 : index
    %c0_3 = arith.constant 0 : index
    %5 = vector.load %arg4[%c0_2, %c0_3] : memref<256x9xf32, #tpu.memory_space<vmem>>, vector<256x1xf32>
    %cst_4 = arith.constant 5.000000e-01 : f32
    %6 = vector.broadcast %cst_4 : f32 to vector<256x1xf32>
    %7 = arith.cmpf ogt, %5, %6 : vector<256x1xf32>
    %8 = vector.shape_cast %7 : vector<256x1xi1> to vector<256x1xi1>
    %9 = vector.broadcast %8 : vector<256x1xi1> to vector<256x4xi1>
    %10 = arith.select %9, %4, %1 : vector<256x4xi1>, vector<256x4xbf16>
    %c0_5 = arith.constant 0 : index
    %c0_6 = arith.constant 0 : index
    %11 = vector.load %arg6[%c0_5, %c0_6] : memref<256x128xbf16, #tpu.memory_space<vmem>>, vector<256x4xbf16>
    tpu.vector_store %arg6[%c0_5, %c0_6], %10 {strides = array<i32>} : memref<256x128xbf16, #tpu.memory_space<vmem>>, vector<256x4xbf16>,
    %cst_7 = arith.constant 0.000000e+00 : bf16
    %12 = vector.broadcast %cst_7 : bf16 to vector<16x4xbf16>
    %13 = vector.extract_strided_slice %0 {offsets = [0, 0], sizes = [240, 4], strides = [1, 1]} : vector<256x4xbf16> to vector<240x4xbf16>
    %14 = tpu.concatenate %12, %13 in 0 : vector<16x4xbf16>, vector<240x4xbf16> -> vector<256x4xbf16>
    %c0_8 = arith.constant 0 : index
    %c1 = arith.constant 1 : index
    %15 = vector.load %arg4[%c0_8, %c1] : memref<256x9xf32, #tpu.memory_space<vmem>>, vector<256x1xf32>
    %cst_9 = arith.constant 5.000000e-01 : f32
    %16 = vector.broadcast %cst_9 : f32 to vector<256x1xf32>
    %17 = arith.cmpf ogt, %15, %16 : vector<256x1xf32>
    %18 = vector.shape_cast %17 : vector<256x1xi1> to vector<256x1xi1>
    %19 = vector.broadcast %18 : vector<256x1xi1> to vector<256x4xi1>
    %20 = arith.select %19, %14, %1 : vector<256x4xi1>, vector<256x4xbf16>
    %c0_10 = arith.constant 0 : index
    %c4 = arith.constant 4 : index
    %21 = vector.load %arg6[%c0_10, %c4] : memref<256x128xbf16, #tpu.memory_space<vmem>>, vector<256x4xbf16>
    tpu.vector_store %arg6[%c0_10, %c4], %20 {strides = array<i32>} : memref<256x128xbf16, #tpu.memory_space<vmem>>, vector<256x4xbf16>,
    %cst_11 = arith.constant 0.000000e+00 : bf16
    %22 = vector.broadcast %cst_11 : bf16 to vector<15x4xbf16>
    %23 = vector.extract_strided_slice %0 {offsets = [0, 0], sizes = [241, 4], strides = [1, 1]} : vector<256x4xbf16> to vector<241x4xbf16>
    %24 = tpu.concatenate %22, %23 in 0 : vector<15x4xbf16>, vector<241x4xbf16> -> vector<256x4xbf16>
    %c0_12 = arith.constant 0 : index
    %c2 = arith.constant 2 : index
    %25 = vector.load %arg4[%c0_12, %c2] : memref<256x9xf32, #tpu.memory_space<vmem>>, vector<256x1xf32>
    %cst_13 = arith.constant 5.000000e-01 : f32
    %26 = vector.broadcast %cst_13 : f32 to vector<256x1xf32>
    %27 = arith.cmpf ogt, %25, %26 : vector<256x1xf32>
    %28 = vector.shape_cast %27 : vector<256x1xi1> to vector<256x1xi1>
    %29 = vector.broadcast %28 : vector<256x1xi1> to vector<256x4xi1>
    %30 = arith.select %29, %24, %1 : vector<256x4xi1>, vector<256x4xbf16>
    %c0_14 = arith.constant 0 : index
    %c8 = arith.constant 8 : index
    %31 = vector.load %arg6[%c0_14, %c8] : memref<256x128xbf16, #tpu.memory_space<vmem>>, vector<256x4xbf16>
    tpu.vector_store %arg6[%c0_14, %c8], %30 {strides = array<i32>} : memref<256x128xbf16, #tpu.memory_space<vmem>>, vector<256x4xbf16>,
    %cst_15 = arith.constant 0.000000e+00 : bf16
    %32 = vector.broadcast %cst_15 : bf16 to vector<1x4xbf16>
    %33 = vector.extract_strided_slice %0 {offsets = [0, 0], sizes = [255, 4], strides = [1, 1]} : vector<256x4xbf16> to vector<255x4xbf16>
    %34 = tpu.concatenate %32, %33 in 0 : vector<1x4xbf16>, vector<255x4xbf16> -> vector<256x4xbf16>
    %c0_16 = arith.constant 0 : index
    %c3 = arith.constant 3 : index
    %35 = vector.load %arg4[%c0_16, %c3] : memref<256x9xf32, #tpu.memory_space<vmem>>, vector<256x1xf32>
    %cst_17 = arith.constant 5.000000e-01 : f32
    %36 = vector.broadcast %cst_17 : f32 to vector<256x1xf32>
    %37 = arith.cmpf ogt, %35, %36 : vector<256x1xf32>
    %38 = vector.shape_cast %37 : vector<256x1xi1> to vector<256x1xi1>
    %39 = vector.broadcast %38 : vector<256x1xi1> to vector<256x4xi1>
    %40 = arith.select %39, %34, %1 : vector<256x4xi1>, vector<256x4xbf16>
    %c0_18 = arith.constant 0 : index
    %c12 = arith.constant 12 : index
    %41 = vector.load %arg6[%c0_18, %c12] : memref<256x128xbf16, #tpu.memory_space<vmem>>, vector<256x4xbf16>
    tpu.vector_store %arg6[%c0_18, %c12], %40 {strides = array<i32>} : memref<256x128xbf16, #tpu.memory_space<vmem>>, vector<256x4xbf16>,
    %c0_19 = arith.constant 0 : index
    %c4_20 = arith.constant 4 : index
    %42 = vector.load %arg4[%c0_19, %c4_20] : memref<256x9xf32, #tpu.memory_space<vmem>>, vector<256x1xf32>
    %cst_21 = arith.constant 5.000000e-01 : f32
    %43 = vector.broadcast %cst_21 : f32 to vector<256x1xf32>
    %44 = arith.cmpf ogt, %42, %43 : vector<256x1xf32>
    %45 = vector.shape_cast %44 : vector<256x1xi1> to vector<256x1xi1>
    %46 = vector.broadcast %45 : vector<256x1xi1> to vector<256x4xi1>
    %47 = arith.select %46, %0, %1 : vector<256x4xi1>, vector<256x4xbf16>
    %c0_22 = arith.constant 0 : index
    %c16 = arith.constant 16 : index
    %48 = vector.load %arg6[%c0_22, %c16] : memref<256x128xbf16, #tpu.memory_space<vmem>>, vector<256x4xbf16>
    tpu.vector_store %arg6[%c0_22, %c16], %47 {strides = array<i32>} : memref<256x128xbf16, #tpu.memory_space<vmem>>, vector<256x4xbf16>,
    %49 = vector.extract_strided_slice %0 {offsets = [1, 0], sizes = [255, 4], strides = [1, 1]} : vector<256x4xbf16> to vector<255x4xbf16>
    %cst_23 = arith.constant 0.000000e+00 : bf16
    %50 = vector.broadcast %cst_23 : bf16 to vector<1x4xbf16>
    %51 = tpu.concatenate %49, %50 in 0 : vector<255x4xbf16>, vector<1x4xbf16> -> vector<256x4xbf16>
    %c0_24 = arith.constant 0 : index
    %c5 = arith.constant 5 : index
    %52 = vector.load %arg4[%c0_24, %c5] : memref<256x9xf32, #tpu.memory_space<vmem>>, vector<256x1xf32>
    %cst_25 = arith.constant 5.000000e-01 : f32
    %53 = vector.broadcast %cst_25 : f32 to vector<256x1xf32>
    %54 = arith.cmpf ogt, %52, %53 : vector<256x1xf32>
    %55 = vector.shape_cast %54 : vector<256x1xi1> to vector<256x1xi1>
    %56 = vector.broadcast %55 : vector<256x1xi1> to vector<256x4xi1>
    %57 = arith.select %56, %51, %1 : vector<256x4xi1>, vector<256x4xbf16>
    %c0_26 = arith.constant 0 : index
    %c20 = arith.constant 20 : index
    %58 = vector.load %arg6[%c0_26, %c20] : memref<256x128xbf16, #tpu.memory_space<vmem>>, vector<256x4xbf16>
    tpu.vector_store %arg6[%c0_26, %c20], %57 {strides = array<i32>} : memref<256x128xbf16, #tpu.memory_space<vmem>>, vector<256x4xbf16>,
    %59 = vector.extract_strided_slice %0 {offsets = [15, 0], sizes = [241, 4], strides = [1, 1]} : vector<256x4xbf16> to vector<241x4xbf16>
    %cst_27 = arith.constant 0.000000e+00 : bf16
    %60 = vector.broadcast %cst_27 : bf16 to vector<15x4xbf16>
    %61 = tpu.concatenate %59, %60 in 0 : vector<241x4xbf16>, vector<15x4xbf16> -> vector<256x4xbf16>
    %c0_28 = arith.constant 0 : index
    %c6 = arith.constant 6 : index
    %62 = vector.load %arg4[%c0_28, %c6] : memref<256x9xf32, #tpu.memory_space<vmem>>, vector<256x1xf32>
    %cst_29 = arith.constant 5.000000e-01 : f32
    %63 = vector.broadcast %cst_29 : f32 to vector<256x1xf32>
    %64 = arith.cmpf ogt, %62, %63 : vector<256x1xf32>
    %65 = vector.shape_cast %64 : vector<256x1xi1> to vector<256x1xi1>
    %66 = vector.broadcast %65 : vector<256x1xi1> to vector<256x4xi1>
    %67 = arith.select %66, %61, %1 : vector<256x4xi1>, vector<256x4xbf16>
    %c0_30 = arith.constant 0 : index
    %c24 = arith.constant 24 : index
    %68 = vector.load %arg6[%c0_30, %c24] : memref<256x128xbf16, #tpu.memory_space<vmem>>, vector<256x4xbf16>
    tpu.vector_store %arg6[%c0_30, %c24], %67 {strides = array<i32>} : memref<256x128xbf16, #tpu.memory_space<vmem>>, vector<256x4xbf16>,
    %69 = vector.extract_strided_slice %0 {offsets = [16, 0], sizes = [240, 4], strides = [1, 1]} : vector<256x4xbf16> to vector<240x4xbf16>
    %cst_31 = arith.constant 0.000000e+00 : bf16
    %70 = vector.broadcast %cst_31 : bf16 to vector<16x4xbf16>
    %71 = tpu.concatenate %69, %70 in 0 : vector<240x4xbf16>, vector<16x4xbf16> -> vector<256x4xbf16>
    %c0_32 = arith.constant 0 : index
    %c7 = arith.constant 7 : index
    %72 = vector.load %arg4[%c0_32, %c7] : memref<256x9xf32, #tpu.memory_space<vmem>>, vector<256x1xf32>
    %cst_33 = arith.constant 5.000000e-01 : f32
    %73 = vector.broadcast %cst_33 : f32 to vector<256x1xf32>
    %74 = arith.cmpf ogt, %72, %73 : vector<256x1xf32>
    %75 = vector.shape_cast %74 : vector<256x1xi1> to vector<256x1xi1>
    %76 = vector.broadcast %75 : vector<256x1xi1> to vector<256x4xi1>
    %77 = arith.select %76, %71, %1 : vector<256x4xi1>, vector<256x4xbf16>
    %c0_34 = arith.constant 0 : index
    %c28 = arith.constant 28 : index
    %78 = vector.load %arg6[%c0_34, %c28] : memref<256x128xbf16, #tpu.memory_space<vmem>>, vector<256x4xbf16>
    tpu.vector_store %arg6[%c0_34, %c28], %77 {strides = array<i32>} : memref<256x128xbf16, #tpu.memory_space<vmem>>, vector<256x4xbf16>,
    %79 = vector.extract_strided_slice %0 {offsets = [17, 0], sizes = [239, 4], strides = [1, 1]} : vector<256x4xbf16> to vector<239x4xbf16>
    %cst_35 = arith.constant 0.000000e+00 : bf16
    %80 = vector.broadcast %cst_35 : bf16 to vector<17x4xbf16>
    %81 = tpu.concatenate %79, %80 in 0 : vector<239x4xbf16>, vector<17x4xbf16> -> vector<256x4xbf16>
    %c0_36 = arith.constant 0 : index
    %c8_37 = arith.constant 8 : index
    %82 = vector.load %arg4[%c0_36, %c8_37] : memref<256x9xf32, #tpu.memory_space<vmem>>, vector<256x1xf32>
    %cst_38 = arith.constant 5.000000e-01 : f32
    %83 = vector.broadcast %cst_38 : f32 to vector<256x1xf32>
    %84 = arith.cmpf ogt, %82, %83 : vector<256x1xf32>
    %85 = vector.shape_cast %84 : vector<256x1xi1> to vector<256x1xi1>
    %86 = vector.broadcast %85 : vector<256x1xi1> to vector<256x4xi1>
    %87 = arith.select %86, %81, %1 : vector<256x4xi1>, vector<256x4xbf16>
    %c0_39 = arith.constant 0 : index
    %c32 = arith.constant 32 : index
    %88 = vector.load %arg6[%c0_39, %c32] : memref<256x128xbf16, #tpu.memory_space<vmem>>, vector<256x4xbf16>
    tpu.vector_store %arg6[%c0_39, %c32], %87 {strides = array<i32>} : memref<256x128xbf16, #tpu.memory_space<vmem>>, vector<256x4xbf16>,
    %cst_40 = arith.constant 0.000000e+00 : bf16
    %89 = vector.broadcast %cst_40 : bf16 to vector<256x92xbf16>
    %c0_41 = arith.constant 0 : index
    %c36 = arith.constant 36 : index
    %90 = vector.load %arg6[%c0_41, %c36] : memref<256x128xbf16, #tpu.memory_space<vmem>>, vector<256x92xbf16>
    tpu.vector_store %arg6[%c0_41, %c36], %89 {strides = array<i32>} : memref<256x128xbf16, #tpu.memory_space<vmem>>, vector<256x92xbf16>,
    %c0_42 = arith.constant 0 : index
    %c0_43 = arith.constant 0 : index
    %91 = vector.load %arg6[%c0_42, %c0_43] : memref<256x128xbf16, #tpu.memory_space<vmem>>, vector<256x128xbf16>
    %c0_44 = arith.constant 0 : index
    %c0_45 = arith.constant 0 : index
    %92 = vector.load %arg2[%c0_44, %c0_45] : memref<128x128xbf16, #tpu.memory_space<vmem>>, vector<128x128xbf16>
    %cst_46 = arith.constant dense<0.000000e+00> : vector<256x128xf32>
    %93 = tpu.matmul %91, %92, %cst_46 {dimension_numbers = #tpu.dot_dimension_numbers<[1], [0], [0], [1], [0, 0, 1, 1], [], []>} : vector<256x128xbf16>, vector<128x128xbf16>, vector<256x128xf32> -> vector<256x128xf32>
    %c0_47 = arith.constant 0 : index
    %c0_48 = arith.constant 0 : index
    %94 = vector.load %arg3[%c0_47, %c0_48] : memref<1x128xf32, #tpu.memory_space<vmem>>, vector<1x128xf32>
    %95 = vector.broadcast %94 : vector<1x128xf32> to vector<256x128xf32>
    %96 = arith.addf %93, %95 : vector<256x128xf32>
    %c0_49 = arith.constant 0 : index
    %c0_50 = arith.constant 0 : index
    %97 = vector.load %arg5[%c0_49, %c0_50] : memref<256x128xf32, #tpu.memory_space<vmem>>, vector<256x128xf32>
    tpu.vector_store %arg5[%c0_49, %c0_50], %96 {strides = array<i32>} : memref<256x128xf32, #tpu.memory_space<vmem>>, vector<256x128xf32>,
    return
  }
  func.func @transform_0(%arg0: i32) -> (i32, i32) {
    %c0_i32 = arith.constant 0 : i32
    %c0_i32_0 = arith.constant 0 : i32
    return %arg0, %c0_i32 : i32, i32
  }
  func.func @transform_1(%arg0: i32) -> (i32, i32) {
    %c0_i32 = arith.constant 0 : i32
    %c0_i32_0 = arith.constant 0 : i32
    %c0_i32_1 = arith.constant 0 : i32
    return %c0_i32, %c0_i32_0 : i32, i32
  }
  func.func @transform_2(%arg0: i32) -> (i32, i32) {
    %c0_i32 = arith.constant 0 : i32
    %c0_i32_0 = arith.constant 0 : i32
    %c0_i32_1 = arith.constant 0 : i32
    return %c0_i32, %c0_i32_0 : i32, i32
  }
  func.func @transform_3(%arg0: i32) -> (i32, i32) {
    %c0_i32 = arith.constant 0 : i32
    %c0_i32_0 = arith.constant 0 : i32
    %c0_i32_1 = arith.constant 0 : i32
    return %c0_i32, %c0_i32_0 : i32, i32
  }
  func.func @transform_4(%arg0: i32) -> (i32, i32) {
    %c0_i32 = arith.constant 0 : i32
    %c0_i32_0 = arith.constant 0 : i32
    return %arg0, %c0_i32 : i32, i32
  }
}

</mosaic_0001>

<bundles_post_ra>
// kernel: spectral_norm_conv_forward.2
= control target key start
LH: loop header
LB: loop body
LE: loop exit
PB: predicated region body
PF: predicated region fallthrough
CT: control target
= control target key end

     0   :  { %10 = vsyncpa [#allocation3], 0  ;;  %s290_s0 = inlined_call_operand.vmem [shape: f32[8,36], index: 0, kind: input, shape index: {}]   ;;  %s291_s1 = inlined_call_operand.vmem [shape: f32[8,1], index: 1, kind: input, shape index: {}]   ;;  %s292_s2 = inlined_call_operand.hbm [shape: f32[1,1], index: 2, kind: output, shape index: {0}]   ;;  %s293_s3 = inlined_call_operand.vmem [shape: f32[8,1], index: 3, kind: output, shape index: {1}]   ;;  %s294_s4 = inlined_call_operand.hbm [shape: f32[1,36], index: 4, kind: output, shape index: {2}]  }
   0x1   :  { %v17_v0 = vld [vmem:[%s291_s1] sm:$0xff] }
   0x2   :  { %11 = vsyncpa [#allocation5], 0  ;;  %v240_v1 = vmov 0   ;;  %v16_v2 = vld [vmem:[%s290_s0] sm:$0xff]  ;;  %vm24_vm0 = vcmask 293888   ;;  %vm33_vm1 = vcmask 286720  }
   0x3   :  { %179 = vset.pattern.permute.xlu0 %v240_v1  ;;  %vm78_vm8 = vcmask 7168   ;;  %s241_s21 = smov [#allocation4]   ;;  %s154_s25 = sshll.u32 %s294_s4, 4  ;;  %vm130_vm15 = vcmask 0   ;;  %s155_s25 = int_to_ptr.hbm [resolvable:$true] %s154_s25 }
   0x4   :  { %20 = vperm.xlu0 %179, %v17_v0   ;;  %s152_s22 = sshll.u32 %s241_s21, 4  ;;  %s141_s29 = sshll.u32 %s292_s2, 4  ;;  %s153_s22 = int_to_ptr.vmem [resolvable:$true] %s152_s22  ;;  %s142_s29 = int_to_ptr.hbm [resolvable:$true] %s141_s29 }
  0x76   :  { %v21_v3 = vpop.permute.xlu0 %20 }
  0x77   :  { %v23_v4 = vmul.f32 %v21_v3, %v16_v2 }
  0x79   :  { %v25_v5 = vsel %vm24_vm0, %v23_v4, 0.0 }
  0x7a   :  { %v26_v6 = vrot.slane %v25_v5, 4 }
  0x7c   :  { %v27_v7 = vadd.f32 %v26_v6, %v25_v5 }
  0x7e   :  { %v28_v8 = vrot.slane %v27_v7, 2 }
  0x80   :  { %v29_v9 = vadd.f32 %v28_v8, %v27_v7 }
  0x82   :  { %v30_v10 = vrot.slane %v29_v9, 1 }
  0x84   :  { %v31_v11 = vadd.f32 %v30_v10, %v29_v9 }
  0x86   :  { %v32_v12 = vmul.f32 %v31_v11, %v31_v11 }
  0x88   :  { %v34_v13 = vsel %vm33_vm1, %v32_v12, 0.0 }
  0x89   :  { %35 = vadd.xlane.f32.xlu0 %v34_v13 }
  0xfc   :  { %v36_v14 = vpop.xlane.xlu0 %35 }
  0xfd   :  { %v37_v15 = vrot.slane %v36_v14, 4 }
  0xff   :  { %v38_v16 = vadd.f32 %v37_v15, %v36_v14 }
 0x101   :  { %v39_v17 = vrot.slane %v38_v16, 2 }
 0x103   :  { %v40_v18 = vadd.f32 %v39_v17, %v38_v16 }
 0x105   :  { %v41_v19 = vrot.slane %v40_v18, 1 }
 0x107   :  { %v42_v20 = vadd.f32 %v41_v19, %v40_v18 }
 0x109   :  { %170 = vpush %v42_v20 }
 0x13a   :  { %s171_s0 = spop %170 }
 0x13b   :  { %v44_v21 = vstv %s171_s0 }
 0x13c   :  { %180 = vrsqrt.f32 %v44_v21  ;;  %vm52_vm2 = vcmp.eq.f32.partialorder %v44_v21, inf  ;;  %v55_v29 = vand.u32 2147483648, %v44_v21  ;;  %vm54_vm3 = vcmp.eq.f32.partialorder %v44_v21, 0.0 }
 0x142   :  { %v181_v22 = vpop.eup %180 }
 0x143   :  { %v46_v23 = vmul.f32 %v181_v22, %v44_v21 }
 0x145   :  { %v47_v24 = vmul.f32 %v181_v22, %v46_v23 }
 0x147   :  { %v48_v25 = vmul.f32 0.5, %v47_v24 }
 0x149   :  { %v49_v26 = vsub.f32 1.5, %v48_v25 }
 0x14b   :  { %v50_v27 = vmul.f32 %v181_v22, %v49_v26 }
 0x14d   :  { %v51_v28 = vmul.f32 %v50_v27, %v44_v21 }
 0x14f   :  { %v53_v30 = vsel %vm52_vm2, %v44_v21, %v51_v28 }
 0x150   :  { %v56_v31 = vsel %vm54_vm3, %v55_v29, %v53_v30 }
 0x151   :  { %v57_v32 = vadd.f32 1e-12, %v56_v31 }
 0x153   :  { %182 = vrcp.f32 %v57_v32  ;;  %v69_v36 = vand.u32 2147483648, %v57_v32  ;;  %v67_v38 = vand.u32 2147483647, %v57_v32  ;;  %vm63_vm5 = vweird.f32 %v57_v32 }
 0x155   :  { %v70_v40 = vor.u32 1.1754944e-38, %v69_v36  ;;  %vm68_vm7 = vcmp.eq.f32.partialorder %v67_v38, 8.507059e+37 }
 0x159   :  { %v183_v33 = vpop.eup %182 }
 0x15a   :  { %v59_v34 = vmul.f32 %v183_v33, %v57_v32  ;;  %vm64_vm4 = vweird.f32 %v183_v33 }
 0x15b   :  { %vm65_vm6 = vmor %vm63_vm5, %vm64_vm4 }
 0x15c   :  { %v60_v35 = vsub.f32 1.0, %v59_v34 }
 0x15e   :  { %v61_v37 = vmul.f32 %v183_v33, %v60_v35 }
 0x160   :  { %v62_v39 = vadd.f32 %v183_v33, %v61_v37 }
 0x162   :  { %v66_v41 = vsel %vm65_vm6, %v183_v33, %v62_v39 }
 0x163   :  { %v71_v42 = vsel %vm68_vm7, %v70_v40, %v66_v41 }
 0x164   :  { %v72_v43 = vmul.f32 %v71_v42, %v31_v11 }
 0x166   :  { %v73_v44 = vmul.f32 %v72_v43, %v16_v2  ;;  %133 = vst.msk [vmem:[#allocation4] sm:$0x1] %vm33_vm1, %v72_v43 }
 0x167   :  { %157 = dma.vmem_to_hbm [thread:$0]  %s153_s22, 16, %s155_s25, [#allocation5]  }
 0x168   :  { %v74_v45 = vsel %vm24_vm0, %v73_v44, 0.0 }
 0x169   :  { %75 = vadd.xlane.f32.xlu1 %v74_v45 }
 0x1dc   :  { %v76_v46 = vpop.xlane.xlu1 %75 }
 0x1dd   :  { %v77_v47 = vmul.f32 %v76_v46, %v76_v46 }
 0x1df   :  { %v79_v48 = vsel %vm78_vm8, %v77_v47, 0.0 }
 0x1e0   :  { %80 = vadd.xlane.f32.xlu1 %v79_v48 }
 0x253   :  { %v81_v49 = vpop.xlane.xlu1 %80 }
 0x254   :  { %v82_v50 = vrot.slane %v81_v49, 4 }
 0x256   :  { %v83_v51 = vadd.f32 %v82_v50, %v81_v49 }
 0x258   :  { %v84_v52 = vrot.slane %v83_v51, 2 }
 0x25a   :  { %v85_v53 = vadd.f32 %v84_v52, %v83_v51 }
 0x25c   :  { %v86_v54 = vrot.slane %v85_v53, 1 }
 0x25e   :  { %v87_v55 = vadd.f32 %v86_v54, %v85_v53 }
 0x260   :  { %172 = vpush %v87_v55 }
 0x291   :  { %s173_s1 = spop %172 }
 0x292   :  { %v89_v56 = vstv %s173_s1 }
 0x293   :  { %184 = vrsqrt.f32 %v89_v56  ;;  %vm97_vm9 = vcmp.eq.f32.partialorder %v89_v56, inf  ;;  %v100_v0 = vand.u32 2147483648, %v89_v56  ;;  %vm99_vm10 = vcmp.eq.f32.partialorder %v89_v56, 0.0 }
 0x299   :  { %v185_v57 = vpop.eup %184 }
 0x29a   :  { %v91_v58 = vmul.f32 %v185_v57, %v89_v56 }
 0x29c   :  { %v92_v59 = vmul.f32 %v185_v57, %v91_v58 }
 0x29e   :  { %v93_v60 = vmul.f32 0.5, %v92_v59 }
 0x2a0   :  { %v94_v61 = vsub.f32 1.5, %v93_v60 }
 0x2a2   :  { %v95_v62 = vmul.f32 %v185_v57, %v94_v61 }
 0x2a4   :  { %v96_v63 = vmul.f32 %v95_v62, %v89_v56 }
 0x2a6   :  { %v98_v1 = vsel %vm97_vm9, %v89_v56, %v96_v63 }
 0x2a7   :  { %v101_v2 = vsel %vm99_vm10, %v100_v0, %v98_v1 }
 0x2a8   :  { %v102_v3 = vadd.f32 1e-12, %v101_v2 }
 0x2aa   :  { %186 = vrcp.f32 %v102_v3  ;;  %v114_v7 = vand.u32 2147483648, %v102_v3  ;;  %v112_v9 = vand.u32 2147483647, %v102_v3  ;;  %vm108_vm12 = vweird.f32 %v102_v3 }
 0x2ac   :  { %v115_v11 = vor.u32 1.1754944e-38, %v114_v7  ;;  %vm113_vm14 = vcmp.eq.f32.partialorder %v112_v9, 8.507059e+37 }
 0x2b0   :  { %v187_v4 = vpop.eup %186 }
 0x2b1   :  { %v104_v5 = vmul.f32 %v187_v4, %v102_v3  ;;  %vm109_vm11 = vweird.f32 %v187_v4 }
 0x2b2   :  { %vm110_vm13 = vmor %vm108_vm12, %vm109_vm11 }
 0x2b3   :  { %v105_v6 = vsub.f32 1.0, %v104_v5 }
 0x2b5   :  { %v106_v8 = vmul.f32 %v187_v4, %v105_v6 }
 0x2b7   :  { %v107_v10 = vadd.f32 %v187_v4, %v106_v8 }
 0x2b9   :  { %v111_v12 = vsel %vm110_vm13, %v187_v4, %v107_v10 }
 0x2ba   :  { %v116_v13 = vsel %vm113_vm14, %v115_v11, %v111_v12 }
 0x2bb   :  { %v117_v14 = vmul.f32 %v116_v13, %v76_v46 }
 0x2bd   :  { %v118_v15 = vmul.f32 %v117_v14, %v76_v46  ;;  %132 = vst.msk [vmem:[%s293_s3] sm:$0xff] %vm78_vm8, %v117_v14  ;;  %s242_s3 = smov [#allocation2]  }
 0x2be   :  { %s139_s26 = sshll.u32 %s242_s3, 4  ;;  %s140_s26 = int_to_ptr.vmem [resolvable:$true] %s139_s26 }
 0x2bf   :  { %v119_v16 = vsel %vm78_vm8, %v118_v15, 0.0 }
 0x2c0   :  { %120 = vadd.xlane.f32.xlu2 %v119_v16 }
 0x333   :  { %v121_v17 = vpop.xlane.xlu2 %120 }
 0x334   :  { %v122_v18 = vrot.slane %v121_v17, 4 }
 0x336   :  { %v123_v19 = vadd.f32 %v122_v18, %v121_v17 }
 0x338   :  { %v124_v20 = vrot.slane %v123_v19, 2 }
 0x33a   :  { %v125_v21 = vadd.f32 %v124_v20, %v123_v19 }
 0x33c   :  { %v126_v22 = vrot.slane %v125_v21, 1 }
 0x33e   :  { %v127_v23 = vadd.f32 %v126_v22, %v125_v21 }
 0x340   :  { %174 = vpush %v127_v23 }
 0x371   :  { %s175_s4 = spop %174 }
 0x372   :  { %v129_v24 = vstv %s175_s4 }
 0x373   :  { %131 = vst.msk [vmem:[#allocation2] sm:$0x1] %vm130_vm15, %v129_v24 }
 0x374   :  { %144 = dma.vmem_to_hbm [thread:$0]  %s140_s26, 16, %s142_s29, [#allocation3]  }
 0x375   :  { %236 = dma.done.wait [#allocation3], 16  }
 0x376   :  { %237 = vsyncadd [#allocation3], 4294967280 }
 0x377   :  { %238 = dma.done.wait [#allocation5], 16  }
 0x378   :  { %239 = vsyncadd [#allocation5], 4294967280 }
 0x379   :  { %168 = vsyncpa [#allocation3], 1 }
 0x37a   :  { %169 = vsyncpa [#allocation5], 1 }

// kernel: spectral_norm_conv_forward.3
= control target key start
LH: loop header
LB: loop body
LE: loop exit
PB: predicated region body
PF: predicated region fallthrough
CT: control target
= control target key end

     0   :  { %s7314_s15 = smov 0   ;;  %s10976_s0 = inlined_call_operand.vmem [shape: bf16[512,4], index: 0, kind: input, shape index: {}]   ;;  %s10977_s1 = inlined_call_operand.vmem [shape: bf16[128,128], index: 1, kind: input, shape index: {}]   ;;  %s10978_s2 = inlined_call_operand.vmem [shape: f32[1,128], index: 2, kind: input, shape index: {}]   ;;  %s10979_s3 = inlined_call_operand.vmem [shape: f32[256,9], index: 3, kind: input, shape index: {}]   ;;  %s10980_s4 = inlined_call_operand.vmem [shape: f32[512,128], index: 4, kind: output, shape index: {}]  }
   0x1 LB: > { %s6776_s16 = sadd.s32 4294967295, %s7270_s15   ;;  %p6780_p0 = scmp.ge.s32.totalorder %s7270_s15, 1  ;;  %s7270_s15 = sphi %s7314_s15, %s14_s15  }
   0x2   : > { %p163_p1 = scmp.lt.s32.totalorder %s7270_s15, 3 }
   0x4   : > { %p164_p2 = pnand %p6780_p0, %p163_p1 }
   0x6   : > { %167 = sbr.rel (%p164_p2) target bundleno = 2122 (0x84a), region = 36 }
   0xb   : > { %v453_v0 = vld [vmem:[%s10979_s3 + $0x30] sm:$0xff]  ;;  %v451_v1 = vld [vmem:[%s10979_s3 + $0x20] sm:$0xff]  ;;  %v11020_v3 = vmov 0   ;;  %v454_v7 = vld [vmem:[%s10979_s3 + $0x38] sm:$0xff]  ;;  %s6781_s29 = sshll.u32 %s6776_s16, 5  ;;  %v7273_v61 = vmov 1  }
   0xc   : > { %v449_v2 = vld [vmem:[%s10979_s3 + $0x10] sm:$0xff]  ;;  %7206 = vset.pattern.permute.xlu2 %v11020_v3  ;;  %7205 = vset.pattern.permute.xlu1 %v11020_v3  ;;  %vm483_vm0 = vcmp.gt.f32.partialorder %v453_v0, 0.5  ;;  %vm481_vm1 = vcmp.gt.f32.partialorder %v451_v1, 0.5  ;;  %v452_v8 = vld [vmem:[%s10979_s3 + $0x28] sm:$0xff]  ;;  %v450_v9 = vld [vmem:[%s10979_s3 + $0x18] sm:$0xff]  ;;  %vm484_vm3 = vcmp.gt.f32.partialorder %v454_v7, 0.5 }
   0xd   : > { %vm479_vm2 = vcmp.gt.f32.partialorder %v449_v2, 0.5  ;;  %7204 = vset.pattern.permute.xlu0 %v11020_v3  ;;  %v7335_v4 = vsel %vm483_vm0, 1, %v11020_v3  ;;  %v7338_v5 = vsel %vm481_vm1, 1, %v11020_v3  ;;  %vm482_vm4 = vcmp.gt.f32.partialorder %v452_v8, 0.5  ;;  %v457_v13 = vld [vmem:[%s10979_s3 + $0x50] sm:$0xff]  ;;  %v456_v14 = vld [vmem:[%s10979_s3 + $0x48] sm:$0xff] }
   0xe   : > { %v7341_v6 = vsel %vm479_vm2, 1, %v11020_v3  ;;  %552 = vperm.xlu2 %7206, %v7335_v4   ;;  %546 = vperm.xlu1 %7205, %v7338_v5   ;;  %vm480_vm5 = vcmp.gt.f32.partialorder %v450_v9, 0.5  ;;  %v7356_v10 = vsel %vm484_vm3, 1, %v11020_v3  ;;  %v7359_v11 = vsel %vm482_vm4, 1, %v11020_v3  ;;  %v455_v15 = vld [vmem:[%s10979_s3 + $0x40] sm:$0xff]  ;;  %v460_v19 = vld [vmem:[%s10979_s3 + $0x68] sm:$0xff] }
   0xf   : > { %540 = vperm.xlu0 %7204, %v7341_v6   ;;  %v7362_v12 = vsel %vm480_vm5, 1, %v11020_v3  ;;  %vm487_vm6 = vcmp.gt.f32.partialorder %v457_v13, 0.5  ;;  %vm486_vm7 = vcmp.gt.f32.partialorder %v456_v14, 0.5  ;;  %vm485_vm8 = vcmp.gt.f32.partialorder %v455_v15, 0.5  ;;  %v459_v20 = vld [vmem:[%s10979_s3 + $0x60] sm:$0xff]  ;;  %v458_v21 = vld [vmem:[%s10979_s3 + $0x58] sm:$0xff] }
  0x10   : > { %v7377_v16 = vsel %vm487_vm6, 1, %v11020_v3  ;;  %v7380_v17 = vsel %vm486_vm7, 1, %v11020_v3  ;;  %v7383_v18 = vsel %vm485_vm8, 1, %v11020_v3  ;;  %vm490_vm9 = vcmp.gt.f32.partialorder %v460_v19, 0.5  ;;  %v463_v25 = vld [vmem:[%s10979_s3 + $0x80] sm:$0xff]  ;;  %v462_v26 = vld [vmem:[%s10979_s3 + $0x78] sm:$0xff] }
  0x11   : > { %vm489_vm10 = vcmp.gt.f32.partialorder %v459_v20, 0.5  ;;  %vm488_vm11 = vcmp.gt.f32.partialorder %v458_v21, 0.5  ;;  %v7398_v22 = vsel %vm490_vm9, 1, %v11020_v3  ;;  %v461_v27 = vld [vmem:[%s10979_s3 + $0x70] sm:$0xff]  ;;  %vm493_vm12 = vcmp.gt.f32.partialorder %v463_v25, 0.5  ;;  %v466_v31 = vld [vmem:[%s10979_s3 + $0x98] sm:$0xff] }
  0x12   : > { %v7401_v23 = vsel %vm489_vm10, 1, %v11020_v3  ;;  %v7404_v24 = vsel %vm488_vm11, 1, %v11020_v3  ;;  %vm492_vm13 = vcmp.gt.f32.partialorder %v462_v26, 0.5  ;;  %vm491_vm14 = vcmp.gt.f32.partialorder %v461_v27, 0.5  ;;  %v465_v32 = vld [vmem:[%s10979_s3 + $0x90] sm:$0xff]  ;;  %v464_v33 = vld [vmem:[%s10979_s3 + $0x88] sm:$0xff] }
  0x13   : > { %v7419_v28 = vsel %vm493_vm12, 1, %v11020_v3  ;;  %v7422_v29 = vsel %vm492_vm13, 1, %v11020_v3  ;;  %v7425_v30 = vsel %vm491_vm14, 1, %v11020_v3  ;;  %vm496_vm15 = vcmp.gt.f32.partialorder %v466_v31, 0.5  ;;  %v469_v37 = vld [vmem:[%s10979_s3 + $0xb0] sm:$0xff]  ;;  %v468_v38 = vld [vmem:[%s10979_s3 + $0xa8] sm:$0xff] }
  0x14   : > { %vm495_vm0 = vcmp.gt.f32.partialorder %v465_v32, 0.5  ;;  %vm494_vm1 = vcmp.gt.f32.partialorder %v464_v33, 0.5  ;;  %v7440_v34 = vsel %vm496_vm15, 1, %v11020_v3  ;;  %v467_v39 = vld [vmem:[%s10979_s3 + $0xa0] sm:$0xff]  ;;  %vm499_vm2 = vcmp.gt.f32.partialorder %v469_v37, 0.5  ;;  %v472_v43 = vld [vmem:[%s10979_s3 + $0xc8] sm:$0xff] }
  0x15   : > { %v7443_v35 = vsel %vm495_vm0, 1, %v11020_v3  ;;  %v7446_v36 = vsel %vm494_vm1, 1, %v11020_v3  ;;  %vm498_vm3 = vcmp.gt.f32.partialorder %v468_v38, 0.5  ;;  %vm497_vm4 = vcmp.gt.f32.partialorder %v467_v39, 0.5  ;;  %v471_v44 = vld [vmem:[%s10979_s3 + $0xc0] sm:$0xff]  ;;  %v470_v45 = vld [vmem:[%s10979_s3 + $0xb8] sm:$0xff] }
  0x16   : > { %555 = vperm.xlu2 %7206, %v7356_v10   ;;  %549 = vperm.xlu1 %7205, %v7359_v11   ;;  %v7461_v40 = vsel %vm499_vm2, 1, %v11020_v3  ;;  %v7464_v41 = vsel %vm498_vm3, 1, %v11020_v3  ;;  %v7467_v42 = vsel %vm497_vm4, 1, %v11020_v3  ;;  %vm502_vm5 = vcmp.gt.f32.partialorder %v472_v43, 0.5  ;;  %v475_v49 = vld [vmem:[%s10979_s3 + $0xe0] sm:$0xff]  ;;  %v474_v50 = vld [vmem:[%s10979_s3 + $0xd8] sm:$0xff] }
  0x17   : > { %543 = vperm.xlu0 %7204, %v7362_v12   ;;  %vm501_vm6 = vcmp.gt.f32.partialorder %v471_v44, 0.5  ;;  %vm500_vm7 = vcmp.gt.f32.partialorder %v470_v45, 0.5  ;;  %v7482_v46 = vsel %vm502_vm5, 1, %v11020_v3  ;;  %v473_v51 = vld [vmem:[%s10979_s3 + $0xd0] sm:$0xff]  ;;  %vm505_vm8 = vcmp.gt.f32.partialorder %v475_v49, 0.5  ;;  %v478_v55 = vld [vmem:[%s10979_s3 + $0xf8] sm:$0xff] }
  0x18   : > { %v7485_v47 = vsel %vm501_vm6, 1, %v11020_v3  ;;  %v7488_v48 = vsel %vm500_vm7, 1, %v11020_v3  ;;  %vm504_vm9 = vcmp.gt.f32.partialorder %v474_v50, 0.5  ;;  %vm503_vm10 = vcmp.gt.f32.partialorder %v473_v51, 0.5  ;;  %v477_v56 = vld [vmem:[%s10979_s3 + $0xf0] sm:$0xff]  ;;  %v476_v57 = vld [vmem:[%s10979_s3 + $0xe8] sm:$0xff] }
  0x19   : > { %v7503_v52 = vsel %vm505_vm8, 1, %v11020_v3  ;;  %v7506_v53 = vsel %vm504_vm9, 1, %v11020_v3  ;;  %v7509_v54 = vsel %vm503_vm10, 1, %v11020_v3  ;;  %vm508_vm11 = vcmp.gt.f32.partialorder %v478_v55, 0.5  ;;  %p190_p3 = scmp.lt.s32.totalorder %s6781_s29, 63  ;;  %s7274_s7 = smov 4  }
  0x1a   : > { %vm507_vm12 = vcmp.gt.f32.partialorder %v477_v56, 0.5  ;;  %vm506_vm13 = vcmp.gt.f32.partialorder %v476_v57, 0.5  ;;  %v7526_v58 = vsel %vm508_vm11, 1, %v11020_v3  ;;  %v7591_v20 = vunpack.c.l.b16 %v11020_v3  ;;  %s7276_s28 = smov 8   ;;  %s7278_s24 = smov 12  }
  0x1b   : > { %v7529_v59 = vsel %vm507_vm12, 1, %v11020_v3  ;;  %v7532_v60 = vsel %vm506_vm13, 1, %v11020_v3  ;;  %s11365_s29 = smov (!%p190_p3, %s6781_s29), 63  ;;  %v7602_v26 = vunpack.c.h.b16 %v11020_v3  ;;  %vm311_vm2 = vsmask.f32 256  ;;  %s7280_s20 = smov 16  }
  0x1c   : > { %s6782_s16 = sshll.u32 %s11365_s29, 2  ;;  %vm996_vm6 = vcmask 27648   ;;  %s7284_s12 = smov 24  }
  0x1d   : > { %s7544_s6 = scalar_lea.vmem %s10976_s0, %s6782_s16  ;;  %s7286_s26 = smov 28  }
  0x1e   : > { %564 = vperm.xlu2 %7206, %v7377_v16   ;;  %561 = vperm.xlu1 %7205, %v7380_v17   ;;  %v7549_v62 = vld [vmem:[%s7544_s6 + $0x10] sm:$0xf]  ;;  %v7552_v63 = vld [vmem:[%s7544_s6 + $0x14] sm:$0xf]  ;;  %v7557_v2 = vld [vmem:[%s7544_s6 + $0x8] sm:$0xf] }
  0x1f   : > { %558 = vperm.xlu0 %7204, %v7383_v18   ;;  %11080 = vst [vmem:[#allocation3_spill] sm:$0xff] %v7549_v62  ;;  %v10990_v0 = vunpack.c.l.b16 %v7549_v62  ;;  %v10989_v1 = vunpack.c.l.b16 %v7552_v63  ;;  %v10982_v7 = vunpack.c.l.b16 %v7557_v2  ;;  %v204_v31 = vld [vmem:[%s7544_s6] sm:$0xf]  ;;  %v7607_v32 = vld [vmem:[%s7544_s6 + $0x4] sm:$0xf]  ;;  %s6784_s16 = sshll.u32 %s11365_s29, 3 }
  0x20   : > { %11081 = vst [vmem:[#allocation4_spill] sm:$0xff] %v7552_v63  ;;  %v266_v38 = vunpack.c.l.b16 %v204_v31  ;;  %v10985_v39 = vunpack.c.l.b16 %v7607_v32  ;;  %v7623_v44 = vld [vmem:[%s7544_s6 + $0x1c] sm:$0xf]  ;;  %v7633_v56 = vld [vmem:[%s7544_s6 + $0x20] sm:$0xf]  ;;  %s10907_s9 = scalar_lea.vmem %s10980_s4, %s6784_s16 }
  0x21   : > { %11082 = vst [vmem:[#allocation5_spill] sm:$0xff] %v7557_v2  ;;  %v10981_v51 = vunpack.c.l.b16 %v7623_v44  ;;  %v7636_v57 = vld [vmem:[%s7544_s6 + $0x24] sm:$0xf]  ;;  %v7667_v31 = vld [vmem:[%s7544_s6 + $0x30] sm:$0xf] }
  0x22   : > { %11086 = vst [vmem:[#allocation9_spill] sm:$0xff] %v7607_v32 }
  0x23   : > { %11088 = vst [vmem:[#allocation11_spill] sm:$0xff] %v7623_v44 }
  0x24   : > { %11089 = vst [vmem:[#allocation12_spill] sm:$0xff] %v7633_v56 }
  0x25   : > { %11090 = vst [vmem:[#allocation13_spill] sm:$0xff] %v7636_v57 }
  0x26   : > { %573 = vperm.xlu2 %7206, %v7398_v22   ;;  %570 = vperm.xlu1 %7205, %v7401_v23   ;;  %11096 = vst [vmem:[#allocation17_spill] sm:$0xff] %v7667_v31 }
  0x27   : > { %567 = vperm.xlu0 %7204, %v7404_v24  }
  0x2e   : > { %582 = vperm.xlu2 %7206, %v7419_v28   ;;  %579 = vperm.xlu1 %7205, %v7422_v29  }
  0x2f   : > { %576 = vperm.xlu0 %7204, %v7425_v30  }
  0x36   : > { %591 = vperm.xlu2 %7206, %v7440_v34   ;;  %588 = vperm.xlu1 %7205, %v7443_v35  }
  0x37   : > { %585 = vperm.xlu0 %7204, %v7446_v36  }
  0x3e   : > { %600 = vperm.xlu2 %7206, %v7461_v40   ;;  %597 = vperm.xlu1 %7205, %v7464_v41  }
  0x3f   : > { %594 = vperm.xlu0 %7204, %v7467_v42  }
  0x46   : > { %609 = vperm.xlu2 %7206, %v7482_v46   ;;  %606 = vperm.xlu1 %7205, %v7485_v47  }
  0x47   : > { %603 = vperm.xlu0 %7204, %v7488_v48  }
  0x4e   : > { %618 = vperm.xlu2 %7206, %v7503_v52   ;;  %615 = vperm.xlu1 %7205, %v7506_v53  }
  0x4f   : > { %612 = vperm.xlu0 %7204, %v7509_v54  }
  0x56   : > { %627 = vperm.xlu2 %7206, %v7526_v58   ;;  %624 = vperm.xlu1 %7205, %v7529_v59  }
  0x57   : > { %621 = vperm.xlu0 %7204, %v7532_v60  }
  0x5e   : > { %7209 = vset.pattern.permute.xlu2 %v7273_v61  ;;  %7208 = vset.pattern.permute.xlu1 %v7273_v61 }
  0x5f   : > { %7207 = vset.pattern.permute.xlu0 %v7273_v61  ;;  %1141 = vperm.xlu2 %7209, %v7338_v5   ;;  %v7560_v5 = vld [vmem:[%s7544_s6 + $0xc] sm:$0xf] }
  0x60   : > { %1138 = vperm.xlu1 %7208, %v7362_v12   ;;  %1135 = vperm.xlu0 %7207, %v7341_v6   ;;  %11083 = vst [vmem:[#allocation6_spill] sm:$0xff] %v7560_v5  ;;  %v10991_v8 = vunpack.c.l.b16 %v7560_v5  ;;  %v7569_v6 = vpack.c.b16 %v10989_v1, %v10990_v0 }
  0x62   : > { %11084 = vst [vmem:[#allocation7_spill] sm:$0xff] %v7569_v6  ;;  %v10993_v13 = vshrl.u32 %v7569_v6, 16  ;;  %v10995_v15 = vshll.u32 %v7569_v6, 16 }
  0x67   : > { %1147 = vperm.xlu2 %7209, %v7335_v4   ;;  %v7578_v4 = vpack.c.b16 %v10991_v8, %v10982_v7  ;;  %v10997_v7 = vunpack.c.l.b16 %v7667_v31 }
  0x68   : > { %1144 = vperm.xlu1 %7208, %v7359_v11   ;;  %1150 = vperm.xlu0 %7207, %v7356_v10   ;;  %v553_v9 = vpop.permute.xlu2 %552  ;;  %v7585_v10 = vrot.slane %v10993_v13, 7 }
  0x69   : > { %vm633_vm14 = vcmp.eq.s32.totalorder %v553_v9, 1  ;;  %11085 = vst [vmem:[#allocation8_spill] sm:$0xff] %v7578_v4  ;;  %v11001_v11 = vshrl.u32 %v7578_v4, 16 }
  0x6a   : > { %vm663_vm15 = vmpackc.low %vm633_vm14, %vm633_vm14 }
  0x6b   : > { %v693_v12 = vsel %vm663_vm15, 65537, %v11020_v3  ;;  %v7596_v25 = vrot.slane %v11001_v11, 7  ;;  %vm446_vm15 = vcmask 1040384  }
  0x6c   : > { %v723_v14 = vunpack.c.l.b16 %v693_v12  ;;  %v7642_v12 = vld [vmem:[%s7544_s6 + $0x28] sm:$0xf] }
  0x6d   : > { %11091 = vst [vmem:[#allocation14_spill] sm:$0xff] %v7642_v12 }
  0x6f   : > { %1156 = vperm.xlu2 %7209, %v7380_v17   ;;  %v6789_v17 = vunpack.i.l.s16 %v723_v14  ;;  %v7645_v14 = vld [vmem:[%s7544_s6 + $0x2c] sm:$0xf] }
  0x70   : > { %1153 = vperm.xlu1 %7208, %v7383_v18   ;;  %1159 = vperm.xlu0 %7207, %v7377_v16   ;;  %v556_v19 = vpop.permute.xlu2 %555  ;;  %v333_v18 = vor.u32 %v10995_v15, %v7585_v10  ;;  %11092 = vst [vmem:[#allocation15_spill] sm:$0xff] %v7645_v14 }
  0x71   : > { %vm634_vm0 = vcmp.eq.s32.totalorder %v556_v19, 1  ;;  %vm782_vm3 = vcmp.ne.s32.totalorder %v6789_v17, %v7591_v20  ;;  %v10984_v17 = vunpack.c.l.b16 %v7633_v56 }
  0x72   : > { %vm664_vm1 = vmpackc.low %vm634_vm0, %vm634_vm0  ;;  %v7612_v33 = vsel %vm311_vm2, %v7596_v25, %v333_v18  ;;  %v10987_v18 = vunpack.c.l.b16 %v7642_v12 }
  0x73   : > { %v694_v21 = vsel %vm664_vm1, 65537, %v11020_v3 }
  0x74   : > { %v724_v16 = vunpack.c.l.b16 %v694_v21  ;;  %v10983_v21 = vunpack.c.l.b16 %v7636_v57 }
  0x76   : > { %v6790_v27 = vunpack.i.l.s16 %v724_v16  ;;  %v10986_v16 = vunpack.c.l.b16 %v7645_v14 }
  0x77   : > { %1165 = vperm.xlu2 %7209, %v7401_v23   ;;  %v7620_v23 = vld [vmem:[%s7544_s6 + $0x18] sm:$0xf] }
  0x78   : > { %vm783_vm4 = vcmp.ne.s32.totalorder %v6790_v27, %v7602_v26  ;;  %1162 = vperm.xlu1 %7208, %v7404_v24   ;;  %1168 = vperm.xlu0 %7207, %v7398_v22   ;;  %v565_v37 = vpop.permute.xlu2 %564  ;;  %11087 = vst [vmem:[#allocation10_spill] sm:$0xff] %v7620_v23  ;;  %v7627_v22 = vpack.c.b16 %v10985_v39, %v266_v38  ;;  %v10988_v50 = vunpack.c.l.b16 %v7620_v23 }
  0x79   : > { %vm784_vm5 = vmpackc.low %vm783_vm4, %vm782_vm3  ;;  %vm637_vm7 = vcmp.eq.s32.totalorder %v565_v37, 1  ;;  %v7670_v37 = vld [vmem:[%s7544_s6 + $0x34] sm:$0xf] }
  0x7a   : > { %v871_v43 = vsel %vm784_vm5, %v7612_v33, 0  ;;  %v10994_v19 = vshrl.u32 %v7627_v22, 16  ;;  %vm7651_vm9 = vmpackc.low %vm637_vm7, %vm637_vm7  ;;  %11097 = vst [vmem:[#allocation18_spill] sm:$0xff] %v7670_v37 }
  0x7b   : > { %v907_v45 = vunpack.c.h.b16 %v871_v43  ;;  %v906_v49 = vunpack.c.l.b16 %v871_v43  ;;  %vm7710_vm3 = vmand %vm446_vm15, %vm311_vm2 }
  0x7c   : > { %v315_v38 = vrot.slane %v10994_v19, 7 }
  0x7d   : > { %v939_v24 = vpack.c.b16 %v907_v45, %v907_v45  ;;  %v938_v55 = vpack.c.b16 %v906_v49, %v906_v49  ;;  %v11002_v49 = vshll.u32 %v7578_v4, 16 }
  0x7f   : > { %1174 = vperm.xlu2 %7209, %v7422_v29   ;;  %1004 = vst.msk [vmem:[#allocation2 + $0x1c] sm:$0xf] %vm996_vm6, %v939_v24  ;;  %v11003_v24 = vshll.u32 %v7627_v22, 16 }
  0x80   : > { %1171 = vperm.xlu1 %7208, %v7425_v30   ;;  %1177 = vperm.xlu0 %7207, %v7419_v28   ;;  %v574_v61 = vpop.permute.xlu2 %573  ;;  %v547_v9 = vpop.permute.xlu1 %546  ;;  %1003 = vst.msk [vmem:[#allocation2 + $0x18] sm:$0xf] %vm996_vm6, %v938_v55  ;;  %v7659_v28 = vpack.c.b16 %v10981_v51, %v10988_v50  ;;  %v697_v55 = vsel %vm7651_vm9, 65537, %v11020_v3 }
  0x81   : > { %vm631_vm8 = vcmp.eq.s32.totalorder %v547_v9, 1  ;;  %v541_v29 = vpop.permute.xlu0 %540  ;;  %vm640_vm11 = vcmp.eq.s32.totalorder %v574_v61, 1  ;;  %v7689_v61 = vpack.c.b16 %v10983_v21, %v10984_v17  ;;  %v7695_v9 = vpack.c.b16 %v10986_v16, %v10987_v18 }
  0x82   : > { %vm629_vm10 = vcmp.eq.s32.totalorder %v541_v29, 1  ;;  %11095 = vst [vmem:[#allocation16_spill] sm:$0xff] %v7659_v28  ;;  %vm661_vm12 = vmpackc.low %vm631_vm8, %vm631_vm8  ;;  %v10992_v29 = vshrl.u32 %v7659_v28, 16  ;;  %v10996_v21 = vunpack.c.l.b16 %v7670_v37  ;;  %v727_v18 = vunpack.c.l.b16 %v697_v55 }
  0x83   : > { %vm659_vm13 = vmpackc.low %vm629_vm10, %vm629_vm10  ;;  %v691_v27 = vsel %vm661_vm12, 65537, %v11020_v3  ;;  %11100 = vst [vmem:[#allocation19_spill] sm:$0xff] %v7689_v61 }
  0x84   : > { %vm7674_vm14 = vmpackc.low %vm640_vm11, %vm640_vm11  ;;  %v689_v45 = vsel %vm659_vm13, 65537, %v11020_v3  ;;  %11101 = vst [vmem:[#allocation20_spill] sm:$0xff] %v7695_v9  ;;  %v721_v51 = vunpack.c.l.b16 %v691_v27  ;;  %v318_v27 = vor.u32 %v11003_v24, %v315_v38  ;;  %v7718_v43 = vrot.slane %v10992_v29, 7 }
  0x85   : > { %v700_v17 = vsel %vm7674_vm14, 65537, %v11020_v3  ;;  %v719_v39 = vunpack.c.l.b16 %v689_v45  ;;  %v10999_v45 = vshrl.u32 %v7695_v9, 16  ;;  %v7728_v1 = vpack.c.b16 %v10996_v21, %v10997_v7  ;;  %v7742_v21 = vld [vmem:[%s7544_s6 + $0x38] sm:$0xf] }
  0x86   : > { %v730_v55 = vunpack.c.l.b16 %v700_v17  ;;  %v7731_v13 = vunpack.i.l.s16 %v727_v18  ;;  %11106 = vst [vmem:[#allocation23_spill] sm:$0xff] %v7742_v21  ;;  %v11004_v18 = vshll.u32 %v7689_v61, 16 }
  0x87   : > { %1183 = vperm.xlu2 %7209, %v7443_v35   ;;  %11105 = vst [vmem:[#allocation22_spill] sm:$0xff] %v7728_v1  ;;  %v6785_v0 = vunpack.i.l.s16 %v719_v39  ;;  %v7745_v39 = vld [vmem:[%s7544_s6 + $0x3c] sm:$0xf]  ;;  %v11005_v7 = vshrl.u32 %v7728_v1, 16 }
  0x88   : > { %1180 = vperm.xlu1 %7208, %v7446_v36   ;;  %1186 = vperm.xlu0 %7207, %v7440_v34   ;;  %v583_v35 = vpop.permute.xlu2 %582  ;;  %v550_v30 = vpop.permute.xlu1 %549  ;;  %v325_v36 = vor.u32 %v11002_v49, %v7596_v25  ;;  %v11102_v34 = vmov 0  ;;  %v11000_v25 = vshll.u32 %v7659_v28, 16  ;;  %11107 = vst [vmem:[#allocation24_spill] sm:$0xff] %v7745_v39 }
  0x89   : > { %vm632_vm0 = vcmp.eq.s32.totalorder %v550_v30, 1  ;;  %v544_v16 = vpop.permute.xlu0 %543  ;;  %v11103_v34 = vsel %vm7710_vm3, 4294967295, %v11102_v34  ;;  %v6787_v30 = vunpack.i.l.s16 %v721_v51  ;;  %vm643_vm7 = vcmp.eq.s32.totalorder %v583_v35, 1 }
  0x8a   : > { %vm630_vm1 = vcmp.eq.s32.totalorder %v544_v16, 1  ;;  %11104 = vst [vmem:[#allocation21_spill] sm:$0xff] %v11103_v34  ;;  %vm662_vm4 = vmpackc.low %vm632_vm0, %vm632_vm0  ;;  %v10998_v16 = vshrl.u32 %v7689_v61, 16  ;;  %v7734_v17 = vsel %vm311_vm2, %v315_v38, %v325_v36  ;;  %v7738_v51 = vsel %vm7710_vm3, 0, %v318_v27 }
  0x8b   : > { %v692_v50 = vsel %vm662_vm4, 65537, %v11020_v3  ;;  %vm660_vm5 = vmpackc.low %vm630_vm1, %vm630_vm1  ;;  %v7755_v38 = vor.u32 %v11000_v25, %v7718_v43  ;;  %v7765_v36 = vrot.slane %v10999_v45, 7  ;;  %vm775_vm9 = vcmp.ne.s32.totalorder %v6787_v30, %v7591_v20  ;;  %v7778_v45 = vld [vmem:[%s7544_s6 + $0x40] sm:$0xf]  ;;  %v7781_v25 = vld [vmem:[%s7544_s6 + $0x44] sm:$0xf] }
  0x8c   : > { %v722_v8 = vunpack.c.l.b16 %v692_v50  ;;  %v690_v29 = vsel %vm660_vm5, 65537, %v11020_v3  ;;  %v7749_v50 = vrot.slane %v10998_v16, 7  ;;  %vm7757_vm8 = vmpackc.low %vm643_vm7, %vm643_vm7  ;;  %v7769_v16 = vunpack.i.l.s16 %v730_v55  ;;  %11110 = vst [vmem:[#allocation25_spill] sm:$0xff] %v7778_v45 }
  0x8d   : > { %v720_v19 = vunpack.c.l.b16 %v690_v29  ;;  %vm768_vm10 = vcmp.ne.s32.totalorder %v6785_v0, %v7591_v20  ;;  %11111 = vst [vmem:[#allocation26_spill] sm:$0xff] %v7781_v25  ;;  %v703_v55 = vsel %vm7757_vm8, 65537, %v11020_v3  ;;  %v7793_v11 = vrot.slane %v11005_v7, 7 }
  0x8e   : > { %v6788_v15 = vunpack.i.l.s16 %v722_v8 }
  0x8f   : > { %1192 = vperm.xlu2 %7209, %v7464_v41   ;;  %v6786_v41 = vunpack.i.l.s16 %v720_v19  ;;  %v11009_v19 = vunpack.c.l.b16 %v7745_v39 }
  0x90   : > { %1189 = vperm.xlu1 %7208, %v7467_v42   ;;  %1195 = vperm.xlu0 %7207, %v7461_v40   ;;  %v592_v8 = vpop.permute.xlu2 %591  ;;  %v562_v35 = vpop.permute.xlu1 %561  ;;  %vm776_vm11 = vcmp.ne.s32.totalorder %v6788_v15, %v7602_v26  ;;  %v11010_v42 = vunpack.c.l.b16 %v7742_v21  ;;  %v349_v15 = vor.u32 %v11004_v18, %v7749_v50 }
  0x91   : > { %v559_v40 = vpop.permute.xlu0 %558  ;;  %vm777_vm12 = vmpackc.low %vm776_vm11, %vm775_vm9  ;;  %vm769_vm13 = vcmp.ne.s32.totalorder %v6786_v41, %v7602_v26  ;;  %vm636_vm14 = vcmp.eq.s32.totalorder %v562_v35, 1  ;;  %vm646_vm5 = vcmp.eq.s32.totalorder %v592_v8, 1  ;;  %vm804_vm11 = vcmp.ne.s32.totalorder %v7769_v16, %v7602_v26 }
  0x92   : > { %vm770_vm15 = vmpackc.low %vm769_vm13, %vm768_vm10  ;;  %vm635_vm0 = vcmp.eq.s32.totalorder %v559_v40, 1  ;;  %v870_v0 = vsel %vm777_vm12, %v7734_v17, 0  ;;  %vm796_vm10 = vcmp.ne.s32.totalorder %v7731_v13, %v7591_v20 }
  0x93   : > { %v904_v30 = vunpack.c.l.b16 %v870_v0  ;;  %v869_v41 = vsel %vm770_vm15, %v7738_v51, 0  ;;  %v905_v35 = vunpack.c.h.b16 %v870_v0  ;;  %vm666_vm1 = vmpackc.low %vm636_vm14, %vm636_vm14  ;;  %v7803_v0 = vpack.c.b16 %v11009_v19, %v11010_v42 }
  0x94   : > { %v903_v40 = vunpack.c.h.b16 %v869_v41  ;;  %v696_v27 = vsel %vm666_vm1, 65537, %v11020_v3  ;;  %vm665_vm4 = vmpackc.low %vm635_vm0, %vm635_vm0  ;;  %v902_v7 = vunpack.c.l.b16 %v869_v41  ;;  %v733_v41 = vunpack.c.l.b16 %v703_v55  ;;  %v7849_v55 = vld [vmem:[%s7544_s6 + $0x4c] sm:$0xf] }
  0x95   : > { %11112 = vst [vmem:[#allocation27_spill] sm:$0xff] %v7803_v0  ;;  %v936_v18 = vpack.c.b16 %v904_v30, %v904_v30  ;;  %v726_v34 = vunpack.c.l.b16 %v696_v27  ;;  %v695_v29 = vsel %vm665_vm4, 65537, %v11020_v3  ;;  %v937_v30 = vpack.c.b16 %v905_v35, %v905_v35  ;;  %vm7818_vm8 = vmpackc.low %vm646_vm5, %vm646_vm5 }
  0x96   : > { %v935_v49 = vpack.c.b16 %v903_v40, %v903_v40  ;;  %v725_v37 = vunpack.c.l.b16 %v695_v29  ;;  %v934_v19 = vpack.c.b16 %v902_v7, %v902_v7  ;;  %v11116_v7 = vunpack.c.l.b16 %v7778_v45  ;;  %11121 = vst [vmem:[#allocation30_spill] sm:$0xff] %v7849_v55  ;;  %v8060_v45 = vld [vmem:[%s7544_s6 + $0x74] sm:$0xf] }
  0x97   : > { %1201 = vperm.xlu2 %7209, %v7485_v47   ;;  %1001 = vst.msk [vmem:[#allocation2 + $0x10] sm:$0xf] %vm996_vm6, %v936_v18  ;;  %v6792_v42 = vunpack.i.l.s16 %v726_v34  ;;  %v11113_v47 = vshll.u32 %v7695_v9, 16  ;;  %v11012_v35 = vshrl.u32 %v7803_v0, 16  ;;  %v7856_v40 = vunpack.i.l.s16 %v733_v41 }
  0x98   : > { %1198 = vperm.xlu1 %7208, %v7488_v48   ;;  %1204 = vperm.xlu0 %7207, %v7482_v46   ;;  %v7809_v24 = vpop.permute.xlu2 %600  ;;  %v571_v21 = vpop.permute.xlu1 %570  ;;  %1000 = vst.msk [vmem:[#allocation2 + $0xc] sm:$0xf] %vm996_vm6, %v935_v49  ;;  %v6791_v48 = vunpack.i.l.s16 %v725_v37  ;;  %v11119_v49 = vshll.u32 %v7728_v1, 16  ;;  %v7841_v37 = vsel %vm311_vm2, %v7585_v10, %v7755_v38 }
  0x99   : > { %vm639_vm7 = vcmp.eq.s32.totalorder %v571_v21, 1  ;;  %v568_v27 = vpop.permute.xlu0 %567  ;;  %v357_v29 = vor.u32 %v11113_v47, %v7765_v36  ;;  %v11117_v21 = vunpack.c.l.b16 %v7781_v25  ;;  %999 = vst.msk [vmem:[#allocation2 + $0x8] sm:$0xf] %vm996_vm6, %v934_v19  ;;  %vm790_vm12 = vcmp.ne.s32.totalorder %v6792_v42, %v7602_v26  ;;  %v7846_v19 = vld [vmem:[%s7544_s6 + $0x48] sm:$0xf] }
  0x9a   : > { %vm638_vm9 = vcmp.eq.s32.totalorder %v568_v27, 1  ;;  %v365_v18 = vor.u32 %v11119_v49, %v7793_v11  ;;  %vm669_vm13 = vmpackc.low %vm639_vm7, %vm639_vm7  ;;  %1002 = vst.msk [vmem:[#allocation2 + $0x14] sm:$0xf] %vm996_vm6, %v937_v30  ;;  %vm789_vm14 = vcmp.ne.s32.totalorder %v6791_v48, %v7591_v20  ;;  %v7853_v42 = vsel %vm311_vm2, %v7718_v43, %v349_v15 }
  0x9b   : > { %v7826_v34 = vpack.c.b16 %v11117_v21, %v11116_v7  ;;  %v699_v8 = vsel %vm669_vm13, 65537, %v11020_v3  ;;  %vm668_vm15 = vmpackc.low %vm638_vm9, %vm638_vm9  ;;  %11120 = vst [vmem:[#allocation29_spill] sm:$0xff] %v7846_v19  ;;  %v7861_v30 = vsel %vm311_vm2, %v7749_v50, %v357_v29  ;;  %v706_v27 = vsel %vm7818_vm8, 65537, %v11020_v3 }
  0x9c   : > { %vm791_vm0 = vmpackc.low %vm790_vm12, %vm789_vm14  ;;  %v729_v10 = vunpack.c.l.b16 %v699_v8  ;;  %v698_v38 = vsel %vm668_vm15, 65537, %v11020_v3  ;;  %v7869_v15 = vsel %vm311_vm2, %v7765_v36, %v365_v18  ;;  %v11014_v48 = vunpack.c.l.b16 %v7846_v19  ;;  %11149 = vst [vmem:[#allocation44_spill] sm:$0xff] %v8060_v45 }
  0x9d   : > { %11118 = vst [vmem:[#allocation28_spill] sm:$0xff] %v7826_v34  ;;  %v728_v47 = vunpack.c.l.b16 %v698_v38  ;;  %v11011_v43 = vshrl.u32 %v7826_v34, 16  ;;  %v11013_v7 = vunpack.c.l.b16 %v7849_v55  ;;  %v872_v50 = vsel %vm791_vm0, %v7841_v37, 0 }
  0x9e   : > { %v6795_v41 = vunpack.i.l.s16 %v729_v10  ;;  %v7879_v36 = vrot.slane %v11012_v35, 7  ;;  %v909_v49 = vunpack.c.h.b16 %v872_v50  ;;  %v736_v18 = vunpack.c.l.b16 %v706_v27 }
  0x9f   : > { %1210 = vperm.xlu2 %7209, %v7506_v53   ;;  %v6794_v29 = vunpack.i.l.s16 %v728_v47  ;;  %vm649_vm1 = vcmp.eq.s32.totalorder %v7809_v24, 1  ;;  %v908_v10 = vunpack.c.l.b16 %v872_v50  ;;  %v7896_v27 = vrot.slane %v11011_v43, 7 }
  0xa0   : > { %1207 = vperm.xlu1 %7208, %v7509_v54   ;;  %1213 = vperm.xlu0 %7207, %v7503_v52   ;;  %v610_v46 = vpop.permute.xlu2 %609  ;;  %v580_v21 = vpop.permute.xlu1 %579  ;;  %vm803_vm4 = vcmp.ne.s32.totalorder %v6795_v41, %v7591_v20  ;;  %v7889_v52 = vld [vmem:[%s7544_s6 + $0x50] sm:$0xf]  ;;  %v7892_v54 = vld [vmem:[%s7544_s6 + $0x54] sm:$0xf]  ;;  %v941_v38 = vpack.c.b16 %v909_v49, %v909_v49  ;;  %v7905_v16 = vpack.c.b16 %v11013_v7, %v11014_v48  ;;  %v7917_v35 = vunpack.i.l.s16 %v736_v18  ;;  %v7924_v7 = vld [vmem:[%s7544_s6 + $0x58] sm:$0xf] }
  0xa1   : > { %v577_v8 = vpop.permute.xlu0 %576  ;;  %vm805_vm5 = vmpackc.low %vm804_vm11, %vm803_vm4  ;;  %vm797_vm7 = vcmp.ne.s32.totalorder %v6794_v29, %v7602_v26  ;;  %vm642_vm8 = vcmp.eq.s32.totalorder %v580_v21, 1  ;;  %11122 = vst [vmem:[#allocation31_spill] sm:$0xff] %v7889_v52  ;;  %v940_v41 = vpack.c.b16 %v908_v10, %v908_v10  ;;  %v7927_v48 = vld [vmem:[%s7544_s6 + $0x5c] sm:$0xf]  ;;  %vm652_vm13 = vcmp.eq.s32.totalorder %v610_v46, 1 }
  0xa2   : > { %11123 = vst [vmem:[#allocation32_spill] sm:$0xff] %v7892_v54  ;;  %vm798_vm9 = vmpackc.low %vm797_vm7, %vm796_vm10  ;;  %vm641_vm12 = vcmp.eq.s32.totalorder %v577_v8, 1  ;;  %v874_v47 = vsel %vm805_vm5, %v7861_v30, 0  ;;  %v11134_v46 = vshll.u32 %v7803_v0, 16  ;;  %vm825_vm5 = vcmp.ne.s32.totalorder %v7917_v35, %v7602_v26 }
  0xa3   : > { %11124 = vst [vmem:[#allocation33_spill] sm:$0xff] %v7905_v16  ;;  %vm7911_vm11 = vmpackc.low %vm649_vm1, %vm649_vm1  ;;  %v873_v13 = vsel %vm798_vm9, %v7853_v42, 0  ;;  %v913_v29 = vunpack.c.h.b16 %v874_v47  ;;  %v912_v43 = vunpack.c.l.b16 %v874_v47  ;;  %vm817_vm1 = vcmp.ne.s32.totalorder %v7856_v40, %v7591_v20 }
  0xa4   : > { %vm672_vm10 = vmpackc.low %vm642_vm8, %vm642_vm8  ;;  %11127 = vst [vmem:[#allocation34_spill] sm:$0xff] %v7924_v7  ;;  %v910_v53 = vunpack.c.l.b16 %v873_v13  ;;  %v709_v47 = vsel %vm7911_vm11, 65537, %v11020_v3  ;;  %v911_v50 = vunpack.c.h.b16 %v873_v13  ;;  %v373_v13 = vor.u32 %v11134_v46, %v7879_v36 }
  0xa5   : > { %11128 = vst [vmem:[#allocation35_spill] sm:$0xff] %v7927_v48  ;;  %v702_v49 = vsel %vm672_vm10, 65537, %v11020_v3  ;;  %vm671_vm14 = vmpackc.low %vm641_vm12, %vm641_vm12  ;;  %v945_v21 = vpack.c.b16 %v913_v29, %v913_v29  ;;  %v944_v18 = vpack.c.b16 %v912_v43, %v912_v43  ;;  %v11019_v43 = vunpack.c.l.b16 %v7924_v7 }
  0xa6   : > { %1006 = vst.msk [vmem:[#allocation2 + $0x24] sm:$0xf] %vm996_vm6, %v941_v38  ;;  %v732_v24 = vunpack.c.l.b16 %v702_v49  ;;  %v701_v10 = vsel %vm671_vm14, 65537, %v11020_v3  ;;  %v942_v38 = vpack.c.b16 %v910_v53, %v910_v53  ;;  %vm7948_vm15 = vmpackc.low %vm652_vm13, %vm652_vm13  ;;  %v11131_v53 = vunpack.c.l.b16 %v7889_v52 }
  0xa7   : > { %1005 = vst.msk [vmem:[#allocation2 + $0x20] sm:$0xf] %vm996_vm6, %v940_v41  ;;  %1219 = vperm.xlu2 %7209, %v7529_v59   ;;  %v731_v55 = vunpack.c.l.b16 %v701_v10  ;;  %v11018_v41 = vunpack.c.l.b16 %v7927_v48  ;;  %v11132_v49 = vunpack.c.l.b16 %v7892_v54 }
  0xa8   : > { %1216 = vperm.xlu1 %7208, %v7532_v60   ;;  %1222 = vperm.xlu0 %7207, %v7526_v58   ;;  %v7941_v8 = vpop.permute.xlu2 %618  ;;  %v589_v29 = vpop.permute.xlu1 %588  ;;  %1010 = vst.msk [vmem:[#allocation2 + $0x34] sm:$0xf] %vm996_vm6, %v945_v21  ;;  %v6798_v60 = vunpack.i.l.s16 %v732_v24  ;;  %v739_v21 = vunpack.c.l.b16 %v709_v47 }
  0xa9   : > { %vm645_vm0 = vcmp.eq.s32.totalorder %v589_v29, 1  ;;  %v586_v58 = vpop.permute.xlu0 %585  ;;  %v7956_v10 = vpack.c.b16 %v11132_v49, %v11131_v53  ;;  %1007 = vst.msk [vmem:[#allocation2 + $0x28] sm:$0xf] %vm996_vm6, %v942_v38  ;;  %v6797_v24 = vunpack.i.l.s16 %v731_v55  ;;  %v943_v29 = vpack.c.b16 %v911_v50, %v911_v50  ;;  %v7969_v38 = vld [vmem:[%s7544_s6 + $0x60] sm:$0xf] }
  0xaa   : > { %vm644_vm4 = vcmp.eq.s32.totalorder %v586_v58, 1  ;;  %1009 = vst.msk [vmem:[#allocation2 + $0x30] sm:$0xf] %vm996_vm6, %v944_v18  ;;  %vm811_vm7 = vcmp.ne.s32.totalorder %v6798_v60, %v7602_v26  ;;  %vm675_vm8 = vmpackc.low %vm645_vm0, %vm645_vm0  ;;  %v7972_v53 = vld [vmem:[%s7544_s6 + $0x64] sm:$0xf]  ;;  %v11137_v49 = vshll.u32 %v7826_v34, 16  ;;  %v7987_v50 = vpack.c.b16 %v11018_v41, %v11019_v43 }
  0xab   : > { %11133 = vst [vmem:[#allocation36_spill] sm:$0xff] %v7956_v10  ;;  %v712_v18 = vsel %vm7948_vm15, 65537, %v11020_v3  ;;  %vm810_vm9 = vcmp.ne.s32.totalorder %v6797_v24, %v7591_v20  ;;  %v705_v47 = vsel %vm675_vm8, 65537, %v11020_v3  ;;  %vm674_vm12 = vmpackc.low %vm644_vm4, %vm644_vm4  ;;  %v7995_v24 = vunpack.i.l.s16 %v739_v21 }
  0xac   : > { %11135 = vst [vmem:[#allocation37_spill] sm:$0xff] %v7969_v38  ;;  %v381_v46 = vor.u32 %v11137_v49, %v7896_v27  ;;  %vm812_vm11 = vmpackc.low %vm811_vm7, %vm810_vm9  ;;  %v735_v60 = vunpack.c.l.b16 %v705_v47  ;;  %v704_v58 = vsel %vm674_vm12, 65537, %v11020_v3  ;;  %v7992_v49 = vsel %vm311_vm2, %v7793_v11, %v373_v13 }
  0xad   : > { %11136 = vst [vmem:[#allocation38_spill] sm:$0xff] %v7972_v53  ;;  %v734_v55 = vunpack.c.l.b16 %v704_v58  ;;  %v742_v41 = vunpack.c.l.b16 %v712_v18  ;;  %v875_v11 = vsel %vm812_vm11, %v7869_v15, 0  ;;  %v11139_v58 = vshrl.u32 %v7905_v16, 16 }
  0xae   : > { %11138 = vst [vmem:[#allocation39_spill] sm:$0xff] %v7987_v50  ;;  %v6801_v43 = vunpack.i.l.s16 %v735_v60  ;;  %v8002_v47 = vsel %vm311_vm2, %v7879_v36, %v381_v46  ;;  %v915_v54 = vunpack.c.h.b16 %v875_v11  ;;  %v11140_v18 = vshrl.u32 %v7956_v10, 16 }
  0xaf   : > { %1008 = vst.msk [vmem:[#allocation2 + $0x2c] sm:$0xf] %vm996_vm6, %v943_v29  ;;  %v6800_v13 = vunpack.i.l.s16 %v734_v55  ;;  %v8009_v59 = vrot.slane %v11139_v58, 7  ;;  %v11027_v46 = vshll.u32 %v7956_v10, 16  ;;  %v914_v55 = vunpack.c.l.b16 %v875_v11 }
  0xb0   : > { %v8005_v3 = vpop.permute.xlu2 %627  ;;  %v598_v21 = vpop.permute.xlu1 %597  ;;  %vm824_vm10 = vcmp.ne.s32.totalorder %v6801_v43, %v7591_v20  ;;  %v8015_v36 = vrot.slane %v11140_v18, 7  ;;  %v11141_v60 = vunpack.c.l.b16 %v7969_v38  ;;  %v11142_v43 = vunpack.c.l.b16 %v7972_v53 }
  0xb1   : > { %v595_v29 = vpop.permute.xlu0 %594  ;;  %vm826_vm13 = vmpackc.low %vm825_vm5, %vm824_vm10  ;;  %vm818_vm14 = vcmp.ne.s32.totalorder %v6800_v13, %v7602_v26  ;;  %vm648_vm15 = vcmp.eq.s32.totalorder %v598_v21, 1  ;;  %v947_v7 = vpack.c.b16 %v915_v54, %v915_v54  ;;  %v8028_v18 = vunpack.i.l.s16 %v742_v41  ;;  %v8038_v41 = vld [vmem:[%s7544_s6 + $0x68] sm:$0xf] }
  0xb2   : > { %v8026_v58 = vpack.c.b16 %v11142_v43, %v11141_v60  ;;  %vm819_vm0 = vmpackc.low %vm818_vm14, %vm817_vm1  ;;  %vm647_vm4 = vcmp.eq.s32.totalorder %v595_v29, 1  ;;  %v877_v35 = vsel %vm826_vm13, %v8002_v47, 0  ;;  %v946_v11 = vpack.c.b16 %v914_v55, %v914_v55  ;;  %11144 = vst [vmem:[#allocation41_spill] sm:$0xff] %v8038_v41 }
  0xb3   : > { %vm655_vm5 = vcmp.eq.s32.totalorder %v7941_v8, 1  ;;  %v876_v13 = vsel %vm819_vm0, %v7992_v49, 0  ;;  %v919_v21 = vunpack.c.h.b16 %v877_v35  ;;  %1012 = vst.msk [vmem:[#allocation2 + $0x3c] sm:$0xf] %vm996_vm6, %v947_v7  ;;  %v918_v54 = vunpack.c.l.b16 %v877_v35  ;;  %vm678_vm7 = vmpackc.low %vm648_vm15, %vm648_vm15  ;;  %v8052_v7 = vld [vmem:[%s7544_s6 + $0x6c] sm:$0xf] }
  0xb4   : > { %11143 = vst [vmem:[#allocation40_spill] sm:$0xff] %v8026_v58  ;;  %v916_v40 = vunpack.c.l.b16 %v876_v13  ;;  %v397_v60 = vor.u32 %v11027_v46, %v8015_v36  ;;  %v11145_v55 = vshrl.u32 %v7987_v50, 16  ;;  %v917_v53 = vunpack.c.h.b16 %v876_v13  ;;  %vm677_vm1 = vmpackc.low %vm647_vm4, %vm647_vm4  ;;  %v8055_v35 = vld [vmem:[%s7544_s6 + $0x70] sm:$0xf] }
  0xb5   : > { %1011 = vst.msk [vmem:[#allocation2 + $0x38] sm:$0xf] %vm996_vm6, %v946_v11  ;;  %v11146_v38 = vmov 0   ;;  %v951_v52 = vpack.c.b16 %v919_v21, %v919_v21  ;;  %v950_v46 = vpack.c.b16 %v918_v54, %v918_v54  ;;  %v11037_v29 = vunpack.c.l.b16 %v8038_v41 }
  0xb6   : > { %v8046_v43 = vrot.slane %v11145_v55, 7  ;;  %v708_v48 = vsel %vm678_vm7, 65537, %v11146_v38  ;;  %11147 = vst [vmem:[#allocation42_spill] sm:$0xff] %v8052_v7  ;;  %v707_v11 = vsel %vm677_vm1, 65537, %v11146_v38  ;;  %v948_v55 = vpack.c.b16 %v916_v40, %v916_v40  ;;  %vm685_vm7 = vmpackc.low %vm655_vm5, %vm655_vm5 }
  0xb7   : > { %11148 = vst [vmem:[#allocation43_spill] sm:$0xff] %v8055_v35  ;;  %v738_v25 = vunpack.c.l.b16 %v708_v48  ;;  %v949_v13 = vpack.c.b16 %v917_v53, %v917_v53  ;;  %v737_v39 = vunpack.c.l.b16 %v707_v11  ;;  %v11038_v14 = vshrl.u32 %v8026_v58, 16 }
  0xb8   : > { %v607_v31 = vpop.permute.xlu1 %606  ;;  %1016 = vst.msk [vmem:[#allocation2 + $0x4c] sm:$0xf] %vm996_vm6, %v951_v52  ;;  %v11039_v21 = vshll.u32 %v7905_v16, 16  ;;  %v11036_v19 = vunpack.c.l.b16 %v8052_v7  ;;  %v11035_v40 = vunpack.c.l.b16 %v8055_v35  ;;  %vm658_vm9 = vcmp.eq.s32.totalorder %v8005_v3, 1 }
  0xb9   : > { %v6804_v12 = vunpack.i.l.s16 %v738_v25  ;;  %vm651_vm8 = vcmp.eq.s32.totalorder %v607_v31, 1  ;;  %v604_v54 = vpop.permute.xlu0 %603  ;;  %v8066_v48 = vpop.permute.xlu2 %1141  ;;  %1013 = vst.msk [vmem:[#allocation2 + $0x40] sm:$0xf] %vm996_vm6, %v948_v55  ;;  %v6803_v53 = vunpack.i.l.s16 %v737_v39  ;;  %v11034_v52 = vunpack.c.l.b16 %v8060_v45  ;;  %vm8123_vm1 = vmpackc.low %vm658_vm9, %vm658_vm9 }
  0xba   : > { %vm681_vm12 = vmpackc.low %vm651_vm8, %vm651_vm8  ;;  %vm650_vm11 = vcmp.eq.s32.totalorder %v604_v54, 1  ;;  %1015 = vst.msk [vmem:[#allocation2 + $0x48] sm:$0xf] %vm996_vm6, %v950_v46  ;;  %v8078_v25 = vpack.c.b16 %v7591_v20, %v7591_v20  ;;  %v11151_v11 = vshll.u32 %v7987_v50, 16  ;;  %vm838_vm15 = vcmp.ne.s32.totalorder %v7995_v24, %v7591_v20 }
  0xbb   : > { %vm832_vm10 = vcmp.ne.s32.totalorder %v6804_v12, %v7602_v26  ;;  %v711_v31 = vsel %vm681_vm12, 65537, %v11146_v38  ;;  %vm680_vm13 = vmpackc.low %vm650_vm11, %vm650_vm11  ;;  %1014 = vst.msk [vmem:[#allocation2 + $0x44] sm:$0xf] %vm996_vm6, %v949_v13  ;;  %vm831_vm14 = vcmp.ne.s32.totalorder %v6803_v53, %v7591_v20  ;;  %v389_v12 = vor.u32 %v11039_v21, %v8009_v59 }
  0xbc   : > { %11150 = vst [vmem:[#allocation45_spill] sm:$0xff] %v8078_v25  ;;  %v405_v55 = vor.u32 %v11151_v11, %v8046_v43  ;;  %v741_v39 = vunpack.c.l.b16 %v711_v31  ;;  %v710_v46 = vsel %vm680_vm13, 65537, %v11146_v38  ;;  %vm846_vm0 = vcmp.ne.s32.totalorder %v8028_v18, %v7602_v26  ;;  %vm833_vm4 = vmpackc.low %vm832_vm10, %vm831_vm14  ;;  %1554 = vrot.lane.b32.xlu1 %v8078_v25, %s7274_s7 }
  0xbd   : > { %v740_v54 = vunpack.c.l.b16 %v710_v46  ;;  %v8099_v13 = vpack.c.b16 %v11036_v19, %v11037_v29  ;;  %997 = vst.msk [vmem:[#allocation2] sm:$0xf] %vm996_vm6, %v8078_v25  ;;  %v8110_v31 = vpack.c.b16 %v11034_v52, %v11035_v40  ;;  %v8114_v11 = vsel %vm311_vm2, %v8009_v59, %v397_v60 }
  0xbe   : > { %v6807_v53 = vunpack.i.l.s16 %v741_v39  ;;  %v8118_v46 = vsel %vm311_vm2, %v7896_v27, %v389_v12  ;;  %v8129_v52 = vrot.slane %v11038_v14, 7  ;;  %v11042_v59 = vshll.u32 %v8026_v58, 16 }
  0xbf   : > { %11152 = vst [vmem:[#allocation46_spill] sm:$0xff] %v8099_v13  ;;  %v6806_v39 = vunpack.i.l.s16 %v740_v54  ;;  %v878_v40 = vsel %vm833_vm4, %v8118_v46, 0  ;;  %v8136_v3 = vsel %vm311_vm2, %v8015_v36, %v405_v55  ;;  %v8139_v19 = vsel %vm685_vm7, 65537, %v11146_v38 }
  0xc0   : > { %11153 = vst [vmem:[#allocation47_spill] sm:$0xff] %v8110_v31  ;;  %vm845_vm5 = vcmp.ne.s32.totalorder %v6807_v53, %v7591_v20  ;;  %v616_v27 = vpop.permute.xlu1 %615  ;;  %v921_v60 = vunpack.c.h.b16 %v878_v40  ;;  %v920_v12 = vunpack.c.l.b16 %v878_v40  ;;  %v718_v36 = vsel %vm8123_vm1, 65537, %v11146_v38 }
  0xc1   : > { %vm847_vm8 = vmpackc.low %vm846_vm0, %vm845_vm5  ;;  %vm839_vm9 = vcmp.ne.s32.totalorder %v6806_v39, %v7602_v26  ;;  %vm654_vm12 = vcmp.eq.s32.totalorder %v616_v27, 1  ;;  %v613_v54 = vpop.permute.xlu0 %612  ;;  %v8145_v29 = vpop.permute.xlu2 %1147  ;;  %v8156_v18 = vpack.c.b16 %v7602_v26, %v7602_v26  ;;  %v413_v8 = vor.u32 %v11042_v59, %v8129_v52 }
  0xc2   : > { %vm840_vm11 = vmpackc.low %vm839_vm9, %vm838_vm15  ;;  %vm653_vm10 = vcmp.eq.s32.totalorder %v613_v54, 1  ;;  %v880_v39 = vsel %vm847_vm8, %v8136_v3, 0  ;;  %v953_v27 = vpack.c.b16 %v921_v60, %v921_v60  ;;  %v952_v21 = vpack.c.b16 %v920_v12, %v920_v12 }
  0xc3   : > { %11156 = vst [vmem:[#allocation48_spill] sm:$0xff] %v8156_v18  ;;  %vm684_vm13 = vmpackc.low %vm654_vm12, %vm654_vm12  ;;  %v879_v55 = vsel %vm840_vm11, %v8114_v11, 0  ;;  %1556 = vrot.lane.b32.xlu2 %v8156_v18, %s7274_s7  ;;  %v925_v14 = vunpack.c.h.b16 %v880_v39  ;;  %v924_v60 = vunpack.c.l.b16 %v880_v39  ;;  %v11055_v7 = vshll.u32 %v8110_v31, 16 }
  0xc4   : > { %v714_v24 = vsel %vm684_vm13, 65537, %v11146_v38  ;;  %vm683_vm14 = vmpackc.low %vm653_vm10, %vm653_vm10  ;;  %998 = vst.msk [vmem:[#allocation2 + $0x4] sm:$0xf] %vm996_vm6, %v8156_v18  ;;  %v922_v54 = vunpack.c.l.b16 %v879_v55  ;;  %v923_v25 = vunpack.c.h.b16 %v879_v55  ;;  %v11157_v18 = vshrl.u32 %v8110_v31, 16 }
  0xc5   : > { %v744_v53 = vunpack.c.l.b16 %v714_v24  ;;  %v713_v40 = vsel %vm683_vm14, 65537, %v11146_v38  ;;  %1018 = vst.msk [vmem:[#allocation2 + $0x54] sm:$0xf] %vm996_vm6, %v953_v27  ;;  %v957_v35 = vpack.c.b16 %v925_v14, %v925_v14  ;;  %v956_v12 = vpack.c.b16 %v924_v60, %v924_v60 }
  0xc6   : > { %v743_v59 = vunpack.c.l.b16 %v713_v40  ;;  %v954_v45 = vpack.c.b16 %v922_v54, %v922_v54  ;;  %1017 = vst.msk [vmem:[#allocation2 + $0x50] sm:$0xf] %vm996_vm6, %v952_v21  ;;  %v8175_v57 = vrot.slane %v11157_v18, 7  ;;  %v955_v24 = vpack.c.b16 %v923_v25, %v923_v25 }
  0xc7   : > { %v6810_v41 = vunpack.i.l.s16 %v744_v53  ;;  %v748_v56 = vunpack.c.l.b16 %v718_v36  ;;  %v11158_v40 = vshrl.u32 %v8099_v13, 16  ;;  %1022 = vst.msk [vmem:[#allocation2 + $0x64] sm:$0xf] %vm996_vm6, %v957_v35  ;;  %v11056_v53 = vshll.u32 %v8099_v13, 16 }
  0xc8   : > { %v6809_v44 = vunpack.i.l.s16 %v743_v59  ;;  %v625_v2 = vpop.permute.xlu1 %624  ;;  %1019 = vst.msk [vmem:[#allocation2 + $0x58] sm:$0xf] %vm996_vm6, %v954_v45  ;;  %v8187_v25 = vsel %vm311_vm2, %v8046_v43, %v413_v8  ;;  %v745_v59 = vunpack.c.l.b16 %v8139_v19  ;;  %v429_v45 = vor.u32 %v11055_v7, %v8175_v57 }
  0xc9   : > { %v418_v55 = vrot.slane %v11158_v40, 7  ;;  %vm853_vm15 = vcmp.ne.s32.totalorder %v6810_v41, %v7602_v26  ;;  %vm657_vm0 = vcmp.eq.s32.totalorder %v625_v2, 1  ;;  %v622_v14 = vpop.permute.xlu0 %621  ;;  %v8181_v21 = vpop.permute.xlu2 %1156  ;;  %1021 = vst.msk [vmem:[#allocation2 + $0x60] sm:$0xf] %vm996_vm6, %v956_v12  ;;  %v6814_v41 = vunpack.i.l.s16 %v748_v56 }
  0xca   : > { %vm852_vm4 = vcmp.ne.s32.totalorder %v6809_v44, %v7591_v20  ;;  %vm687_vm7 = vmpackc.low %vm657_vm0, %vm657_vm0  ;;  %vm656_vm1 = vcmp.eq.s32.totalorder %v622_v14, 1  ;;  %1020 = vst.msk [vmem:[#allocation2 + $0x5c] sm:$0xf] %vm996_vm6, %v955_v24  ;;  %v6811_v39 = vunpack.i.l.s16 %v745_v59 }
  0xcb   : > { %vm854_vm5 = vmpackc.low %vm853_vm15, %vm852_vm4  ;;  %v717_v2 = vsel %vm687_vm7, 65537, %v11146_v38  ;;  %v421_v35 = vor.u32 %v11056_v53, %v418_v55  ;;  %v8202_v54 = vsel %vm311_vm2, %v418_v55, %v429_v45  ;;  %vm867_vm9 = vcmp.ne.s32.totalorder %v6814_v41, %v7602_v26 }
  0xcc   : > { %v747_v43 = vunpack.c.l.b16 %v717_v2  ;;  %vm686_vm8 = vmpackc.low %vm656_vm1, %vm656_vm1  ;;  %v881_v19 = vsel %vm854_vm5, %v8187_v25, 0  ;;  %vm859_vm10 = vcmp.ne.s32.totalorder %v6811_v39, %v7591_v20  ;;  %vm1226_vm4 = vcmp.eq.s32.totalorder %v8066_v48, 1 }
  0xcd   : > { %v716_v44 = vsel %vm686_vm8, 65537, %v11146_v38  ;;  %v927_v36 = vunpack.c.h.b16 %v881_v19  ;;  %v926_v18 = vunpack.c.l.b16 %v881_v19  ;;  %v8210_v40 = vsel %vm311_vm2, %v8129_v52, %v421_v35  ;;  %vm1256_vm8 = vmpackc.low %vm1226_vm4, %vm1226_vm4 }
  0xce   : > { %v6813_v27 = vunpack.i.l.s16 %v747_v43  ;;  %v746_v8 = vunpack.c.l.b16 %v716_v44  ;;  %vm1228_vm7 = vcmp.eq.s32.totalorder %v8145_v29, 1 }
  0xcf   : > { %v959_v60 = vpack.c.b16 %v927_v36, %v927_v36  ;;  %v958_v12 = vpack.c.b16 %v926_v18, %v926_v18 }
  0xd0   : > { %vm866_vm12 = vcmp.ne.s32.totalorder %v6813_v27, %v7591_v20  ;;  %v6812_v56 = vunpack.i.l.s16 %v746_v8 }
  0xd1   : > { %vm868_vm11 = vmpackc.low %vm867_vm9, %vm866_vm12  ;;  %v8206_v24 = vpop.permute.xlu2 %1165  ;;  %1024 = vst.msk [vmem:[#allocation2 + $0x6c] sm:$0xf] %vm996_vm6, %v959_v60  ;;  %v1286_v60 = vsel %vm1256_vm8, 65537, %v11146_v38 }
  0xd2   : > { %vm860_vm13 = vcmp.ne.s32.totalorder %v6812_v56, %v7602_v26  ;;  %v1139_v55 = vpop.permute.xlu1 %1138  ;;  %v1136_v14 = vpop.permute.xlu0 %1135  ;;  %v883_v59 = vsel %vm868_vm11, %v8202_v54, 0  ;;  %1023 = vst.msk [vmem:[#allocation2 + $0x68] sm:$0xf] %vm996_vm6, %v958_v12  ;;  %vm1258_vm9 = vmpackc.low %vm1228_vm7, %vm1228_vm7  ;;  %vm1234_vm7 = vcmp.eq.s32.totalorder %v8206_v24, 1 }
  0xd3   : > { %vm861_vm14 = vmpackc.low %vm860_vm13, %vm859_vm10  ;;  %vm1225_vm15 = vcmp.eq.s32.totalorder %v1139_v55, 1  ;;  %vm1224_vm0 = vcmp.eq.s32.totalorder %v1136_v14, 1  ;;  %v931_v2 = vunpack.c.h.b16 %v883_v59  ;;  %v930_v45 = vunpack.c.l.b16 %v883_v59 }
  0xd4   : > { %v882_v52 = vsel %vm861_vm14, %v8210_v40, 0  ;;  %vm1255_vm1 = vmpackc.low %vm1225_vm15, %vm1225_vm15  ;;  %v1288_v14 = vsel %vm1258_vm9, 65537, %v11146_v38  ;;  %vm1231_vm13 = vcmp.eq.s32.totalorder %v8181_v21, 1  ;;  %v1316_v59 = vunpack.c.l.b16 %v1286_v60 }
  0xd5   : > { %v928_v41 = vunpack.c.l.b16 %v882_v52  ;;  %v963_v43 = vpack.c.b16 %v931_v2, %v931_v2  ;;  %v929_v19 = vunpack.c.h.b16 %v882_v52  ;;  %v1285_v44 = vsel %vm1255_vm1, 65537, %v11146_v38  ;;  %vm1254_vm5 = vmpackc.low %vm1224_vm0, %vm1224_vm0 }
  0xd6   : > { %v962_v35 = vpack.c.b16 %v930_v45, %v930_v45  ;;  %v1315_v36 = vunpack.c.l.b16 %v1285_v44  ;;  %v1284_v18 = vsel %vm1254_vm5, 65537, %v11146_v38  ;;  %v1318_v52 = vunpack.c.l.b16 %v1288_v14  ;;  %vm1261_vm4 = vmpackc.low %vm1231_vm13, %vm1231_vm13 }
  0xd7   : > { %v960_v39 = vpack.c.b16 %v928_v41, %v928_v41  ;;  %1028 = vst.msk [vmem:[#allocation2 + $0x7c] sm:$0xf] %vm996_vm6, %v963_v43  ;;  %v961_v48 = vpack.c.b16 %v929_v19, %v929_v19  ;;  %v1314_v27 = vunpack.c.l.b16 %v1284_v18  ;;  %vm8238_vm1 = vmpackc.low %vm1234_vm7, %vm1234_vm7 }
  0xd8   : > { %1027 = vst.msk [vmem:[#allocation2 + $0x78] sm:$0xf] %vm996_vm6, %v962_v35  ;;  %v6816_v29 = vunpack.i.l.s16 %v1315_v36  ;;  %v6817_v36 = vunpack.i.l.s16 %v1316_v59 }
  0xd9   : > { %v8224_v8 = vpop.permute.xlu2 %1174  ;;  %1025 = vst.msk [vmem:[#allocation2 + $0x70] sm:$0xf] %vm996_vm6, %v960_v39  ;;  %v6815_v12 = vunpack.i.l.s16 %v1314_v27  ;;  %v6819_v39 = vunpack.i.l.s16 %v1318_v52 }
  0xda   : > { %v1145_v56 = vpop.permute.xlu1 %1144  ;;  %v1151_v55 = vpop.permute.xlu0 %1150  ;;  %1026 = vst.msk [vmem:[#allocation2 + $0x74] sm:$0xf] %vm996_vm6, %v961_v48  ;;  %vm1364_vm12 = vcmp.ne.s32.totalorder %v6816_v29, %v7602_v26  ;;  %v1291_v48 = vsel %vm1261_vm4, 65537, %v11146_v38 }
  0xdb   : > { %vm1227_vm11 = vcmp.eq.s32.totalorder %v1145_v56, 1  ;;  %vm1229_vm10 = vcmp.eq.s32.totalorder %v1151_v55, 1  ;;  %vm1363_vm14 = vcmp.ne.s32.totalorder %v6815_v12, %v7591_v20  ;;  %v1321_v24 = vunpack.c.l.b16 %v1291_v48 }
  0xdc   : > { %vm1257_vm15 = vmpackc.low %vm1227_vm11, %vm1227_vm11 }
  0xdd   : > { %v1287_v2 = vsel %vm1257_vm15, 65537, %v11146_v38  ;;  %vm1259_vm0 = vmpackc.low %vm1229_vm10, %vm1229_vm10  ;;  %vm1370_vm10 = vcmp.ne.s32.totalorder %v6817_v36, %v7591_v20 }
  0xde   : > { %v1317_v45 = vunpack.c.l.b16 %v1287_v2  ;;  %v1289_v41 = vsel %vm1259_vm0, 65537, %v11146_v38  ;;  %vm1365_vm6 = vmpackc.low %vm1364_vm12, %vm1363_vm14  ;;  %vm1377_vm14 = vcmp.ne.s32.totalorder %v6819_v39, %v7591_v20 }
  0xdf   : > { %v1319_v43 = vunpack.c.l.b16 %v1289_v41  ;;  %v1464_v19 = vsel %vm1365_vm6, %v7627_v22, 0 }
  0xe0   : > { %v6818_v44 = vunpack.i.l.s16 %v1317_v45  ;;  %v1495_v21 = vunpack.c.h.b16 %v1464_v19  ;;  %v1494_v35 = vunpack.c.l.b16 %v1464_v19  ;;  %v6822_v19 = vunpack.i.l.s16 %v1321_v24 }
  0xe1   : > { %v6820_v18 = vunpack.i.l.s16 %v1319_v43  ;;  %v8243_v55 = vpop.permute.xlu2 %1183 }
  0xe2   : > { %v1525_v27 = vpack.c.b16 %v1495_v21, %v1495_v21  ;;  %v1524_v29 = vpack.c.b16 %v1494_v35, %v1494_v35  ;;  %v1154_v60 = vpop.permute.xlu1 %1153  ;;  %v1160_v12 = vpop.permute.xlu0 %1159  ;;  %vm1371_vm5 = vcmp.ne.s32.totalorder %v6818_v44, %v7602_v26  ;;  %v1294_v21 = vsel %vm8238_vm1, 65537, %v11146_v38 }
  0xe3   : > { %vm1230_vm8 = vcmp.eq.s32.totalorder %v1154_v60, 1  ;;  %vm1232_vm9 = vcmp.eq.s32.totalorder %v1160_v12, 1  ;;  %vm1378_vm12 = vcmp.ne.s32.totalorder %v6820_v18, %v7602_v26  ;;  %vm1372_vm15 = vmpackc.low %vm1371_vm5, %vm1370_vm10  ;;  %vm1237_vm5 = vcmp.eq.s32.totalorder %v8224_v8, 1 }
  0xe4   : > { %1560 = vrot.lane.b32.xlu1 %v1525_v27, %s7274_s7  ;;  %1558 = vrot.lane.b32.xlu0 %v1524_v29, %s7274_s7  ;;  %vm1260_vm11 = vmpackc.low %vm1230_vm8, %vm1230_vm8  ;;  %v1465_v2 = vsel %vm1372_vm15, %v7578_v4, 0  ;;  %vm1385_vm1 = vcmp.ne.s32.totalorder %v6822_v19, %v7602_v26  ;;  %v1324_v29 = vunpack.c.l.b16 %v1294_v21  ;;  %vm1240_vm10 = vcmp.eq.s32.totalorder %v8243_v55, 1 }
  0xe5   : > { %v1290_v14 = vsel %vm1260_vm11, 65537, %v11146_v38  ;;  %vm1262_vm13 = vmpackc.low %vm1232_vm9, %vm1232_vm9  ;;  %v1496_v45 = vunpack.c.l.b16 %v1465_v2  ;;  %v1497_v43 = vunpack.c.h.b16 %v1465_v2 }
  0xe6   : > { %v1320_v59 = vunpack.c.l.b16 %v1290_v14  ;;  %vm1379_vm0 = vmpackc.low %vm1378_vm12, %vm1377_vm14  ;;  %v1292_v35 = vsel %vm1262_vm13, 65537, %v11146_v38  ;;  %v6825_v21 = vunpack.i.l.s16 %v1324_v29 }
  0xe7   : > { %v1466_v41 = vsel %vm1379_vm0, %v7569_v6, 0  ;;  %v1526_v36 = vpack.c.b16 %v1496_v45, %v1496_v45  ;;  %v1527_v18 = vpack.c.b16 %v1497_v43, %v1497_v43  ;;  %v1322_v60 = vunpack.c.l.b16 %v1292_v35  ;;  %vm1267_vm11 = vmpackc.low %vm1237_vm5, %vm1237_vm5 }
  0xe8   : > { %v6821_v52 = vunpack.i.l.s16 %v1320_v59  ;;  %v1498_v44 = vunpack.c.l.b16 %v1466_v41  ;;  %v1499_v59 = vunpack.c.h.b16 %v1466_v41  ;;  %v1297_v41 = vsel %vm1267_vm11, 65537, %v11146_v38  ;;  %vm8273_vm13 = vmpackc.low %vm1240_vm10, %vm1240_vm10 }
  0xe9   : > { %1562 = vrot.lane.b32.xlu2 %v1526_v36, %s7274_s7  ;;  %v1193_v12 = vpop.permute.xlu2 %1192  ;;  %v6823_v35 = vunpack.i.l.s16 %v1322_v60  ;;  %v1327_v55 = vunpack.c.l.b16 %v1297_v41 }
  0xea   : > { %v1163_v39 = vpop.permute.xlu1 %1162  ;;  %v1169_v48 = vpop.permute.xlu0 %1168  ;;  %vm1384_vm6 = vcmp.ne.s32.totalorder %v6821_v52, %v7591_v20  ;;  %v1528_v27 = vpack.c.b16 %v1498_v44, %v1498_v44 }
  0xeb   : > { %vm1233_vm4 = vcmp.eq.s32.totalorder %v1163_v39, 1  ;;  %vm1235_vm7 = vcmp.eq.s32.totalorder %v1169_v48, 1  ;;  %vm1386_vm12 = vmpackc.low %vm1385_vm1, %vm1384_vm6 }
  0xec   : > { %1564 = vrot.lane.b32.xlu0 %v1527_v18, %s7274_s7  ;;  %vm1263_vm8 = vmpackc.low %vm1233_vm4, %vm1233_vm4  ;;  %1566 = vrot.lane.b32.xlu1 %v1528_v27, %s7274_s7  ;;  %v1467_v45 = vsel %vm1386_vm12, %v7659_v28, 0  ;;  %v1529_v18 = vpack.c.b16 %v1499_v59, %v1499_v59 }
  0xed   : > { %v1293_v56 = vsel %vm1263_vm8, 65537, %v11146_v38  ;;  %vm1265_vm9 = vmpackc.low %vm1235_vm7, %vm1235_vm7  ;;  %v1501_v19 = vunpack.c.h.b16 %v1467_v45  ;;  %v1500_v44 = vunpack.c.l.b16 %v1467_v45  ;;  %vm1391_vm7 = vcmp.ne.s32.totalorder %v6823_v35, %v7591_v20 }
  0xee   : > { %v1323_v24 = vunpack.c.l.b16 %v1293_v56  ;;  %v1295_v14 = vsel %vm1265_vm9, 65537, %v11146_v38  ;;  %vm1398_vm8 = vcmp.ne.s32.totalorder %v6825_v21, %v7591_v20  ;;  %vm1243_vm9 = vcmp.eq.s32.totalorder %v1193_v12, 1 }
  0xef   : > { %v1325_v2 = vunpack.c.l.b16 %v1295_v14  ;;  %v1531_v52 = vpack.c.b16 %v1501_v19, %v1501_v19  ;;  %v1530_v39 = vpack.c.b16 %v1500_v44, %v1500_v44  ;;  %v1300_v44 = vsel %vm8273_vm13, 65537, %v11146_v38  ;;  %vm8295_vm11 = vmpackc.low %vm1243_vm9, %vm1243_vm9 }
  0xf0   : > { %v6824_v43 = vunpack.i.l.s16 %v1323_v24 }
  0xf1   : > { %v6826_v36 = vunpack.i.l.s16 %v1325_v2  ;;  %1568 = vrot.lane.b32.xlu2 %v1529_v18, %s7274_s7  ;;  %v1202_v56 = vpop.permute.xlu2 %1201 }
  0xf2   : > { %v1172_v48 = vpop.permute.xlu1 %1171  ;;  %v1178_v8 = vpop.permute.xlu0 %1177  ;;  %vm1392_vm14 = vcmp.ne.s32.totalorder %v6824_v43, %v7602_v26  ;;  %v6828_v43 = vunpack.i.l.s16 %v1327_v55 }
  0xf3   : > { %vm1236_vm15 = vcmp.eq.s32.totalorder %v1172_v48, 1  ;;  %vm1238_vm0 = vcmp.eq.s32.totalorder %v1178_v8, 1  ;;  %vm1399_vm6 = vcmp.ne.s32.totalorder %v6826_v36, %v7602_v26  ;;  %vm1393_vm1 = vmpackc.low %vm1392_vm14, %vm1391_vm7  ;;  %v1330_v48 = vunpack.c.l.b16 %v1300_v44 }
  0xf4   : > { %1570 = vrot.lane.b32.xlu0 %v1530_v39, %s7274_s7  ;;  %vm1266_vm4 = vmpackc.low %vm1236_vm15, %vm1236_vm15  ;;  %1572 = vrot.lane.b32.xlu1 %v1531_v52, %s7274_s7  ;;  %v1468_v24 = vsel %vm1393_vm1, %v7689_v61, 0  ;;  %vm1246_vm7 = vcmp.eq.s32.totalorder %v1202_v56, 1 }
  0xf5   : > { %v1296_v29 = vsel %vm1266_vm4, 65537, %v11146_v38  ;;  %vm1268_vm5 = vmpackc.low %vm1238_vm0, %vm1238_vm0  ;;  %v1502_v59 = vunpack.c.l.b16 %v1468_v24  ;;  %v1503_v45 = vunpack.c.h.b16 %v1468_v24  ;;  %vm1406_vm0 = vcmp.ne.s32.totalorder %v6828_v43, %v7602_v26 }
  0xf6   : > { %v1326_v60 = vunpack.c.l.b16 %v1296_v29  ;;  %vm1400_vm12 = vmpackc.low %vm1399_vm6, %vm1398_vm8  ;;  %v1298_v21 = vsel %vm1268_vm5, 65537, %v11146_v38  ;;  %v6831_v44 = vunpack.i.l.s16 %v1330_v48 }
  0xf7   : > { %v1469_v2 = vsel %vm1400_vm12, %v7695_v9, 0  ;;  %v1532_v35 = vpack.c.b16 %v1502_v59, %v1502_v59  ;;  %v1533_v41 = vpack.c.b16 %v1503_v45, %v1503_v45  ;;  %v1328_v8 = vunpack.c.l.b16 %v1298_v21  ;;  %vm8312_vm5 = vmpackc.low %vm1246_vm7, %vm1246_vm7 }
  0xf8   : > { %v6827_v14 = vunpack.i.l.s16 %v1326_v60  ;;  %v1504_v19 = vunpack.c.l.b16 %v1469_v2  ;;  %v1505_v29 = vunpack.c.h.b16 %v1469_v2  ;;  %v1303_v60 = vsel %vm8295_vm11, 65537, %v11146_v38 }
  0xf9   : > { %1574 = vrot.lane.b32.xlu2 %v1532_v35, %s7274_s7  ;;  %v6829_v21 = vunpack.i.l.s16 %v1328_v8  ;;  %v1211_v35 = vpop.permute.xlu2 %1210 }
  0xfa   : > { %v1181_v18 = vpop.permute.xlu1 %1180  ;;  %v1187_v52 = vpop.permute.xlu0 %1186  ;;  %vm1405_vm10 = vcmp.ne.s32.totalorder %v6827_v14, %v7591_v20  ;;  %v1534_v39 = vpack.c.b16 %v1504_v19, %v1504_v19  ;;  %v1535_v2 = vpack.c.b16 %v1505_v29, %v1505_v29 }
  0xfb   : > { %vm1239_vm14 = vcmp.eq.s32.totalorder %v1181_v18, 1  ;;  %vm1241_vm15 = vcmp.eq.s32.totalorder %v1187_v52, 1  ;;  %vm1407_vm4 = vmpackc.low %vm1406_vm0, %vm1405_vm10  ;;  %v1333_v18 = vunpack.c.l.b16 %v1303_v60  ;;  %vm1412_vm10 = vcmp.ne.s32.totalorder %v6829_v21, %v7591_v20 }
  0xfc   : > { %1576 = vrot.lane.b32.xlu0 %v1533_v41, %s7274_s7  ;;  %vm1269_vm13 = vmpackc.low %vm1239_vm14, %vm1239_vm14  ;;  %1578 = vrot.lane.b32.xlu1 %v1534_v39, %s7274_s7  ;;  %v1470_v59 = vsel %vm1407_vm4, %v7728_v1, 0  ;;  %vm1249_vm0 = vcmp.eq.s32.totalorder %v1211_v35, 1 }
  0xfd   : > { %v1299_v12 = vsel %vm1269_vm13, 65537, %v11146_v38  ;;  %vm1271_vm6 = vmpackc.low %vm1241_vm15, %vm1241_vm15  ;;  %v1507_v43 = vunpack.c.h.b16 %v1470_v59  ;;  %v1506_v19 = vunpack.c.l.b16 %v1470_v59  ;;  %vm1419_vm15 = vcmp.ne.s32.totalorder %v6831_v44, %v7591_v20 }
  0xfe   : > { %v1329_v27 = vunpack.c.l.b16 %v1299_v12  ;;  %v1301_v55 = vsel %vm1271_vm6, 65537, %v11146_v38  ;;  %v6834_v48 = vunpack.i.l.s16 %v1333_v18  ;;  %vm8335_vm7 = vmpackc.low %vm1249_vm0, %vm1249_vm0 }
  0xff   : > { %v1331_v24 = vunpack.c.l.b16 %v1301_v55  ;;  %v1537_v52 = vpack.c.b16 %v1507_v43, %v1507_v43  ;;  %v1536_v14 = vpack.c.b16 %v1506_v19, %v1506_v19  ;;  %v1306_v43 = vsel %vm8312_vm5, 65537, %v11146_v38 }
 0x100   : > { %v6830_v45 = vunpack.i.l.s16 %v1329_v27  ;;  %vm1427_vm4 = vcmp.ne.s32.totalorder %v6834_v48, %v7602_v26 }
 0x101   : > { %v6832_v41 = vunpack.i.l.s16 %v1331_v24  ;;  %1580 = vrot.lane.b32.xlu2 %v1535_v2, %s7274_s7 }
 0x102   : > { %v1190_v39 = vpop.permute.xlu1 %1189  ;;  %v1196_v12 = vpop.permute.xlu0 %1195  ;;  %vm1413_vm8 = vcmp.ne.s32.totalorder %v6830_v45, %v7602_v26 }
 0x103   : > { %vm1242_vm1 = vcmp.eq.s32.totalorder %v1190_v39, 1  ;;  %vm1244_vm9 = vcmp.eq.s32.totalorder %v1196_v12, 1  ;;  %vm1420_vm12 = vcmp.ne.s32.totalorder %v6832_v41, %v7602_v26  ;;  %vm1414_vm13 = vmpackc.low %vm1413_vm8, %vm1412_vm10 }
 0x104   : > { %1582 = vrot.lane.b32.xlu0 %v1536_v14, %s7274_s7  ;;  %vm1272_vm11 = vmpackc.low %vm1242_vm1, %vm1242_vm1  ;;  %1584 = vrot.lane.b32.xlu1 %v1537_v52, %s7274_s7  ;;  %v1471_v55 = vsel %vm1414_vm13, %v7803_v0, 0  ;;  %v1336_v52 = vunpack.c.l.b16 %v1306_v43  ;;  %v1220_v14 = vpop.permute.xlu2 %1219 }
 0x105   : > { %v1302_v56 = vsel %vm1272_vm11, 65537, %v11146_v38  ;;  %vm1274_vm14 = vmpackc.low %vm1244_vm9, %vm1244_vm9  ;;  %v1508_v60 = vunpack.c.l.b16 %v1471_v55  ;;  %v1509_v59 = vunpack.c.h.b16 %v1471_v55  ;;  %vm1252_vm10 = vcmp.eq.s32.totalorder %v1220_v14, 1 }
 0x106   : > { %v1332_v8 = vunpack.c.l.b16 %v1302_v56  ;;  %v1304_v27 = vsel %vm1274_vm14, 65537, %v11146_v38  ;;  %vm1421_vm6 = vmpackc.low %vm1420_vm12, %vm1419_vm15 }
 0x107   : > { %v1472_v24 = vsel %vm1421_vm6, %v7826_v34, 0  ;;  %v1334_v19 = vunpack.c.l.b16 %v1304_v27  ;;  %v1538_v21 = vpack.c.b16 %v1508_v60, %v1508_v60  ;;  %v1539_v35 = vpack.c.b16 %v1509_v59, %v1509_v59  ;;  %vm8349_vm14 = vmpackc.low %vm1252_vm10, %vm1252_vm10 }
 0x108   : > { %v6833_v29 = vunpack.i.l.s16 %v1332_v8  ;;  %v1510_v44 = vunpack.c.l.b16 %v1472_v24  ;;  %v1511_v55 = vunpack.c.h.b16 %v1472_v24  ;;  %v7275_v59 = vmov 2  }
 0x109   : > { %1586 = vrot.lane.b32.xlu2 %v1538_v21, %s7274_s7  ;;  %v6835_v12 = vunpack.i.l.s16 %v1334_v19  ;;  %7211 = vset.pattern.permute.xlu1 %v7275_v59 }
 0x10a   : > { %vm1426_vm8 = vcmp.ne.s32.totalorder %v6833_v29, %v7591_v20  ;;  %v1199_v41 = vpop.permute.xlu1 %1198  ;;  %v1205_v18 = vpop.permute.xlu0 %1204  ;;  %v1540_v2 = vpack.c.b16 %v1510_v44, %v1510_v44  ;;  %v1309_v29 = vsel %vm8335_vm7, 65537, %v11146_v38  ;;  %7210 = vset.pattern.permute.xlu0 %v7275_v59  ;;  %7212 = vset.pattern.permute.xlu2 %v7275_v59  ;;  %v6837_v44 = vunpack.i.l.s16 %v1336_v52 }
 0x10b   : > { %vm1245_vm1 = vcmp.eq.s32.totalorder %v1199_v41, 1  ;;  %vm1247_vm9 = vcmp.eq.s32.totalorder %v1205_v18, 1  ;;  %vm1428_vm12 = vmpackc.low %vm1427_vm4, %vm1426_vm8  ;;  %v1339_v41 = vunpack.c.l.b16 %v1309_v29  ;;  %vm1433_vm15 = vcmp.ne.s32.totalorder %v6835_v12, %v7591_v20 }
 0x10c   : > { %1588 = vrot.lane.b32.xlu0 %v1539_v35, %s7274_s7  ;;  %vm1275_vm5 = vmpackc.low %vm1245_vm1, %vm1245_vm1  ;;  %v1473_v39 = vsel %vm1428_vm12, %v7905_v16, 0  ;;  %1590 = vrot.lane.b32.xlu1 %v1540_v2, %s7274_s7  ;;  %v1541_v24 = vpack.c.b16 %v1511_v55, %v1511_v55  ;;  %vm1440_vm1 = vcmp.ne.s32.totalorder %v6837_v44, %v7591_v20 }
 0x10d   : > { %v1305_v36 = vsel %vm1275_vm5, 65537, %v11146_v38  ;;  %vm1277_vm11 = vmpackc.low %vm1247_vm9, %vm1247_vm9  ;;  %v1513_v56 = vunpack.c.h.b16 %v1473_v39  ;;  %v1512_v48 = vunpack.c.l.b16 %v1473_v39 }
 0x10e   : > { %v1335_v8 = vunpack.c.l.b16 %v1305_v36  ;;  %v1307_v27 = vsel %vm1277_vm11, 65537, %v11146_v38  ;;  %v6840_v36 = vunpack.i.l.s16 %v1339_v41 }
 0x10f   : > { %v1337_v60 = vunpack.c.l.b16 %v1307_v27  ;;  %v1542_v19 = vpack.c.b16 %v1512_v48, %v1512_v48  ;;  %v1543_v35 = vpack.c.b16 %v1513_v56, %v1513_v56  ;;  %v1312_v48 = vsel %vm8349_vm14, 65537, %v11146_v38 }
 0x110   : > { %v6836_v43 = vunpack.i.l.s16 %v1335_v8  ;;  %vm1448_vm5 = vcmp.ne.s32.totalorder %v6840_v36, %v7602_v26 }
 0x111   : > { %v6838_v21 = vunpack.i.l.s16 %v1337_v60  ;;  %1592 = vrot.lane.b32.xlu2 %v1541_v24, %s7274_s7 }
 0x112   : > { %vm1434_vm13 = vcmp.ne.s32.totalorder %v6836_v43, %v7602_v26  ;;  %v1208_v45 = vpop.permute.xlu1 %1207  ;;  %v1214_v2 = vpop.permute.xlu0 %1213 }
 0x113   : > { %vm1441_vm0 = vcmp.ne.s32.totalorder %v6838_v21, %v7602_v26  ;;  %vm1248_vm6 = vcmp.eq.s32.totalorder %v1208_v45, 1  ;;  %vm1250_vm4 = vcmp.eq.s32.totalorder %v1214_v2, 1  ;;  %vm1435_vm7 = vmpackc.low %vm1434_vm13, %vm1433_vm15 }
 0x114   : > { %1594 = vrot.lane.b32.xlu0 %v1542_v19, %s7274_s7  ;;  %vm1278_vm8 = vmpackc.low %vm1248_vm6, %vm1248_vm6  ;;  %v1474_v52 = vsel %vm1435_vm7, %v7956_v10, 0  ;;  %1596 = vrot.lane.b32.xlu1 %v1543_v35, %s7274_s7  ;;  %v1342_v35 = vunpack.c.l.b16 %v1312_v48  ;;  %vm1650_vm6 = vcmask 60448  }
 0x115   : > { %v1308_v14 = vsel %vm1278_vm8, 65537, %v11146_v38  ;;  %vm1280_vm9 = vmpackc.low %vm1250_vm4, %vm1250_vm4  ;;  %v1514_v39 = vunpack.c.l.b16 %v1474_v52  ;;  %v1515_v12 = vunpack.c.h.b16 %v1474_v52 }
 0x116   : > { %v1338_v56 = vunpack.c.l.b16 %v1308_v14  ;;  %vm1442_vm12 = vmpackc.low %vm1441_vm0, %vm1440_vm1  ;;  %v1310_v8 = vsel %vm1280_vm9, 65537, %v11146_v38  ;;  %v6843_v36 = vunpack.i.l.s16 %v1342_v35 }
 0x117   : > { %v1475_v27 = vsel %vm1442_vm12, %v7987_v50, 0  ;;  %v1544_v29 = vpack.c.b16 %v1514_v39, %v1514_v39  ;;  %v1545_v59 = vpack.c.b16 %v1515_v12, %v1515_v12  ;;  %v1340_v43 = vunpack.c.l.b16 %v1310_v8 }
 0x118   : > { %v6839_v55 = vunpack.i.l.s16 %v1338_v56  ;;  %v1516_v60 = vunpack.c.l.b16 %v1475_v27  ;;  %v1517_v24 = vunpack.c.h.b16 %v1475_v27  ;;  %vm1461_vm8 = vcmp.ne.s32.totalorder %v6843_v36, %v7591_v20  ;;  %v1760_v36 = vld [vmem:[%s10979_s3 + $0x28] sm:$0xff] }
 0x119   : > { %1598 = vrot.lane.b32.xlu2 %v1544_v29, %s7274_s7  ;;  %v6841_v52 = vunpack.i.l.s16 %v1340_v43 }
 0x11a   : > { %vm1447_vm11 = vcmp.ne.s32.totalorder %v6839_v55, %v7591_v20  ;;  %v1546_v19 = vpack.c.b16 %v1516_v60, %v1516_v60  ;;  %v1217_v44 = vpop.permute.xlu1 %1216  ;;  %v1223_v21 = vpop.permute.xlu0 %1222  ;;  %v1547_v27 = vpack.c.b16 %v1517_v24, %v1517_v24  ;;  %v1756_v24 = vld [vmem:[%s10979_s3 + $0x8] sm:$0xff] }
 0x11b   : > { %vm1251_vm10 = vcmp.eq.s32.totalorder %v1217_v44, 1  ;;  %vm1253_vm15 = vcmp.eq.s32.totalorder %v1223_v21, 1  ;;  %vm1449_vm14 = vmpackc.low %vm1448_vm5, %vm1447_vm11  ;;  %vm1454_vm4 = vcmp.ne.s32.totalorder %v6841_v52, %v7591_v20  ;;  %vm1788_vm11 = vcmp.gt.f32.partialorder %v1756_v24, 0.5 }
 0x11c   : > { %1600 = vrot.lane.b32.xlu0 %v1545_v59, %s7274_s7  ;;  %vm1281_vm13 = vmpackc.low %vm1251_vm10, %vm1251_vm10  ;;  %v1476_v41 = vsel %vm1449_vm14, %v8026_v58, 0  ;;  %1602 = vrot.lane.b32.xlu1 %v1546_v19, %s7274_s7 }
 0x11d   : > { %v1311_v18 = vsel %vm1281_vm13, 65537, %v11146_v38  ;;  %vm1283_vm0 = vmpackc.low %vm1253_vm15, %vm1253_vm15  ;;  %v1519_v45 = vunpack.c.h.b16 %v1476_v41  ;;  %v1518_v2 = vunpack.c.l.b16 %v1476_v41  ;;  %v1557_v12 = vpop.permute.xlu2 %1556  ;;  %vm1792_vm15 = vcmp.gt.f32.partialorder %v1760_v36, 0.5 }
 0x11e   : > { %v1341_v14 = vunpack.c.l.b16 %v1311_v18  ;;  %v1313_v39 = vsel %vm1283_vm0, 65537, %v11146_v38  ;;  %1652 = vst.msk [vmem:[#allocation2 + $0x4] sm:$0xf] %vm1650_vm6, %v1557_v12  ;;  %v1755_v18 = vld [vmem:[%s10979_s3] sm:$0xff]  ;;  %v1757_v12 = vld [vmem:[%s10979_s3 + $0x10] sm:$0xff] }
 0x11f   : > { %v1343_v56 = vunpack.c.l.b16 %v1313_v39  ;;  %v1548_v8 = vpack.c.b16 %v1518_v2, %v1518_v2  ;;  %v1549_v29 = vpack.c.b16 %v1519_v45, %v1519_v45  ;;  %vm1787_vm5 = vcmp.gt.f32.partialorder %v1755_v18, 0.5 }
 0x120   : > { %v6842_v48 = vunpack.i.l.s16 %v1341_v14  ;;  %v1819_v52 = vsel %vm1787_vm5, 1, %v11146_v38  ;;  %v1820_v39 = vsel %vm1788_vm11, 1, %v11146_v38  ;;  %vm1789_vm10 = vcmp.gt.f32.partialorder %v1757_v12, 0.5 }
 0x121   : > { %v6844_v55 = vunpack.i.l.s16 %v1343_v56  ;;  %1604 = vrot.lane.b32.xlu2 %v1547_v27, %s7274_s7  ;;  %v1758_v56 = vld [vmem:[%s10979_s3 + $0x18] sm:$0xff]  ;;  %v1763_v27 = vld [vmem:[%s10979_s3 + $0x40] sm:$0xff] }
 0x122   : > { %vm1455_vm7 = vcmp.ne.s32.totalorder %v6842_v48, %v7602_v26  ;;  %vm1790_vm14 = vcmp.gt.f32.partialorder %v1758_v56, 0.5  ;;  %v1821_v48 = vsel %vm1789_vm10, 1, %v11146_v38  ;;  %vm1795_vm0 = vcmp.gt.f32.partialorder %v1763_v27, 0.5 }
 0x123   : > { %vm1462_vm1 = vcmp.ne.s32.totalorder %v6844_v55, %v7602_v26  ;;  %vm1456_vm9 = vmpackc.low %vm1455_vm7, %vm1454_vm4  ;;  %v1822_v55 = vsel %vm1790_vm14, 1, %v11146_v38 }
 0x124   : > { %1606 = vrot.lane.b32.xlu0 %v1548_v8, %s7274_s7  ;;  %v1477_v60 = vsel %vm1456_vm9, %v8099_v13, 0  ;;  %vm1463_vm12 = vmpackc.low %vm1462_vm1, %vm1461_vm8  ;;  %1608 = vrot.lane.b32.xlu1 %v1549_v29, %s7274_s7  ;;  %v1824_v8 = vsel %vm1792_vm15, 1, %v11146_v38  ;;  %v1759_v29 = vld [vmem:[%s10979_s3 + $0x20] sm:$0xff] }
 0x125   : > { %v1520_v59 = vunpack.c.l.b16 %v1477_v60  ;;  %v1478_v43 = vsel %vm1463_vm12, %v8110_v31, 0  ;;  %v1521_v19 = vunpack.c.h.b16 %v1477_v60  ;;  %v1761_v60 = vld [vmem:[%s10979_s3 + $0x30] sm:$0xff]  ;;  %vm1791_vm13 = vcmp.gt.f32.partialorder %v1759_v29, 0.5 }
 0x126   : > { %v1522_v44 = vunpack.c.l.b16 %v1478_v43  ;;  %v1523_v45 = vunpack.c.h.b16 %v1478_v43  ;;  %vm1793_vm4 = vcmp.gt.f32.partialorder %v1761_v60, 0.5  ;;  %v1827_v43 = vsel %vm1795_vm0, 1, %v11146_v38 }
 0x127   : > { %v1550_v21 = vpack.c.b16 %v1520_v59, %v1520_v59  ;;  %v1551_v35 = vpack.c.b16 %v1521_v19, %v1521_v19  ;;  %v1823_v59 = vsel %vm1791_vm13, 1, %v11146_v38  ;;  %v1825_v19 = vsel %vm1793_vm4, 1, %v11146_v38 }
 0x128   : > { %v1552_v41 = vpack.c.b16 %v1522_v44, %v1522_v44  ;;  %v1553_v14 = vpack.c.b16 %v1523_v45, %v1523_v45  ;;  %v1762_v44 = vld [vmem:[%s10979_s3 + $0x38] sm:$0xff] }
 0x129   : > { %1610 = vrot.lane.b32.xlu2 %v1550_v21, %s7274_s7  ;;  %v1766_v21 = vld [vmem:[%s10979_s3 + $0x58] sm:$0xff]  ;;  %vm1794_vm7 = vcmp.gt.f32.partialorder %v1762_v44, 0.5  ;;  %v1771_v44 = vld [vmem:[%s10979_s3 + $0x80] sm:$0xff] }
 0x12a   : > { %vm1798_vm8 = vcmp.gt.f32.partialorder %v1766_v21, 0.5  ;;  %v1826_v18 = vsel %vm1794_vm7, 1, %v11146_v38  ;;  %v1775_v21 = vld [vmem:[%s10979_s3 + $0xa0] sm:$0xff]  ;;  %vm1803_vm14 = vcmp.gt.f32.partialorder %v1771_v44, 0.5 }
 0x12b   : > { %v1830_v24 = vsel %vm1798_vm8, 1, %v11146_v38  ;;  %vm1807_vm13 = vcmp.gt.f32.partialorder %v1775_v21, 0.5 }
 0x12c   : > { %1612 = vrot.lane.b32.xlu0 %v1551_v35, %s7274_s7  ;;  %1614 = vrot.lane.b32.xlu1 %v1552_v41, %s7274_s7  ;;  %v1764_v35 = vld [vmem:[%s10979_s3 + $0x48] sm:$0xff] }
 0x12d   : > { %vm1796_vm1 = vcmp.gt.f32.partialorder %v1764_v35, 0.5  ;;  %v1773_v35 = vld [vmem:[%s10979_s3 + $0x90] sm:$0xff] }
 0x12e   : > { %v1555_v2 = vpop.permute.xlu1 %1554  ;;  %v1828_v45 = vsel %vm1796_vm1, 1, %v11146_v38  ;;  %vm1805_vm0 = vcmp.gt.f32.partialorder %v1773_v35, 0.5 }
 0x12f   : > { %1651 = vst.msk [vmem:[#allocation2] sm:$0xf] %vm1650_vm6, %v1555_v2  ;;  %v1765_v2 = vld [vmem:[%s10979_s3 + $0x50] sm:$0xff] }
 0x130   : > { %vm1797_vm9 = vcmp.gt.f32.partialorder %v1765_v2, 0.5  ;;  %v1839_v2 = vsel %vm1807_vm13, 1, %v11146_v38 }
 0x131   : > { %1616 = vrot.lane.b32.xlu2 %v1553_v14, %s7274_s7  ;;  %v1767_v14 = vld [vmem:[%s10979_s3 + $0x60] sm:$0xff]  ;;  %v1829_v12 = vsel %vm1797_vm9, 1, %v11146_v38  ;;  %s7288_s7 = smov 32  }
 0x132   : > { %vm1799_vm5 = vcmp.gt.f32.partialorder %v1767_v14, 0.5  ;;  %v1774_v14 = vld [vmem:[%s10979_s3 + $0x98] sm:$0xff] }
 0x133   : > { %v1831_v56 = vsel %vm1799_vm5, 1, %v11146_v38  ;;  %vm1806_vm4 = vcmp.gt.f32.partialorder %v1774_v14, 0.5 }
 0x134   : > { %1852 = vperm.xlu0 %7210, %v1819_v52   ;;  %1855 = vperm.xlu1 %7211, %v1820_v39   ;;  %v1769_v52 = vld [vmem:[%s10979_s3 + $0x70] sm:$0xff] }
 0x135   : > { %vm1801_vm12 = vcmp.gt.f32.partialorder %v1769_v52, 0.5  ;;  %v1837_v52 = vsel %vm1805_vm0, 1, %v11146_v38  ;;  %vm1686_vm0 = vsmask.f32 7424 }
 0x136   : > { %v1833_v36 = vsel %vm1801_vm12, 1, %v11146_v38 }
 0x139   : > { %1858 = vperm.xlu2 %7212, %v1821_v48   ;;  %v1768_v48 = vld [vmem:[%s10979_s3 + $0x68] sm:$0xff] }
 0x13a   : > { %vm1800_vm11 = vcmp.gt.f32.partialorder %v1768_v48, 0.5 }
 0x13c   : > { %1867 = vperm.xlu0 %7210, %v1824_v8   ;;  %1861 = vperm.xlu1 %7211, %v1822_v55   ;;  %v1772_v8 = vld [vmem:[%s10979_s3 + $0x88] sm:$0xff]  ;;  %v1770_v55 = vld [vmem:[%s10979_s3 + $0x78] sm:$0xff] }
 0x13d   : > { %vm1804_vm10 = vcmp.gt.f32.partialorder %v1772_v8, 0.5  ;;  %vm1802_vm15 = vcmp.gt.f32.partialorder %v1770_v55, 0.5  ;;  %v1838_v8 = vsel %vm1806_vm4, 1, %v11146_v38  ;;  %vm1752_vm4 = vcmask 1047552  }
 0x141   : > { %1864 = vperm.xlu2 %7212, %v1823_v59   ;;  %v1832_v59 = vsel %vm1800_vm11, 1, %v11146_v38 }
 0x143   : > { %v1563_v41 = vpop.permute.xlu2 %1562 }
 0x144   : > { %1876 = vperm.xlu0 %7210, %v1827_v43   ;;  %1870 = vperm.xlu1 %7211, %v1825_v19   ;;  %1655 = vst.msk [vmem:[#allocation2 + $0x10] sm:$0xf] %vm1650_vm6, %v1563_v41  ;;  %v1836_v43 = vsel %vm1804_vm10, 1, %v11146_v38  ;;  %v1834_v19 = vsel %vm1802_vm15, 1, %v11146_v38 }
 0x149   : > { %1873 = vperm.xlu2 %7212, %v1826_v18  }
 0x14b   : > { %v1569_v39 = vpop.permute.xlu2 %1568 }
 0x14c   : > { %1885 = vperm.xlu0 %7210, %v1830_v24   ;;  %1879 = vperm.xlu1 %7211, %v1828_v45   ;;  %1658 = vst.msk [vmem:[#allocation2 + $0x1c] sm:$0xf] %vm1650_vm6, %v1569_v39  ;;  %v1835_v45 = vsel %vm1803_vm14, 1, %v11146_v38  ;;  %v1778_v39 = vld [vmem:[%s10979_s3 + $0xb8] sm:$0xff] }
 0x14d   : > { %vm1810_vm7 = vcmp.gt.f32.partialorder %v1778_v39, 0.5 }
 0x14e   : > { %v1842_v55 = vsel %vm1810_vm7, 1, %v11146_v38  ;;  %vm8570_vm7 = vmand %vm1752_vm4, %vm1686_vm0 }
 0x151   : > { %1882 = vperm.xlu2 %7212, %v1829_v12   ;;  %v1776_v12 = vld [vmem:[%s10979_s3 + $0xa8] sm:$0xff] }
 0x152   : > { %vm1808_vm8 = vcmp.gt.f32.partialorder %v1776_v12, 0.5 }
 0x153   : > { %v1575_v29 = vpop.permute.xlu2 %1574 }
 0x154   : > { %1894 = vperm.xlu0 %7210, %v1833_v36   ;;  %1888 = vperm.xlu1 %7211, %v1831_v56   ;;  %1661 = vst.msk [vmem:[#allocation2 + $0x28] sm:$0xf] %vm1650_vm6, %v1575_v29  ;;  %v1840_v29 = vsel %vm1808_vm8, 1, %v11146_v38 }
 0x156   : > { %v1561_v27 = vpop.permute.xlu1 %1560  ;;  %v1559_v60 = vpop.permute.xlu0 %1558 }
 0x157   : > { %1654 = vst.msk [vmem:[#allocation2 + $0xc] sm:$0xf] %vm1650_vm6, %v1561_v27  ;;  %v1777_v27 = vld [vmem:[%s10979_s3 + $0xb0] sm:$0xff] }
 0x158   : > { %1653 = vst.msk [vmem:[#allocation2 + $0x8] sm:$0xf] %vm1650_vm6, %v1559_v60  ;;  %v1781_v60 = vld [vmem:[%s10979_s3 + $0xd0] sm:$0xff]  ;;  %vm1809_vm1 = vcmp.gt.f32.partialorder %v1777_v27, 0.5 }
 0x159   : > { %1891 = vperm.xlu2 %7212, %v1832_v59   ;;  %v1779_v59 = vld [vmem:[%s10979_s3 + $0xc0] sm:$0xff]  ;;  %vm1813_vm9 = vcmp.gt.f32.partialorder %v1781_v60, 0.5  ;;  %v1841_v21 = vsel %vm1809_vm1, 1, %v11146_v38 }
 0x15a   : > { %vm1811_vm12 = vcmp.gt.f32.partialorder %v1779_v59, 0.5  ;;  %v1845_v35 = vsel %vm1813_vm9, 1, %v11146_v38  ;;  %v1786_v59 = vld [vmem:[%s10979_s3 + $0xf8] sm:$0xff] }
 0x15b   : > { %v1581_v41 = vpop.permute.xlu2 %1580  ;;  %vm1818_vm13 = vcmp.gt.f32.partialorder %v1786_v59, 0.5 }
 0x15c   : > { %1903 = vperm.xlu0 %7210, %v1836_v43   ;;  %1897 = vperm.xlu1 %7211, %v1834_v19   ;;  %1664 = vst.msk [vmem:[#allocation2 + $0x34] sm:$0xf] %vm1650_vm6, %v1581_v41  ;;  %v1843_v41 = vsel %vm1811_vm12, 1, %v11146_v38 }
 0x15e   : > { %v1567_v18 = vpop.permute.xlu1 %1566  ;;  %v1565_v24 = vpop.permute.xlu0 %1564 }
 0x15f   : > { %1657 = vst.msk [vmem:[#allocation2 + $0x18] sm:$0xf] %vm1650_vm6, %v1567_v18  ;;  %v1780_v18 = vld [vmem:[%s10979_s3 + $0xc8] sm:$0xff] }
 0x160   : > { %1656 = vst.msk [vmem:[#allocation2 + $0x14] sm:$0xf] %vm1650_vm6, %v1565_v24  ;;  %v1784_v24 = vld [vmem:[%s10979_s3 + $0xe8] sm:$0xff]  ;;  %vm1812_vm5 = vcmp.gt.f32.partialorder %v1780_v18, 0.5 }
 0x161   : > { %1900 = vperm.xlu2 %7212, %v1835_v45   ;;  %v1782_v45 = vld [vmem:[%s10979_s3 + $0xd8] sm:$0xff]  ;;  %vm1816_vm11 = vcmp.gt.f32.partialorder %v1784_v24, 0.5  ;;  %v1844_v39 = vsel %vm1812_vm5, 1, %v11146_v38 }
 0x162   : > { %vm1814_vm10 = vcmp.gt.f32.partialorder %v1782_v45, 0.5  ;;  %v1848_v12 = vsel %vm1816_vm11, 1, %v11146_v38  ;;  %v234_v24 = vld [vmem:[%s7544_s6 + $0x78] sm:$0xf] }
 0x163   : > { %v1587_v36 = vpop.permute.xlu2 %1586 }
 0x164   : > { %1912 = vperm.xlu0 %7210, %v1839_v2   ;;  %1906 = vperm.xlu1 %7211, %v1837_v52   ;;  %1667 = vst.msk [vmem:[#allocation2 + $0x40] sm:$0xf] %vm1650_vm6, %v1587_v36  ;;  %v1846_v36 = vsel %vm1814_vm10, 1, %v11146_v38 }
 0x166   : > { %v1573_v56 = vpop.permute.xlu1 %1572  ;;  %v1571_v48 = vpop.permute.xlu0 %1570 }
 0x167   : > { %1660 = vst.msk [vmem:[#allocation2 + $0x24] sm:$0xf] %vm1650_vm6, %v1573_v56  ;;  %v1783_v56 = vld [vmem:[%s10979_s3 + $0xe0] sm:$0xff] }
 0x168   : > { %1659 = vst.msk [vmem:[#allocation2 + $0x20] sm:$0xf] %vm1650_vm6, %v1571_v48  ;;  %v1785_v48 = vld [vmem:[%s10979_s3 + $0xf0] sm:$0xff]  ;;  %vm1815_vm15 = vcmp.gt.f32.partialorder %v1783_v56, 0.5 }
 0x169   : > { %1909 = vperm.xlu2 %7212, %v1838_v8   ;;  %vm1817_vm14 = vcmp.gt.f32.partialorder %v1785_v48, 0.5  ;;  %v1847_v27 = vsel %vm1815_vm15, 1, %v11146_v38 }
 0x16a   : > { %v1849_v60 = vsel %vm1817_vm14, 1, %v11146_v38 }
 0x16b   : > { %v1593_v43 = vpop.permute.xlu2 %1592 }
 0x16c   : > { %1921 = vperm.xlu0 %7210, %v1842_v55   ;;  %1915 = vperm.xlu1 %7211, %v1840_v29   ;;  %1670 = vst.msk [vmem:[#allocation2 + $0x4c] sm:$0xf] %vm1650_vm6, %v1593_v43 }
 0x16e   : > { %v1579_v19 = vpop.permute.xlu1 %1578  ;;  %v1577_v44 = vpop.permute.xlu0 %1576 }
 0x16f   : > { %1663 = vst.msk [vmem:[#allocation2 + $0x30] sm:$0xf] %vm1650_vm6, %v1579_v19 }
 0x170   : > { %1662 = vst.msk [vmem:[#allocation2 + $0x2c] sm:$0xf] %vm1650_vm6, %v1577_v44 }
 0x171   : > { %1918 = vperm.xlu2 %7212, %v1841_v21   ;;  %v1850_v21 = vsel %vm1818_vm13, 1, %v11146_v38 }
 0x173   : > { %v1599_v2 = vpop.permute.xlu2 %1598 }
 0x174   : > { %1930 = vperm.xlu0 %7210, %v1845_v35   ;;  %1924 = vperm.xlu1 %7211, %v1843_v41   ;;  %1673 = vst.msk [vmem:[#allocation2 + $0x58] sm:$0xf] %vm1650_vm6, %v1599_v2 }
 0x176   : > { %v1585_v52 = vpop.permute.xlu1 %1584  ;;  %v1583_v14 = vpop.permute.xlu0 %1582 }
 0x177   : > { %1666 = vst.msk [vmem:[#allocation2 + $0x3c] sm:$0xf] %vm1650_vm6, %v1585_v52 }
 0x178   : > { %1665 = vst.msk [vmem:[#allocation2 + $0x38] sm:$0xf] %vm1650_vm6, %v1583_v14  ;;  %v235_v14 = vld [vmem:[%s7544_s6 + $0x7c] sm:$0xf] }
 0x179   : > { %1927 = vperm.xlu2 %7212, %v1844_v39   ;;  %v8549_v39 = vunpack.c.l.b16 %v234_v24 }
 0x17b   : > { %v1605_v8 = vpop.permute.xlu2 %1604  ;;  %11171 = vst [vmem:[#allocation49_spill] sm:$0xff] %v8549_v39 }
 0x17c   : > { %1939 = vperm.xlu0 %7210, %v1848_v12   ;;  %1933 = vperm.xlu1 %7211, %v1846_v36   ;;  %1676 = vst.msk [vmem:[#allocation2 + $0x64] sm:$0xf] %vm1650_vm6, %v1605_v8  ;;  %v8552_v12 = vunpack.c.l.b16 %v235_v14 }
 0x17e   : > { %v1591_v55 = vpop.permute.xlu1 %1590  ;;  %v1589_v29 = vpop.permute.xlu0 %1588  ;;  %11172 = vst [vmem:[#allocation50_spill] sm:$0xff] %v8552_v12  ;;  %v8556_v36 = vpack.c.b16 %v8552_v12, %v8549_v39 }
 0x17f   : > { %1669 = vst.msk [vmem:[#allocation2 + $0x48] sm:$0xf] %vm1650_vm6, %v1591_v55 }
 0x180   : > { %1668 = vst.msk [vmem:[#allocation2 + $0x44] sm:$0xf] %vm1650_vm6, %v1589_v29  ;;  %v11053_v56 = vshll.u32 %v8556_v36, 16  ;;  %v11054_v29 = vshrl.u32 %v8556_v36, 16 }
 0x181   : > { %1936 = vperm.xlu2 %7212, %v1847_v27   ;;  %11173 = vst [vmem:[#allocation51_spill] sm:$0xff] %v8556_v36 }
 0x182   : > { %v8562_v27 = vrot.slane %v11053_v56, 1 }
 0x183   : > { %v1611_v43 = vpop.permute.xlu2 %1610 }
 0x184   : > { %1942 = vperm.xlu1 %7211, %v1849_v60   ;;  %1679 = vst.msk [vmem:[#allocation2 + $0x70] sm:$0xf] %vm1650_vm6, %v1611_v43  ;;  %v3564_v60 = vor.u32 %v8562_v27, %v11054_v29 }
 0x186   : > { %v1597_v19 = vpop.permute.xlu1 %1596  ;;  %v1595_v44 = vpop.permute.xlu0 %1594  ;;  %v8576_v43 = vsel %vm8570_vm7, %v3564_v60, 0 }
 0x187   : > { %1672 = vst.msk [vmem:[#allocation2 + $0x54] sm:$0xf] %vm1650_vm6, %v1597_v19 }
 0x188   : > { %1671 = vst.msk [vmem:[#allocation2 + $0x50] sm:$0xf] %vm1650_vm6, %v1595_v44 }
 0x189   : > { %1945 = vperm.xlu2 %7212, %v1850_v21   ;;  %11176 = vst [vmem:[#allocation52_spill] sm:$0xff] %v8576_v43 }
 0x18b   : > { %v1617_v35 = vpop.permute.xlu2 %1616 }
 0x18c   : > { %1682 = vst.msk [vmem:[#allocation2 + $0x7c] sm:$0xf] %vm1650_vm6, %v1617_v35 }
 0x18e   : > { %v1603_v41 = vpop.permute.xlu1 %1602  ;;  %v1601_v18 = vpop.permute.xlu0 %1600 }
 0x18f   : > { %1675 = vst.msk [vmem:[#allocation2 + $0x60] sm:$0xf] %vm1650_vm6, %v1603_v41 }
 0x190   : > { %1674 = vst.msk [vmem:[#allocation2 + $0x5c] sm:$0xf] %vm1650_vm6, %v1601_v18 }
 0x193   : > { %v1859_v45 = vpop.permute.xlu2 %1858 }
 0x194   : > { %vm1949_vm8 = vcmp.eq.s32.totalorder %v1859_v45, 1 }
 0x195   : > { %vm1981_vm11 = vmpackc.low %vm1949_vm8, %vm1949_vm8 }
 0x196   : > { %v1609_v2 = vpop.permute.xlu1 %1608  ;;  %v1607_v52 = vpop.permute.xlu0 %1606  ;;  %v2013_v45 = vsel %vm1981_vm11, 65537, %v11146_v38 }
 0x197   : > { %1678 = vst.msk [vmem:[#allocation2 + $0x6c] sm:$0xf] %vm1650_vm6, %v1609_v2 }
 0x198   : > { %1677 = vst.msk [vmem:[#allocation2 + $0x68] sm:$0xf] %vm1650_vm6, %v1607_v52  ;;  %v11177_v52 = vshll.u32 %v7627_v22, 16 }
 0x19a   : > { %v1687_v14 = vrot.slane %v11177_v52, 1 }
 0x19b   : > { %v1865_v48 = vpop.permute.xlu2 %1864 }
 0x19e   : > { %v1615_v8 = vpop.permute.xlu1 %1614  ;;  %v1613_v55 = vpop.permute.xlu0 %1612 }
 0x19f   : > { %1681 = vst.msk [vmem:[#allocation2 + $0x78] sm:$0xf] %vm1650_vm6, %v1615_v8 }
 0x1a0   : > { %1680 = vst.msk [vmem:[#allocation2 + $0x74] sm:$0xf] %vm1650_vm6, %v1613_v55  ;;  %vm1951_vm6 = vcmp.eq.s32.totalorder %v1865_v48, 1 }
 0x1a1   : > { %vm1983_vm10 = vmpackc.low %vm1951_vm6, %vm1951_vm6 }
 0x1a2   : > { %v2015_v48 = vsel %vm1983_vm10, 65537, %v11146_v38 }
 0x1a3   : > { %v1874_v19 = vpop.permute.xlu2 %1873 }
 0x1a4   : > { %vm1954_vm8 = vcmp.eq.s32.totalorder %v1874_v19, 1  ;;  %v11180_v19 = vshll.u32 %v7569_v6, 16 }
 0x1a6   : > { %v1856_v44 = vpop.permute.xlu1 %1855  ;;  %v1853_v21 = vpop.permute.xlu0 %1852 }
 0x1a7   : > { %vm1948_vm1 = vcmp.eq.s32.totalorder %v1856_v44, 1  ;;  %vm1947_vm9 = vcmp.eq.s32.totalorder %v1853_v21, 1  ;;  %v11178_v21 = vshll.u32 %v7578_v4, 16 }
 0x1a8   : > { %vm1980_vm12 = vmpackc.low %vm1948_vm1, %vm1948_vm1 }
 0x1a9   : > { %v2012_v35 = vsel %vm1980_vm12, 65537, %v11146_v38  ;;  %vm1979_vm5 = vmpackc.low %vm1947_vm9, %vm1947_vm9  ;;  %v1689_v56 = vrot.slane %v11178_v21, 1 }
 0x1aa   : > { %v2044_v41 = vunpack.c.l.b16 %v2012_v35  ;;  %v2011_v18 = vsel %vm1979_vm5, 65537, %v11146_v38  ;;  %v1754_v35 = vsel %vm8570_vm7, 0, %v1687_v14  ;;  %vm1986_vm12 = vmpackc.low %vm1954_vm8, %vm1954_vm8 }
 0x1ab   : > { %v2043_v24 = vunpack.c.l.b16 %v2011_v18  ;;  %v1883_v55 = vpop.permute.xlu2 %1882 }
 0x1ac   : > { %v6846_v2 = vunpack.i.l.s16 %v2044_v41  ;;  %v2047_v41 = vunpack.c.l.b16 %v2015_v48  ;;  %vm1957_vm5 = vcmp.eq.s32.totalorder %v1883_v55, 1 }
 0x1ad   : > { %v6845_v8 = vunpack.i.l.s16 %v2043_v24  ;;  %v2045_v24 = vunpack.c.l.b16 %v2013_v45  ;;  %v11181_v45 = vshrl.u32 %v7627_v22, 16  ;;  %vm8599_vm7 = vmpackc.low %vm1957_vm5, %vm1957_vm5 }
 0x1ae   : > { %v1862_v60 = vpop.permute.xlu1 %1861  ;;  %v1868_v44 = vpop.permute.xlu0 %1867  ;;  %vm2096_vm15 = vcmp.ne.s32.totalorder %v6846_v2, %v7602_v26  ;;  %v6849_v53 = vunpack.i.l.s16 %v2047_v41 }
 0x1af   : > { %vm2095_vm14 = vcmp.ne.s32.totalorder %v6845_v8, %v7591_v20  ;;  %vm1950_vm13 = vcmp.eq.s32.totalorder %v1862_v60, 1  ;;  %vm1952_vm4 = vcmp.eq.s32.totalorder %v1868_v44, 1  ;;  %v11179_v8 = vshrl.u32 %v7578_v4, 16 }
 0x1b0   : > { %vm1982_vm1 = vmpackc.low %vm1950_vm13, %vm1950_vm13  ;;  %v1692_v44 = vrot.slane %v11180_v19, 1  ;;  %v6847_v23 = vunpack.i.l.s16 %v2045_v24 }
 0x1b1   : > { %v2014_v18 = vsel %vm1982_vm1, 65537, %v11146_v38  ;;  %vm1984_vm9 = vmpackc.low %vm1952_vm4, %vm1952_vm4  ;;  %v1691_v60 = vor.u32 %v1689_v56, %v11179_v8  ;;  %vm2109_vm4 = vcmp.ne.s32.totalorder %v6849_v53, %v7591_v20  ;;  %v11186_v53 = vshrl.u32 %v7569_v6, 16 }
 0x1b2   : > { %v2046_v52 = vunpack.c.l.b16 %v2014_v18  ;;  %v2016_v29 = vsel %vm1984_vm9, 65537, %v11146_v38  ;;  %vm2097_vm6 = vmpackc.low %vm2096_vm15, %vm2095_vm14  ;;  %v1688_v18 = vor.u32 %v1687_v14, %v11181_v45  ;;  %vm2102_vm1 = vcmp.ne.s32.totalorder %v6847_v23, %v7591_v20 }
 0x1b3   : > { %v2048_v2 = vunpack.c.l.b16 %v2016_v29  ;;  %v2203_v21 = vsel %vm2097_vm6, %v1754_v35, 0  ;;  %v1892_v32 = vpop.permute.xlu2 %1891  ;;  %v2018_v29 = vsel %vm1986_vm12, 65537, %v11146_v38  ;;  %v8608_v22 = vsel %vm1686_vm0, %v1691_v60, %v1692_v44 }
 0x1b4   : > { %v6848_v59 = vunpack.i.l.s16 %v2046_v52  ;;  %v2236_v48 = vunpack.c.h.b16 %v2203_v21  ;;  %v2235_v7 = vunpack.c.l.b16 %v2203_v21  ;;  %v1694_v24 = vor.u32 %v1692_v44, %v11186_v53 }
 0x1b5   : > { %v6850_v12 = vunpack.i.l.s16 %v2048_v2  ;;  %v2021_v45 = vsel %vm8599_vm7, 65537, %v11146_v38 }
 0x1b6   : > { %v2268_v35 = vpack.c.b16 %v2236_v48, %v2236_v48  ;;  %v2267_v63 = vpack.c.b16 %v2235_v7, %v2235_v7  ;;  %v1871_v4 = vpop.permute.xlu1 %1870  ;;  %v1877_v8 = vpop.permute.xlu0 %1876  ;;  %vm2103_vm14 = vcmp.ne.s32.totalorder %v6848_v59, %v7602_v26  ;;  %v2050_v7 = vunpack.c.l.b16 %v2018_v29 }
 0x1b7   : > { %vm2110_vm11 = vcmp.ne.s32.totalorder %v6850_v12, %v7602_v26  ;;  %vm1953_vm10 = vcmp.eq.s32.totalorder %v1871_v4, 1  ;;  %vm1955_vm15 = vcmp.eq.s32.totalorder %v1877_v8, 1  ;;  %v8617_v4 = vsel %vm1686_vm0, %v1688_v18, %v1689_v56  ;;  %vm2104_vm6 = vmpackc.low %vm2103_vm14, %vm2102_vm1 }
 0x1b8   : > { %2301 = vrot.lane.b32.xlu1 %v2268_v35, %s7276_s28  ;;  %2299 = vrot.lane.b32.xlu0 %v2267_v63, %s7276_s28  ;;  %vm1985_vm13 = vmpackc.low %vm1953_vm10, %vm1953_vm10  ;;  %v2204_v21 = vsel %vm2104_vm6, %v8617_v4, 0  ;;  %v11187_v56 = vshll.u32 %v7659_v28, 16  ;;  %v6852_v23 = vunpack.i.l.s16 %v2050_v7  ;;  %v11188_v35 = vshll.u32 %v7689_v61, 16 }
 0x1b9   : > { %v2017_v14 = vsel %vm1985_vm13, 65537, %v11146_v38  ;;  %vm8612_vm8 = vmpackc.low %vm1955_vm15, %vm1955_vm15  ;;  %v2238_v19 = vunpack.c.h.b16 %v2204_v21  ;;  %v2237_v48 = vunpack.c.l.b16 %v2204_v21  ;;  %v2053_v55 = vunpack.c.l.b16 %v2021_v45 }
 0x1ba   : > { %v2049_v41 = vunpack.c.l.b16 %v2017_v14  ;;  %vm2111_vm9 = vmpackc.low %vm2110_vm11, %vm2109_vm4  ;;  %v1695_v60 = vrot.slane %v11187_v56, 1  ;;  %v2019_v59 = vsel %vm8612_vm8, 65537, %v11146_v38  ;;  %v1698_v8 = vrot.slane %v11188_v35, 1 }
 0x1bb   : > { %v2205_v63 = vsel %vm2111_vm9, %v8608_v22, 0  ;;  %v1901_v12 = vpop.permute.xlu2 %1900  ;;  %v2270_v7 = vpack.c.b16 %v2238_v19, %v2238_v19  ;;  %v2269_v14 = vpack.c.b16 %v2237_v48, %v2237_v48  ;;  %vm1960_vm11 = vcmp.eq.s32.totalorder %v1892_v32, 1 }
 0x1bc   : > { %v6851_v52 = vunpack.i.l.s16 %v2049_v41  ;;  %v2239_v2 = vunpack.c.l.b16 %v2205_v63  ;;  %v8641_v62 = vsel %vm1686_vm0, %v1694_v24, %v1695_v60  ;;  %vm2117_vm15 = vcmp.ne.s32.totalorder %v6852_v23, %v7602_v26  ;;  %vm1992_vm4 = vmpackc.low %vm1960_vm11, %vm1960_vm11 }
 0x1bd   : > { %2303 = vrot.lane.b32.xlu2 %v2269_v14, %s7276_s28  ;;  %v2051_v53 = vunpack.c.l.b16 %v2019_v59  ;;  %v11189_v24 = vshrl.u32 %v7689_v61, 16  ;;  %v2240_v48 = vunpack.c.h.b16 %v2205_v63  ;;  %v11190_v45 = vshll.u32 %v7695_v9, 16 }
 0x1be   : > { %v2271_v44 = vpack.c.b16 %v2239_v2, %v2239_v2  ;;  %v1880_v18 = vpop.permute.xlu1 %1879  ;;  %v1886_v29 = vpop.permute.xlu0 %1885  ;;  %vm2116_vm12 = vcmp.ne.s32.totalorder %v6851_v52, %v7591_v20  ;;  %vm1963_vm8 = vcmp.eq.s32.totalorder %v1901_v12, 1  ;;  %v6855_v35 = vunpack.i.l.s16 %v2053_v55 }
 0x1bf   : > { %vm1956_vm5 = vcmp.eq.s32.totalorder %v1880_v18, 1  ;;  %vm1958_vm7 = vcmp.eq.s32.totalorder %v1886_v29, 1  ;;  %vm2118_vm13 = vmpackc.low %vm2117_vm15, %vm2116_vm12  ;;  %v1700_v56 = vor.u32 %v1698_v8, %v11189_v24  ;;  %v11191_v14 = vshrl.u32 %v7659_v28, 16 }
 0x1c0   : > { %2307 = vrot.lane.b32.xlu1 %v2271_v44, %s7276_s28  ;;  %vm1988_vm10 = vmpackc.low %vm1956_vm5, %vm1956_vm5  ;;  %2305 = vrot.lane.b32.xlu0 %v2270_v7, %s7276_s28  ;;  %v2206_v19 = vsel %vm2118_vm13, %v8641_v62, 0  ;;  %v1701_v44 = vrot.slane %v11190_v45, 1  ;;  %v2272_v12 = vpack.c.b16 %v2240_v48, %v2240_v48 }
 0x1c1   : > { %v2020_v41 = vsel %vm1988_vm10, 65537, %v11146_v38  ;;  %vm1990_vm14 = vmpackc.low %vm1958_vm7, %vm1958_vm7  ;;  %v2242_v18 = vunpack.c.h.b16 %v2206_v19  ;;  %v2241_v29 = vunpack.c.l.b16 %v2206_v19  ;;  %v1697_v32 = vor.u32 %v1695_v60, %v11191_v14 }
 0x1c2   : > { %v2052_v2 = vunpack.c.l.b16 %v2020_v41  ;;  %v2022_v21 = vsel %vm1990_vm14, 65537, %v11146_v38  ;;  %v2024_v41 = vsel %vm1992_vm4, 65537, %v11146_v38  ;;  %vm8662_vm1 = vmpackc.low %vm1963_vm8, %vm1963_vm8  ;;  %v8670_v60 = vsel %vm1686_vm0, %v1700_v56, %v1701_v44 }
 0x1c3   : > { %v2054_v23 = vunpack.c.l.b16 %v2022_v21  ;;  %v8657_v7 = vpop.permute.xlu2 %1909  ;;  %v6853_v21 = vunpack.i.l.s16 %v2051_v53  ;;  %v2274_v24 = vpack.c.b16 %v2242_v18, %v2242_v18  ;;  %v2273_v61 = vpack.c.b16 %v2241_v29, %v2241_v29 }
 0x1c4   : > { %v6854_v59 = vunpack.i.l.s16 %v2052_v2  ;;  %vm2130_vm10 = vcmp.ne.s32.totalorder %v6855_v35, %v7591_v20  ;;  %v2056_v55 = vunpack.c.l.b16 %v2024_v41 }
 0x1c5   : > { %v6856_v52 = vunpack.i.l.s16 %v2054_v23  ;;  %2309 = vrot.lane.b32.xlu2 %v2272_v12, %s7276_s28  ;;  %vm2123_vm15 = vcmp.ne.s32.totalorder %v6853_v21, %v7591_v20  ;;  %v2027_v21 = vsel %vm8662_vm1, 65537, %v11146_v38  ;;  %v11198_v12 = vshll.u32 %v7803_v0, 16 }
 0x1c6   : > { %v1889_v63 = vpop.permute.xlu1 %1888  ;;  %v1895_v6 = vpop.permute.xlu0 %1894  ;;  %vm2124_vm5 = vcmp.ne.s32.totalorder %v6854_v59, %v7602_v26  ;;  %v6858_v14 = vunpack.i.l.s16 %v2056_v55  ;;  %v2059_v2 = vunpack.c.l.b16 %v2027_v21 }
 0x1c7   : > { %vm2131_vm9 = vcmp.ne.s32.totalorder %v6856_v52, %v7602_v26  ;;  %vm1959_vm6 = vcmp.eq.s32.totalorder %v1889_v63, 1  ;;  %vm1961_vm12 = vcmp.eq.s32.totalorder %v1895_v6, 1  ;;  %v8681_v6 = vsel %vm1686_vm0, %v1697_v32, %v1698_v8  ;;  %vm2125_vm13 = vmpackc.low %vm2124_vm5, %vm2123_vm15 }
 0x1c8   : > { %2313 = vrot.lane.b32.xlu1 %v2274_v24, %s7276_s28  ;;  %vm1991_vm11 = vmpackc.low %vm1959_vm6, %vm1959_vm6  ;;  %2311 = vrot.lane.b32.xlu0 %v2273_v61, %s7276_s28  ;;  %v11196_v61 = vshrl.u32 %v7695_v9, 16  ;;  %v2207_v29 = vsel %vm2125_vm13, %v8681_v6, 0  ;;  %v11197_v8 = vshll.u32 %v7728_v1, 16 }
 0x1c9   : > { %v2023_v53 = vsel %vm1991_vm11, 65537, %v11146_v38  ;;  %vm8676_vm7 = vmpackc.low %vm1961_vm12, %vm1961_vm12  ;;  %v2244_v32 = vunpack.c.h.b16 %v2207_v29  ;;  %v2243_v41 = vunpack.c.l.b16 %v2207_v29  ;;  %vm2138_vm12 = vcmp.ne.s32.totalorder %v6858_v14, %v7602_v26 }
 0x1ca   : > { %v2055_v56 = vunpack.c.l.b16 %v2023_v53  ;;  %vm2132_vm14 = vmpackc.low %vm2131_vm9, %vm2130_vm10  ;;  %v1703_v19 = vor.u32 %v1701_v44, %v11196_v61  ;;  %v1704_v35 = vrot.slane %v11197_v8, 1  ;;  %v2025_v59 = vsel %vm8676_vm7, 65537, %v11146_v38 }
 0x1cb   : > { %v2208_v23 = vsel %vm2132_vm14, %v8670_v60, 0  ;;  %v1919_v52 = vpop.permute.xlu2 %1918  ;;  %v1707_v53 = vrot.slane %v11198_v12, 1  ;;  %v2276_v55 = vpack.c.b16 %v2244_v32, %v2244_v32  ;;  %vm1966_vm9 = vcmp.eq.s32.totalorder %v8657_v7, 1 }
 0x1cc   : > { %v6857_v48 = vunpack.i.l.s16 %v2055_v56  ;;  %v2245_v18 = vunpack.c.l.b16 %v2208_v23  ;;  %v2275_v56 = vpack.c.b16 %v2243_v41, %v2243_v41  ;;  %v8706_v45 = vsel %vm1686_vm0, %v1703_v19, %v1704_v35  ;;  %vm1998_vm10 = vmpackc.low %vm1966_vm9, %vm1966_vm9 }
 0x1cd   : > { %v11199_v19 = vshrl.u32 %v7803_v0, 16  ;;  %v2246_v21 = vunpack.c.h.b16 %v2208_v23  ;;  %vm1969_vm7 = vcmp.eq.s32.totalorder %v1919_v52, 1  ;;  %v2030_v7 = vsel %vm1998_vm10, 65537, %v11146_v38 }
 0x1ce   : > { %v2277_v44 = vpack.c.b16 %v2245_v18, %v2245_v18  ;;  %v1898_v24 = vpop.permute.xlu1 %1897  ;;  %v1904_v63 = vpop.permute.xlu0 %1903  ;;  %vm2137_vm4 = vcmp.ne.s32.totalorder %v6857_v48, %v7591_v20  ;;  %2315 = vrot.lane.b32.xlu2 %v2275_v56, %s7276_s28  ;;  %v2057_v18 = vunpack.c.l.b16 %v2025_v59  ;;  %v6861_v48 = vunpack.i.l.s16 %v2059_v2  ;;  %vm8726_vm15 = vmpackc.low %vm1969_vm7, %vm1969_vm7 }
 0x1cf   : > { %vm1962_vm8 = vcmp.eq.s32.totalorder %v1898_v24, 1  ;;  %vm1964_vm6 = vcmp.eq.s32.totalorder %v1904_v63, 1  ;;  %vm2139_vm11 = vmpackc.low %vm2138_vm12, %vm2137_vm4  ;;  %v1709_v32 = vor.u32 %v1707_v53, %v11199_v19  ;;  %v2278_v52 = vpack.c.b16 %v2246_v21, %v2246_v21 }
 0x1d0   : > { %2319 = vrot.lane.b32.xlu1 %v2277_v44, %s7276_s28  ;;  %vm1994_vm1 = vmpackc.low %vm1962_vm8, %vm1962_vm8  ;;  %2317 = vrot.lane.b32.xlu0 %v2276_v55, %s7276_s28  ;;  %v2209_v41 = vsel %vm2139_vm11, %v8706_v45, 0  ;;  %v11200_v44 = vshll.u32 %v7826_v34, 16  ;;  %v6859_v0 = vunpack.i.l.s16 %v2057_v18  ;;  %v2062_v2 = vunpack.c.l.b16 %v2030_v7 }
 0x1d1   : > { %v2026_v61 = vsel %vm1994_vm1, 65537, %v11146_v38  ;;  %vm1996_vm5 = vmpackc.low %vm1964_vm6, %vm1964_vm6  ;;  %v2248_v63 = vunpack.c.h.b16 %v2209_v41  ;;  %v2247_v12 = vunpack.c.l.b16 %v2209_v41  ;;  %vm2151_vm1 = vcmp.ne.s32.totalorder %v6861_v48, %v7591_v20 }
 0x1d2   : > { %v2058_v29 = vunpack.c.l.b16 %v2026_v61  ;;  %v2028_v8 = vsel %vm1996_vm5, 65537, %v11146_v38  ;;  %v1710_v59 = vrot.slane %v11200_v44, 1  ;;  %v11201_v61 = vshrl.u32 %v7728_v1, 16 }
 0x1d3   : > { %v2060_v14 = vunpack.c.l.b16 %v2028_v8  ;;  %v1928_v56 = vpop.permute.xlu2 %1927  ;;  %v2280_v8 = vpack.c.b16 %v2248_v63, %v2248_v63  ;;  %v2279_v9 = vpack.c.b16 %v2247_v12, %v2247_v12  ;;  %vm2144_vm12 = vcmp.ne.s32.totalorder %v6859_v0, %v7591_v20 }
 0x1d4   : > { %v6860_v24 = vunpack.i.l.s16 %v2058_v29  ;;  %v1706_v19 = vor.u32 %v1704_v35, %v11201_v61  ;;  %v8734_v35 = vsel %vm1686_vm0, %v1709_v32, %v1710_v59  ;;  %v2033_v32 = vsel %vm8726_vm15, 65537, %v11146_v38 }
 0x1d5   : > { %v6862_v55 = vunpack.i.l.s16 %v2060_v14  ;;  %v11206_v41 = vshll.u32 %v7956_v10, 16  ;;  %v11208_v44 = vshll.u32 %v7905_v16, 16  ;;  %vm1972_vm10 = vcmp.eq.s32.totalorder %v1928_v56, 1 }
 0x1d6   : > { %v1907_v28 = vpop.permute.xlu1 %1906  ;;  %v1913_v23 = vpop.permute.xlu0 %1912  ;;  %vm2145_vm8 = vcmp.ne.s32.totalorder %v6860_v24, %v7602_v26  ;;  %2321 = vrot.lane.b32.xlu2 %v2278_v52, %s7276_s28  ;;  %v8745_v29 = vsel %vm1686_vm0, %v1706_v19, %v1707_v53  ;;  %v11207_v53 = vshrl.u32 %v7826_v34, 16  ;;  %v2065_v61 = vunpack.c.l.b16 %v2033_v32  ;;  %vm8768_vm7 = vmpackc.low %vm1972_vm10, %vm1972_vm10 }
 0x1d7   : > { %vm2152_vm14 = vcmp.ne.s32.totalorder %v6862_v55, %v7602_v26  ;;  %vm1965_vm13 = vcmp.eq.s32.totalorder %v1907_v28, 1  ;;  %vm1967_vm4 = vcmp.eq.s32.totalorder %v1913_v23, 1  ;;  %vm2146_vm11 = vmpackc.low %vm2145_vm8, %vm2144_vm12  ;;  %v8758_v21 = vrot.slane %v11206_v41, 1 }
 0x1d8   : > { %2325 = vrot.lane.b32.xlu1 %v2280_v8, %s7276_s28  ;;  %vm1997_vm9 = vmpackc.low %vm1965_vm13, %vm1965_vm13  ;;  %2323 = vrot.lane.b32.xlu0 %v2279_v9, %s7276_s28  ;;  %v1712_v0 = vor.u32 %v1710_v59, %v11207_v53  ;;  %v1713_v5 = vrot.slane %v11208_v44, 1  ;;  %v2210_v48 = vsel %vm2146_vm11, %v8745_v29, 0  ;;  %v6864_v55 = vunpack.i.l.s16 %v2062_v2 }
 0x1d9   : > { %v2029_v18 = vsel %vm1997_vm9, 65537, %v11146_v38  ;;  %vm8740_vm6 = vmpackc.low %vm1967_vm4, %vm1967_vm4  ;;  %v2250_v19 = vunpack.c.h.b16 %v2210_v48  ;;  %v2249_v24 = vunpack.c.l.b16 %v2210_v48  ;;  %v11211_v2 = vshll.u32 %v7987_v50, 16 }
 0x1da   : > { %v2061_v14 = vunpack.c.l.b16 %v2029_v18  ;;  %vm2153_vm5 = vmpackc.low %vm2152_vm14, %vm2151_vm1  ;;  %v2031_v7 = vsel %vm8740_vm6, 65537, %v11146_v38  ;;  %v8777_v32 = vsel %vm1686_vm0, %v1712_v0, %v1713_v5  ;;  %vm2159_vm8 = vcmp.ne.s32.totalorder %v6864_v55, %v7602_v26 }
 0x1db   : > { %v2211_v9 = vsel %vm2153_vm5, %v8734_v35, 0  ;;  %v2282_v56 = vpack.c.b16 %v2250_v19, %v2250_v19  ;;  %v2281_v18 = vpack.c.b16 %v2249_v24, %v2249_v24  ;;  %v1719_v28 = vrot.slane %v11211_v2, 1 }
 0x1dc   : > { %v6863_v63 = vunpack.i.l.s16 %v2061_v14  ;;  %v2251_v12 = vunpack.c.l.b16 %v2211_v9  ;;  %v1937_v14 = vpop.permute.xlu2 %1936  ;;  %v6867_v41 = vunpack.i.l.s16 %v2065_v61  ;;  %v11212_v44 = vshrl.u32 %v7956_v10, 16 }
 0x1dd   : > { %v2063_v48 = vunpack.c.l.b16 %v2031_v7  ;;  %v2036_v0 = vsel %vm8768_vm7, 65537, %v11146_v38  ;;  %vm1975_vm6 = vcmp.eq.s32.totalorder %v1937_v14, 1 }
 0x1de   : > { %v2283_v8 = vpack.c.b16 %v2251_v12, %v2251_v12  ;;  %v1916_v23 = vpop.permute.xlu1 %1915  ;;  %v1922_v52 = vpop.permute.xlu0 %1921  ;;  %vm2158_vm15 = vcmp.ne.s32.totalorder %v6863_v63, %v7591_v20  ;;  %2327 = vrot.lane.b32.xlu2 %v2281_v18, %s7276_s28  ;;  %v1718_v12 = vor.u32 %v8758_v21, %v11212_v44  ;;  %vm2172_vm12 = vcmp.ne.s32.totalorder %v6867_v41, %v7591_v20  ;;  %vm8799_vm5 = vmpackc.low %vm1975_vm6, %vm1975_vm6 }
 0x1df   : > { %vm1968_vm14 = vcmp.eq.s32.totalorder %v1916_v23, 1  ;;  %vm1970_vm4 = vcmp.eq.s32.totalorder %v1922_v52, 1  ;;  %vm2160_vm1 = vmpackc.low %vm2159_vm8, %vm2158_vm15  ;;  %v11213_v63 = vshrl.u32 %v7905_v16, 16  ;;  %v6865_v59 = vunpack.i.l.s16 %v2063_v48 }
 0x1e0   : > { %2331 = vrot.lane.b32.xlu1 %v2283_v8, %s7276_s28  ;;  %vm2000_vm13 = vmpackc.low %vm1968_vm14, %vm1968_vm14  ;;  %2329 = vrot.lane.b32.xlu0 %v2282_v56, %s7276_s28  ;;  %v2212_v61 = vsel %vm2160_vm1, %v8777_v32, 0  ;;  %v2252_v8 = vunpack.c.h.b16 %v2211_v9  ;;  %v8795_v7 = vsel %vm1686_vm0, %v1718_v12, %v1719_v28 }
 0x1e1   : > { %v2032_v53 = vsel %vm2000_vm13, 65537, %v11146_v38  ;;  %vm2002_vm9 = vmpackc.low %vm1970_vm4, %vm1970_vm4  ;;  %v2254_v52 = vunpack.c.h.b16 %v2212_v61  ;;  %v2253_v56 = vunpack.c.l.b16 %v2212_v61  ;;  %v1715_v2 = vor.u32 %v1713_v5, %v11213_v63 }
 0x1e2   : > { %v2064_v19 = vunpack.c.l.b16 %v2032_v53  ;;  %v2034_v24 = vsel %vm2002_vm9, 65537, %v11146_v38  ;;  %v2068_v53 = vunpack.c.l.b16 %v2036_v0  ;;  %v2284_v14 = vpack.c.b16 %v2252_v8, %v2252_v8 }
 0x1e3   : > { %v2066_v55 = vunpack.c.l.b16 %v2034_v24  ;;  %v2286_v44 = vpack.c.b16 %v2254_v52, %v2254_v52  ;;  %v2285_v24 = vpack.c.b16 %v2253_v56, %v2253_v56  ;;  %v11216_v5 = vshrl.u32 %v7987_v50, 16 }
 0x1e4   : > { %v6866_v23 = vunpack.i.l.s16 %v2064_v19  ;;  %v1946_v19 = vpop.permute.xlu2 %1945  ;;  %v8819_v41 = vsel %vm1686_vm0, %v1715_v2, %v8758_v21  ;;  %v6870_v0 = vunpack.i.l.s16 %v2068_v53  ;;  %vm2165_vm4 = vcmp.ne.s32.totalorder %v6865_v59, %v7591_v20 }
 0x1e5   : > { %v6868_v18 = vunpack.i.l.s16 %v2066_v55  ;;  %v1721_v12 = vor.u32 %v1719_v28, %v11216_v5  ;;  %v7277_v61 = vmov 3   ;;  %vm1978_vm1 = vcmp.eq.s32.totalorder %v1946_v19, 1 }
 0x1e6   : > { %v1925_v10 = vpop.permute.xlu1 %1924  ;;  %v1931_v34 = vpop.permute.xlu0 %1930  ;;  %vm2166_vm15 = vcmp.ne.s32.totalorder %v6866_v23, %v7602_v26  ;;  %2333 = vrot.lane.b32.xlu2 %v2284_v14, %s7276_s28  ;;  %7215 = vset.pattern.permute.xlu1 %v7277_v61  ;;  %v2039_v2 = vsel %vm8799_vm5, 65537, %v11146_v38  ;;  %vm2180_vm6 = vcmp.ne.s32.totalorder %v6870_v0, %v7602_v26  ;;  %v11221_v0 = vshrl.u32 %v8026_v58, 16 }
 0x1e7   : > { %vm2173_vm11 = vcmp.ne.s32.totalorder %v6868_v18, %v7602_v26  ;;  %vm1971_vm10 = vcmp.eq.s32.totalorder %v1925_v10, 1  ;;  %vm1973_vm7 = vcmp.eq.s32.totalorder %v1931_v34, 1  ;;  %v11217_v34 = vshll.u32 %v8026_v58, 16  ;;  %7213 = vset.pattern.permute.xlu2 %v7277_v61  ;;  %vm2167_vm9 = vmpackc.low %vm2166_vm15, %vm2165_vm4  ;;  %7214 = vset.pattern.permute.xlu0 %v7277_v61 }
 0x1e8   : > { %vm2174_vm14 = vmpackc.low %vm2173_vm11, %vm2172_vm12  ;;  %2337 = vrot.lane.b32.xlu1 %v2286_v44, %s7276_s28  ;;  %2335 = vrot.lane.b32.xlu0 %v2285_v24, %s7276_s28  ;;  %v2213_v56 = vsel %vm2167_vm9, %v8819_v41, 0  ;;  %v11218_v18 = vshll.u32 %v8099_v13, 16  ;;  %v11222_v61 = vshrl.u32 %v8099_v13, 16 }
 0x1e9   : > { %v8811_v48 = vsel %vm2174_vm14, %v8795_v7, 0  ;;  %v1722_v10 = vrot.slane %v11217_v34, 1  ;;  %vm2003_vm13 = vmpackc.low %vm1971_vm10, %vm1971_vm10  ;;  %v2256_v59 = vunpack.c.h.b16 %v2213_v56  ;;  %v2255_v44 = vunpack.c.l.b16 %v2213_v56 }
 0x1ea   : > { %v2035_v28 = vsel %vm2003_vm13, 65537, %v11146_v38  ;;  %vm2005_vm8 = vmpackc.low %vm1973_vm7, %vm1973_vm7  ;;  %v2257_v55 = vunpack.c.l.b16 %v8811_v48  ;;  %v1725_v63 = vrot.slane %v11218_v18, 1 }
 0x1eb   : > { %v2067_v8 = vunpack.c.l.b16 %v2035_v28  ;;  %v2037_v52 = vsel %vm2005_vm8, 65537, %v11146_v38  ;;  %v8835_v23 = vsel %vm1686_vm0, %v1721_v12, %v1722_v10  ;;  %vm8837_vm12 = vmpackc.low %vm1978_vm1, %vm1978_vm1  ;;  %v2288_v34 = vpack.c.b16 %v2256_v59, %v2256_v59 }
 0x1ec   : > { %v2289_v21 = vpack.c.b16 %v2257_v55, %v2257_v55  ;;  %v2069_v24 = vunpack.c.l.b16 %v2037_v52  ;;  %v2287_v9 = vpack.c.b16 %v2255_v44, %v2255_v44  ;;  %v2071_v28 = vunpack.c.l.b16 %v2039_v2 }
 0x1ed   : > { %v6869_v53 = vunpack.i.l.s16 %v2067_v8  ;;  %v1724_v55 = vor.u32 %v1722_v10, %v11221_v0  ;;  %v1727_v8 = vor.u32 %v1725_v63, %v11222_v61  ;;  %v11223_v52 = vshll.u32 %v8110_v31, 16 }
 0x1ee   : > { %v1934_v14 = vpop.permute.xlu1 %1933  ;;  %v1940_v5 = vpop.permute.xlu0 %1939  ;;  %2339 = vrot.lane.b32.xlu2 %v2287_v9, %s7276_s28  ;;  %v6871_v59 = vunpack.i.l.s16 %v2069_v24  ;;  %v2258_v10 = vunpack.c.h.b16 %v8811_v48  ;;  %v2042_v0 = vsel %vm8837_vm12, 65537, %v11146_v38 }
 0x1ef   : > { %vm2179_vm11 = vcmp.ne.s32.totalorder %v6869_v53, %v7591_v20  ;;  %vm1974_vm5 = vcmp.eq.s32.totalorder %v1934_v14, 1  ;;  %vm1976_vm7 = vcmp.eq.s32.totalorder %v1940_v5, 1  ;;  %v1728_v56 = vrot.slane %v11223_v52, 1 }
 0x1f0   : > { %vm2181_vm10 = vmpackc.low %vm2180_vm6, %vm2179_vm11  ;;  %2343 = vrot.lane.b32.xlu1 %v2289_v21, %s7276_s28  ;;  %2341 = vrot.lane.b32.xlu0 %v2288_v34, %s7276_s28  ;;  %v1685_v53 = vpack.c.b16 %v8549_v39, %v8549_v39  ;;  %v6873_v5 = vunpack.i.l.s16 %v2071_v28  ;;  %vm2186_vm13 = vcmp.ne.s32.totalorder %v6871_v59, %v7591_v20  ;;  %v2290_v48 = vpack.c.b16 %v2258_v10, %v2258_v10 }
 0x1f1   : > { %v2215_v12 = vsel %vm2181_vm10, %v8835_v23, 0  ;;  %vm2006_vm15 = vmpackc.low %vm1974_vm5, %vm1974_vm5  ;;  %v8864_v13 = vsel %vm1686_vm0, %v1727_v8, %v1728_v56  ;;  %v2074_v19 = vunpack.c.l.b16 %v2042_v0  ;;  %v11224_v8 = vshrl.u32 %v8110_v31, 16 }
 0x1f2   : > { %v2038_v18 = vsel %vm2006_vm15, 65537, %v11146_v38  ;;  %vm2008_vm14 = vmpackc.low %vm1976_vm7, %vm1976_vm7  ;;  %v2260_v21 = vunpack.c.h.b16 %v2215_v12  ;;  %v2259_v2 = vunpack.c.l.b16 %v2215_v12  ;;  %v8861_v12 = vsel %vm1686_vm0, %v1724_v55, %v1725_v63 }
 0x1f3   : > { %v2070_v44 = vunpack.c.l.b16 %v2038_v18  ;;  %v2040_v14 = vsel %vm2008_vm14, 65537, %v11146_v38  ;;  %v1732_v18 = vshll.u32 %v1685_v53, 16  ;;  %vm2193_vm9 = vcmp.ne.s32.totalorder %v6873_v5, %v7591_v20 }
 0x1f4   : > { %v2072_v34 = vunpack.c.l.b16 %v2040_v14  ;;  %v2292_v9 = vpack.c.b16 %v2260_v21, %v2260_v21  ;;  %v2291_v52 = vpack.c.b16 %v2259_v2, %v2259_v2  ;;  %v8877_v21 = vor.u32 %v1728_v56, %v11224_v8 }
 0x1f5   : > { %v6872_v61 = vunpack.i.l.s16 %v2070_v44  ;;  %v1734_v2 = vrot.slane %v1732_v18, 1  ;;  %v6876_v44 = vunpack.i.l.s16 %v2074_v19 }
 0x1f6   : > { %v6874_v24 = vunpack.i.l.s16 %v2072_v34  ;;  %v1943_v58 = vpop.permute.xlu1 %1942  ;;  %2345 = vrot.lane.b32.xlu2 %v2290_v48, %s7276_s28 }
 0x1f7   : > { %vm2187_vm4 = vcmp.ne.s32.totalorder %v6872_v61, %v7602_v26  ;;  %vm1977_vm8 = vcmp.eq.s32.totalorder %v1943_v58, 1  ;;  %v1735_v0 = vsel %vm1686_vm0, %v8877_v21, %v1734_v2  ;;  %vm2201_vm5 = vcmp.ne.s32.totalorder %v6876_v44, %v7602_v26  ;;  %v2443_v44 = vld [vmem:[%s10979_s3 + $0x18] sm:$0xff] }
 0x1f8   : > { %vm2188_vm1 = vmpackc.low %vm2187_vm4, %vm2186_vm13  ;;  %vm2194_vm6 = vcmp.ne.s32.totalorder %v6874_v24, %v7602_v26  ;;  %2349 = vrot.lane.b32.xlu1 %v2292_v9, %s7276_s28  ;;  %2347 = vrot.lane.b32.xlu0 %v2291_v52, %s7276_s28 }
 0x1f9   : > { %v2216_v63 = vsel %vm2188_vm1, %v8861_v12, 0  ;;  %vm2195_vm12 = vmpackc.low %vm2194_vm6, %vm2193_vm9  ;;  %vm2475_vm9 = vcmp.gt.f32.partialorder %v2443_v44, 0.5  ;;  %vm2395_vm1 = vcmask 93248  }
 0x1fa   : > { %v2217_v28 = vsel %vm2195_vm12, %v8864_v13, 0  ;;  %vm2009_vm11 = vmpackc.low %vm1977_vm8, %vm1977_vm8  ;;  %v2262_v55 = vunpack.c.h.b16 %v2216_v63  ;;  %v2261_v58 = vunpack.c.l.b16 %v2216_v63  ;;  %v2442_v63 = vld [vmem:[%s10979_s3 + $0x10] sm:$0xff] }
 0x1fb   : > { %v2041_v53 = vsel %vm2009_vm11, 65537, %v11146_v38  ;;  %v2263_v59 = vunpack.c.l.b16 %v2217_v28  ;;  %v2264_v24 = vunpack.c.h.b16 %v2217_v28  ;;  %vm2474_vm15 = vcmp.gt.f32.partialorder %v2442_v63, 0.5 }
 0x1fc   : > { %v2073_v14 = vunpack.c.l.b16 %v2041_v53  ;;  %v2294_v5 = vpack.c.b16 %v2262_v55, %v2262_v55  ;;  %v2293_v34 = vpack.c.b16 %v2261_v58, %v2261_v58  ;;  %v2441_v55 = vld [vmem:[%s10979_s3 + $0x8] sm:$0xff]  ;;  %v2440_v58 = vld [vmem:[%s10979_s3] sm:$0xff]  ;;  %v2506_v28 = vsel %vm2474_vm15, 1, %v11146_v38 }
 0x1fd   : > { %v2295_v10 = vpack.c.b16 %v2263_v59, %v2263_v59  ;;  %v2296_v19 = vpack.c.b16 %v2264_v24, %v2264_v24  ;;  %vm2473_vm14 = vcmp.gt.f32.partialorder %v2441_v55, 0.5  ;;  %vm2472_vm13 = vcmp.gt.f32.partialorder %v2440_v58, 0.5  ;;  %v2444_v53 = vld [vmem:[%s10979_s3 + $0x20] sm:$0xff]  ;;  %v2446_v59 = vld [vmem:[%s10979_s3 + $0x30] sm:$0xff] }
 0x1fe   : > { %v6875_v9 = vunpack.i.l.s16 %v2073_v14  ;;  %2351 = vrot.lane.b32.xlu2 %v2293_v34, %s7276_s28  ;;  %v2505_v8 = vsel %vm2473_vm14, 1, %v11146_v38  ;;  %v2504_v2 = vsel %vm2472_vm13, 1, %v11146_v38  ;;  %vm2476_vm4 = vcmp.gt.f32.partialorder %v2444_v53, 0.5  ;;  %v2447_v34 = vld [vmem:[%s10979_s3 + $0x38] sm:$0xff] }
 0x1ff   : > { %vm2478_vm8 = vcmp.gt.f32.partialorder %v2446_v59, 0.5  ;;  %v2508_v14 = vsel %vm2476_vm4, 1, %v11146_v38  ;;  %vm2479_vm6 = vcmp.gt.f32.partialorder %v2447_v34, 0.5  ;;  %v2451_v53 = vld [vmem:[%s10979_s3 + $0x58] sm:$0xff] }
 0x200   : > { %vm2200_vm10 = vcmp.ne.s32.totalorder %v6875_v9, %v7591_v20  ;;  %2355 = vrot.lane.b32.xlu1 %v2295_v10, %s7276_s28  ;;  %2353 = vrot.lane.b32.xlu0 %v2294_v5, %s7276_s28  ;;  %v2510_v10 = vsel %vm2478_vm8, 1, %v11146_v38  ;;  %v2507_v5 = vsel %vm2475_vm9, 1, %v11146_v38  ;;  %v2449_v9 = vld [vmem:[%s10979_s3 + $0x48] sm:$0xff]  ;;  %vm2483_vm13 = vcmp.gt.f32.partialorder %v2451_v53, 0.5 }
 0x201   : > { %vm2202_vm7 = vmpackc.low %vm2201_vm5, %vm2200_vm10  ;;  %vm2481_vm12 = vcmp.gt.f32.partialorder %v2449_v9, 0.5  ;;  %v2515_v34 = vsel %vm2483_vm13, 1, %v11146_v38  ;;  %v2456_v9 = vld [vmem:[%s10979_s3 + $0x80] sm:$0xff] }
 0x202   : > { %v2218_v56 = vsel %vm2202_vm7, %v1735_v0, 0  ;;  %v2445_v0 = vld [vmem:[%s10979_s3 + $0x28] sm:$0xff]  ;;  %vm2488_vm4 = vcmp.gt.f32.partialorder %v2456_v9, 0.5 }
 0x203   : > { %v2266_v61 = vunpack.c.h.b16 %v2218_v56  ;;  %v2265_v52 = vunpack.c.l.b16 %v2218_v56  ;;  %vm2477_vm11 = vcmp.gt.f32.partialorder %v2445_v0, 0.5  ;;  %v2458_v0 = vld [vmem:[%s10979_s3 + $0x90] sm:$0xff] }
 0x204   : > { %v2509_v24 = vsel %vm2477_vm11, 1, %v11146_v38  ;;  %vm2490_vm8 = vcmp.gt.f32.partialorder %v2458_v0, 0.5 }
 0x205   : > { %v2298_v18 = vpack.c.b16 %v2266_v61, %v2266_v61  ;;  %v2297_v48 = vpack.c.b16 %v2265_v52, %v2265_v52  ;;  %v2511_v61 = vsel %vm2479_vm6, 1, %v11146_v38  ;;  %v2513_v52 = vsel %vm2481_vm12, 1, %v11146_v38 }
 0x206   : > { %2357 = vrot.lane.b32.xlu2 %v2296_v19, %s7276_s28  ;;  %v2448_v19 = vld [vmem:[%s10979_s3 + $0x40] sm:$0xff] }
 0x207   : > { %vm2480_vm7 = vcmp.gt.f32.partialorder %v2448_v19, 0.5 }
 0x208   : > { %2361 = vrot.lane.b32.xlu1 %v2298_v18, %s7276_s28  ;;  %2359 = vrot.lane.b32.xlu0 %v2297_v48, %s7276_s28  ;;  %v2450_v18 = vld [vmem:[%s10979_s3 + $0x50] sm:$0xff]  ;;  %v2452_v48 = vld [vmem:[%s10979_s3 + $0x60] sm:$0xff] }
 0x209   : > { %vm2482_vm5 = vcmp.gt.f32.partialorder %v2450_v18, 0.5  ;;  %vm2484_vm10 = vcmp.gt.f32.partialorder %v2452_v48, 0.5  ;;  %v2520_v18 = vsel %vm2488_vm4, 1, %v11146_v38  ;;  %v2522_v48 = vsel %vm2490_vm8, 1, %v11146_v38 }
 0x20a   : > { %v2514_v55 = vsel %vm2482_vm5, 1, %v11146_v38  ;;  %v2516_v58 = vsel %vm2484_vm10, 1, %v11146_v38 }
 0x20e   : > { %2537 = vperm.xlu2 %7213, %v2504_v2   ;;  %v2455_v2 = vld [vmem:[%s10979_s3 + $0x78] sm:$0xff] }
 0x20f   : > { %vm2487_vm14 = vcmp.gt.f32.partialorder %v2455_v2, 0.5 }
 0x210   : > { %2543 = vperm.xlu1 %7215, %v2506_v28   ;;  %2540 = vperm.xlu0 %7214, %v2505_v8   ;;  %v2512_v28 = vsel %vm2480_vm7, 1, %v11146_v38  ;;  %v2453_v8 = vld [vmem:[%s10979_s3 + $0x68] sm:$0xff] }
 0x211   : > { %vm2485_vm15 = vcmp.gt.f32.partialorder %v2453_v8, 0.5 }
 0x216   : > { %2546 = vperm.xlu2 %7213, %v2507_v5   ;;  %v2519_v5 = vsel %vm2487_vm14, 1, %v11146_v38 }
 0x217   : > { %v2304_v56 = vpop.permute.xlu2 %2303 }
 0x218   : > { %2549 = vperm.xlu1 %7215, %v2508_v14   ;;  %2555 = vperm.xlu0 %7214, %v2510_v10   ;;  %2398 = vst.msk [vmem:[#allocation2 + $0x8] sm:$0xf] %vm2395_vm1, %v2304_v56  ;;  %v2517_v10 = vsel %vm2485_vm15, 1, %v11146_v38  ;;  %v2454_v56 = vld [vmem:[%s10979_s3 + $0x70] sm:$0xff] }
 0x219   : > { %vm2486_vm9 = vcmp.gt.f32.partialorder %v2454_v56, 0.5 }
 0x21a   : > { %v2518_v19 = vsel %vm2486_vm9, 1, %v11146_v38 }
 0x21e   : > { %2552 = vperm.xlu2 %7213, %v2509_v24  }
 0x21f   : > { %v2310_v63 = vpop.permute.xlu2 %2309 }
 0x220   : > { %2558 = vperm.xlu1 %7215, %v2511_v61   ;;  %2564 = vperm.xlu0 %7214, %v2513_v52   ;;  %2401 = vst.msk [vmem:[#allocation2 + $0x14] sm:$0xf] %vm2395_vm1, %v2310_v63  ;;  %v2459_v63 = vld [vmem:[%s10979_s3 + $0x98] sm:$0xff] }
 0x221   : > { %vm2491_vm6 = vcmp.gt.f32.partialorder %v2459_v63, 0.5 }
 0x222   : > { %v2523_v53 = vsel %vm2491_vm6, 1, %v11146_v38 }
 0x226   : > { %2561 = vperm.xlu2 %7213, %v2512_v28  }
 0x228   : > { %2567 = vperm.xlu1 %7215, %v2514_v55   ;;  %2573 = vperm.xlu0 %7214, %v2516_v58   ;;  %v2316_v14 = vpop.permute.xlu2 %2315  ;;  %v2461_v55 = vld [vmem:[%s10979_s3 + $0xa8] sm:$0xff] }
 0x229   : > { %2404 = vst.msk [vmem:[#allocation2 + $0x20] sm:$0xf] %vm2395_vm1, %v2316_v14  ;;  %v2457_v58 = vld [vmem:[%s10979_s3 + $0x88] sm:$0xff]  ;;  %vm2493_vm12 = vcmp.gt.f32.partialorder %v2461_v55, 0.5  ;;  %v2462_v14 = vld [vmem:[%s10979_s3 + $0xb0] sm:$0xff] }
 0x22a   : > { %v2302_v59 = vpop.permute.xlu1 %2301  ;;  %v2300_v44 = vpop.permute.xlu0 %2299  ;;  %vm2489_vm11 = vcmp.gt.f32.partialorder %v2457_v58, 0.5  ;;  %vm2494_vm5 = vcmp.gt.f32.partialorder %v2462_v14, 0.5 }
 0x22b   : > { %2397 = vst.msk [vmem:[#allocation2 + $0x4] sm:$0xf] %vm2395_vm1, %v2302_v59  ;;  %v2525_v59 = vsel %vm2493_vm12, 1, %v11146_v38  ;;  %v2526_v56 = vsel %vm2494_vm5, 1, %v11146_v38 }
 0x22c   : > { %2396 = vst.msk [vmem:[#allocation2] sm:$0xf] %vm2395_vm1, %v2300_v44  ;;  %v2521_v44 = vsel %vm2489_vm11, 1, %v11146_v38 }
 0x22e   : > { %2570 = vperm.xlu2 %7213, %v2515_v34  }
 0x230   : > { %2576 = vperm.xlu1 %7215, %v2517_v10   ;;  %2582 = vperm.xlu0 %7214, %v2519_v5   ;;  %v2322_v24 = vpop.permute.xlu2 %2321  ;;  %v2464_v10 = vld [vmem:[%s10979_s3 + $0xc0] sm:$0xff] }
 0x231   : > { %2407 = vst.msk [vmem:[#allocation2 + $0x2c] sm:$0xf] %vm2395_vm1, %v2322_v24  ;;  %v2460_v5 = vld [vmem:[%s10979_s3 + $0xa0] sm:$0xff]  ;;  %vm2496_vm10 = vcmp.gt.f32.partialorder %v2464_v10, 0.5  ;;  %v2465_v24 = vld [vmem:[%s10979_s3 + $0xc8] sm:$0xff] }
 0x232   : > { %v2308_v61 = vpop.permute.xlu1 %2307  ;;  %v2306_v52 = vpop.permute.xlu0 %2305  ;;  %vm2492_vm7 = vcmp.gt.f32.partialorder %v2460_v5, 0.5  ;;  %vm2497_vm15 = vcmp.gt.f32.partialorder %v2465_v24, 0.5 }
 0x233   : > { %2400 = vst.msk [vmem:[#allocation2 + $0x10] sm:$0xf] %vm2395_vm1, %v2308_v61  ;;  %v2528_v61 = vsel %vm2496_vm10, 1, %v11146_v38  ;;  %v2529_v58 = vsel %vm2497_vm15, 1, %v11146_v38 }
 0x234   : > { %2399 = vst.msk [vmem:[#allocation2 + $0xc] sm:$0xf] %vm2395_vm1, %v2306_v52  ;;  %v2524_v52 = vsel %vm2492_vm7, 1, %v11146_v38 }
 0x236   : > { %2579 = vperm.xlu2 %7213, %v2518_v19  }
 0x238   : > { %2585 = vperm.xlu1 %7215, %v2520_v18   ;;  %2591 = vperm.xlu0 %7214, %v2522_v48   ;;  %v2328_v2 = vpop.permute.xlu2 %2327  ;;  %v2467_v18 = vld [vmem:[%s10979_s3 + $0xd8] sm:$0xff] }
 0x239   : > { %2410 = vst.msk [vmem:[#allocation2 + $0x38] sm:$0xf] %vm2395_vm1, %v2328_v2  ;;  %v2463_v48 = vld [vmem:[%s10979_s3 + $0xb8] sm:$0xff]  ;;  %vm2499_vm14 = vcmp.gt.f32.partialorder %v2467_v18, 0.5  ;;  %v2468_v2 = vld [vmem:[%s10979_s3 + $0xe0] sm:$0xff] }
 0x23a   : > { %v2314_v28 = vpop.permute.xlu1 %2313  ;;  %v2312_v8 = vpop.permute.xlu0 %2311  ;;  %vm2495_vm13 = vcmp.gt.f32.partialorder %v2463_v48, 0.5  ;;  %vm2500_vm4 = vcmp.gt.f32.partialorder %v2468_v2, 0.5 }
 0x23b   : > { %2403 = vst.msk [vmem:[#allocation2 + $0x1c] sm:$0xf] %vm2395_vm1, %v2314_v28  ;;  %v2531_v28 = vsel %vm2499_vm14, 1, %v11146_v38  ;;  %v2532_v5 = vsel %vm2500_vm4, 1, %v11146_v38 }
 0x23c   : > { %2402 = vst.msk [vmem:[#allocation2 + $0x18] sm:$0xf] %vm2395_vm1, %v2312_v8  ;;  %v2527_v8 = vsel %vm2495_vm13, 1, %v11146_v38 }
 0x23e   : > { %2588 = vperm.xlu2 %7213, %v2521_v44  }
 0x240   : > { %2594 = vperm.xlu1 %7215, %v2523_v53   ;;  %2600 = vperm.xlu0 %7214, %v2525_v59   ;;  %v2334_v0 = vpop.permute.xlu2 %2333  ;;  %v2470_v53 = vld [vmem:[%s10979_s3 + $0xf0] sm:$0xff] }
 0x241   : > { %2413 = vst.msk [vmem:[#allocation2 + $0x44] sm:$0xf] %vm2395_vm1, %v2334_v0  ;;  %v2466_v59 = vld [vmem:[%s10979_s3 + $0xd0] sm:$0xff]  ;;  %vm2502_vm8 = vcmp.gt.f32.partialorder %v2470_v53, 0.5  ;;  %v2471_v0 = vld [vmem:[%s10979_s3 + $0xf8] sm:$0xff] }
 0x242   : > { %v2320_v34 = vpop.permute.xlu1 %2319  ;;  %v2318_v9 = vpop.permute.xlu0 %2317  ;;  %vm2498_vm9 = vcmp.gt.f32.partialorder %v2466_v59, 0.5  ;;  %vm2503_vm6 = vcmp.gt.f32.partialorder %v2471_v0, 0.5 }
 0x243   : > { %2406 = vst.msk [vmem:[#allocation2 + $0x28] sm:$0xf] %vm2395_vm1, %v2320_v34  ;;  %v2534_v34 = vsel %vm2502_vm8, 1, %v11146_v38  ;;  %v2535_v18 = vsel %vm2503_vm6, 1, %v11146_v38 }
 0x244   : > { %2405 = vst.msk [vmem:[#allocation2 + $0x24] sm:$0xf] %vm2395_vm1, %v2318_v9  ;;  %v2530_v9 = vsel %vm2498_vm9, 1, %v11146_v38 }
 0x246   : > { %2597 = vperm.xlu2 %7213, %v2524_v52  }
 0x248   : > { %2603 = vperm.xlu1 %7215, %v2526_v56   ;;  %2609 = vperm.xlu0 %7214, %v2528_v61   ;;  %v2340_v55 = vpop.permute.xlu2 %2339  ;;  %v2469_v56 = vld [vmem:[%s10979_s3 + $0xe8] sm:$0xff] }
 0x249   : > { %2416 = vst.msk [vmem:[#allocation2 + $0x50] sm:$0xf] %vm2395_vm1, %v2340_v55  ;;  %vm2501_vm12 = vcmp.gt.f32.partialorder %v2469_v56, 0.5 }
 0x24a   : > { %v2326_v19 = vpop.permute.xlu1 %2325  ;;  %v2324_v63 = vpop.permute.xlu0 %2323  ;;  %v2533_v48 = vsel %vm2501_vm12, 1, %v11146_v38 }
 0x24b   : > { %2409 = vst.msk [vmem:[#allocation2 + $0x34] sm:$0xf] %vm2395_vm1, %v2326_v19 }
 0x24c   : > { %2408 = vst.msk [vmem:[#allocation2 + $0x30] sm:$0xf] %vm2395_vm1, %v2324_v63 }
 0x24e   : > { %2606 = vperm.xlu2 %7213, %v2527_v8  }
 0x250   : > { %2612 = vperm.xlu1 %7215, %v2529_v58   ;;  %2618 = vperm.xlu0 %7214, %v2531_v28   ;;  %v2346_v10 = vpop.permute.xlu2 %2345 }
 0x251   : > { %2419 = vst.msk [vmem:[#allocation2 + $0x5c] sm:$0xf] %vm2395_vm1, %v2346_v10 }
 0x252   : > { %v2332_v44 = vpop.permute.xlu1 %2331  ;;  %v2330_v14 = vpop.permute.xlu0 %2329 }
 0x253   : > { %2412 = vst.msk [vmem:[#allocation2 + $0x40] sm:$0xf] %vm2395_vm1, %v2332_v44 }
 0x254   : > { %2411 = vst.msk [vmem:[#allocation2 + $0x3c] sm:$0xf] %vm2395_vm1, %v2330_v14 }
 0x256   : > { %2615 = vperm.xlu2 %7213, %v2530_v9  }
 0x258   : > { %2621 = vperm.xlu1 %7215, %v2532_v5   ;;  %2627 = vperm.xlu0 %7214, %v2534_v34   ;;  %v2352_v24 = vpop.permute.xlu2 %2351 }
 0x259   : > { %2422 = vst.msk [vmem:[#allocation2 + $0x68] sm:$0xf] %vm2395_vm1, %v2352_v24 }
 0x25a   : > { %v2338_v61 = vpop.permute.xlu1 %2337  ;;  %v2336_v52 = vpop.permute.xlu0 %2335 }
 0x25b   : > { %2415 = vst.msk [vmem:[#allocation2 + $0x4c] sm:$0xf] %vm2395_vm1, %v2338_v61 }
 0x25c   : > { %2414 = vst.msk [vmem:[#allocation2 + $0x48] sm:$0xf] %vm2395_vm1, %v2336_v52 }
 0x25e   : > { %2624 = vperm.xlu2 %7213, %v2533_v48  }
 0x260   : > { %2630 = vperm.xlu1 %7215, %v2535_v18   ;;  %v2358_v55 = vpop.permute.xlu2 %2357 }
 0x261   : > { %2425 = vst.msk [vmem:[#allocation2 + $0x74] sm:$0xf] %vm2395_vm1, %v2358_v55 }
 0x262   : > { %v2344_v19 = vpop.permute.xlu1 %2343  ;;  %v2342_v63 = vpop.permute.xlu0 %2341 }
 0x263   : > { %2418 = vst.msk [vmem:[#allocation2 + $0x58] sm:$0xf] %vm2395_vm1, %v2344_v19 }
 0x264   : > { %2417 = vst.msk [vmem:[#allocation2 + $0x54] sm:$0xf] %vm2395_vm1, %v2342_v63 }
 0x268   : > { %v2538_v8 = vpop.permute.xlu2 %2537 }
 0x269   : > { %vm2632_vm5 = vcmp.eq.s32.totalorder %v2538_v8, 1 }
 0x26a   : > { %v2350_v58 = vpop.permute.xlu1 %2349  ;;  %v2348_v28 = vpop.permute.xlu0 %2347  ;;  %vm2664_vm7 = vmpackc.low %vm2632_vm5, %vm2632_vm5 }
 0x26b   : > { %2421 = vst.msk [vmem:[#allocation2 + $0x64] sm:$0xf] %vm2395_vm1, %v2350_v58  ;;  %v2696_v34 = vsel %vm2664_vm7, 65537, %v11146_v38 }
 0x26c   : > { %2420 = vst.msk [vmem:[#allocation2 + $0x60] sm:$0xf] %vm2395_vm1, %v2348_v28  ;;  %v2728_v56 = vunpack.c.l.b16 %v2696_v34 }
 0x26e   : > { %v6877_v63 = vunpack.i.l.s16 %v2728_v56 }
 0x270   : > { %v2547_v59 = vpop.permute.xlu2 %2546  ;;  %vm2780_vm5 = vcmp.ne.s32.totalorder %v6877_v63, %v7591_v20 }
 0x271   : > { %vm2635_vm11 = vcmp.eq.s32.totalorder %v2547_v59, 1 }
 0x272   : > { %v2356_v2 = vpop.permute.xlu1 %2355  ;;  %v2354_v53 = vpop.permute.xlu0 %2353  ;;  %vm2667_vm10 = vmpackc.low %vm2635_vm11, %vm2635_vm11 }
 0x273   : > { %2424 = vst.msk [vmem:[#allocation2 + $0x70] sm:$0xf] %vm2395_vm1, %v2356_v2  ;;  %v2699_v5 = vsel %vm2667_vm10, 65537, %v11146_v38 }
 0x274   : > { %2423 = vst.msk [vmem:[#allocation2 + $0x6c] sm:$0xf] %vm2395_vm1, %v2354_v53  ;;  %v2731_v9 = vunpack.c.l.b16 %v2699_v5 }
 0x276   : > { %v6880_v18 = vunpack.i.l.s16 %v2731_v9 }
 0x278   : > { %v2553_v10 = vpop.permute.xlu2 %2552  ;;  %vm2788_vm6 = vcmp.ne.s32.totalorder %v6880_v18, %v7602_v26 }
 0x279   : > { %vm2637_vm15 = vcmp.eq.s32.totalorder %v2553_v10, 1 }
 0x27a   : > { %v2362_v44 = vpop.permute.xlu1 %2361  ;;  %v2360_v14 = vpop.permute.xlu0 %2359  ;;  %vm2669_vm14 = vmpackc.low %vm2637_vm15, %vm2637_vm15 }
 0x27b   : > { %2427 = vst.msk [vmem:[#allocation2 + $0x7c] sm:$0xf] %vm2395_vm1, %v2362_v44  ;;  %v2701_v58 = vsel %vm2669_vm14, 65537, %v11146_v38 }
 0x27c   : > { %2426 = vst.msk [vmem:[#allocation2 + $0x78] sm:$0xf] %vm2395_vm1, %v2360_v14  ;;  %v2733_v59 = vunpack.c.l.b16 %v2701_v58 }
 0x280   : > { %v2562_v52 = vpop.permute.xlu2 %2561 }
 0x281   : > { %vm2640_vm1 = vcmp.eq.s32.totalorder %v2562_v52, 1 }
 0x282   : > { %v2544_v0 = vpop.permute.xlu1 %2543  ;;  %v2541_v61 = vpop.permute.xlu0 %2540  ;;  %vm9057_vm11 = vmpackc.low %vm2640_vm1, %vm2640_vm1 }
 0x283   : > { %vm2634_vm13 = vcmp.eq.s32.totalorder %v2544_v0, 1  ;;  %vm2633_vm8 = vcmp.eq.s32.totalorder %v2541_v61, 1  ;;  %v6882_v61 = vunpack.i.l.s16 %v2733_v59  ;;  %v2704_v52 = vsel %vm9057_vm11, 65537, %v11146_v38 }
 0x284   : > { %vm2666_vm4 = vmpackc.low %vm2634_vm13, %vm2634_vm13  ;;  %v2736_v63 = vunpack.c.l.b16 %v2704_v52 }
 0x285   : > { %v2698_v24 = vsel %vm2666_vm4, 65537, %v11146_v38  ;;  %vm2665_vm9 = vmpackc.low %vm2633_vm8, %vm2633_vm8  ;;  %vm2795_vm1 = vcmp.ne.s32.totalorder %v6882_v61, %v7602_v26 }
 0x286   : > { %v2730_v48 = vunpack.c.l.b16 %v2698_v24  ;;  %v2697_v19 = vsel %vm2665_vm9, 65537, %v11146_v38  ;;  %v6885_v59 = vunpack.i.l.s16 %v2736_v63 }
 0x287   : > { %v2729_v55 = vunpack.c.l.b16 %v2697_v19 }
 0x288   : > { %v6879_v28 = vunpack.i.l.s16 %v2730_v48  ;;  %v2571_v14 = vpop.permute.xlu2 %2570 }
 0x289   : > { %v6878_v8 = vunpack.i.l.s16 %v2729_v55  ;;  %vm2643_vm9 = vcmp.eq.s32.totalorder %v2571_v14, 1 }
 0x28a   : > { %vm2787_vm12 = vcmp.ne.s32.totalorder %v6879_v28, %v7591_v20  ;;  %v2550_v53 = vpop.permute.xlu1 %2549  ;;  %v2556_v44 = vpop.permute.xlu0 %2555 }
 0x28b   : > { %vm2789_vm10 = vmpackc.low %vm2788_vm6, %vm2787_vm12  ;;  %vm2781_vm7 = vcmp.ne.s32.totalorder %v6878_v8, %v7602_v26  ;;  %vm2636_vm15 = vcmp.eq.s32.totalorder %v2550_v53, 1  ;;  %vm2638_vm13 = vcmp.eq.s32.totalorder %v2556_v44, 1 }
 0x28c   : > { %v2889_v10 = vsel %vm2789_vm10, %v7734_v17, 0  ;;  %vm2782_vm14 = vmpackc.low %vm2781_vm7, %vm2780_vm5 }
 0x28d   : > { %v2888_v5 = vsel %vm2782_vm14, %v7738_v51, 0  ;;  %vm2668_vm4 = vmpackc.low %vm2636_vm15, %vm2636_vm15  ;;  %v2922_v34 = vunpack.c.l.b16 %v2889_v10  ;;  %v2923_v53 = vunpack.c.h.b16 %v2889_v10 }
 0x28e   : > { %v2700_v9 = vsel %vm2668_vm4, 65537, %v11146_v38  ;;  %vm2670_vm8 = vmpackc.low %vm2638_vm13, %vm2638_vm13  ;;  %v2921_v0 = vunpack.c.h.b16 %v2888_v5  ;;  %v2920_v56 = vunpack.c.l.b16 %v2888_v5 }
 0x28f   : > { %v2732_v24 = vunpack.c.l.b16 %v2700_v9  ;;  %v2954_v18 = vpack.c.b16 %v2922_v34, %v2922_v34  ;;  %v2702_v17 = vsel %vm2670_vm8, 65537, %v11146_v38  ;;  %vm2675_vm12 = vmpackc.low %vm2643_vm9, %vm2643_vm9 }
 0x290   : > { %v2953_v48 = vpack.c.b16 %v2921_v0, %v2921_v0  ;;  %v2952_v19 = vpack.c.b16 %v2920_v56, %v2920_v56  ;;  %v2734_v58 = vunpack.c.l.b16 %v2702_v17  ;;  %v2580_v8 = vpop.permute.xlu2 %2579  ;;  %v2707_v9 = vsel %vm2675_vm12, 65537, %v11146_v38 }
 0x291   : > { %v6881_v51 = vunpack.i.l.s16 %v2732_v24  ;;  %2988 = vrot.lane.b32.xlu1 %v2954_v18, %s7278_s24  ;;  %vm2646_vm14 = vcmp.eq.s32.totalorder %v2580_v8, 1 }
 0x292   : > { %2986 = vrot.lane.b32.xlu0 %v2953_v48, %s7278_s24  ;;  %2984 = vrot.lane.b32.xlu2 %v2952_v19, %s7278_s24  ;;  %v2559_v55 = vpop.permute.xlu1 %2558  ;;  %v2565_v28 = vpop.permute.xlu0 %2564  ;;  %v6883_v34 = vunpack.i.l.s16 %v2734_v58  ;;  %v2739_v48 = vunpack.c.l.b16 %v2707_v9  ;;  %vm9083_vm8 = vmpackc.low %vm2646_vm14, %vm2646_vm14 }
 0x293   : > { %vm2794_vm6 = vcmp.ne.s32.totalorder %v6881_v51, %v7591_v20  ;;  %vm2639_vm11 = vcmp.eq.s32.totalorder %v2559_v55, 1  ;;  %vm2641_vm10 = vcmp.eq.s32.totalorder %v2565_v28, 1 }
 0x294   : > { %vm2796_vm5 = vmpackc.low %vm2795_vm1, %vm2794_vm6  ;;  %vm2801_vm13 = vcmp.ne.s32.totalorder %v6883_v34, %v7591_v20  ;;  %vm2808_vm1 = vcmp.ne.s32.totalorder %v6885_v59, %v7591_v20 }
 0x295   : > { %v2890_v2 = vsel %vm2796_vm5, %v7612_v33, 0  ;;  %vm2671_vm7 = vmpackc.low %vm2639_vm11, %vm2639_vm11  ;;  %v2955_v33 = vpack.c.b16 %v2923_v53, %v2923_v53 }
 0x296   : > { %v2703_v44 = vsel %vm2671_vm7, 65537, %v11146_v38  ;;  %vm2673_vm15 = vmpackc.low %vm2641_vm10, %vm2641_vm10  ;;  %v2925_v14 = vunpack.c.h.b16 %v2890_v2  ;;  %v2924_v5 = vunpack.c.l.b16 %v2890_v2  ;;  %v6888_v2 = vunpack.i.l.s16 %v2739_v48 }
 0x297   : > { %v2735_v0 = vunpack.c.l.b16 %v2703_v44  ;;  %v2705_v56 = vsel %vm2673_vm15, 65537, %v11146_v38 }
 0x298   : > { %v2737_v61 = vunpack.c.l.b16 %v2705_v56  ;;  %v2957_v52 = vpack.c.b16 %v2925_v14, %v2925_v14  ;;  %v2956_v24 = vpack.c.b16 %v2924_v5, %v2924_v5  ;;  %v2589_v63 = vpop.permute.xlu2 %2588 }
 0x299   : > { %v6884_v18 = vunpack.i.l.s16 %v2735_v0  ;;  %vm2649_vm15 = vcmp.eq.s32.totalorder %v2589_v63, 1 }
 0x29a   : > { %v6886_v17 = vunpack.i.l.s16 %v2737_v61  ;;  %2994 = vrot.lane.b32.xlu1 %v2957_v52, %s7278_s24  ;;  %2992 = vrot.lane.b32.xlu0 %v2956_v24, %s7278_s24  ;;  %v2568_v10 = vpop.permute.xlu1 %2567  ;;  %v2574_v51 = vpop.permute.xlu0 %2573  ;;  %vm9098_vm14 = vmpackc.low %vm2649_vm15, %vm2649_vm15 }
 0x29b   : > { %vm2802_vm4 = vcmp.ne.s32.totalorder %v6884_v18, %v7602_v26  ;;  %2990 = vrot.lane.b32.xlu2 %v2955_v33, %s7278_s24  ;;  %vm2642_vm9 = vcmp.eq.s32.totalorder %v2568_v10, 1  ;;  %vm2644_vm11 = vcmp.eq.s32.totalorder %v2574_v51, 1  ;;  %v2713_v19 = vsel %vm9098_vm14, 65537, %v11146_v38 }
 0x29c   : > { %vm2803_vm6 = vmpackc.low %vm2802_vm4, %vm2801_vm13  ;;  %vm2809_vm12 = vcmp.ne.s32.totalorder %v6886_v17, %v7602_v26  ;;  %vm2816_vm4 = vcmp.ne.s32.totalorder %v6888_v2, %v7602_v26 }
 0x29d   : > { %v2891_v55 = vsel %vm2803_vm6, %v7841_v37, 0  ;;  %vm2810_vm5 = vmpackc.low %vm2809_vm12, %vm2808_vm1  ;;  %v2710_v37 = vsel %vm9083_vm8, 65537, %v11146_v38 }
 0x29e   : > { %v2892_v58 = vsel %vm2810_vm5, %v7853_v42, 0  ;;  %vm2674_vm10 = vmpackc.low %vm2642_vm9, %vm2642_vm9  ;;  %v2927_v28 = vunpack.c.h.b16 %v2891_v55  ;;  %v2926_v8 = vunpack.c.l.b16 %v2891_v55  ;;  %v2742_v18 = vunpack.c.l.b16 %v2710_v37 }
 0x29f   : > { %v2706_v53 = vsel %vm2674_vm10, 65537, %v11146_v38  ;;  %vm2676_vm7 = vmpackc.low %vm2644_vm11, %vm2644_vm11  ;;  %v2928_v44 = vunpack.c.l.b16 %v2892_v58  ;;  %v2929_v17 = vunpack.c.h.b16 %v2892_v58 }
 0x2a0   : > { %v2738_v14 = vunpack.c.l.b16 %v2706_v53  ;;  %v2708_v59 = vsel %vm2676_vm7, 65537, %v11146_v38  ;;  %v2959_v5 = vpack.c.b16 %v2927_v28, %v2927_v28  ;;  %v2958_v34 = vpack.c.b16 %v2926_v8, %v2926_v8  ;;  %v2598_v24 = vpop.permute.xlu2 %2597 }
 0x2a1   : > { %v2960_v9 = vpack.c.b16 %v2928_v44, %v2928_v44  ;;  %v2740_v0 = vunpack.c.l.b16 %v2708_v59  ;;  %vm2652_vm11 = vcmp.eq.s32.totalorder %v2598_v24, 1  ;;  %v6891_v8 = vunpack.i.l.s16 %v2742_v18 }
 0x2a2   : > { %v6887_v42 = vunpack.i.l.s16 %v2738_v14  ;;  %2998 = vrot.lane.b32.xlu0 %v2959_v5, %s7278_s24  ;;  %v2577_v56 = vpop.permute.xlu1 %2576  ;;  %v2583_v52 = vpop.permute.xlu0 %2582  ;;  %v2961_v58 = vpack.c.b16 %v2929_v17, %v2929_v17  ;;  %vm9114_vm7 = vmpackc.low %vm2652_vm11, %vm2652_vm11 }
 0x2a3   : > { %3000 = vrot.lane.b32.xlu1 %v2960_v9, %s7278_s24  ;;  %2996 = vrot.lane.b32.xlu2 %v2958_v34, %s7278_s24  ;;  %vm2645_vm13 = vcmp.eq.s32.totalorder %v2577_v56, 1  ;;  %vm2647_vm1 = vcmp.eq.s32.totalorder %v2583_v52, 1  ;;  %v6889_v48 = vunpack.i.l.s16 %v2740_v0  ;;  %v2716_v0 = vsel %vm9114_vm7, 65537, %v11146_v38 }
 0x2a4   : > { %vm2815_vm8 = vcmp.ne.s32.totalorder %v6887_v42, %v7591_v20  ;;  %vm2677_vm9 = vmpackc.low %vm2645_vm13, %vm2645_vm13  ;;  %vm2829_vm13 = vcmp.ne.s32.totalorder %v6891_v8, %v7591_v20 }
 0x2a5   : > { %vm2817_vm6 = vmpackc.low %vm2816_vm4, %vm2815_vm8  ;;  %v2709_v33 = vsel %vm2677_vm9, 65537, %v11146_v38  ;;  %vm2822_vm5 = vcmp.ne.s32.totalorder %v6889_v48, %v7591_v20  ;;  %v2748_v48 = vunpack.c.l.b16 %v2716_v0 }
 0x2a6   : > { %v2893_v10 = vsel %vm2817_vm6, %v7861_v30, 0  ;;  %v2741_v51 = vunpack.c.l.b16 %v2709_v33  ;;  %vm2679_vm12 = vmpackc.low %vm2647_vm1, %vm2647_vm1  ;;  %v2745_v30 = vunpack.c.l.b16 %v2713_v19 }
 0x2a7   : > { %v2711_v63 = vsel %vm2679_vm12, 65537, %v11146_v38  ;;  %v2931_v55 = vunpack.c.h.b16 %v2893_v10  ;;  %v2930_v28 = vunpack.c.l.b16 %v2893_v10 }
 0x2a8   : > { %v6890_v2 = vunpack.i.l.s16 %v2741_v51  ;;  %v2743_v53 = vunpack.c.l.b16 %v2711_v63  ;;  %v2607_v9 = vpop.permute.xlu2 %2606  ;;  %v6894_v24 = vunpack.i.l.s16 %v2745_v30 }
 0x2a9   : > { %v2963_v44 = vpack.c.b16 %v2931_v55, %v2931_v55  ;;  %v2962_v14 = vpack.c.b16 %v2930_v28, %v2930_v28  ;;  %vm2655_vm12 = vcmp.eq.s32.totalorder %v2607_v9, 1 }
 0x2aa   : > { %vm2823_vm10 = vcmp.ne.s32.totalorder %v6890_v2, %v7602_v26  ;;  %v6892_v59 = vunpack.i.l.s16 %v2743_v53  ;;  %v2586_v34 = vpop.permute.xlu1 %2585  ;;  %v2592_v37 = vpop.permute.xlu0 %2591  ;;  %vm2837_vm11 = vcmp.ne.s32.totalorder %v6894_v24, %v7602_v26  ;;  %v6897_v2 = vunpack.i.l.s16 %v2748_v48 }
 0x2ab   : > { %vm2824_vm15 = vmpackc.low %vm2823_vm10, %vm2822_vm5  ;;  %3006 = vrot.lane.b32.xlu1 %v2963_v44, %s7278_s24  ;;  %3004 = vrot.lane.b32.xlu0 %v2962_v14, %s7278_s24  ;;  %vm2648_vm14 = vcmp.eq.s32.totalorder %v2586_v34, 1  ;;  %vm2650_vm9 = vcmp.eq.s32.totalorder %v2592_v37, 1 }
 0x2ac   : > { %v2894_v42 = vsel %vm2824_vm15, %v7869_v15, 0  ;;  %vm2830_vm4 = vcmp.ne.s32.totalorder %v6892_v59, %v7602_v26  ;;  %3002 = vrot.lane.b32.xlu2 %v2961_v58, %s7278_s24  ;;  %vm2680_vm8 = vmpackc.low %vm2648_vm14, %vm2648_vm14 }
 0x2ad   : > { %vm2831_vm1 = vmpackc.low %vm2830_vm4, %vm2829_vm13  ;;  %v2712_v56 = vsel %vm2680_vm8, 65537, %v11146_v38  ;;  %v2933_v61 = vunpack.c.h.b16 %v2894_v42  ;;  %v2932_v52 = vunpack.c.l.b16 %v2894_v42 }
 0x2ae   : > { %v2895_v18 = vsel %vm2831_vm1, %v7992_v49, 0  ;;  %v2744_v33 = vunpack.c.l.b16 %v2712_v56  ;;  %vm2682_vm6 = vmpackc.low %vm2650_vm9, %vm2650_vm9 }
 0x2af   : > { %v2714_v15 = vsel %vm2682_vm6, 65537, %v11146_v38  ;;  %v2934_v17 = vunpack.c.l.b16 %v2895_v18  ;;  %v2965_v10 = vpack.c.b16 %v2933_v61, %v2933_v61  ;;  %v2964_v51 = vpack.c.b16 %v2932_v52, %v2932_v52  ;;  %vm2687_vm10 = vmpackc.low %vm2655_vm12, %vm2655_vm12 }
 0x2b0   : > { %v6893_v19 = vunpack.i.l.s16 %v2744_v33  ;;  %v2746_v55 = vunpack.c.l.b16 %v2714_v15  ;;  %v2616_v8 = vpop.permute.xlu2 %2615  ;;  %v2719_v44 = vsel %vm2687_vm10, 65537, %v11146_v38  ;;  %v2935_v37 = vunpack.c.h.b16 %v2895_v18 }
 0x2b1   : > { %v2966_v63 = vpack.c.b16 %v2934_v17, %v2934_v17  ;;  %vm2658_vm8 = vcmp.eq.s32.totalorder %v2616_v8, 1  ;;  %v2751_v61 = vunpack.c.l.b16 %v2719_v44  ;;  %vm2850_vm12 = vcmp.ne.s32.totalorder %v6897_v2, %v7591_v20 }
 0x2b2   : > { %vm2836_vm5 = vcmp.ne.s32.totalorder %v6893_v19, %v7591_v20  ;;  %v2595_v28 = vpop.permute.xlu1 %2594  ;;  %v2601_v49 = vpop.permute.xlu0 %2600  ;;  %v6895_v59 = vunpack.i.l.s16 %v2746_v55  ;;  %vm9141_vm6 = vmpackc.low %vm2658_vm8, %vm2658_vm8  ;;  %v2967_v24 = vpack.c.b16 %v2935_v37, %v2935_v37 }
 0x2b3   : > { %vm2838_vm7 = vmpackc.low %vm2837_vm11, %vm2836_vm5  ;;  %3012 = vrot.lane.b32.xlu1 %v2966_v63, %s7278_s24  ;;  %3010 = vrot.lane.b32.xlu0 %v2965_v10, %s7278_s24  ;;  %vm2651_vm15 = vcmp.eq.s32.totalorder %v2595_v28, 1  ;;  %vm2653_vm13 = vcmp.eq.s32.totalorder %v2601_v49, 1  ;;  %v7279_v28 = vmov 4  }
 0x2b4   : > { %v2896_v53 = vsel %vm2838_vm7, %v8002_v47, 0  ;;  %3008 = vrot.lane.b32.xlu2 %v2964_v51, %s7278_s24  ;;  %vm2683_vm14 = vmpackc.low %vm2651_vm15, %vm2651_vm15  ;;  %vm2843_vm9 = vcmp.ne.s32.totalorder %v6895_v59, %v7591_v20  ;;  %v6900_v51 = vunpack.i.l.s16 %v2751_v61  ;;  %7216 = vset.pattern.permute.xlu1 %v7279_v28 }
 0x2b5   : > { %v2715_v14 = vsel %vm2683_vm14, 65537, %v11146_v38  ;;  %vm2685_vm4 = vmpackc.low %vm2653_vm13, %vm2653_vm13  ;;  %v2937_v58 = vunpack.c.h.b16 %v2896_v53  ;;  %v2936_v30 = vunpack.c.l.b16 %v2896_v53  ;;  %7218 = vset.pattern.permute.xlu0 %v7279_v28  ;;  %7217 = vset.pattern.permute.xlu2 %v7279_v28 }
 0x2b6   : > { %v2747_v5 = vunpack.c.l.b16 %v2715_v14  ;;  %v2717_v34 = vsel %vm2685_vm4, 65537, %v11146_v38  ;;  %vm2858_vm8 = vcmp.ne.s32.totalorder %v6900_v51, %v7602_v26 }
 0x2b7   : > { %v2749_v9 = vunpack.c.l.b16 %v2717_v34  ;;  %v2969_v42 = vpack.c.b16 %v2937_v58, %v2937_v58  ;;  %v2968_v47 = vpack.c.b16 %v2936_v30, %v2936_v30 }
 0x2b8   : > { %v6896_v0 = vunpack.i.l.s16 %v2747_v5  ;;  %v2625_v10 = vpop.permute.xlu2 %2624 }
 0x2b9   : > { %v6898_v56 = vunpack.i.l.s16 %v2749_v9  ;;  %vm2661_vm4 = vcmp.eq.s32.totalorder %v2625_v10, 1 }
 0x2ba   : > { %vm2844_vm1 = vcmp.ne.s32.totalorder %v6896_v0, %v7602_v26  ;;  %v2604_v33 = vpop.permute.xlu1 %2603  ;;  %v2610_v18 = vpop.permute.xlu0 %2609 }
 0x2bb   : > { %vm2845_vm11 = vmpackc.low %vm2844_vm1, %vm2843_vm9  ;;  %vm2851_vm5 = vcmp.ne.s32.totalorder %v6898_v56, %v7602_v26  ;;  %3018 = vrot.lane.b32.xlu1 %v2969_v42, %s7278_s24  ;;  %3016 = vrot.lane.b32.xlu0 %v2968_v47, %s7278_s24  ;;  %vm2654_vm10 = vcmp.eq.s32.totalorder %v2604_v33, 1  ;;  %vm2656_vm15 = vcmp.eq.s32.totalorder %v2610_v18, 1 }
 0x2bc   : > { %v2897_v15 = vsel %vm2845_vm11, %v8118_v46, 0  ;;  %vm2852_vm7 = vmpackc.low %vm2851_vm5, %vm2850_vm12  ;;  %3014 = vrot.lane.b32.xlu2 %v2967_v24, %s7278_s24  ;;  %v2722_v46 = vsel %vm9141_vm6, 65537, %v11146_v38 }
 0x2bd   : > { %v2898_v17 = vsel %vm2852_vm7, %v8114_v11, 0  ;;  %vm2686_vm14 = vmpackc.low %vm2654_vm10, %vm2654_vm10  ;;  %v2939_v48 = vunpack.c.h.b16 %v2897_v15  ;;  %v2938_v19 = vunpack.c.l.b16 %v2897_v15  ;;  %v2754_v58 = vunpack.c.l.b16 %v2722_v46 }
 0x2be   : > { %v2718_v63 = vsel %vm2686_vm14, 65537, %v11146_v38  ;;  %vm2688_vm13 = vmpackc.low %vm2656_vm15, %vm2656_vm15  ;;  %v2940_v55 = vunpack.c.l.b16 %v2898_v17  ;;  %v2941_v47 = vunpack.c.h.b16 %v2898_v17 }
 0x2bf   : > { %v2750_v49 = vunpack.c.l.b16 %v2718_v63  ;;  %v2971_v8 = vpack.c.b16 %v2939_v48, %v2939_v48  ;;  %v2720_v11 = vsel %vm2688_vm13, 65537, %v11146_v38  ;;  %v2970_v53 = vpack.c.b16 %v2938_v19, %v2938_v19  ;;  %vm9159_vm1 = vmpackc.low %vm2661_vm4, %vm2661_vm4 }
 0x2c0   : > { %v2972_v2 = vpack.c.b16 %v2940_v55, %v2940_v55  ;;  %v2752_v30 = vunpack.c.l.b16 %v2720_v11  ;;  %v6903_v0 = vunpack.i.l.s16 %v2754_v58  ;;  %v2725_v24 = vsel %vm9159_vm1, 65537, %v11146_v38 }
 0x2c1   : > { %v6899_v44 = vunpack.i.l.s16 %v2750_v49  ;;  %v2973_v48 = vpack.c.b16 %v2941_v47, %v2941_v47  ;;  %v2757_v51 = vunpack.c.l.b16 %v2725_v24  ;;  %v11237_v58 = vshrl.u32 %v8556_v36, 16 }
 0x2c2   : > { %v2613_v14 = vpop.permute.xlu1 %2612  ;;  %v2619_v5 = vpop.permute.xlu0 %2618  ;;  %v6901_v56 = vunpack.i.l.s16 %v2752_v30  ;;  %vm2871_vm13 = vcmp.ne.s32.totalorder %v6903_v0, %v7591_v20 }
 0x2c3   : > { %vm2857_vm9 = vcmp.ne.s32.totalorder %v6899_v44, %v7591_v20  ;;  %3024 = vrot.lane.b32.xlu1 %v2972_v2, %s7278_s24  ;;  %3022 = vrot.lane.b32.xlu0 %v2971_v8, %s7278_s24  ;;  %vm2657_vm6 = vcmp.eq.s32.totalorder %v2613_v14, 1  ;;  %vm2659_vm11 = vcmp.eq.s32.totalorder %v2619_v5, 1  ;;  %v6906_v49 = vunpack.i.l.s16 %v2757_v51 }
 0x2c4   : > { %vm2859_vm12 = vmpackc.low %vm2858_vm8, %vm2857_vm9  ;;  %3020 = vrot.lane.b32.xlu2 %v2970_v53, %s7278_s24  ;;  %vm2864_vm7 = vcmp.ne.s32.totalorder %v6901_v56, %v7591_v20  ;;  %v2434_v30 = vrot.slane %v11237_v58, 7 }
 0x2c5   : > { %v2899_v34 = vsel %vm2859_vm12, %v8136_v3, 0  ;;  %vm2689_vm5 = vmpackc.low %vm2657_vm6, %vm2657_vm6 }
 0x2c6   : > { %v2721_v37 = vsel %vm2689_vm5, 65537, %v11146_v38  ;;  %vm2691_vm10 = vmpackc.low %vm2659_vm11, %vm2659_vm11  ;;  %v2943_v9 = vunpack.c.h.b16 %v2899_v34  ;;  %v2942_v42 = vunpack.c.l.b16 %v2899_v34  ;;  %vm2879_vm5 = vcmp.ne.s32.totalorder %v6906_v49, %v7602_v26 }
 0x2c7   : > { %v2753_v61 = vunpack.c.l.b16 %v2721_v37  ;;  %v2723_v52 = vsel %vm2691_vm10, 65537, %v11146_v38  ;;  %v11238_v34 = vshll.u32 %v8556_v36, 16 }
 0x2c8   : > { %v2755_v33 = vunpack.c.l.b16 %v2723_v52  ;;  %v2975_v18 = vpack.c.b16 %v2943_v9, %v2943_v9  ;;  %v2974_v15 = vpack.c.b16 %v2942_v42, %v2942_v42 }
 0x2c9   : > { %v6902_v3 = vunpack.i.l.s16 %v2753_v61  ;;  %v2437_v37 = vor.u32 %v11238_v34, %v2434_v30 }
 0x2ca   : > { %v6904_v10 = vunpack.i.l.s16 %v2755_v33  ;;  %v2622_v19 = vpop.permute.xlu1 %2621  ;;  %v2628_v17 = vpop.permute.xlu0 %2627 }
 0x2cb   : > { %vm2865_vm15 = vcmp.ne.s32.totalorder %v6902_v3, %v7602_v26  ;;  %3030 = vrot.lane.b32.xlu1 %v2975_v18, %s7278_s24  ;;  %3028 = vrot.lane.b32.xlu0 %v2974_v15, %s7278_s24  ;;  %vm2660_vm14 = vcmp.eq.s32.totalorder %v2622_v19, 1  ;;  %vm2662_vm9 = vcmp.eq.s32.totalorder %v2628_v17, 1  ;;  %v2438_v33 = vsel %vm311_vm2, %v8175_v57, %v2437_v37 }
 0x2cc   : > { %vm2866_vm4 = vmpackc.low %vm2865_vm15, %vm2864_vm7  ;;  %vm2872_vm8 = vcmp.ne.s32.totalorder %v6904_v10, %v7602_v26  ;;  %3026 = vrot.lane.b32.xlu2 %v2973_v48, %s7278_s24 }
 0x2cd   : > { %v2900_v63 = vsel %vm2866_vm4, %v8187_v25, 0  ;;  %vm2873_vm1 = vmpackc.low %vm2872_vm8, %vm2871_vm13 }
 0x2ce   : > { %v2901_v55 = vsel %vm2873_vm1, %v8210_v40, 0  ;;  %vm2692_vm6 = vmpackc.low %vm2660_vm14, %vm2660_vm14  ;;  %v2945_v28 = vunpack.c.h.b16 %v2900_v63  ;;  %v2944_v46 = vunpack.c.l.b16 %v2900_v63  ;;  %v3116_v63 = vld [vmem:[%s10979_s3 + $0x18] sm:$0xff] }
 0x2cf   : > { %v2724_v8 = vsel %vm2692_vm6, 65537, %v11146_v38  ;;  %vm2694_vm12 = vmpackc.low %vm2662_vm9, %vm2662_vm9  ;;  %v2946_v11 = vunpack.c.l.b16 %v2901_v55  ;;  %v2947_v56 = vunpack.c.h.b16 %v2901_v55  ;;  %v3115_v55 = vld [vmem:[%s10979_s3 + $0x10] sm:$0xff]  ;;  %vm3148_vm8 = vcmp.gt.f32.partialorder %v3116_v63, 0.5  ;;  %v3132_v63 = vld [vmem:[%s10979_s3 + $0x98] sm:$0xff] }
 0x2d0   : > { %v2756_v2 = vunpack.c.l.b16 %v2724_v8  ;;  %v2726_v53 = vsel %vm2694_vm12, 65537, %v11146_v38  ;;  %v2977_v44 = vpack.c.b16 %v2945_v28, %v2945_v28  ;;  %v2976_v14 = vpack.c.b16 %v2944_v46, %v2944_v46  ;;  %v3114_v28 = vld [vmem:[%s10979_s3 + $0x8] sm:$0xff] }
 0x2d1   : > { %v2978_v25 = vpack.c.b16 %v2946_v11, %v2946_v11  ;;  %v2758_v5 = vunpack.c.l.b16 %v2726_v53  ;;  %v2979_v3 = vpack.c.b16 %v2947_v56, %v2947_v56  ;;  %vm3147_vm9 = vcmp.gt.f32.partialorder %v3115_v55, 0.5  ;;  %v3118_v11 = vld [vmem:[%s10979_s3 + $0x28] sm:$0xff]  ;;  %v3117_v53 = vld [vmem:[%s10979_s3 + $0x20] sm:$0xff]  ;;  %v3128_v55 = vld [vmem:[%s10979_s3 + $0x78] sm:$0xff] }
 0x2d2   : > { %v6905_v59 = vunpack.i.l.s16 %v2756_v2  ;;  %v2631_v40 = vpop.permute.xlu1 %2630  ;;  %vm3146_vm1 = vcmp.gt.f32.partialorder %v3114_v28, 0.5  ;;  %v9220_v46 = vsel %vm3148_vm8, 1, %v11146_v38  ;;  %v9223_v49 = vsel %vm3147_vm9, 1, %v11146_v38  ;;  %v3120_v2 = vld [vmem:[%s10979_s3 + $0x38] sm:$0xff] }
 0x2d3   : > { %3036 = vrot.lane.b32.xlu1 %v2978_v25, %s7278_s24  ;;  %3034 = vrot.lane.b32.xlu0 %v2977_v44, %s7278_s24  ;;  %vm2663_vm11 = vcmp.eq.s32.totalorder %v2631_v40, 1  ;;  %v6907_v47 = vunpack.i.l.s16 %v2758_v5  ;;  %v9226_v8 = vsel %vm3146_vm1, 1, %v11146_v38  ;;  %vm3080_vm6 = vcmask 126048   ;;  %v3121_v25 = vld [vmem:[%s10979_s3 + $0x40] sm:$0xff]  ;;  %v3119_v5 = vld [vmem:[%s10979_s3 + $0x30] sm:$0xff] }
 0x2d4   : > { %vm2878_vm10 = vcmp.ne.s32.totalorder %v6905_v59, %v7591_v20  ;;  %3032 = vrot.lane.b32.xlu2 %v2976_v14, %s7278_s24  ;;  %vm2695_vm7 = vmpackc.low %vm2663_vm11, %vm2663_vm11  ;;  %vm3150_vm12 = vcmp.gt.f32.partialorder %v3118_v11, 0.5  ;;  %vm3152_vm11 = vcmp.gt.f32.partialorder %v3120_v2, 0.5  ;;  %v3123_v59 = vld [vmem:[%s10979_s3 + $0x50] sm:$0xff] }
 0x2d5   : > { %vm2880_vm15 = vmpackc.low %vm2879_vm5, %vm2878_vm10  ;;  %v2727_v9 = vsel %vm2695_vm7, 65537, %v11146_v38  ;;  %vm2885_vm14 = vcmp.ne.s32.totalorder %v6907_v47, %v7591_v20  ;;  %vm3149_vm5 = vcmp.gt.f32.partialorder %v3117_v53, 0.5  ;;  %v9242_v14 = vsel %vm3150_vm12, 1, %v11146_v38  ;;  %v3126_v47 = vld [vmem:[%s10979_s3 + $0x68] sm:$0xff] }
 0x2d6   : > { %v2902_v42 = vsel %vm2880_vm15, %v8202_v54, 0  ;;  %v2759_v0 = vunpack.c.l.b16 %v2727_v9  ;;  %v3113_v54 = vld [vmem:[%s10979_s3] sm:$0xff]  ;;  %v9245_v58 = vsel %vm3152_vm11, 1, %v11146_v38  ;;  %v9248_v30 = vsel %vm3149_vm5, 1, %v11146_v38 }
 0x2d7   : > { %v2949_v61 = vunpack.c.h.b16 %v2902_v42  ;;  %v2948_v52 = vunpack.c.l.b16 %v2902_v42  ;;  %vm3145_vm2 = vcmp.gt.f32.partialorder %v3113_v54, 0.5  ;;  %vm3153_vm10 = vcmp.gt.f32.partialorder %v3121_v25, 0.5  ;;  %v3124_v42 = vld [vmem:[%s10979_s3 + $0x58] sm:$0xff] }
 0x2d8   : > { %v6908_v24 = vunpack.i.l.s16 %v2759_v0  ;;  %v9205_v51 = vsel %vm3145_vm2, 1, %v11146_v38  ;;  %vm3155_vm7 = vcmp.gt.f32.partialorder %v3123_v59, 0.5  ;;  %vm3151_vm15 = vcmp.gt.f32.partialorder %v3119_v5, 0.5  ;;  %v3122_v0 = vld [vmem:[%s10979_s3 + $0x48] sm:$0xff]  ;;  %v3133_v59 = vld [vmem:[%s10979_s3 + $0xa0] sm:$0xff]  ;;  %v3135_v5 = vld [vmem:[%s10979_s3 + $0xb0] sm:$0xff] }
 0x2d9   : > { %v2981_v18 = vpack.c.b16 %v2949_v61, %v2949_v61  ;;  %v2980_v15 = vpack.c.b16 %v2948_v52, %v2948_v52  ;;  %v9264_v34 = vsel %vm3153_vm10, 1, %v11146_v38  ;;  %v9267_v37 = vsel %vm3155_vm7, 1, %v11146_v38 }
 0x2da   : > { %vm2886_vm13 = vcmp.ne.s32.totalorder %v6908_v24, %v7602_v26  ;;  %v9270_v9 = vsel %vm3151_vm15, 1, %v11146_v38  ;;  %vm3164_vm12 = vcmp.gt.f32.partialorder %v3132_v63, 0.5  ;;  %vm3160_vm11 = vcmp.gt.f32.partialorder %v3128_v55, 0.5 }
 0x2db   : > { %vm2887_vm4 = vmpackc.low %vm2886_vm13, %vm2885_vm14  ;;  %3042 = vrot.lane.b32.xlu1 %v2981_v18, %s7278_s24  ;;  %3040 = vrot.lane.b32.xlu0 %v2980_v15, %s7278_s24  ;;  %vm3156_vm14 = vcmp.gt.f32.partialorder %v3124_v42, 0.5  ;;  %vm3158_vm13 = vcmp.gt.f32.partialorder %v3126_v47, 0.5  ;;  %v3129_v18 = vld [vmem:[%s10979_s3 + $0x80] sm:$0xff]  ;;  %v9340_v25 = vsel %vm3160_vm11, 1, %v11146_v38  ;;  %vm3165_vm5 = vcmp.gt.f32.partialorder %v3133_v59, 0.5 }
 0x2dc   : > { %v2903_v10 = vsel %vm2887_vm4, %v2438_v33, 0  ;;  %3038 = vrot.lane.b32.xlu2 %v2979_v3, %s7278_s24  ;;  %vm3154_vm4 = vcmp.gt.f32.partialorder %v3122_v0, 0.5  ;;  %v9286_v61 = vsel %vm3156_vm14, 1, %v11146_v38  ;;  %v9289_v52 = vsel %vm3158_vm13, 1, %v11146_v38  ;;  %v3127_v33 = vld [vmem:[%s10979_s3 + $0x70] sm:$0xff]  ;;  %v3125_v3 = vld [vmem:[%s10979_s3 + $0x60] sm:$0xff] }
 0x2dd   : > { %v2951_v57 = vunpack.c.h.b16 %v2903_v10  ;;  %v2950_v48 = vunpack.c.l.b16 %v2903_v10  ;;  %v9292_v24 = vsel %vm3154_vm4, 1, %v11146_v38  ;;  %vm3159_vm2 = vcmp.gt.f32.partialorder %v3127_v33, 0.5  ;;  %v3141_v59 = vld [vmem:[%s10979_s3 + $0xe0] sm:$0xff] }
 0x2de   : > { %vm3161_vm8 = vcmp.gt.f32.partialorder %v3129_v18, 0.5  ;;  %vm3157_vm9 = vcmp.gt.f32.partialorder %v3125_v3, 0.5  ;;  %vm3167_vm10 = vcmp.gt.f32.partialorder %v3135_v5, 0.5  ;;  %v3138_v3 = vld [vmem:[%s10979_s3 + $0xc8] sm:$0xff]  ;;  %v3137_v5 = vld [vmem:[%s10979_s3 + $0xc0] sm:$0xff] }
 0x2df   : > { %v2983_v19 = vpack.c.b16 %v2951_v57, %v2951_v57  ;;  %v2982_v17 = vpack.c.b16 %v2950_v48, %v2950_v48  ;;  %v9310_v57 = vsel %vm3159_vm2, 1, %v11146_v38  ;;  %v9313_v48 = vsel %vm3161_vm8, 1, %v11146_v38 }
 0x2e0   : > { %v9361_v33 = vsel %vm3167_vm10, 1, %v11146_v38  ;;  %vm3170_vm14 = vcmp.gt.f32.partialorder %v3138_v3, 0.5  ;;  %vm3173_vm2 = vcmp.gt.f32.partialorder %v3141_v59, 0.5  ;;  %vm3169_vm8 = vcmp.gt.f32.partialorder %v3137_v5, 0.5 }
 0x2e1   : > { %v9412_v3 = vsel %vm3169_vm8, 1, %v11146_v38 }
 0x2e3   : > { %3210 = vperm.xlu1 %7216, %v9205_v51   ;;  %3046 = vrot.lane.b32.xlu0 %v2983_v19, %s7278_s24  ;;  %v9316_v19 = vsel %vm3157_vm9, 1, %v11146_v38 }
 0x2e4   : > { %3044 = vrot.lane.b32.xlu2 %v2982_v17, %s7278_s24  ;;  %v3130_v17 = vld [vmem:[%s10979_s3 + $0x88] sm:$0xff] }
 0x2e5   : > { %vm3162_vm1 = vcmp.gt.f32.partialorder %v3130_v17, 0.5 }
 0x2e6   : > { %v9334_v53 = vsel %vm3162_vm1, 1, %v11146_v38 }
 0x2eb   : > { %3219 = vperm.xlu1 %7216, %v9220_v46   ;;  %3216 = vperm.xlu0 %7218, %v9223_v49  }
 0x2ec   : > { %3213 = vperm.xlu2 %7217, %v9226_v8   ;;  %v2985_v44 = vpop.permute.xlu2 %2984 }
 0x2ed   : > { %3081 = vst.msk [vmem:[#allocation2] sm:$0xf] %vm3080_vm6, %v2985_v44  ;;  %v9337_v44 = vsel %vm3164_vm12, 1, %v11146_v38 }
 0x2f3   : > { %3225 = vperm.xlu1 %7216, %v9242_v14   ;;  %3231 = vperm.xlu0 %7218, %v9245_v58  }
 0x2f4   : > { %3222 = vperm.xlu2 %7217, %v9248_v30  }
 0x2f5   : > { %v2991_v40 = vpop.permute.xlu2 %2990 }
 0x2f6   : > { %3084 = vst.msk [vmem:[#allocation2 + $0xc] sm:$0xf] %vm3080_vm6, %v2991_v40  ;;  %v3131_v40 = vld [vmem:[%s10979_s3 + $0x90] sm:$0xff] }
 0x2f7   : > { %vm3163_vm7 = vcmp.gt.f32.partialorder %v3131_v40, 0.5 }
 0x2f8   : > { %v9364_v18 = vsel %vm3163_vm7, 1, %v11146_v38 }
 0x2fb   : > { %3234 = vperm.xlu1 %7216, %v9264_v34   ;;  %3240 = vperm.xlu0 %7218, %v9267_v37  }
 0x2fc   : > { %3228 = vperm.xlu2 %7217, %v9270_v9  }
 0x2fd   : > { %v2997_v56 = vpop.permute.xlu2 %2996 }
 0x2fe   : > { %3087 = vst.msk [vmem:[#allocation2 + $0x18] sm:$0xf] %vm3080_vm6, %v2997_v56  ;;  %v9358_v56 = vsel %vm3165_vm5, 1, %v11146_v38 }
 0x303   : > { %3243 = vperm.xlu1 %7216, %v9286_v61   ;;  %3249 = vperm.xlu0 %7218, %v9289_v52   ;;  %v2989_v15 = vpop.permute.xlu1 %2988 }
 0x304   : > { %3237 = vperm.xlu2 %7217, %v9292_v24   ;;  %3083 = vst.msk [vmem:[#allocation2 + $0x8] sm:$0xf] %vm3080_vm6, %v2989_v15  ;;  %v2987_v54 = vpop.permute.xlu0 %2986  ;;  %v3136_v15 = vld [vmem:[%s10979_s3 + $0xb8] sm:$0xff] }
 0x305   : > { %3082 = vst.msk [vmem:[#allocation2 + $0x4] sm:$0xf] %vm3080_vm6, %v2987_v54  ;;  %v3134_v54 = vld [vmem:[%s10979_s3 + $0xa8] sm:$0xff]  ;;  %vm3168_vm15 = vcmp.gt.f32.partialorder %v3136_v15, 0.5  ;;  %v9409_v15 = vsel %vm3173_vm2, 1, %v11146_v38 }
 0x306   : > { %v3003_v10 = vpop.permute.xlu2 %3002  ;;  %vm3166_vm13 = vcmp.gt.f32.partialorder %v3134_v54, 0.5  ;;  %v9382_v55 = vsel %vm3168_vm15, 1, %v11146_v38  ;;  %v3142_v54 = vld [vmem:[%s10979_s3 + $0xe8] sm:$0xff] }
 0x307   : > { %3090 = vst.msk [vmem:[#allocation2 + $0x24] sm:$0xf] %vm3080_vm6, %v3003_v10  ;;  %vm3174_vm9 = vcmp.gt.f32.partialorder %v3142_v54, 0.5 }
 0x308   : > { %v9430_v5 = vsel %vm3174_vm9, 1, %v11146_v38 }
 0x30b   : > { %3252 = vperm.xlu1 %7216, %v9310_v57   ;;  %3258 = vperm.xlu0 %7218, %v9313_v48  }
 0x30c   : > { %3246 = vperm.xlu2 %7217, %v9316_v19   ;;  %v2995_v28 = vpop.permute.xlu1 %2994  ;;  %v2993_v11 = vpop.permute.xlu0 %2992 }
 0x30d   : > { %3086 = vst.msk [vmem:[#allocation2 + $0x14] sm:$0xf] %vm3080_vm6, %v2995_v28  ;;  %v9385_v28 = vsel %vm3170_vm14, 1, %v11146_v38 }
 0x30e   : > { %3085 = vst.msk [vmem:[#allocation2 + $0x10] sm:$0xf] %vm3080_vm6, %v2993_v11  ;;  %v3009_v2 = vpop.permute.xlu2 %3008  ;;  %v9388_v11 = vsel %vm3166_vm13, 1, %v11146_v38 }
 0x30f   : > { %3093 = vst.msk [vmem:[#allocation2 + $0x30] sm:$0xf] %vm3080_vm6, %v3009_v2  ;;  %v3139_v2 = vld [vmem:[%s10979_s3 + $0xd0] sm:$0xff] }
 0x310   : > { %vm3171_vm4 = vcmp.gt.f32.partialorder %v3139_v2, 0.5 }
 0x313   : > { %3261 = vperm.xlu1 %7216, %v9334_v53   ;;  %3267 = vperm.xlu0 %7218, %v9337_v44  }
 0x314   : > { %3255 = vperm.xlu2 %7217, %v9340_v25   ;;  %v2999_v42 = vpop.permute.xlu0 %2998 }
 0x315   : > { %v3001_v47 = vpop.permute.xlu1 %3000  ;;  %3088 = vst.msk [vmem:[#allocation2 + $0x1c] sm:$0xf] %vm3080_vm6, %v2999_v42 }
 0x316   : > { %3089 = vst.msk [vmem:[#allocation2 + $0x20] sm:$0xf] %vm3080_vm6, %v3001_v47  ;;  %v3015_v0 = vpop.permute.xlu2 %3014 }
 0x317   : > { %3096 = vst.msk [vmem:[#allocation2 + $0x3c] sm:$0xf] %vm3080_vm6, %v3015_v0  ;;  %v9406_v0 = vsel %vm3171_vm4, 1, %v11146_v38 }
 0x31b   : > { %3270 = vperm.xlu1 %7216, %v9358_v56   ;;  %3276 = vperm.xlu0 %7218, %v9361_v33  }
 0x31c   : > { %3264 = vperm.xlu2 %7217, %v9364_v18  }
 0x31d   : > { %v3007_v10 = vpop.permute.xlu1 %3006  ;;  %v3005_v17 = vpop.permute.xlu0 %3004 }
 0x31e   : > { %3092 = vst.msk [vmem:[#allocation2 + $0x2c] sm:$0xf] %vm3080_vm6, %v3007_v10  ;;  %v3021_v63 = vpop.permute.xlu2 %3020  ;;  %v3144_v10 = vld [vmem:[%s10979_s3 + $0xf8] sm:$0xff] }
 0x31f   : > { %3091 = vst.msk [vmem:[#allocation2 + $0x28] sm:$0xf] %vm3080_vm6, %v3005_v17  ;;  %v3140_v17 = vld [vmem:[%s10979_s3 + $0xd8] sm:$0xff]  ;;  %vm3176_vm1 = vcmp.gt.f32.partialorder %v3144_v10, 0.5 }
 0x320   : > { %3099 = vst.msk [vmem:[#allocation2 + $0x48] sm:$0xf] %vm3080_vm6, %v3021_v63  ;;  %vm3172_vm12 = vcmp.gt.f32.partialorder %v3140_v17, 0.5 }
 0x323   : > { %3279 = vperm.xlu1 %7216, %v9382_v55   ;;  %3285 = vperm.xlu0 %7218, %v9385_v28  }
 0x324   : > { %3273 = vperm.xlu2 %7217, %v9388_v11  }
 0x325   : > { %v3013_v40 = vpop.permute.xlu1 %3012  ;;  %v3011_v42 = vpop.permute.xlu0 %3010 }
 0x326   : > { %3095 = vst.msk [vmem:[#allocation2 + $0x38] sm:$0xf] %vm3080_vm6, %v3013_v40  ;;  %v3027_v47 = vpop.permute.xlu2 %3026  ;;  %v9433_v40 = vsel %vm3176_vm1, 1, %v11146_v38 }
 0x327   : > { %3094 = vst.msk [vmem:[#allocation2 + $0x34] sm:$0xf] %vm3080_vm6, %v3011_v42  ;;  %v9436_v42 = vsel %vm3172_vm12, 1, %v11146_v38 }
 0x328   : > { %3102 = vst.msk [vmem:[#allocation2 + $0x54] sm:$0xf] %vm3080_vm6, %v3027_v47  ;;  %v3143_v47 = vld [vmem:[%s10979_s3 + $0xf0] sm:$0xff] }
 0x329   : > { %vm3175_vm11 = vcmp.gt.f32.partialorder %v3143_v47, 0.5 }
 0x32b   : > { %3288 = vperm.xlu1 %7216, %v9406_v0   ;;  %3294 = vperm.xlu0 %7218, %v9409_v15  }
 0x32c   : > { %3282 = vperm.xlu2 %7217, %v9412_v3  }
 0x32d   : > { %v3019_v63 = vpop.permute.xlu1 %3018  ;;  %v3017_v2 = vpop.permute.xlu0 %3016 }
 0x32e   : > { %3098 = vst.msk [vmem:[#allocation2 + $0x44] sm:$0xf] %vm3080_vm6, %v3019_v63  ;;  %v3033_v59 = vpop.permute.xlu2 %3032  ;;  %v9448_v63 = vsel %vm3175_vm11, 1, %v11146_v38 }
 0x32f   : > { %3097 = vst.msk [vmem:[#allocation2 + $0x40] sm:$0xf] %vm3080_vm6, %v3017_v2 }
 0x330   : > { %3105 = vst.msk [vmem:[#allocation2 + $0x60] sm:$0xf] %vm3080_vm6, %v3033_v59 }
 0x333   : > { %3297 = vperm.xlu1 %7216, %v9430_v5   ;;  %3303 = vperm.xlu0 %7218, %v9433_v40  }
 0x334   : > { %3291 = vperm.xlu2 %7217, %v9436_v42  }
 0x335   : > { %v3025_v54 = vpop.permute.xlu1 %3024  ;;  %v3023_v10 = vpop.permute.xlu0 %3022 }
 0x336   : > { %3101 = vst.msk [vmem:[#allocation2 + $0x50] sm:$0xf] %vm3080_vm6, %v3025_v54  ;;  %v3039_v17 = vpop.permute.xlu2 %3038 }
 0x337   : > { %3100 = vst.msk [vmem:[#allocation2 + $0x4c] sm:$0xf] %vm3080_vm6, %v3023_v10 }
 0x338   : > { %3108 = vst.msk [vmem:[#allocation2 + $0x6c] sm:$0xf] %vm3080_vm6, %v3039_v17  ;;  %v7232_v17 = vld [vmem:[%s7544_s6 + $0x4] sm:$0xf] }
 0x33c   : > { %3300 = vperm.xlu2 %7217, %v9448_v63  }
 0x33d   : > { %v3031_v2 = vpop.permute.xlu1 %3030  ;;  %v3029_v59 = vpop.permute.xlu0 %3028 }
 0x33e   : > { %3104 = vst.msk [vmem:[#allocation2 + $0x5c] sm:$0xf] %vm3080_vm6, %v3031_v2  ;;  %v3045_v36 = vpop.permute.xlu2 %3044 }
 0x33f   : > { %3103 = vst.msk [vmem:[#allocation2 + $0x58] sm:$0xf] %vm3080_vm6, %v3029_v59 }
 0x340   : > { %3111 = vst.msk [vmem:[#allocation2 + $0x78] sm:$0xf] %vm3080_vm6, %v3045_v36 }
 0x345   : > { %v3037_v47 = vpop.permute.xlu1 %3036  ;;  %v3035_v54 = vpop.permute.xlu0 %3034 }
 0x346   : > { %3107 = vst.msk [vmem:[#allocation2 + $0x68] sm:$0xf] %vm3080_vm6, %v3037_v47  ;;  %v3214_v10 = vpop.permute.xlu2 %3213  ;;  %v7233_v47 = vld [vmem:[%s7544_s6 + $0x10] sm:$0xf] }
 0x347   : > { %3106 = vst.msk [vmem:[#allocation2 + $0x64] sm:$0xf] %vm3080_vm6, %v3035_v54  ;;  %vm3306_vm5 = vcmp.eq.s32.totalorder %v3214_v10, 1 }
 0x348   : > { %vm3338_vm10 = vmpackc.low %vm3306_vm5, %vm3306_vm5 }
 0x349   : > { %v3370_v31 = vsel %vm3338_vm10, %v7232_v17, 0  ;;  %v7234_v17 = vld [vmem:[%s7544_s6] sm:$0xf] }
 0x34a   : > { %3435 = vrot.lane.b32.xlu2 %v3370_v31, %s7280_s20 }
 0x34d   : > { %v3043_v2 = vpop.permute.xlu1 %3042  ;;  %v3041_v59 = vpop.permute.xlu0 %3040 }
 0x34e   : > { %3110 = vst.msk [vmem:[#allocation2 + $0x74] sm:$0xf] %vm3080_vm6, %v3043_v2  ;;  %v3223_v36 = vpop.permute.xlu2 %3222 }
 0x34f   : > { %3109 = vst.msk [vmem:[#allocation2 + $0x70] sm:$0xf] %vm3080_vm6, %v3041_v59  ;;  %vm3309_vm7 = vcmp.eq.s32.totalorder %v3223_v36, 1 }
 0x350   : > { %vm3341_vm15 = vmpackc.low %vm3309_vm7, %vm3309_vm7 }
 0x351   : > { %v3373_v50 = vsel %vm3341_vm15, %v7233_v47, 0 }
 0x352   : > { %3441 = vrot.lane.b32.xlu2 %v3373_v50, %s7280_s20  ;;  %v7235_v50 = vld [vmem:[%s7544_s6 + $0xc] sm:$0xf] }
 0x355   : > { %v3211_v54 = vpop.permute.xlu1 %3210  ;;  %v3047_v10 = vpop.permute.xlu0 %3046 }
 0x356   : > { %vm3305_vm14 = vcmp.eq.s32.totalorder %v3211_v54, 1  ;;  %3112 = vst.msk [vmem:[#allocation2 + $0x7c] sm:$0xf] %vm3080_vm6, %v3047_v10  ;;  %v3229_v31 = vpop.permute.xlu2 %3228  ;;  %v7236_v54 = vld [vmem:[%s7544_s6 + $0x8] sm:$0xf] }
 0x357   : > { %vm3337_vm13 = vmpackc.low %vm3305_vm14, %vm3305_vm14  ;;  %vm3311_vm6 = vcmp.eq.s32.totalorder %v3229_v31, 1 }
 0x358   : > { %v3369_v2 = vsel %vm3337_vm13, %v7234_v17, 0  ;;  %vm3343_vm1 = vmpackc.low %vm3311_vm6, %vm3311_vm6 }
 0x359   : > { %3433 = vrot.lane.b32.xlu1 %v3369_v2, %s7280_s20 }
 0x35d   : > { %v3220_v59 = vpop.permute.xlu1 %3219  ;;  %v3217_v36 = vpop.permute.xlu0 %3216 }
 0x35e   : > { %vm3308_vm4 = vcmp.eq.s32.totalorder %v3220_v59, 1  ;;  %vm3307_vm2 = vcmp.eq.s32.totalorder %v3217_v36, 1  ;;  %v3238_v47 = vpop.permute.xlu2 %3237  ;;  %v7237_v59 = vld [vmem:[%s7544_s6 + $0x18] sm:$0xf] }
 0x35f   : > { %vm3340_vm8 = vmpackc.low %vm3308_vm4, %vm3308_vm4  ;;  %v3375_v36 = vsel %vm3343_vm1, %v7237_v59, 0  ;;  %vm3314_vm7 = vcmp.eq.s32.totalorder %v3238_v47, 1  ;;  %v7241_v59 = vld [vmem:[%s7544_s6 + $0x20] sm:$0xf] }
 0x360   : > { %v3372_v16 = vsel %vm3340_vm8, %v7235_v50, 0  ;;  %vm3339_vm9 = vmpackc.low %vm3307_vm2, %vm3307_vm2  ;;  %v7238_v50 = vld [vmem:[%s7544_s6 + $0x14] sm:$0xf] }
 0x361   : > { %v3371_v1 = vsel %vm3339_vm9, %v7236_v54, 0  ;;  %3439 = vrot.lane.b32.xlu1 %v3372_v16, %s7280_s20  ;;  %v7239_v54 = vld [vmem:[%s7544_s6 + $0x1c] sm:$0xf]  ;;  %vm3346_vm15 = vmpackc.low %vm3314_vm7, %vm3314_vm7 }
 0x362   : > { %3437 = vrot.lane.b32.xlu0 %v3371_v1, %s7280_s20 }
 0x365   : > { %v3226_v10 = vpop.permute.xlu1 %3225  ;;  %v3232_v17 = vpop.permute.xlu0 %3231 }
 0x366   : > { %vm3310_vm12 = vcmp.eq.s32.totalorder %v3226_v10, 1  ;;  %vm3312_vm11 = vcmp.eq.s32.totalorder %v3232_v17, 1  ;;  %v3247_v2 = vpop.permute.xlu2 %3246  ;;  %v7240_v10 = vld [vmem:[%s7544_s6 + $0x24] sm:$0xf] }
 0x367   : > { %vm3342_vm5 = vmpackc.low %vm3310_vm12, %vm3310_vm12  ;;  %v3378_v17 = vsel %vm3346_vm15, %v7240_v10, 0  ;;  %vm3317_vm8 = vcmp.eq.s32.totalorder %v3247_v2, 1  ;;  %v7244_v10 = vld [vmem:[%s7544_s6 + $0x2c] sm:$0xf] }
 0x368   : > { %v3374_v39 = vsel %vm3342_vm5, %v7238_v50, 0  ;;  %vm3344_vm10 = vmpackc.low %vm3312_vm11, %vm3312_vm11 }
 0x369   : > { %v3376_v43 = vsel %vm3344_vm10, %v7239_v54, 0  ;;  %3445 = vrot.lane.b32.xlu1 %v3375_v36, %s7280_s20  ;;  %v7242_v36 = vld [vmem:[%s7544_s6 + $0x28] sm:$0xf]  ;;  %vm3349_vm9 = vmpackc.low %vm3317_vm8, %vm3317_vm8 }
 0x36a   : > { %3443 = vrot.lane.b32.xlu0 %v3374_v39, %s7280_s20  ;;  %3447 = vrot.lane.b32.xlu2 %v3376_v43, %s7280_s20 }
 0x36d   : > { %v3235_v1 = vpop.permute.xlu1 %3234  ;;  %v3241_v16 = vpop.permute.xlu0 %3240 }
 0x36e   : > { %vm3313_vm14 = vcmp.eq.s32.totalorder %v3235_v1, 1  ;;  %vm3315_vm13 = vcmp.eq.s32.totalorder %v3241_v16, 1  ;;  %v3256_v31 = vpop.permute.xlu2 %3255  ;;  %v7243_v1 = vld [vmem:[%s7544_s6 + $0x30] sm:$0xf] }
 0x36f   : > { %vm3345_vm4 = vmpackc.low %vm3313_vm14, %vm3313_vm14  ;;  %v3381_v16 = vsel %vm3349_vm9, %v7243_v1, 0  ;;  %vm3320_vm5 = vcmp.eq.s32.totalorder %v3256_v31, 1  ;;  %v7247_v1 = vld [vmem:[%s7544_s6 + $0x38] sm:$0xf] }
 0x370   : > { %v3377_v50 = vsel %vm3345_vm4, %v7241_v59, 0  ;;  %vm3347_vm2 = vmpackc.low %vm3315_vm13, %vm3315_vm13 }
 0x371   : > { %v3379_v47 = vsel %vm3347_vm2, %v7242_v36, 0  ;;  %3451 = vrot.lane.b32.xlu1 %v3378_v17, %s7280_s20  ;;  %v7245_v17 = vld [vmem:[%s7544_s6 + $0x34] sm:$0xf]  ;;  %vm3352_vm10 = vmpackc.low %vm3320_vm5, %vm3320_vm5 }
 0x372   : > { %3449 = vrot.lane.b32.xlu0 %v3377_v50, %s7280_s20  ;;  %3453 = vrot.lane.b32.xlu2 %v3379_v47, %s7280_s20 }
 0x375   : > { %v3244_v39 = vpop.permute.xlu1 %3243  ;;  %v3250_v43 = vpop.permute.xlu0 %3249 }
 0x376   : > { %vm3316_vm6 = vcmp.eq.s32.totalorder %v3244_v39, 1  ;;  %vm3318_vm1 = vcmp.eq.s32.totalorder %v3250_v43, 1  ;;  %v3265_v54 = vpop.permute.xlu2 %3264  ;;  %v7246_v39 = vld [vmem:[%s7544_s6 + $0x3c] sm:$0xf] }
 0x377   : > { %vm3348_vm12 = vmpackc.low %vm3316_vm6, %vm3316_vm6  ;;  %v3384_v43 = vsel %vm3352_vm10, %v7246_v39, 0  ;;  %vm3323_vm4 = vcmp.eq.s32.totalorder %v3265_v54, 1  ;;  %v7281_v54 = vmov 5  }
 0x378   : > { %v3380_v59 = vsel %vm3348_vm12, %v7244_v10, 0  ;;  %vm3350_vm11 = vmpackc.low %vm3318_vm1, %vm3318_vm1  ;;  %7220 = vset.pattern.permute.xlu1 %v7281_v54  ;;  %7219 = vset.pattern.permute.xlu0 %v7281_v54 }
 0x379   : > { %v3382_v2 = vsel %vm3350_vm11, %v7245_v17, 0  ;;  %3457 = vrot.lane.b32.xlu1 %v3381_v16, %s7280_s20  ;;  %v7248_v16 = vld [vmem:[%s7544_s6 + $0x40] sm:$0xf]  ;;  %vm3355_vm2 = vmpackc.low %vm3323_vm4, %vm3323_vm4  ;;  %7221 = vset.pattern.permute.xlu2 %v7281_v54 }
 0x37a   : > { %3455 = vrot.lane.b32.xlu0 %v3380_v59, %s7280_s20  ;;  %3459 = vrot.lane.b32.xlu2 %v3382_v2, %s7280_s20  ;;  %v7249_v2 = vld [vmem:[%s7544_s6 + $0x48] sm:$0xf]  ;;  %v7255_v54 = vld [vmem:[%s7544_s6 + $0x60] sm:$0xf] }
 0x37d   : > { %v3253_v50 = vpop.permute.xlu1 %3252  ;;  %v3259_v36 = vpop.permute.xlu0 %3258 }
 0x37e   : > { %vm3319_vm7 = vcmp.eq.s32.totalorder %v3253_v50, 1  ;;  %vm3321_vm15 = vcmp.eq.s32.totalorder %v3259_v36, 1  ;;  %v3274_v47 = vpop.permute.xlu2 %3273  ;;  %v3387_v50 = vsel %vm3355_vm2, %v7249_v2, 0  ;;  %v7250_v36 = vld [vmem:[%s7544_s6 + $0x44] sm:$0xf] }
 0x37f   : > { %vm3351_vm14 = vmpackc.low %vm3319_vm7, %vm3319_vm7  ;;  %vm3326_vm12 = vcmp.eq.s32.totalorder %v3274_v47, 1  ;;  %v7253_v2 = vld [vmem:[%s7544_s6 + $0x50] sm:$0xf] }
 0x380   : > { %v3383_v10 = vsel %vm3351_vm14, %v7247_v1, 0  ;;  %vm3353_vm13 = vmpackc.low %vm3321_vm15, %vm3321_vm15 }
 0x381   : > { %v3385_v31 = vsel %vm3353_vm13, %v7248_v16, 0  ;;  %3463 = vrot.lane.b32.xlu1 %v3384_v43, %s7280_s20  ;;  %v7251_v16 = vld [vmem:[%s7544_s6 + $0x4c] sm:$0xf]  ;;  %vm3358_vm11 = vmpackc.low %vm3326_vm12, %vm3326_vm12 }
 0x382   : > { %3461 = vrot.lane.b32.xlu0 %v3383_v10, %s7280_s20  ;;  %3465 = vrot.lane.b32.xlu2 %v3385_v31, %s7280_s20 }
 0x385   : > { %v3262_v59 = vpop.permute.xlu1 %3261  ;;  %v3268_v17 = vpop.permute.xlu0 %3267 }
 0x386   : > { %vm3322_vm8 = vcmp.eq.s32.totalorder %v3262_v59, 1  ;;  %vm3324_vm9 = vcmp.eq.s32.totalorder %v3268_v17, 1  ;;  %v3283_v1 = vpop.permute.xlu2 %3282  ;;  %v7252_v59 = vld [vmem:[%s7544_s6 + $0x54] sm:$0xf] }
 0x387   : > { %vm3354_vm6 = vmpackc.low %vm3322_vm8, %vm3322_vm8  ;;  %v3390_v17 = vsel %vm3358_vm11, %v7252_v59, 0  ;;  %vm3329_vm14 = vcmp.eq.s32.totalorder %v3283_v1, 1 }
 0x388   : > { %v3386_v39 = vsel %vm3354_vm6, %v7250_v36, 0  ;;  %vm3356_vm1 = vmpackc.low %vm3324_vm9, %vm3324_vm9 }
 0x389   : > { %v3388_v43 = vsel %vm3356_vm1, %v7251_v16, 0  ;;  %3469 = vrot.lane.b32.xlu1 %v3387_v50, %s7280_s20  ;;  %v7254_v50 = vld [vmem:[%s7544_s6 + $0x58] sm:$0xf]  ;;  %vm3361_vm13 = vmpackc.low %vm3329_vm14, %vm3329_vm14 }
 0x38a   : > { %3467 = vrot.lane.b32.xlu0 %v3386_v39, %s7280_s20  ;;  %3471 = vrot.lane.b32.xlu2 %v3388_v43, %s7280_s20 }
 0x38d   : > { %v3271_v10 = vpop.permute.xlu1 %3270  ;;  %v3277_v31 = vpop.permute.xlu0 %3276 }
 0x38e   : > { %vm3325_vm5 = vcmp.eq.s32.totalorder %v3271_v10, 1  ;;  %vm3327_vm10 = vcmp.eq.s32.totalorder %v3277_v31, 1  ;;  %v3292_v39 = vpop.permute.xlu2 %3291  ;;  %v3393_v10 = vsel %vm3361_vm13, %v7255_v54, 0  ;;  %v7256_v31 = vld [vmem:[%s7544_s6 + $0x5c] sm:$0xf] }
 0x38f   : > { %vm3357_vm7 = vmpackc.low %vm3325_vm5, %vm3325_vm5  ;;  %vm3332_vm6 = vcmp.eq.s32.totalorder %v3292_v39, 1 }
 0x390   : > { %v3389_v47 = vsel %vm3357_vm7, %v7253_v2, 0  ;;  %vm3359_vm15 = vmpackc.low %vm3327_vm10, %vm3327_vm10 }
 0x391   : > { %v3391_v36 = vsel %vm3359_vm15, %v7254_v50, 0  ;;  %3475 = vrot.lane.b32.xlu1 %v3390_v17, %s7280_s20  ;;  %v7257_v17 = vld [vmem:[%s7544_s6 + $0x64] sm:$0xf]  ;;  %vm3364_vm1 = vmpackc.low %vm3332_vm6, %vm3332_vm6  ;;  %vm3529_vm15 = vcmask 158848  }
 0x392   : > { %3473 = vrot.lane.b32.xlu0 %v3389_v47, %s7280_s20  ;;  %3477 = vrot.lane.b32.xlu2 %v3391_v36, %s7280_s20  ;;  %v7258_v36 = vld [vmem:[%s7544_s6 + $0x6c] sm:$0xf] }
 0x395   : > { %v3280_v16 = vpop.permute.xlu1 %3279  ;;  %v3286_v43 = vpop.permute.xlu0 %3285 }
 0x396   : > { %vm3328_vm4 = vcmp.eq.s32.totalorder %v3280_v16, 1  ;;  %vm3330_vm2 = vcmp.eq.s32.totalorder %v3286_v43, 1  ;;  %v3301_v2 = vpop.permute.xlu2 %3300  ;;  %v3396_v16 = vsel %vm3364_vm1, %v7258_v36, 0  ;;  %v7259_v43 = vld [vmem:[%s7544_s6 + $0x68] sm:$0xf] }
 0x397   : > { %vm3360_vm8 = vmpackc.low %vm3328_vm4, %vm3328_vm4  ;;  %vm3335_vm7 = vcmp.eq.s32.totalorder %v3301_v2, 1  ;;  %v7263_v2 = vld [vmem:[%s7544_s6 + $0x7c] sm:$0xf] }
 0x398   : > { %v3392_v59 = vsel %vm3360_vm8, %v7256_v31, 0  ;;  %vm3362_vm9 = vmpackc.low %vm3330_vm2, %vm3330_vm2 }
 0x399   : > { %v3394_v1 = vsel %vm3362_vm9, %v7257_v17, 0  ;;  %3481 = vrot.lane.b32.xlu1 %v3393_v10, %s7280_s20  ;;  %v7260_v10 = vld [vmem:[%s7544_s6 + $0x70] sm:$0xf]  ;;  %vm3367_vm14 = vmpackc.low %vm3335_vm7, %vm3335_vm7 }
 0x39a   : > { %3479 = vrot.lane.b32.xlu0 %v3392_v59, %s7280_s20  ;;  %3483 = vrot.lane.b32.xlu2 %v3394_v1, %s7280_s20  ;;  %v7261_v1 = vld [vmem:[%s7544_s6 + $0x78] sm:$0xf] }
 0x39d   : > { %v3289_v47 = vpop.permute.xlu1 %3288  ;;  %v3295_v50 = vpop.permute.xlu0 %3294 }
 0x39e   : > { %vm3331_vm12 = vcmp.eq.s32.totalorder %v3289_v47, 1  ;;  %vm3333_vm11 = vcmp.eq.s32.totalorder %v3295_v50, 1  ;;  %v3399_v47 = vsel %vm3367_vm14, %v7261_v1, 0  ;;  %v7262_v50 = vld [vmem:[%s7544_s6 + $0x74] sm:$0xf]  ;;  %s7282_s6 = smov 20  }
 0x39f   : > { %vm3363_vm5 = vmpackc.low %vm3331_vm12, %vm3331_vm12 }
 0x3a0   : > { %v3395_v54 = vsel %vm3363_vm5, %v7259_v43, 0  ;;  %vm3365_vm10 = vmpackc.low %vm3333_vm11, %vm3333_vm11 }
 0x3a1   : > { %v3397_v31 = vsel %vm3365_vm10, %v7260_v10, 0  ;;  %3487 = vrot.lane.b32.xlu1 %v3396_v16, %s7280_s20 }
 0x3a2   : > { %3485 = vrot.lane.b32.xlu0 %v3395_v54, %s7280_s20  ;;  %3489 = vrot.lane.b32.xlu2 %v3397_v31, %s7280_s20 }
 0x3a4   : > { %v3436_v39 = vpop.permute.xlu2 %3435 }
 0x3a5   : > { %v3298_v59 = vpop.permute.xlu1 %3297  ;;  %v3304_v17 = vpop.permute.xlu0 %3303  ;;  %3531 = vst.msk [vmem:[#allocation2 + $0x4] sm:$0xf] %vm3529_vm15, %v3436_v39 }
 0x3a6   : > { %vm3334_vm13 = vcmp.eq.s32.totalorder %v3298_v59, 1  ;;  %vm3336_vm4 = vcmp.eq.s32.totalorder %v3304_v17, 1 }
 0x3a7   : > { %vm3366_vm2 = vmpackc.low %vm3334_vm13, %vm3334_vm13 }
 0x3a8   : > { %v3398_v36 = vsel %vm3366_vm2, %v7262_v50, 0  ;;  %vm3368_vm8 = vmpackc.low %vm3336_vm4, %vm3336_vm4 }
 0x3a9   : > { %v3400_v16 = vsel %vm3368_vm8, %v7263_v2, 0  ;;  %3493 = vrot.lane.b32.xlu1 %v3399_v47, %s7280_s20 }
 0x3aa   : > { %3491 = vrot.lane.b32.xlu0 %v3398_v36, %s7280_s20  ;;  %3495 = vrot.lane.b32.xlu2 %v3400_v16, %s7280_s20 }
 0x3ac   : > { %v3442_v43 = vpop.permute.xlu2 %3441 }
 0x3ad   : > { %3534 = vst.msk [vmem:[#allocation2 + $0x10] sm:$0xf] %vm3529_vm15, %v3442_v43 }
 0x3b1   : > { %3668 = vperm.xlu1 %7220, %v9226_v8  }
 0x3b2   : > { %3665 = vperm.xlu0 %7219, %v9205_v51   ;;  %3671 = vperm.xlu2 %7221, %v9223_v49  }
 0x3b9   : > { %3674 = vperm.xlu1 %7220, %v9220_v46  }
 0x3ba   : > { %3680 = vperm.xlu0 %7219, %v9242_v14   ;;  %3677 = vperm.xlu2 %7221, %v9248_v30  }
 0x3c1   : > { %3683 = vperm.xlu1 %7220, %v9270_v9  }
 0x3c2   : > { %3689 = vperm.xlu0 %7219, %v9264_v34   ;;  %3686 = vperm.xlu2 %7221, %v9245_v58  }
 0x3c4   : > { %v3448_v54 = vpop.permute.xlu2 %3447 }
 0x3c5   : > { %3537 = vst.msk [vmem:[#allocation2 + $0x1c] sm:$0xf] %vm3529_vm15, %v3448_v54 }
 0x3c9   : > { %3692 = vperm.xlu1 %7220, %v9292_v24  }
 0x3ca   : > { %3698 = vperm.xlu0 %7219, %v9286_v61   ;;  %3695 = vperm.xlu2 %7221, %v9267_v37  }
 0x3cb   : > { %v3434_v51 = vpop.permute.xlu1 %3433 }
 0x3cc   : > { %3530 = vst.msk [vmem:[#allocation2] sm:$0xf] %vm3529_vm15, %v3434_v51  ;;  %v3454_v46 = vpop.permute.xlu2 %3453 }
 0x3cd   : > { %3540 = vst.msk [vmem:[#allocation2 + $0x28] sm:$0xf] %vm3529_vm15, %v3454_v46 }
 0x3d1   : > { %3701 = vperm.xlu1 %7220, %v9316_v19  }
 0x3d2   : > { %3707 = vperm.xlu0 %7219, %v9310_v57   ;;  %3704 = vperm.xlu2 %7221, %v9289_v52  }
 0x3d3   : > { %v3440_v49 = vpop.permute.xlu1 %3439 }
 0x3d4   : > { %3533 = vst.msk [vmem:[#allocation2 + $0xc] sm:$0xf] %vm3529_vm15, %v3440_v49  ;;  %v3438_v8 = vpop.permute.xlu0 %3437  ;;  %v3460_v14 = vpop.permute.xlu2 %3459 }
 0x3d5   : > { %3532 = vst.msk [vmem:[#allocation2 + $0x8] sm:$0xf] %vm3529_vm15, %v3438_v8 }
 0x3d6   : > { %3543 = vst.msk [vmem:[#allocation2 + $0x34] sm:$0xf] %vm3529_vm15, %v3460_v14 }
 0x3d9   : > { %3710 = vperm.xlu1 %7220, %v9340_v25  }
 0x3da   : > { %3716 = vperm.xlu0 %7219, %v9334_v53   ;;  %3713 = vperm.xlu2 %7221, %v9313_v48  }
 0x3db   : > { %v3446_v58 = vpop.permute.xlu1 %3445 }
 0x3dc   : > { %v3444_v30 = vpop.permute.xlu0 %3443  ;;  %3536 = vst.msk [vmem:[#allocation2 + $0x18] sm:$0xf] %vm3529_vm15, %v3446_v58  ;;  %v3466_v34 = vpop.permute.xlu2 %3465 }
 0x3dd   : > { %3535 = vst.msk [vmem:[#allocation2 + $0x14] sm:$0xf] %vm3529_vm15, %v3444_v30 }
 0x3de   : > { %3546 = vst.msk [vmem:[#allocation2 + $0x40] sm:$0xf] %vm3529_vm15, %v3466_v34 }
 0x3e1   : > { %3719 = vperm.xlu1 %7220, %v9364_v18  }
 0x3e2   : > { %3725 = vperm.xlu0 %7219, %v9358_v56   ;;  %3722 = vperm.xlu2 %7221, %v9337_v44  }
 0x3e3   : > { %v3452_v37 = vpop.permute.xlu1 %3451 }
 0x3e4   : > { %v3450_v9 = vpop.permute.xlu0 %3449  ;;  %3539 = vst.msk [vmem:[#allocation2 + $0x24] sm:$0xf] %vm3529_vm15, %v3452_v37  ;;  %v3472_v61 = vpop.permute.xlu2 %3471 }
 0x3e5   : > { %3538 = vst.msk [vmem:[#allocation2 + $0x20] sm:$0xf] %vm3529_vm15, %v3450_v9 }
 0x3e6   : > { %3549 = vst.msk [vmem:[#allocation2 + $0x4c] sm:$0xf] %vm3529_vm15, %v3472_v61 }
 0x3e9   : > { %3728 = vperm.xlu1 %7220, %v9388_v11  }
 0x3ea   : > { %3734 = vperm.xlu0 %7219, %v9382_v55   ;;  %3731 = vperm.xlu2 %7221, %v9361_v33  }
 0x3eb   : > { %v3458_v52 = vpop.permute.xlu1 %3457 }
 0x3ec   : > { %v3456_v24 = vpop.permute.xlu0 %3455  ;;  %3542 = vst.msk [vmem:[#allocation2 + $0x30] sm:$0xf] %vm3529_vm15, %v3458_v52  ;;  %v3478_v57 = vpop.permute.xlu2 %3477 }
 0x3ed   : > { %3541 = vst.msk [vmem:[#allocation2 + $0x2c] sm:$0xf] %vm3529_vm15, %v3456_v24 }
 0x3ee   : > { %3552 = vst.msk [vmem:[#allocation2 + $0x58] sm:$0xf] %vm3529_vm15, %v3478_v57 }
 0x3f1   : > { %3737 = vperm.xlu1 %7220, %v9412_v3  }
 0x3f2   : > { %3743 = vperm.xlu0 %7219, %v9406_v0   ;;  %3740 = vperm.xlu2 %7221, %v9385_v28  }
 0x3f3   : > { %v3464_v48 = vpop.permute.xlu1 %3463 }
 0x3f4   : > { %v3462_v19 = vpop.permute.xlu0 %3461  ;;  %3545 = vst.msk [vmem:[#allocation2 + $0x3c] sm:$0xf] %vm3529_vm15, %v3464_v48  ;;  %v3484_v53 = vpop.permute.xlu2 %3483 }
 0x3f5   : > { %3544 = vst.msk [vmem:[#allocation2 + $0x38] sm:$0xf] %vm3529_vm15, %v3462_v19 }
 0x3f6   : > { %3555 = vst.msk [vmem:[#allocation2 + $0x64] sm:$0xf] %vm3529_vm15, %v3484_v53 }
 0x3f9   : > { %3746 = vperm.xlu1 %7220, %v9436_v42  }
 0x3fa   : > { %3752 = vperm.xlu0 %7219, %v9430_v5   ;;  %3749 = vperm.xlu2 %7221, %v9409_v15  }
 0x3fb   : > { %v3470_v44 = vpop.permute.xlu1 %3469 }
 0x3fc   : > { %v3468_v25 = vpop.permute.xlu0 %3467  ;;  %3548 = vst.msk [vmem:[#allocation2 + $0x48] sm:$0xf] %vm3529_vm15, %v3470_v44  ;;  %v3490_v56 = vpop.permute.xlu2 %3489 }
 0x3fd   : > { %3547 = vst.msk [vmem:[#allocation2 + $0x44] sm:$0xf] %vm3529_vm15, %v3468_v25 }
 0x3fe   : > { %3558 = vst.msk [vmem:[#allocation2 + $0x70] sm:$0xf] %vm3529_vm15, %v3490_v56 }
 0x401   : > { %3755 = vperm.xlu1 %7220, %v9448_v63  }
 0x402   : > { %3758 = vperm.xlu2 %7221, %v9433_v40  }
 0x403   : > { %v3476_v33 = vpop.permute.xlu1 %3475 }
 0x404   : > { %v3474_v18 = vpop.permute.xlu0 %3473  ;;  %3551 = vst.msk [vmem:[#allocation2 + $0x54] sm:$0xf] %vm3529_vm15, %v3476_v33  ;;  %v3496_v55 = vpop.permute.xlu2 %3495 }
 0x405   : > { %3550 = vst.msk [vmem:[#allocation2 + $0x50] sm:$0xf] %vm3529_vm15, %v3474_v18 }
 0x406   : > { %3561 = vst.msk [vmem:[#allocation2 + $0x7c] sm:$0xf] %vm3529_vm15, %v3496_v55 }
 0x40b   : > { %v3482_v28 = vpop.permute.xlu1 %3481 }
 0x40c   : > { %v3480_v11 = vpop.permute.xlu0 %3479  ;;  %3554 = vst.msk [vmem:[#allocation2 + $0x60] sm:$0xf] %vm3529_vm15, %v3482_v28  ;;  %v3672_v0 = vpop.permute.xlu2 %3671 }
 0x40d   : > { %3553 = vst.msk [vmem:[#allocation2 + $0x5c] sm:$0xf] %vm3529_vm15, %v3480_v11  ;;  %vm3762_vm9 = vcmp.eq.s32.totalorder %v3672_v0, 1 }
 0x40e   : > { %vm3794_vm1 = vmpackc.low %vm3762_vm9, %vm3762_vm9 }
 0x40f   : > { %v3826_v50 = vsel %vm3794_vm1, 65537, %v11146_v38 }
 0x410   : > { %v3858_v54 = vunpack.c.l.b16 %v3826_v50 }
 0x412   : > { %v6911_v34 = vunpack.i.l.s16 %v3858_v54 }
 0x413   : > { %v3488_v15 = vpop.permute.xlu1 %3487 }
 0x414   : > { %v3486_v3 = vpop.permute.xlu0 %3485  ;;  %3557 = vst.msk [vmem:[#allocation2 + $0x6c] sm:$0xf] %vm3529_vm15, %v3488_v15  ;;  %v3678_v5 = vpop.permute.xlu2 %3677 }
 0x415   : > { %3556 = vst.msk [vmem:[#allocation2 + $0x68] sm:$0xf] %vm3529_vm15, %v3486_v3  ;;  %vm3764_vm6 = vcmp.eq.s32.totalorder %v3678_v5, 1 }
 0x416   : > { %vm3796_vm12 = vmpackc.low %vm3764_vm6, %vm3764_vm6 }
 0x417   : > { %v3828_v36 = vsel %vm3796_vm12, 65537, %v11146_v38 }
 0x418   : > { %v3860_v51 = vunpack.c.l.b16 %v3828_v36 }
 0x41a   : > { %v6913_v37 = vunpack.i.l.s16 %v3860_v51 }
 0x41b   : > { %v3494_v40 = vpop.permute.xlu1 %3493 }
 0x41c   : > { %v3492_v42 = vpop.permute.xlu0 %3491  ;;  %3560 = vst.msk [vmem:[#allocation2 + $0x78] sm:$0xf] %vm3529_vm15, %v3494_v40  ;;  %v3687_v63 = vpop.permute.xlu2 %3686 }
 0x41d   : > { %3559 = vst.msk [vmem:[#allocation2 + $0x74] sm:$0xf] %vm3529_vm15, %v3492_v42  ;;  %vm3767_vm4 = vcmp.eq.s32.totalorder %v3687_v63, 1 }
 0x41e   : > { %vm3799_vm1 = vmpackc.low %vm3767_vm4, %vm3767_vm4 }
 0x41f   : > { %v3831_v19 = vsel %vm3799_vm1, 65537, %v11146_v38 }
 0x420   : > { %v3863_v33 = vunpack.c.l.b16 %v3831_v19 }
 0x422   : > { %v6916_v42 = vunpack.i.l.s16 %v3863_v33 }
 0x423   : > { %v3669_v10 = vpop.permute.xlu1 %3668 }
 0x424   : > { %v3666_v31 = vpop.permute.xlu0 %3665  ;;  %vm3761_vm11 = vcmp.eq.s32.totalorder %v3669_v10, 1  ;;  %v3696_v39 = vpop.permute.xlu2 %3695 }
 0x425   : > { %vm3760_vm5 = vcmp.eq.s32.totalorder %v3666_v31, 1  ;;  %vm3793_vm10 = vmpackc.low %vm3761_vm11, %vm3761_vm11  ;;  %vm3770_vm12 = vcmp.eq.s32.totalorder %v3696_v39, 1  ;;  %vm3922_vm11 = vcmp.ne.s32.totalorder %v6913_v37, %v7591_v20 }
 0x426   : > { %vm3792_vm7 = vmpackc.low %vm3760_vm5, %vm3760_vm5  ;;  %v3825_v59 = vsel %vm3793_vm10, 65537, %v11146_v38 }
 0x427   : > { %v3824_v17 = vsel %vm3792_vm7, 65537, %v11146_v38  ;;  %v3857_v1 = vunpack.c.l.b16 %v3825_v59  ;;  %vm9600_vm5 = vmpackc.low %vm3770_vm12, %vm3770_vm12  ;;  %vm3915_vm7 = vcmp.ne.s32.totalorder %v6911_v34, %v7591_v20 }
 0x428   : > { %v3856_v47 = vunpack.c.l.b16 %v3824_v17  ;;  %v3834_v3 = vsel %vm9600_vm5, 65537, %v11146_v38 }
 0x429   : > { %v6910_v2 = vunpack.i.l.s16 %v3857_v1  ;;  %v3866_v17 = vunpack.c.l.b16 %v3834_v3 }
 0x42a   : > { %v6909_v16 = vunpack.i.l.s16 %v3856_v47 }
 0x42b   : > { %vm3909_vm15 = vcmp.ne.s32.totalorder %v6910_v2, %v7602_v26  ;;  %v3675_v43 = vpop.permute.xlu1 %3674 }
 0x42c   : > { %vm3908_vm14 = vcmp.ne.s32.totalorder %v6909_v16, %v7591_v20  ;;  %v3681_v46 = vpop.permute.xlu0 %3680  ;;  %vm3763_vm13 = vcmp.eq.s32.totalorder %v3675_v43, 1  ;;  %v3705_v49 = vpop.permute.xlu2 %3704 }
 0x42d   : > { %vm3910_vm2 = vmpackc.low %vm3909_vm15, %vm3908_vm14  ;;  %vm3765_vm8 = vcmp.eq.s32.totalorder %v3681_v46, 1  ;;  %v6919_v46 = vunpack.i.l.s16 %v3866_v17 }
 0x42e   : > { %v4016_v8 = vsel %vm3910_vm2, %v8617_v4, 0  ;;  %vm3797_vm9 = vmpackc.low %vm3765_vm8, %vm3765_vm8 }
 0x42f   : > { %v3829_v14 = vsel %vm3797_vm9, 65537, %v11146_v38  ;;  %vm3795_vm6 = vmpackc.low %vm3763_vm13, %vm3763_vm13  ;;  %v4049_v58 = vunpack.c.h.b16 %v4016_v8  ;;  %v4048_v30 = vunpack.c.l.b16 %v4016_v8 }
 0x430   : > { %v3861_v9 = vunpack.c.l.b16 %v3829_v14  ;;  %v3827_v61 = vsel %vm3795_vm6, 65537, %v11146_v38  ;;  %vm3773_vm6 = vcmp.eq.s32.totalorder %v3705_v49, 1 }
 0x431   : > { %v3859_v52 = vunpack.c.l.b16 %v3827_v61  ;;  %v4081_v24 = vpack.c.b16 %v4049_v58, %v4049_v58  ;;  %v4080_v57 = vpack.c.b16 %v4048_v30, %v4048_v30  ;;  %vm9615_vm1 = vmpackc.low %vm3773_vm6, %vm3773_vm6 }
 0x432   : > { %v6914_v48 = vunpack.i.l.s16 %v3861_v9  ;;  %v3837_v14 = vsel %vm9615_vm1, 65537, %v11146_v38 }
 0x433   : > { %v6912_v4 = vunpack.i.l.s16 %v3859_v52  ;;  %4114 = vrot.lane.b32.xlu1 %v4081_v24, %s7282_s6  ;;  %4112 = vrot.lane.b32.xlu0 %v4080_v57, %s7282_s6  ;;  %v3684_v53 = vpop.permute.xlu1 %3683 }
 0x434   : > { %vm3923_vm10 = vcmp.ne.s32.totalorder %v6914_v48, %v7602_v26  ;;  %v3690_v25 = vpop.permute.xlu0 %3689  ;;  %v3714_v56 = vpop.permute.xlu2 %3713  ;;  %vm3766_vm4 = vcmp.eq.s32.totalorder %v3684_v53, 1  ;;  %v3869_v48 = vunpack.c.l.b16 %v3837_v14 }
 0x435   : > { %vm3924_vm15 = vmpackc.low %vm3923_vm10, %vm3922_vm11  ;;  %vm3916_vm14 = vcmp.ne.s32.totalorder %v6912_v4, %v7602_v26  ;;  %vm3768_vm13 = vcmp.eq.s32.totalorder %v3690_v25, 1  ;;  %vm3930_vm10 = vcmp.ne.s32.totalorder %v6916_v42, %v7602_v26 }
 0x436   : > { %v4018_v18 = vsel %vm3924_vm15, %v8641_v62, 0  ;;  %vm3917_vm2 = vmpackc.low %vm3916_vm14, %vm3915_vm7  ;;  %v6922_v33 = vunpack.i.l.s16 %v3869_v48 }
 0x437   : > { %v4017_v55 = vsel %vm3917_vm2, %v8608_v22, 0  ;;  %vm3800_vm8 = vmpackc.low %vm3768_vm13, %vm3768_vm13  ;;  %v4052_v28 = vunpack.c.l.b16 %v4018_v18  ;;  %v4053_v16 = vunpack.c.h.b16 %v4018_v18  ;;  %vm3776_vm13 = vcmp.eq.s32.totalorder %v3714_v56, 1 }
 0x438   : > { %v3832_v11 = vsel %vm3800_vm8, 65537, %v11146_v38  ;;  %vm3798_vm9 = vmpackc.low %vm3766_vm4, %vm3766_vm4  ;;  %v4051_v0 = vunpack.c.h.b16 %v4017_v55  ;;  %v4050_v15 = vunpack.c.l.b16 %v4017_v55 }
 0x439   : > { %v3830_v5 = vsel %vm3798_vm9, 65537, %v11146_v38  ;;  %v4084_v40 = vpack.c.b16 %v4052_v28, %v4052_v28  ;;  %v3864_v39 = vunpack.c.l.b16 %v3832_v11  ;;  %v4085_v9 = vpack.c.b16 %v4053_v16, %v4053_v16  ;;  %vm9630_vm2 = vmpackc.low %vm3776_vm13, %vm3776_vm13 }
 0x43a   : > { %v3862_v63 = vunpack.c.l.b16 %v3830_v5  ;;  %v4083_v10 = vpack.c.b16 %v4051_v0, %v4051_v0  ;;  %v4082_v31 = vpack.c.b16 %v4050_v15, %v4050_v15  ;;  %vm3943_vm9 = vcmp.ne.s32.totalorder %v6919_v46, %v7591_v20 }
 0x43b   : > { %4120 = vrot.lane.b32.xlu1 %v4084_v40, %s7282_s6  ;;  %v3693_v59 = vpop.permute.xlu1 %3692  ;;  %v6917_v43 = vunpack.i.l.s16 %v3864_v39  ;;  %v3840_v5 = vsel %vm9630_vm2, 65537, %v11146_v38 }
 0x43c   : > { %v6915_v47 = vunpack.i.l.s16 %v3862_v63  ;;  %4118 = vrot.lane.b32.xlu0 %v4083_v10, %s7282_s6  ;;  %4116 = vrot.lane.b32.xlu2 %v4082_v31, %s7282_s6  ;;  %v3699_v50 = vpop.permute.xlu0 %3698  ;;  %vm3769_vm12 = vcmp.eq.s32.totalorder %v3693_v59, 1  ;;  %v3723_v2 = vpop.permute.xlu2 %3722  ;;  %v3872_v31 = vunpack.c.l.b16 %v3840_v5 }
 0x43d   : > { %vm3771_vm11 = vcmp.eq.s32.totalorder %v3699_v50, 1  ;;  %vm3801_vm5 = vmpackc.low %vm3769_vm12, %vm3769_vm12  ;;  %vm3936_vm4 = vcmp.ne.s32.totalorder %v6917_v43, %v7591_v20 }
 0x43e   : > { %vm3929_vm7 = vcmp.ne.s32.totalorder %v6915_v47, %v7591_v20  ;;  %vm3803_vm15 = vmpackc.low %vm3771_vm11, %vm3771_vm11  ;;  %v3833_v36 = vsel %vm3801_vm5, 65537, %v11146_v38  ;;  %v6925_v43 = vunpack.i.l.s16 %v3872_v31 }
 0x43f   : > { %vm3931_vm14 = vmpackc.low %vm3930_vm10, %vm3929_vm7  ;;  %v3835_v54 = vsel %vm3803_vm15, 65537, %v11146_v38  ;;  %v3865_v51 = vunpack.c.l.b16 %v3833_v36  ;;  %vm3779_vm15 = vcmp.eq.s32.totalorder %v3723_v2, 1 }
 0x440   : > { %v4019_v49 = vsel %vm3931_vm14, %v8681_v6, 0  ;;  %v3867_v8 = vunpack.c.l.b16 %v3835_v54  ;;  %vm3811_vm14 = vmpackc.low %vm3779_vm15, %vm3779_vm15 }
 0x441   : > { %v6918_v58 = vunpack.i.l.s16 %v3865_v51  ;;  %v4055_v30 = vunpack.c.h.b16 %v4019_v49  ;;  %v4054_v34 = vunpack.c.l.b16 %v4019_v49  ;;  %v3843_v17 = vsel %vm3811_vm14, 65537, %v11146_v38 }
 0x442   : > { %v6920_v37 = vunpack.i.l.s16 %v3867_v8  ;;  %vm3964_vm14 = vcmp.ne.s32.totalorder %v6925_v43, %v7591_v20 }
 0x443   : > { %vm3937_vm8 = vcmp.ne.s32.totalorder %v6918_v58, %v7602_v26  ;;  %v4087_v52 = vpack.c.b16 %v4055_v30, %v4055_v30  ;;  %v4086_v24 = vpack.c.b16 %v4054_v34, %v4054_v34  ;;  %v3702_v57 = vpop.permute.xlu1 %3701  ;;  %v3875_v58 = vunpack.c.l.b16 %v3843_v17 }
 0x444   : > { %vm3944_vm6 = vcmp.ne.s32.totalorder %v6920_v37, %v7602_v26  ;;  %vm3938_vm1 = vmpackc.low %vm3937_vm8, %vm3936_vm4  ;;  %4122 = vrot.lane.b32.xlu2 %v4085_v9, %s7282_s6  ;;  %v3708_v19 = vpop.permute.xlu0 %3707  ;;  %vm3772_vm12 = vcmp.eq.s32.totalorder %v3702_v57, 1  ;;  %v3732_v28 = vpop.permute.xlu2 %3731  ;;  %vm3951_vm4 = vcmp.ne.s32.totalorder %v6922_v33, %v7602_v26 }
 0x445   : > { %vm3945_vm11 = vmpackc.low %vm3944_vm6, %vm3943_vm9  ;;  %v4020_v4 = vsel %vm3938_vm1, %v8670_v60, 0  ;;  %4126 = vrot.lane.b32.xlu1 %v4087_v52, %s7282_s6  ;;  %4124 = vrot.lane.b32.xlu0 %v4086_v24, %s7282_s6  ;;  %vm3774_vm5 = vcmp.eq.s32.totalorder %v3708_v19, 1  ;;  %v6928_v48 = vunpack.i.l.s16 %v3875_v58 }
 0x446   : > { %v4021_v53 = vsel %vm3945_vm11, %v8706_v45, 0  ;;  %vm3806_vm10 = vmpackc.low %vm3774_vm5, %vm3774_vm5  ;;  %v4056_v44 = vunpack.c.l.b16 %v4020_v4  ;;  %v4057_v25 = vunpack.c.h.b16 %v4020_v4 }
 0x447   : > { %vm3804_vm7 = vmpackc.low %vm3772_vm12, %vm3772_vm12  ;;  %v4058_v56 = vunpack.c.l.b16 %v4021_v53  ;;  %v3838_v18 = vsel %vm3806_vm10, 65537, %v11146_v38  ;;  %v4059_v59 = vunpack.c.h.b16 %v4021_v53  ;;  %vm3782_vm12 = vcmp.eq.s32.totalorder %v3732_v28, 1 }
 0x448   : > { %v3836_v55 = vsel %vm3804_vm7, 65537, %v11146_v38  ;;  %v4088_v11 = vpack.c.b16 %v4056_v44, %v4056_v44  ;;  %v4089_v15 = vpack.c.b16 %v4057_v25, %v4057_v25  ;;  %v3870_v40 = vunpack.c.l.b16 %v3838_v18  ;;  %vm9657_vm5 = vmpackc.low %vm3782_vm12, %vm3782_vm12 }
 0x449   : > { %v3868_v0 = vunpack.c.l.b16 %v3836_v55  ;;  %v4090_v3 = vpack.c.b16 %v4058_v56, %v4058_v56  ;;  %v4091_v49 = vpack.c.b16 %v4059_v59, %v4059_v59  ;;  %v3846_v56 = vsel %vm9657_vm5, 65537, %v11146_v38 }
 0x44a   : > { %v6923_v1 = vunpack.i.l.s16 %v3870_v40 }
 0x44b   : > { %v6921_v42 = vunpack.i.l.s16 %v3868_v0  ;;  %v3711_v63 = vpop.permute.xlu1 %3710 }
 0x44c   : > { %4128 = vrot.lane.b32.xlu2 %v4088_v11, %s7282_s6  ;;  %v3717_v10 = vpop.permute.xlu0 %3716  ;;  %vm3775_vm13 = vcmp.eq.s32.totalorder %v3711_v63, 1  ;;  %v3741_v46 = vpop.permute.xlu2 %3740  ;;  %vm3957_vm11 = vcmp.ne.s32.totalorder %v6923_v1, %v7591_v20 }
 0x44d   : > { %vm3950_vm8 = vcmp.ne.s32.totalorder %v6921_v42, %v7591_v20  ;;  %4130 = vrot.lane.b32.xlu0 %v4089_v15, %s7282_s6  ;;  %4132 = vrot.lane.b32.xlu1 %v4090_v3, %s7282_s6  ;;  %vm3777_vm9 = vcmp.eq.s32.totalorder %v3717_v10, 1  ;;  %vm3807_vm6 = vmpackc.low %vm3775_vm13, %vm3775_vm13  ;;  %v3878_v15 = vunpack.c.l.b16 %v3846_v56 }
 0x44e   : > { %vm3952_vm2 = vmpackc.low %vm3951_vm4, %vm3950_vm8  ;;  %v3839_v39 = vsel %vm3807_vm6, 65537, %v11146_v38 }
 0x44f   : > { %v4022_v47 = vsel %vm3952_vm2, %v8745_v29, 0  ;;  %vm3809_vm1 = vmpackc.low %vm3777_vm9, %vm3777_vm9  ;;  %v3871_v50 = vunpack.c.l.b16 %v3839_v39  ;;  %vm3785_vm2 = vcmp.eq.s32.totalorder %v3741_v46, 1  ;;  %v6931_v1 = vunpack.i.l.s16 %v3878_v15 }
 0x450   : > { %v3841_v36 = vsel %vm3809_vm1, 65537, %v11146_v38  ;;  %v4061_v2 = vunpack.c.h.b16 %v4022_v47  ;;  %v4060_v16 = vunpack.c.l.b16 %v4022_v47  ;;  %vm3972_vm1 = vcmp.ne.s32.totalorder %v6928_v48, %v7602_v26  ;;  %vm9675_vm12 = vmpackc.low %vm3785_vm2, %vm3785_vm2 }
 0x451   : > { %v3873_v54 = vunpack.c.l.b16 %v3841_v36  ;;  %v6924_v51 = vunpack.i.l.s16 %v3871_v50  ;;  %v3849_v50 = vsel %vm9675_vm12, 65537, %v11146_v38 }
 0x452   : > { %v4093_v8 = vpack.c.b16 %v4061_v2, %v4061_v2  ;;  %v4092_v14 = vpack.c.b16 %v4060_v16, %v4060_v16 }
 0x453   : > { %v6926_v34 = vunpack.i.l.s16 %v3873_v54  ;;  %vm3958_vm10 = vcmp.ne.s32.totalorder %v6924_v51, %v7602_v26  ;;  %v3720_v37 = vpop.permute.xlu1 %3719 }
 0x454   : > { %vm3959_vm7 = vmpackc.low %vm3958_vm10, %vm3957_vm11  ;;  %4134 = vrot.lane.b32.xlu2 %v4091_v49, %s7282_s6  ;;  %v3726_v9 = vpop.permute.xlu0 %3725  ;;  %vm3778_vm15 = vcmp.eq.s32.totalorder %v3720_v37, 1  ;;  %v3750_v3 = vpop.permute.xlu2 %3749  ;;  %v3881_v49 = vunpack.c.l.b16 %v3849_v50 }
 0x455   : > { %vm3965_vm13 = vcmp.ne.s32.totalorder %v6926_v34, %v7602_v26  ;;  %v4023_v61 = vsel %vm3959_vm7, %v8734_v35, 0  ;;  %4138 = vrot.lane.b32.xlu1 %v4093_v8, %s7282_s6  ;;  %4136 = vrot.lane.b32.xlu0 %v4092_v14, %s7282_s6  ;;  %vm3780_vm4 = vcmp.eq.s32.totalorder %v3726_v9, 1  ;;  %vm3810_vm8 = vmpackc.low %vm3778_vm15, %vm3778_vm15  ;;  %v7283_v9 = vmov 6  }
 0x456   : > { %vm3966_vm9 = vmpackc.low %vm3965_vm13, %vm3964_vm14  ;;  %v3842_v52 = vsel %vm3810_vm8, 65537, %v11146_v38  ;;  %v4062_v24 = vunpack.c.l.b16 %v4023_v61  ;;  %v4063_v57 = vunpack.c.h.b16 %v4023_v61  ;;  %vm3788_vm13 = vcmp.eq.s32.totalorder %v3750_v3, 1  ;;  %7223 = vset.pattern.permute.xlu0 %v7283_v9  ;;  %7222 = vset.pattern.permute.xlu2 %v7283_v9 }
 0x457   : > { %v4024_v19 = vsel %vm3966_vm9, %v8777_v32, 0  ;;  %vm3812_vm6 = vmpackc.low %vm3780_vm4, %vm3780_vm4  ;;  %v3874_v4 = vunpack.c.l.b16 %v3842_v52  ;;  %7224 = vset.pattern.permute.xlu1 %v7283_v9  ;;  %v6934_v52 = vunpack.i.l.s16 %v3881_v49 }
 0x458   : > { %v3844_v53 = vsel %vm3812_vm6, 65537, %v11146_v38  ;;  %v4094_v44 = vpack.c.b16 %v4062_v24, %v4062_v24  ;;  %v4064_v25 = vunpack.c.l.b16 %v4024_v19  ;;  %v4095_v18 = vpack.c.b16 %v4063_v57, %v4063_v57  ;;  %vm9690_vm8 = vmpackc.low %vm3788_vm13, %vm3788_vm13 }
 0x459   : > { %v6927_v33 = vunpack.i.l.s16 %v3874_v4  ;;  %v3876_v11 = vunpack.c.l.b16 %v3844_v53  ;;  %v4065_v63 = vunpack.c.h.b16 %v4024_v19  ;;  %vm3985_vm6 = vcmp.ne.s32.totalorder %v6931_v1, %v7591_v20 }
 0x45a   : > { %v4096_v55 = vpack.c.b16 %v4064_v25, %v4064_v25 }
 0x45b   : > { %vm3971_vm11 = vcmp.ne.s32.totalorder %v6927_v33, %v7591_v20  ;;  %v3729_v0 = vpop.permute.xlu1 %3728  ;;  %v6929_v39 = vunpack.i.l.s16 %v3876_v11  ;;  %v4097_v54 = vpack.c.b16 %v4065_v63, %v4065_v63 }
 0x45c   : > { %vm3973_vm10 = vmpackc.low %vm3972_vm1, %vm3971_vm11  ;;  %4140 = vrot.lane.b32.xlu2 %v4094_v44, %s7282_s6  ;;  %v3735_v5 = vpop.permute.xlu0 %3734  ;;  %vm3781_vm5 = vcmp.eq.s32.totalorder %v3729_v0, 1  ;;  %v3759_v30 = vpop.permute.xlu2 %3758  ;;  %v3852_v44 = vsel %vm9690_vm8, 65537, %v11146_v38 }
 0x45d   : > { %v4025_v40 = vsel %vm3973_vm10, %v8819_v41, 0  ;;  %4142 = vrot.lane.b32.xlu0 %v4095_v18, %s7282_s6  ;;  %4144 = vrot.lane.b32.xlu1 %v4096_v55, %s7282_s6  ;;  %vm3783_vm7 = vcmp.eq.s32.totalorder %v3735_v5, 1  ;;  %vm3813_vm15 = vmpackc.low %vm3781_vm5, %vm3781_vm5  ;;  %vm3978_vm4 = vcmp.ne.s32.totalorder %v6929_v39, %v7591_v20  ;;  %v3884_v28 = vunpack.c.l.b16 %v3852_v44  ;;  %v4419_v44 = vld [vmem:[%s10979_s3 + $0x8] sm:$0xff]  ;;  %v4421_v18 = vld [vmem:[%s10979_s3 + $0x18] sm:$0xff] }
 0x45e   : > { %vm3815_vm14 = vmpackc.low %vm3783_vm7, %vm3783_vm7  ;;  %v3845_v42 = vsel %vm3813_vm15, 65537, %v11146_v38  ;;  %v4067_v10 = vunpack.c.h.b16 %v4025_v40  ;;  %v4066_v31 = vunpack.c.l.b16 %v4025_v40  ;;  %vm3791_vm15 = vcmp.eq.s32.totalorder %v3759_v30, 1 }
 0x45f   : > { %v3847_v59 = vsel %vm3815_vm14, 65537, %v11146_v38  ;;  %v3877_v17 = vunpack.c.l.b16 %v3845_v42  ;;  %vm9707_vm14 = vmpackc.low %vm3791_vm15, %vm3791_vm15 }
 0x460   : > { %v3879_v47 = vunpack.c.l.b16 %v3847_v59  ;;  %v4099_v2 = vpack.c.b16 %v4067_v10, %v4067_v10  ;;  %v4098_v16 = vpack.c.b16 %v4066_v31, %v4066_v31  ;;  %v3855_v40 = vsel %vm9707_vm14, 65537, %v11146_v38 }
 0x461   : > { %v6930_v36 = vunpack.i.l.s16 %v3877_v17  ;;  %v6937_v31 = vunpack.i.l.s16 %v3884_v28  ;;  %v3887_v50 = vunpack.c.l.b16 %v3855_v40  ;;  %v4424_v28 = vld [vmem:[%s10979_s3 + $0x30] sm:$0xff]  ;;  %v4427_v40 = vld [vmem:[%s10979_s3 + $0x48] sm:$0xff] }
 0x462   : > { %v6932_v43 = vunpack.i.l.s16 %v3879_v47 }
 0x463   : > { %vm3979_vm9 = vcmp.ne.s32.totalorder %v6930_v36, %v7602_v26  ;;  %v3738_v46 = vpop.permute.xlu1 %3737  ;;  %v6940_v51 = vunpack.i.l.s16 %v3887_v50 }
 0x464   : > { %vm3986_vm2 = vcmp.ne.s32.totalorder %v6932_v43, %v7602_v26  ;;  %vm3980_vm1 = vmpackc.low %vm3979_vm9, %vm3978_vm4  ;;  %4146 = vrot.lane.b32.xlu2 %v4097_v54, %s7282_s6  ;;  %v3744_v8 = vpop.permute.xlu0 %3743  ;;  %vm3784_vm12 = vcmp.eq.s32.totalorder %v3738_v46, 1  ;;  %vm3993_vm4 = vcmp.ne.s32.totalorder %v6934_v52, %v7602_v26 }
 0x465   : > { %vm3987_vm11 = vmpackc.low %vm3986_vm2, %vm3985_vm6  ;;  %v4026_v14 = vsel %vm3980_vm1, %v8795_v7, 0  ;;  %4150 = vrot.lane.b32.xlu1 %v4099_v2, %s7282_s6  ;;  %4148 = vrot.lane.b32.xlu0 %v4098_v16, %s7282_s6  ;;  %vm3786_vm10 = vcmp.eq.s32.totalorder %v3744_v8, 1  ;;  %v9727_v16 = vsel %vm1686_vm0, %v8877_v21, %v8562_v27  ;;  %vm4014_vm0 = vcmp.ne.s32.totalorder %v6940_v51, %v7602_v26 }
 0x466   : > { %v4027_v58 = vsel %vm3987_vm11, %v8835_v23, 0  ;;  %vm3818_vm5 = vmpackc.low %vm3786_vm10, %vm3786_vm10  ;;  %v4068_v34 = vunpack.c.l.b16 %v4026_v14  ;;  %v4069_v37 = vunpack.c.h.b16 %v4026_v14 }
 0x467   : > { %vm3816_vm7 = vmpackc.low %vm3784_vm12, %vm3784_vm12  ;;  %v4070_v61 = vunpack.c.l.b16 %v4027_v58  ;;  %v3850_v24 = vsel %vm3818_vm5, 65537, %v11146_v38  ;;  %v4071_v0 = vunpack.c.h.b16 %v4027_v58 }
 0x468   : > { %v3848_v57 = vsel %vm3816_vm7, 65537, %v11146_v38  ;;  %v4100_v48 = vpack.c.b16 %v4068_v34, %v4068_v34  ;;  %v4101_v4 = vpack.c.b16 %v4069_v37, %v4069_v37  ;;  %v3882_v25 = vunpack.c.l.b16 %v3850_v24  ;;  %v11253_v37 = vld [vmem:[#allocation52_spill] sm:$0xff] }
 0x469   : > { %v3880_v19 = vunpack.c.l.b16 %v3848_v57  ;;  %v4102_v53 = vpack.c.b16 %v4070_v61, %v4070_v61  ;;  %v4103_v17 = vpack.c.b16 %v4071_v0, %v4071_v0  ;;  %vm4006_vm7 = vcmp.ne.s32.totalorder %v6937_v31, %v7591_v20 }
 0x46a   : > { %v6935_v15 = vunpack.i.l.s16 %v3882_v25 }
 0x46b   : > { %v6933_v56 = vunpack.i.l.s16 %v3880_v19  ;;  %v3747_v33 = vpop.permute.xlu1 %3746 }
 0x46c   : > { %4152 = vrot.lane.b32.xlu2 %v4100_v48, %s7282_s6  ;;  %v3753_v55 = vpop.permute.xlu0 %3752  ;;  %vm3787_vm13 = vcmp.eq.s32.totalorder %v3747_v33, 1  ;;  %vm3999_vm12 = vcmp.ne.s32.totalorder %v6935_v15, %v7591_v20 }
 0x46d   : > { %vm3992_vm9 = vcmp.ne.s32.totalorder %v6933_v56, %v7591_v20  ;;  %4154 = vrot.lane.b32.xlu0 %v4101_v4, %s7282_s6  ;;  %4156 = vrot.lane.b32.xlu1 %v4102_v53, %s7282_s6  ;;  %vm3789_vm8 = vcmp.eq.s32.totalorder %v3753_v55, 1  ;;  %vm3819_vm6 = vmpackc.low %vm3787_vm13, %vm3787_vm13  ;;  %v4418_v4 = vld [vmem:[%s10979_s3] sm:$0xff]  ;;  %v4420_v53 = vld [vmem:[%s10979_s3 + $0x10] sm:$0xff] }
 0x46e   : > { %vm3994_vm2 = vmpackc.low %vm3993_vm4, %vm3992_vm9  ;;  %v3851_v11 = vsel %vm3819_vm6, 65537, %v11146_v38  ;;  %vm4452_vm6 = vcmp.gt.f32.partialorder %v4420_v53, 0.5  ;;  %v4422_v55 = vld [vmem:[%s10979_s3 + $0x20] sm:$0xff] }
 0x46f   : > { %v4028_v3 = vsel %vm3994_vm2, %v8861_v12, 0  ;;  %vm3821_vm1 = vmpackc.low %vm3789_vm8, %vm3789_vm8  ;;  %v3883_v5 = vunpack.c.l.b16 %v3851_v11  ;;  %vm4450_vm8 = vcmp.gt.f32.partialorder %v4418_v4, 0.5  ;;  %vm4451_vm2 = vcmp.gt.f32.partialorder %v4419_v44, 0.5  ;;  %v4439_v4 = vld [vmem:[%s10979_s3 + $0xa8] sm:$0xff] }
 0x470   : > { %v3853_v42 = vsel %vm3821_vm1, 65537, %v11146_v38  ;;  %v4073_v63 = vunpack.c.h.b16 %v4028_v3  ;;  %v4072_v10 = vunpack.c.l.b16 %v4028_v3  ;;  %v4482_v25 = vsel %vm4450_vm8, 1, %v11146_v38  ;;  %v4423_v3 = vld [vmem:[%s10979_s3 + $0x28] sm:$0xff] }
 0x471   : > { %v3885_v39 = vunpack.c.l.b16 %v3853_v42  ;;  %v6936_v59 = vunpack.i.l.s16 %v3883_v5  ;;  %v4484_v56 = vsel %vm4452_vm6, 1, %v11146_v38  ;;  %v4483_v33 = vsel %vm4451_vm2, 1, %v11146_v38  ;;  %v4425_v5 = vld [vmem:[%s10979_s3 + $0x38] sm:$0xff] }
 0x472   : > { %v4105_v1 = vpack.c.b16 %v4073_v63, %v4073_v63  ;;  %v4104_v47 = vpack.c.b16 %v4072_v10, %v4072_v10  ;;  %vm4453_vm1 = vcmp.gt.f32.partialorder %v4421_v18, 0.5 }
 0x473   : > { %v6938_v36 = vunpack.i.l.s16 %v3885_v39  ;;  %vm4000_vm11 = vcmp.ne.s32.totalorder %v6936_v59, %v7602_v26  ;;  %v3756_v2 = vpop.permute.xlu1 %3755  ;;  %v4485_v11 = vsel %vm4453_vm1, 1, %v11146_v38  ;;  %v4426_v39 = vld [vmem:[%s10979_s3 + $0x40] sm:$0xff]  ;;  %v4428_v59 = vld [vmem:[%s10979_s3 + $0x50] sm:$0xff] }
 0x474   : > { %vm4001_vm10 = vmpackc.low %vm4000_vm11, %vm3999_vm12  ;;  %4158 = vrot.lane.b32.xlu2 %v4103_v17, %s7282_s6  ;;  %vm3790_vm5 = vcmp.eq.s32.totalorder %v3756_v2, 1  ;;  %vm4454_vm12 = vcmp.gt.f32.partialorder %v4422_v55, 0.5  ;;  %vm4456_vm11 = vcmp.gt.f32.partialorder %v4424_v28, 0.5  ;;  %v4430_v17 = vld [vmem:[%s10979_s3 + $0x60] sm:$0xff]  ;;  %v4429_v2 = vld [vmem:[%s10979_s3 + $0x58] sm:$0xff] }
 0x475   : > { %vm4007_vm15 = vcmp.ne.s32.totalorder %v6938_v36, %v7602_v26  ;;  %v4029_v43 = vsel %vm4001_vm10, %v8864_v13, 0  ;;  %4162 = vrot.lane.b32.xlu1 %v4105_v1, %s7282_s6  ;;  %4160 = vrot.lane.b32.xlu0 %v4104_v47, %s7282_s6  ;;  %vm3822_vm14 = vmpackc.low %vm3790_vm5, %vm3790_vm5  ;;  %v4486_v0 = vsel %vm4454_vm12, 1, %v11146_v38  ;;  %v4488_v15 = vsel %vm4456_vm11, 1, %v11146_v38  ;;  %v4438_v55 = vld [vmem:[%s10979_s3 + $0xa0] sm:$0xff]  ;;  %v4440_v28 = vld [vmem:[%s10979_s3 + $0xb0] sm:$0xff] }
 0x476   : > { %vm4008_vm13 = vmpackc.low %vm4007_vm15, %vm4006_vm7  ;;  %v3854_v54 = vsel %vm3822_vm14, 65537, %v11146_v38  ;;  %v4074_v27 = vunpack.c.l.b16 %v4029_v43  ;;  %v4075_v21 = vunpack.c.h.b16 %v4029_v43  ;;  %vm4208_vm10 = vcmask 191648   ;;  %v4431_v43 = vld [vmem:[%s10979_s3 + $0x68] sm:$0xff] }
 0x477   : > { %v4030_v46 = vsel %vm4008_vm13, %v9727_v16, 0  ;;  %v3886_v49 = vunpack.c.l.b16 %v3854_v54  ;;  %vm4455_vm5 = vcmp.gt.f32.partialorder %v4423_v3, 0.5  ;;  %vm4457_vm7 = vcmp.gt.f32.partialorder %v4425_v5, 0.5  ;;  %v4433_v54 = vld [vmem:[%s10979_s3 + $0x78] sm:$0xff] }
 0x478   : > { %v4106_v8 = vpack.c.b16 %v4074_v27, %v4074_v27  ;;  %v4076_v14 = vunpack.c.l.b16 %v4030_v46  ;;  %v4107_v30 = vpack.c.b16 %v4075_v21, %v4075_v21  ;;  %v4077_v61 = vunpack.c.h.b16 %v4030_v46 }
 0x479   : > { %v6939_v58 = vunpack.i.l.s16 %v3886_v49  ;;  %vm4459_vm15 = vcmp.gt.f32.partialorder %v4427_v40, 0.5  ;;  %v4487_v63 = vsel %vm4455_vm5, 1, %v11146_v38  ;;  %v4489_v10 = vsel %vm4457_vm7, 1, %v11146_v38 }
 0x47a   : > { %v4108_v34 = vpack.c.b16 %v4076_v14, %v4076_v14  ;;  %v4109_v19 = vpack.c.b16 %v4077_v61, %v4077_v61  ;;  %v4491_v31 = vsel %vm4459_vm15, 1, %v11146_v38  ;;  %vm4458_vm14 = vcmp.gt.f32.partialorder %v4426_v39, 0.5  ;;  %v4432_v14 = vld [vmem:[%s10979_s3 + $0x70] sm:$0xff] }
 0x47b   : > { %vm4013_vm4 = vcmp.ne.s32.totalorder %v6939_v58, %v7591_v20  ;;  %vm4460_vm13 = vcmp.gt.f32.partialorder %v4428_v59, 0.5  ;;  %v4490_v47 = vsel %vm4458_vm14, 1, %v11146_v38  ;;  %vm4465_vm8 = vcmp.gt.f32.partialorder %v4433_v54, 0.5  ;;  %v4434_v58 = vld [vmem:[%s10979_s3 + $0x80] sm:$0xff] }
 0x47c   : > { %vm4015_vm9 = vmpackc.low %vm4014_vm0, %vm4013_vm4  ;;  %4164 = vrot.lane.b32.xlu2 %v4106_v8, %s7282_s6  ;;  %vm4462_vm0 = vcmp.gt.f32.partialorder %v4430_v17, 0.5  ;;  %v4492_v50 = vsel %vm4460_vm13, 1, %v11146_v38  ;;  %vm4461_vm4 = vcmp.gt.f32.partialorder %v4429_v2, 0.5  ;;  %v4497_v8 = vsel %vm4465_vm8, 1, %v11146_v38  ;;  %v4446_v2 = vld [vmem:[%s10979_s3 + $0xe0] sm:$0xff] }
 0x47d   : > { %v4031_v9 = vsel %vm4015_vm9, %v11253_v37, 0  ;;  %4166 = vrot.lane.b32.xlu0 %v4107_v30, %s7282_s6  ;;  %4168 = vrot.lane.b32.xlu1 %v4108_v34, %s7282_s6  ;;  %v4494_v36 = vsel %vm4462_vm0, 1, %v11146_v38  ;;  %vm4463_vm9 = vcmp.gt.f32.partialorder %v4431_v43, 0.5  ;;  %v4493_v46 = vsel %vm4461_vm4, 1, %v11146_v38  ;;  %v4436_v30 = vld [vmem:[%s10979_s3 + $0x90] sm:$0xff] }
 0x47e   : > { %v4079_v52 = vunpack.c.h.b16 %v4031_v9  ;;  %v4078_v24 = vunpack.c.l.b16 %v4031_v9  ;;  %v4495_v49 = vsel %vm4463_vm9, 1, %v11146_v38  ;;  %vm4464_vm6 = vcmp.gt.f32.partialorder %v4432_v14, 0.5  ;;  %v4448_v43 = vld [vmem:[%s10979_s3 + $0xf0] sm:$0xff]  ;;  %v4449_v14 = vld [vmem:[%s10979_s3 + $0xf8] sm:$0xff] }
 0x47f   : > { %vm4466_vm2 = vcmp.gt.f32.partialorder %v4434_v58, 0.5  ;;  %vm4468_vm1 = vcmp.gt.f32.partialorder %v4436_v30, 0.5  ;;  %vm4471_vm5 = vcmp.gt.f32.partialorder %v4439_v4, 0.5  ;;  %vm4470_vm7 = vcmp.gt.f32.partialorder %v4438_v55, 0.5 }
 0x480   : > { %v4111_v57 = vpack.c.b16 %v4079_v52, %v4079_v52  ;;  %v4110_v48 = vpack.c.b16 %v4078_v24, %v4078_v24  ;;  %v4496_v52 = vsel %vm4464_vm6, 1, %v11146_v38  ;;  %v4498_v24 = vsel %vm4466_vm2, 1, %v11146_v38 }
 0x481   : > { %v4503_v18 = vsel %vm4471_vm5, 1, %v11146_v38  ;;  %vm4472_vm15 = vcmp.gt.f32.partialorder %v4440_v28, 0.5  ;;  %v4502_v5 = vsel %vm4470_vm7, 1, %v11146_v38  ;;  %vm4478_vm8 = vcmp.gt.f32.partialorder %v4446_v2, 0.5 }
 0x482   : > { %v4504_v40 = vsel %vm4472_vm15, 1, %v11146_v38  ;;  %vm4480_vm6 = vcmp.gt.f32.partialorder %v4448_v43, 0.5 }
 0x484   : > { %4170 = vrot.lane.b32.xlu2 %v4109_v19, %s7282_s6  ;;  %v4437_v19 = vld [vmem:[%s10979_s3 + $0x98] sm:$0xff] }
 0x485   : > { %4174 = vrot.lane.b32.xlu1 %v4111_v57, %s7282_s6  ;;  %4172 = vrot.lane.b32.xlu0 %v4110_v48, %s7282_s6  ;;  %v4500_v57 = vsel %vm4468_vm1, 1, %v11146_v38  ;;  %v4435_v48 = vld [vmem:[%s10979_s3 + $0x88] sm:$0xff]  ;;  %vm4469_vm11 = vcmp.gt.f32.partialorder %v4437_v19, 0.5  ;;  %vm4481_vm1 = vcmp.gt.f32.partialorder %v4449_v14, 0.5 }
 0x486   : > { %vm4467_vm12 = vcmp.gt.f32.partialorder %v4435_v48, 0.5 }
 0x48c   : > { %4515 = vperm.xlu2 %7222, %v4482_v25  }
 0x48d   : > { %4521 = vperm.xlu1 %7224, %v4484_v56   ;;  %4518 = vperm.xlu0 %7223, %v4483_v33   ;;  %v4499_v56 = vsel %vm4467_vm12, 1, %v11146_v38  ;;  %v4501_v33 = vsel %vm4469_vm11, 1, %v11146_v38 }
 0x494   : > { %4524 = vperm.xlu2 %7222, %v4485_v11   ;;  %v4442_v11 = vld [vmem:[%s10979_s3 + $0xc0] sm:$0xff] }
 0x495   : > { %4527 = vperm.xlu1 %7224, %v4486_v0   ;;  %4533 = vperm.xlu0 %7223, %v4488_v15   ;;  %vm4474_vm14 = vcmp.gt.f32.partialorder %v4442_v11, 0.5  ;;  %v11258_v11 = vld [vmem:[#allocation4_spill] sm:$0xff] }
 0x496   : > { %v4117_v42 = vpop.permute.xlu2 %4116 }
 0x497   : > { %4211 = vst.msk [vmem:[#allocation2 + $0x8] sm:$0xf] %vm4208_vm10, %v4117_v42  ;;  %v4506_v42 = vsel %vm4474_vm14, 1, %v11146_v38 }
 0x49c   : > { %4530 = vperm.xlu2 %7222, %v4487_v63   ;;  %v4441_v63 = vld [vmem:[%s10979_s3 + $0xb8] sm:$0xff] }
 0x49d   : > { %4536 = vperm.xlu1 %7224, %v4489_v10   ;;  %4542 = vperm.xlu0 %7223, %v4491_v31   ;;  %v4443_v10 = vld [vmem:[%s10979_s3 + $0xc8] sm:$0xff]  ;;  %v4445_v31 = vld [vmem:[%s10979_s3 + $0xd8] sm:$0xff]  ;;  %vm4473_vm13 = vcmp.gt.f32.partialorder %v4441_v63, 0.5  ;;  %v11264_v63 = vld [vmem:[#allocation5_spill] sm:$0xff] }
 0x49e   : > { %v4123_v1 = vpop.permute.xlu2 %4122  ;;  %vm4475_vm0 = vcmp.gt.f32.partialorder %v4443_v10, 0.5  ;;  %vm4477_vm4 = vcmp.gt.f32.partialorder %v4445_v31, 0.5  ;;  %v11265_v10 = vunpack.c.l.b16 %v11264_v63 }
 0x49f   : > { %4214 = vst.msk [vmem:[#allocation2 + $0x14] sm:$0xf] %vm4208_vm10, %v4123_v1  ;;  %v4505_v1 = vsel %vm4473_vm13, 1, %v11146_v38 }
 0x4a4   : > { %4539 = vperm.xlu2 %7222, %v4490_v47   ;;  %v4507_v47 = vsel %vm4475_vm0, 1, %v11146_v38  ;;  %vm4257_vm0 = vsmask.f32 4352 }
 0x4a5   : > { %4545 = vperm.xlu1 %7224, %v4492_v50   ;;  %4551 = vperm.xlu0 %7223, %v4494_v36   ;;  %v4113_v27 = vpop.permute.xlu0 %4112  ;;  %v4115_v21 = vpop.permute.xlu1 %4114  ;;  %v4509_v50 = vsel %vm4477_vm4, 1, %v11146_v38  ;;  %v4444_v36 = vld [vmem:[%s10979_s3 + $0xd0] sm:$0xff] }
 0x4a6   : > { %4209 = vst.msk [vmem:[#allocation2] sm:$0xf] %vm4208_vm10, %v4113_v27  ;;  %v4129_v51 = vpop.permute.xlu2 %4128  ;;  %vm4476_vm9 = vcmp.gt.f32.partialorder %v4444_v36, 0.5 }
 0x4a7   : > { %4210 = vst.msk [vmem:[#allocation2 + $0x4] sm:$0xf] %vm4208_vm10, %v4115_v21 }
 0x4a8   : > { %4217 = vst.msk [vmem:[#allocation2 + $0x20] sm:$0xf] %vm4208_vm10, %v4129_v51  ;;  %v4508_v51 = vsel %vm4476_vm9, 1, %v11146_v38 }
 0x4ac   : > { %4548 = vperm.xlu2 %7222, %v4493_v46   ;;  %v4510_v46 = vsel %vm4478_vm8, 1, %v11146_v38 }
 0x4ad   : > { %4554 = vperm.xlu1 %7224, %v4495_v49   ;;  %4560 = vperm.xlu0 %7223, %v4497_v8   ;;  %v4121_v34 = vpop.permute.xlu1 %4120  ;;  %v4512_v49 = vsel %vm4480_vm6, 1, %v11146_v38  ;;  %v4447_v8 = vld [vmem:[%s10979_s3 + $0xe8] sm:$0xff] }
 0x4ae   : > { %v4119_v9 = vpop.permute.xlu0 %4118  ;;  %4213 = vst.msk [vmem:[#allocation2 + $0x10] sm:$0xf] %vm4208_vm10, %v4121_v34  ;;  %v4135_v61 = vpop.permute.xlu2 %4134  ;;  %vm4479_vm2 = vcmp.gt.f32.partialorder %v4447_v8, 0.5 }
 0x4af   : > { %4212 = vst.msk [vmem:[#allocation2 + $0xc] sm:$0xf] %vm4208_vm10, %v4119_v9  ;;  %v4511_v9 = vsel %vm4479_vm2, 1, %v11146_v38 }
 0x4b0   : > { %4220 = vst.msk [vmem:[#allocation2 + $0x2c] sm:$0xf] %vm4208_vm10, %v4135_v61  ;;  %v4513_v61 = vsel %vm4481_vm1, 1, %v11146_v38 }
 0x4b4   : > { %4557 = vperm.xlu2 %7222, %v4496_v52  }
 0x4b5   : > { %4563 = vperm.xlu1 %7224, %v4498_v24   ;;  %4569 = vperm.xlu0 %7223, %v4500_v57  }
 0x4b6   : > { %v4141_v53 = vpop.permute.xlu2 %4140 }
 0x4b7   : > { %v4127_v44 = vpop.permute.xlu1 %4126  ;;  %v4125_v25 = vpop.permute.xlu0 %4124  ;;  %4223 = vst.msk [vmem:[#allocation2 + $0x38] sm:$0xf] %vm4208_vm10, %v4141_v53 }
 0x4b8   : > { %4216 = vst.msk [vmem:[#allocation2 + $0x1c] sm:$0xf] %vm4208_vm10, %v4127_v44 }
 0x4b9   : > { %4215 = vst.msk [vmem:[#allocation2 + $0x18] sm:$0xf] %vm4208_vm10, %v4125_v25 }
 0x4bc   : > { %4566 = vperm.xlu2 %7222, %v4499_v56   ;;  %v11254_v56 = vld [vmem:[#allocation6_spill] sm:$0xff] }
 0x4bd   : > { %4572 = vperm.xlu1 %7224, %v4501_v33   ;;  %4578 = vperm.xlu0 %7223, %v4503_v18   ;;  %v11255_v33 = vunpack.c.l.b16 %v11254_v56  ;;  %v11256_v18 = vld [vmem:[#allocation3_spill] sm:$0xff] }
 0x4be   : > { %v4147_v0 = vpop.permute.xlu2 %4146  ;;  %v11257_v55 = vunpack.c.l.b16 %v11256_v18  ;;  %v11274_v56 = vld [vmem:[#allocation15_spill] sm:$0xff]  ;;  %v11276_v18 = vld [vmem:[#allocation17_spill] sm:$0xff] }
 0x4bf   : > { %v4131_v15 = vpop.permute.xlu0 %4130  ;;  %v4133_v3 = vpop.permute.xlu1 %4132  ;;  %4226 = vst.msk [vmem:[#allocation2 + $0x44] sm:$0xf] %vm4208_vm10, %v4147_v0  ;;  %v11259_v0 = vunpack.c.l.b16 %v11258_v11 }
 0x4c0   : > { %4218 = vst.msk [vmem:[#allocation2 + $0x24] sm:$0xf] %vm4208_vm10, %v4131_v15  ;;  %v4242_v28 = vpack.c.b16 %v11257_v55, %v11255_v33  ;;  %v11260_v15 = vld [vmem:[#allocation10_spill] sm:$0xff]  ;;  %v11275_v33 = vunpack.c.l.b16 %v11274_v56  ;;  %v11277_v55 = vunpack.c.l.b16 %v11276_v18 }
 0x4c1   : > { %4219 = vst.msk [vmem:[#allocation2 + $0x28] sm:$0xf] %vm4208_vm10, %v4133_v3  ;;  %v11261_v3 = vunpack.c.l.b16 %v11260_v15 }
 0x4c4   : > { %4575 = vperm.xlu2 %7222, %v4502_v5   ;;  %v4243_v5 = vpack.c.b16 %v11261_v3, %v11259_v0  ;;  %v11278_v3 = vld [vmem:[#allocation18_spill] sm:$0xff] }
 0x4c5   : > { %4581 = vperm.xlu1 %7224, %v4504_v40   ;;  %4587 = vperm.xlu0 %7223, %v4506_v42   ;;  %v11262_v40 = vld [vmem:[#allocation9_spill] sm:$0xff] }
 0x4c6   : > { %v4153_v39 = vpop.permute.xlu2 %4152  ;;  %v11263_v42 = vunpack.c.l.b16 %v11262_v40  ;;  %v4279_v36 = vshll.u32 %v4243_v5, 16  ;;  %v11280_v40 = vld [vmem:[#allocation23_spill] sm:$0xff] }
 0x4c7   : > { %v4139_v59 = vpop.permute.xlu1 %4138  ;;  %v4137_v17 = vpop.permute.xlu0 %4136  ;;  %4229 = vst.msk [vmem:[#allocation2 + $0x50] sm:$0xf] %vm4208_vm10, %v4153_v39 }
 0x4c8   : > { %4222 = vst.msk [vmem:[#allocation2 + $0x34] sm:$0xf] %vm4208_vm10, %v4139_v59  ;;  %v4241_v31 = vpack.c.b16 %v11265_v10, %v11263_v42  ;;  %v11281_v42 = vunpack.c.l.b16 %v11280_v40  ;;  %v11282_v10 = vld [vmem:[#allocation24_spill] sm:$0xff] }
 0x4c9   : > { %4221 = vst.msk [vmem:[#allocation2 + $0x30] sm:$0xf] %vm4208_vm10, %v4137_v17 }
 0x4ca   : > { %v4259_v2 = vshrl.u32 %v4241_v31, 16  ;;  %v4262_v43 = vshll.u32 %v4241_v31, 16  ;;  %v11283_v31 = vunpack.c.l.b16 %v11282_v10 }
 0x4cc   : > { %4584 = vperm.xlu2 %7222, %v4505_v1   ;;  %v4267_v1 = vshrl.u32 %v4242_v28, 16 }
 0x4cd   : > { %4590 = vperm.xlu1 %7224, %v4507_v47   ;;  %4596 = vperm.xlu0 %7223, %v4509_v50   ;;  %v4270_v47 = vshll.u32 %v4242_v28, 16  ;;  %v4276_v50 = vshrl.u32 %v4243_v5, 16  ;;  %v4246_v28 = vpack.c.b16 %v11277_v55, %v11275_v33  ;;  %v11279_v5 = vunpack.c.l.b16 %v11278_v3 }
 0x4ce   : > { %v4159_v54 = vpop.permute.xlu2 %4158  ;;  %v4269_v14 = vrot.slane %v4267_v1, 3 }
 0x4cf   : > { %v4143_v27 = vpop.permute.xlu0 %4142  ;;  %v4145_v21 = vpop.permute.xlu1 %4144  ;;  %4232 = vst.msk [vmem:[#allocation2 + $0x5c] sm:$0xf] %vm4208_vm10, %v4159_v54  ;;  %v11266_v54 = vld [vmem:[#allocation11_spill] sm:$0xff]  ;;  %v9936_v63 = vpack.c.b16 %v11281_v42, %v11279_v5  ;;  %v4306_v56 = vshll.u32 %v4246_v28, 16 }
 0x4d0   : > { %4224 = vst.msk [vmem:[#allocation2 + $0x3c] sm:$0xf] %vm4208_vm10, %v4143_v27  ;;  %v11267_v27 = vunpack.c.l.b16 %v11266_v54 }
 0x4d1   : > { %4225 = vst.msk [vmem:[#allocation2 + $0x40] sm:$0xf] %vm4208_vm10, %v4145_v21  ;;  %v11268_v21 = vld [vmem:[#allocation12_spill] sm:$0xff]  ;;  %v4308_v42 = vrot.slane %v4306_v56, 4  ;;  %v4312_v10 = vshrl.u32 %v9936_v63, 16 }
 0x4d4   : > { %4593 = vperm.xlu2 %7222, %v4508_v51   ;;  %v11269_v51 = vunpack.c.l.b16 %v11268_v21 }
 0x4d5   : > { %4599 = vperm.xlu1 %7224, %v4510_v46   ;;  %4605 = vperm.xlu0 %7223, %v4512_v49  }
 0x4d6   : > { %v4165_v58 = vpop.permute.xlu2 %4164  ;;  %v4244_v46 = vpack.c.b16 %v11269_v51, %v11267_v27 }
 0x4d7   : > { %v4151_v30 = vpop.permute.xlu1 %4150  ;;  %v4149_v34 = vpop.permute.xlu0 %4148  ;;  %4235 = vst.msk [vmem:[#allocation2 + $0x68] sm:$0xf] %vm4208_vm10, %v4165_v58  ;;  %v4272_v58 = vrot.slane %v4270_v47, 4 }
 0x4d8   : > { %4228 = vst.msk [vmem:[#allocation2 + $0x4c] sm:$0xf] %vm4208_vm10, %v4151_v30  ;;  %v4278_v30 = vrot.slane %v4276_v50, 3 }
 0x4d9   : > { %4227 = vst.msk [vmem:[#allocation2 + $0x48] sm:$0xf] %vm4208_vm10, %v4149_v34  ;;  %v4281_v34 = vrot.slane %v4279_v36, 4  ;;  %v4273_v47 = vor.u32 %v4272_v58, %v4269_v14 }
 0x4db   : > { %v4282_v50 = vor.u32 %v4281_v34, %v4278_v30 }
 0x4dc   : > { %4602 = vperm.xlu2 %7222, %v4511_v9   ;;  %v4261_v9 = vrot.slane %v4259_v2, 3 }
 0x4dd   : > { %4608 = vperm.xlu1 %7224, %v4513_v61   ;;  %v4264_v61 = vrot.slane %v4262_v43, 4  ;;  %v4283_v34 = vsel %vm4257_vm0, %v4273_v47, %v4282_v50 }
 0x4de   : > { %v4171_v52 = vpop.permute.xlu2 %4170 }
 0x4df   : > { %v4155_v24 = vpop.permute.xlu0 %4154  ;;  %v4157_v57 = vpop.permute.xlu1 %4156  ;;  %4238 = vst.msk [vmem:[#allocation2 + $0x74] sm:$0xf] %vm4208_vm10, %v4171_v52  ;;  %v4265_v36 = vor.u32 %v4264_v61, %v4261_v9 }
 0x4e0   : > { %4230 = vst.msk [vmem:[#allocation2 + $0x54] sm:$0xf] %vm4208_vm10, %v4155_v24 }
 0x4e1   : > { %4231 = vst.msk [vmem:[#allocation2 + $0x58] sm:$0xf] %vm4208_vm10, %v4157_v57  ;;  %v4285_v57 = vshrl.u32 %v4244_v46, 16 }
 0x4e3   : > { %v4287_v54 = vrot.slane %v4285_v57, 3 }
 0x4e6   : > { %v4516_v48 = vpop.permute.xlu2 %4515 }
 0x4e7   : > { %v4163_v19 = vpop.permute.xlu1 %4162  ;;  %v4161_v4 = vpop.permute.xlu0 %4160  ;;  %vm4610_vm12 = vcmp.eq.s32.totalorder %v4516_v48, 1  ;;  %v4288_v48 = vshll.u32 %v4244_v46, 16 }
 0x4e8   : > { %4234 = vst.msk [vmem:[#allocation2 + $0x64] sm:$0xf] %vm4208_vm10, %v4163_v19  ;;  %vm4642_vm5 = vmpackc.low %vm4610_vm12, %vm4610_vm12  ;;  %v11270_v19 = vld [vmem:[#allocation13_spill] sm:$0xff] }
 0x4e9   : > { %4233 = vst.msk [vmem:[#allocation2 + $0x60] sm:$0xf] %vm4208_vm10, %v4161_v4  ;;  %v4674_v49 = vsel %vm4642_vm5, 65537, %v11146_v38  ;;  %v11271_v4 = vunpack.c.l.b16 %v11270_v19  ;;  %v4290_v27 = vrot.slane %v4288_v48, 4  ;;  %v11290_v19 = vld [vmem:[#allocation29_spill] sm:$0xff]  ;;  %v4314_v48 = vrot.slane %v4312_v10, 3 }
 0x4ea   : > { %v4706_v52 = vunpack.c.l.b16 %v4674_v49  ;;  %v11288_v49 = vld [vmem:[#allocation26_spill] sm:$0xff] }
 0x4eb   : > { %v9968_v18 = vor.u32 %v4290_v27, %v4287_v54 }
 0x4ec   : > { %v6941_v2 = vunpack.i.l.s16 %v4706_v52  ;;  %v4303_v52 = vshrl.u32 %v4246_v28, 16 }
 0x4ee   : > { %v4525_v53 = vpop.permute.xlu2 %4524  ;;  %vm4758_vm6 = vcmp.ne.s32.totalorder %v6941_v2, %v7591_v20  ;;  %v4305_v3 = vrot.slane %v4303_v52, 3 }
 0x4ef   : > { %v4167_v44 = vpop.permute.xlu0 %4166  ;;  %v4169_v25 = vpop.permute.xlu1 %4168  ;;  %vm4613_vm11 = vcmp.eq.s32.totalorder %v4525_v53, 1  ;;  %v11272_v53 = vld [vmem:[#allocation14_spill] sm:$0xff] }
 0x4f0   : > { %4236 = vst.msk [vmem:[#allocation2 + $0x6c] sm:$0xf] %vm4208_vm10, %v4167_v44  ;;  %vm4645_vm7 = vmpackc.low %vm4613_vm11, %vm4613_vm11  ;;  %v11273_v44 = vunpack.c.l.b16 %v11272_v53 }
 0x4f1   : > { %4237 = vst.msk [vmem:[#allocation2 + $0x70] sm:$0xf] %vm4208_vm10, %v4169_v25  ;;  %v4677_v8 = vsel %vm4645_vm7, 65537, %v11146_v38 }
 0x4f2   : > { %v4245_v25 = vpack.c.b16 %v11273_v44, %v11271_v4  ;;  %v4709_v11 = vunpack.c.l.b16 %v4677_v8  ;;  %v11289_v8 = vunpack.c.l.b16 %v11288_v49  ;;  %v11291_v4 = vunpack.c.l.b16 %v11290_v19  ;;  %v11296_v49 = vld [vmem:[#allocation31_spill] sm:$0xff] }
 0x4f4   : > { %v6944_v21 = vunpack.i.l.s16 %v4709_v11  ;;  %v9954_v53 = vpack.c.b16 %v11291_v4, %v11289_v8  ;;  %v4294_v30 = vshrl.u32 %v4245_v25, 16  ;;  %v4297_v61 = vshll.u32 %v4245_v25, 16 }
 0x4f5   : > { %v11297_v8 = vunpack.c.l.b16 %v11296_v49  ;;  %v4292_v4 = vsel %vm4257_vm0, %v4282_v50, %v9968_v18 }
 0x4f6   : > { %v4531_v39 = vpop.permute.xlu2 %4530  ;;  %vm4766_vm1 = vcmp.ne.s32.totalorder %v6944_v21, %v7602_v26  ;;  %v4296_v11 = vrot.slane %v4294_v30, 3 }
 0x4f7   : > { %v4175_v59 = vpop.permute.xlu1 %4174  ;;  %v4173_v17 = vpop.permute.xlu0 %4172  ;;  %vm4615_vm15 = vcmp.eq.s32.totalorder %v4531_v39, 1  ;;  %v11284_v39 = vld [vmem:[#allocation25_spill] sm:$0xff] }
 0x4f8   : > { %4240 = vst.msk [vmem:[#allocation2 + $0x7c] sm:$0xf] %vm4208_vm10, %v4175_v59  ;;  %v11285_v59 = vunpack.c.l.b16 %v11284_v39 }
 0x4f9   : > { %4239 = vst.msk [vmem:[#allocation2 + $0x78] sm:$0xf] %vm4208_vm10, %v4173_v17  ;;  %vm9944_vm10 = vmpackc.low %vm4615_vm15, %vm4615_vm15 }
 0x4fa   : > { %v9942_v17 = vpack.c.b16 %v11285_v59, %v11283_v31  ;;  %v4679_v14 = vsel %vm9944_vm10, 65537, %v11146_v38 }
 0x4fb   : > { %v4711_v33 = vunpack.c.l.b16 %v4679_v14 }
 0x4fd   : > { %v6946_v31 = vunpack.i.l.s16 %v4711_v33  ;;  %v4324_v33 = vshll.u32 %v9942_v17, 16 }
 0x4fe   : > { %v4540_v24 = vpop.permute.xlu2 %4539 }
 0x4ff   : > { %v4522_v0 = vpop.permute.xlu1 %4521  ;;  %v4519_v15 = vpop.permute.xlu0 %4518  ;;  %vm4618_vm8 = vcmp.eq.s32.totalorder %v4540_v24, 1  ;;  %v4274_v24 = vsel %vm4257_vm0, %v4265_v36, %v4273_v47 }
 0x500   : > { %vm4612_vm14 = vcmp.eq.s32.totalorder %v4522_v0, 1  ;;  %vm4611_vm13 = vcmp.eq.s32.totalorder %v4519_v15, 1  ;;  %vm9962_vm2 = vmpackc.low %vm4618_vm8, %vm4618_vm8  ;;  %v4299_v15 = vrot.slane %v4297_v61, 4 }
 0x501   : > { %vm4644_vm4 = vmpackc.low %vm4612_vm14, %vm4612_vm14  ;;  %v4682_v28 = vsel %vm9962_vm2, 65537, %v11146_v38 }
 0x502   : > { %v4676_v43 = vsel %vm4644_vm4, 65537, %v11146_v38  ;;  %vm4643_vm9 = vmpackc.low %vm4611_vm13, %vm4611_vm13  ;;  %v4714_v47 = vunpack.c.l.b16 %v4682_v28  ;;  %v4300_v30 = vor.u32 %v4299_v15, %v4296_v11  ;;  %v4330_v11 = vshrl.u32 %v9954_v53, 16 }
 0x503   : > { %v4708_v51 = vunpack.c.l.b16 %v4676_v43  ;;  %v4675_v46 = vsel %vm4643_vm9, 65537, %v11146_v38  ;;  %v4315_v43 = vshll.u32 %v9936_v63, 16  ;;  %v4321_v63 = vshrl.u32 %v9942_v17, 16 }
 0x504   : > { %v4707_v58 = vunpack.c.l.b16 %v4675_v46  ;;  %vm4773_vm9 = vcmp.ne.s32.totalorder %v6946_v31, %v7602_v26 }
 0x505   : > { %v6943_v9 = vunpack.i.l.s16 %v4708_v51  ;;  %v11294_v51 = vld [vmem:[#allocation30_spill] sm:$0xff]  ;;  %v4317_v56 = vrot.slane %v4315_v43, 4 }
 0x506   : > { %v6942_v57 = vunpack.i.l.s16 %v4707_v58  ;;  %v4549_v44 = vpop.permute.xlu2 %4548  ;;  %v11295_v46 = vunpack.c.l.b16 %v11294_v51  ;;  %v4301_v51 = vsel %vm4257_vm0, %v9968_v18, %v4300_v30 }
 0x507   : > { %vm4765_vm12 = vcmp.ne.s32.totalorder %v6943_v9, %v7591_v20  ;;  %v4528_v25 = vpop.permute.xlu1 %4527  ;;  %v4534_v55 = vpop.permute.xlu0 %4533  ;;  %vm4621_vm4 = vcmp.eq.s32.totalorder %v4549_v44, 1  ;;  %v9993_v9 = vor.u32 %v4308_v42, %v4305_v3  ;;  %v4333_v44 = vshll.u32 %v9954_v53, 16 }
 0x508   : > { %vm4767_vm11 = vmpackc.low %vm4766_vm1, %vm4765_vm12  ;;  %vm4759_vm5 = vcmp.ne.s32.totalorder %v6942_v57, %v7602_v26  ;;  %vm4614_vm7 = vcmp.eq.s32.totalorder %v4528_v25, 1  ;;  %vm4616_vm15 = vcmp.eq.s32.totalorder %v4534_v55, 1  ;;  %v9984_v19 = vpack.c.b16 %v11297_v8, %v11295_v46 }
 0x509   : > { %v4867_v0 = vsel %vm4767_vm11, %v4283_v34, 0  ;;  %vm4760_vm10 = vmpackc.low %vm4759_vm5, %vm4758_vm6  ;;  %v6949_v57 = vunpack.i.l.s16 %v4714_v47  ;;  %v4323_v55 = vrot.slane %v4321_v63, 3  ;;  %v4332_v47 = vrot.slane %v4330_v11, 3 }
 0x50a   : > { %v4866_v5 = vsel %vm4760_vm10, %v4274_v24, 0  ;;  %vm4646_vm14 = vmpackc.low %vm4614_vm7, %vm4614_vm7  ;;  %v4900_v40 = vunpack.c.l.b16 %v4867_v0  ;;  %v4901_v52 = vunpack.c.h.b16 %v4867_v0  ;;  %v4310_v46 = vsel %vm4257_vm0, %v4300_v30, %v9993_v9 }
 0x50b   : > { %v4678_v39 = vsel %vm4646_vm14, 65537, %v11146_v38  ;;  %vm4648_vm13 = vmpackc.low %vm4616_vm15, %vm4616_vm15  ;;  %v4899_v59 = vunpack.c.h.b16 %v4866_v5  ;;  %v4898_v1 = vunpack.c.l.b16 %v4866_v5  ;;  %v4318_v18 = vor.u32 %v4317_v56, %v4314_v48 }
 0x50c   : > { %v4710_v36 = vunpack.c.l.b16 %v4678_v39  ;;  %v4932_v2 = vpack.c.b16 %v4900_v40, %v4900_v40  ;;  %v4680_v54 = vsel %vm4648_vm13, 65537, %v11146_v38  ;;  %vm9998_vm6 = vmpackc.low %vm4621_vm4, %vm4621_vm4  ;;  %v4933_v28 = vpack.c.b16 %v4901_v52, %v4901_v52 }
 0x50d   : > { %v4931_v27 = vpack.c.b16 %v4899_v59, %v4899_v59  ;;  %v4930_v21 = vpack.c.b16 %v4898_v1, %v4898_v1  ;;  %v4712_v50 = vunpack.c.l.b16 %v4680_v54  ;;  %v4685_v40 = vsel %vm9998_vm6, 65537, %v11146_v38  ;;  %v11302_v54 = vld [vmem:[#allocation34_spill] sm:$0xff] }
 0x50e   : > { %v6945_v14 = vunpack.i.l.s16 %v4710_v36  ;;  %4966 = vrot.lane.b32.xlu1 %v4932_v2, %s7284_s12  ;;  %v4558_v58 = vpop.permute.xlu2 %4557  ;;  %v4326_v1 = vrot.slane %v4324_v33, 4  ;;  %v4335_v36 = vrot.slane %v4333_v44, 4  ;;  %v11300_v2 = vld [vmem:[#allocation32_spill] sm:$0xff]  ;;  %vm4786_vm4 = vcmp.ne.s32.totalorder %v6949_v57, %v7591_v20  ;;  %v11304_v44 = vld [vmem:[#allocation35_spill] sm:$0xff] }
 0x50f   : > { %4964 = vrot.lane.b32.xlu0 %v4931_v27, %s7284_s12  ;;  %4962 = vrot.lane.b32.xlu2 %v4930_v21, %s7284_s12  ;;  %v4537_v34 = vpop.permute.xlu1 %4536  ;;  %v4543_v61 = vpop.permute.xlu0 %4542  ;;  %v6947_v5 = vunpack.i.l.s16 %v4712_v50  ;;  %vm4624_vm7 = vcmp.eq.s32.totalorder %v4558_v58, 1  ;;  %v11301_v43 = vunpack.c.l.b16 %v11300_v2  ;;  %v11303_v27 = vunpack.c.l.b16 %v11302_v54 }
 0x510   : > { %vm4772_vm8 = vcmp.ne.s32.totalorder %v6945_v14, %v7591_v20  ;;  %vm4617_vm2 = vcmp.eq.s32.totalorder %v4537_v34, 1  ;;  %vm4619_vm1 = vcmp.eq.s32.totalorder %v4543_v61, 1  ;;  %v4717_v14 = vunpack.c.l.b16 %v4685_v40  ;;  %vm4656_vm14 = vmpackc.low %vm4624_vm7, %vm4624_vm7 }
 0x511   : > { %vm4774_vm12 = vmpackc.low %vm4773_vm9, %vm4772_vm8  ;;  %v10014_v21 = vpack.c.b16 %v11303_v27, %v11301_v43  ;;  %vm4779_vm15 = vcmp.ne.s32.totalorder %v6947_v5, %v7591_v20  ;;  %v4327_v30 = vor.u32 %v4326_v1, %v4323_v55  ;;  %v10029_v34 = vor.u32 %v4335_v36, %v4332_v47 }
 0x512   : > { %v4868_v25 = vsel %vm4774_vm12, %v4292_v4, 0  ;;  %vm4649_vm11 = vmpackc.low %vm4617_vm2, %vm4617_vm2  ;;  %v4339_v61 = vshrl.u32 %v9984_v19, 16  ;;  %v4688_v52 = vsel %vm4656_vm14, 65537, %v11146_v38  ;;  %v6952_v33 = vunpack.i.l.s16 %v4717_v14 }
 0x513   : > { %v4681_v0 = vsel %vm4649_vm11, 65537, %v11146_v38  ;;  %vm4651_vm5 = vmpackc.low %vm4619_vm1, %vm4619_vm1  ;;  %v4903_v15 = vunpack.c.h.b16 %v4868_v25  ;;  %v4902_v3 = vunpack.c.l.b16 %v4868_v25  ;;  %v4720_v5 = vunpack.c.l.b16 %v4688_v52 }
 0x514   : > { %v4713_v42 = vunpack.c.l.b16 %v4681_v0  ;;  %v4683_v17 = vsel %vm4651_vm5, 65537, %v11146_v38  ;;  %v11305_v0 = vunpack.c.l.b16 %v11304_v44  ;;  %v4319_v47 = vsel %vm4257_vm0, %v9993_v9, %v4318_v18 }
 0x515   : > { %v4715_v10 = vunpack.c.l.b16 %v4683_v17  ;;  %v4935_v31 = vpack.c.b16 %v4903_v15, %v4903_v15  ;;  %v4934_v39 = vpack.c.b16 %v4902_v3, %v4902_v3  ;;  %v4342_v17 = vshll.u32 %v9984_v19, 16 }
 0x516   : > { %v6948_v59 = vunpack.i.l.s16 %v4713_v42  ;;  %v4567_v53 = vpop.permute.xlu2 %4566  ;;  %v4328_v19 = vsel %vm4257_vm0, %v4318_v18, %v4327_v30  ;;  %v4337_v9 = vsel %vm4257_vm0, %v4327_v30, %v10029_v34 }
 0x517   : > { %v6950_v49 = vunpack.i.l.s16 %v4715_v10  ;;  %4968 = vrot.lane.b32.xlu2 %v4933_v28, %s7284_s12  ;;  %4972 = vrot.lane.b32.xlu1 %v4935_v31, %s7284_s12  ;;  %v4546_v8 = vpop.permute.xlu1 %4545  ;;  %v4552_v4 = vpop.permute.xlu0 %4551  ;;  %vm4627_vm11 = vcmp.eq.s32.totalorder %v4567_v53, 1  ;;  %v11306_v28 = vld [vmem:[#allocation37_spill] sm:$0xff]  ;;  %v11308_v10 = vld [vmem:[#allocation38_spill] sm:$0xff] }
 0x518   : > { %vm4780_vm10 = vcmp.ne.s32.totalorder %v6948_v59, %v7602_v26  ;;  %4970 = vrot.lane.b32.xlu0 %v4934_v39, %s7284_s12  ;;  %vm4620_vm13 = vcmp.eq.s32.totalorder %v4546_v8, 1  ;;  %vm4622_vm6 = vcmp.eq.s32.totalorder %v4552_v4, 1  ;;  %v11307_v15 = vunpack.c.l.b16 %v11306_v28  ;;  %v11310_v39 = vld [vmem:[#allocation41_spill] sm:$0xff]  ;;  %vm10053_vm5 = vmpackc.low %vm4627_vm11, %vm4627_vm11 }
 0x519   : > { %vm4781_vm9 = vmpackc.low %vm4780_vm10, %vm4779_vm15  ;;  %vm4787_vm8 = vcmp.ne.s32.totalorder %v6950_v49, %v7602_v26  ;;  %v11309_v31 = vunpack.c.l.b16 %v11308_v10  ;;  %v11311_v59 = vunpack.c.l.b16 %v11310_v39  ;;  %vm4794_vm10 = vcmp.ne.s32.totalorder %v6952_v33, %v7602_v26 }
 0x51a   : > { %v4869_v63 = vsel %vm4781_vm9, %v4301_v51, 0  ;;  %vm4788_vm2 = vmpackc.low %vm4787_vm8, %vm4786_vm4  ;;  %v10039_v3 = vpack.c.b16 %v11307_v15, %v11305_v0  ;;  %v4341_v51 = vrot.slane %v4339_v61, 3  ;;  %v4344_v8 = vrot.slane %v4342_v17, 4 }
 0x51b   : > { %v4870_v58 = vsel %vm4788_vm2, %v4310_v46, 0  ;;  %vm4652_vm1 = vmpackc.low %vm4620_vm13, %vm4620_vm13  ;;  %v4904_v50 = vunpack.c.l.b16 %v4869_v63  ;;  %v4905_v24 = vunpack.c.h.b16 %v4869_v63  ;;  %v10046_v1 = vpack.c.b16 %v11311_v59, %v11309_v31 }
 0x51c   : > { %v4684_v57 = vsel %vm4652_vm1, 65537, %v11146_v38  ;;  %vm4654_vm12 = vmpackc.low %vm4622_vm6, %vm4622_vm6  ;;  %v4906_v48 = vunpack.c.l.b16 %v4870_v58  ;;  %v4907_v53 = vunpack.c.h.b16 %v4870_v58  ;;  %v6955_v46 = vunpack.i.l.s16 %v4720_v5 }
 0x51d   : > { %v4716_v56 = vunpack.c.l.b16 %v4684_v57  ;;  %v4686_v25 = vsel %vm4654_vm12, 65537, %v11146_v38  ;;  %v4936_v55 = vpack.c.b16 %v4904_v50, %v4904_v50  ;;  %v4937_v11 = vpack.c.b16 %v4905_v24, %v4905_v24 }
 0x51e   : > { %v4938_v40 = vpack.c.b16 %v4906_v48, %v4906_v48  ;;  %v4576_v42 = vpop.permute.xlu2 %4575  ;;  %v4718_v2 = vunpack.c.l.b16 %v4686_v25  ;;  %v4348_v4 = vshrl.u32 %v10014_v21, 16  ;;  %v4691_v63 = vsel %vm10053_vm5, 65537, %v11146_v38 }
 0x51f   : > { %v6951_v36 = vunpack.i.l.s16 %v4716_v56  ;;  %4974 = vrot.lane.b32.xlu2 %v4936_v55, %s7284_s12  ;;  %v4555_v43 = vpop.permute.xlu1 %4554  ;;  %v4561_v54 = vpop.permute.xlu0 %4560  ;;  %vm4630_vm8 = vcmp.eq.s32.totalorder %v4576_v42, 1  ;;  %v4939_v33 = vpack.c.b16 %v4907_v53, %v4907_v53  ;;  %v4351_v57 = vshll.u32 %v10014_v21, 16 }
 0x520   : > { %4976 = vrot.lane.b32.xlu0 %v4937_v11, %s7284_s12  ;;  %4978 = vrot.lane.b32.xlu1 %v4938_v40, %s7284_s12  ;;  %vm4623_vm7 = vcmp.eq.s32.totalorder %v4555_v43, 1  ;;  %vm4625_vm15 = vcmp.eq.s32.totalorder %v4561_v54, 1  ;;  %v6953_v18 = vunpack.i.l.s16 %v4718_v2  ;;  %v4723_v48 = vunpack.c.l.b16 %v4691_v63  ;;  %vm10075_vm1 = vmpackc.low %vm4630_vm8, %vm4630_vm8 }
 0x521   : > { %vm4793_vm14 = vcmp.ne.s32.totalorder %v6951_v36, %v7591_v20  ;;  %vm4655_vm13 = vmpackc.low %vm4623_vm7, %vm4623_vm7  ;;  %v10071_v55 = vor.u32 %v4344_v8, %v4341_v51  ;;  %v4350_v21 = vrot.slane %v4348_v4, 3  ;;  %vm4807_vm12 = vcmp.ne.s32.totalorder %v6955_v46, %v7591_v20  ;;  %v11316_v46 = vld [vmem:[#allocation42_spill] sm:$0xff]  ;;  %v11318_v8 = vld [vmem:[#allocation43_spill] sm:$0xff] }
 0x522   : > { %vm4795_vm4 = vmpackc.low %vm4794_vm10, %vm4793_vm14  ;;  %v4687_v49 = vsel %vm4655_vm13, 65537, %v11146_v38  ;;  %vm4800_vm6 = vcmp.ne.s32.totalorder %v6953_v18, %v7591_v20  ;;  %v4357_v5 = vshrl.u32 %v10039_v3, 16  ;;  %v4353_v42 = vrot.slane %v4351_v57, 4 }
 0x523   : > { %v4871_v14 = vsel %vm4795_vm4, %v4319_v47, 0  ;;  %v4719_v30 = vunpack.c.l.b16 %v4687_v49  ;;  %vm4657_vm9 = vmpackc.low %vm4625_vm15, %vm4625_vm15  ;;  %v4360_v17 = vshll.u32 %v10039_v3, 16  ;;  %v6958_v10 = vunpack.i.l.s16 %v4723_v48 }
 0x524   : > { %v4689_v52 = vsel %vm4657_vm9, 65537, %v11146_v38  ;;  %v4909_v58 = vunpack.c.h.b16 %v4871_v14  ;;  %v4908_v61 = vunpack.c.l.b16 %v4871_v14  ;;  %v4694_v36 = vsel %vm10075_vm1, 65537, %v11146_v38 }
 0x525   : > { %v6954_v50 = vunpack.i.l.s16 %v4719_v30  ;;  %v4721_v24 = vunpack.c.l.b16 %v4689_v52  ;;  %v4359_v53 = vrot.slane %v4357_v5, 3  ;;  %v4362_v51 = vrot.slane %v4360_v17, 4  ;;  %v11320_v30 = vld [vmem:[#allocation44_spill] sm:$0xff] }
 0x526   : > { %v4941_v56 = vpack.c.b16 %v4909_v58, %v4909_v58  ;;  %v4940_v25 = vpack.c.b16 %v4908_v61, %v4908_v61  ;;  %v4585_v11 = vpop.permute.xlu2 %4584  ;;  %v11317_v49 = vunpack.c.l.b16 %v11316_v46  ;;  %v11319_v4 = vunpack.c.l.b16 %v11318_v8  ;;  %v11322_v58 = vld [vmem:[#allocation49_spill] sm:$0xff] }
 0x527   : > { %vm4801_vm2 = vcmp.ne.s32.totalorder %v6954_v50, %v7602_v26  ;;  %v6956_v44 = vunpack.i.l.s16 %v4721_v24  ;;  %4980 = vrot.lane.b32.xlu2 %v4939_v33, %s7284_s12  ;;  %v4564_v28 = vpop.permute.xlu1 %4563  ;;  %v4570_v15 = vpop.permute.xlu0 %4569  ;;  %vm4633_vm4 = vcmp.eq.s32.totalorder %v4585_v11, 1  ;;  %v4726_v14 = vunpack.c.l.b16 %v4694_v36 }
 0x528   : > { %vm4802_vm11 = vmpackc.low %vm4801_vm2, %vm4800_vm6  ;;  %4984 = vrot.lane.b32.xlu1 %v4941_v56, %s7284_s12  ;;  %4982 = vrot.lane.b32.xlu0 %v4940_v25, %s7284_s12  ;;  %vm4626_vm5 = vcmp.eq.s32.totalorder %v4564_v28, 1  ;;  %vm4628_vm7 = vcmp.eq.s32.totalorder %v4570_v15, 1  ;;  %v4346_v18 = vsel %vm4257_vm0, %v10029_v34, %v10071_v55  ;;  %v11321_v52 = vunpack.c.l.b16 %v11320_v30 }
 0x529   : > { %v4872_v40 = vsel %vm4802_vm11, %v4328_v19, 0  ;;  %vm4808_vm15 = vcmp.ne.s32.totalorder %v6956_v44, %v7602_v26  ;;  %vm4658_vm10 = vmpackc.low %vm4626_vm5, %vm4626_vm5  ;;  %vm4815_vm9 = vcmp.ne.s32.totalorder %v6958_v10, %v7602_v26  ;;  %v4354_v57 = vor.u32 %v4353_v42, %v4350_v21 }
 0x52a   : > { %vm4809_vm14 = vmpackc.low %vm4808_vm15, %vm4807_vm12  ;;  %v4690_v31 = vsel %vm4658_vm10, 65537, %v11146_v38  ;;  %v4910_v39 = vunpack.c.l.b16 %v4872_v40  ;;  %v4911_v59 = vunpack.c.h.b16 %v4872_v40  ;;  %v10103_v61 = vpack.c.b16 %v11322_v58, %v11321_v52 }
 0x52b   : > { %v4873_v47 = vsel %vm4809_vm14, %v4337_v9, 0  ;;  %v4722_v2 = vunpack.c.l.b16 %v4690_v31  ;;  %vm4660_vm13 = vmpackc.low %vm4628_vm7, %vm4628_vm7  ;;  %v10095_v9 = vpack.c.b16 %v11319_v4, %v11317_v49  ;;  %v4366_v56 = vshrl.u32 %v10046_v1, 16 }
 0x52c   : > { %v4692_v43 = vsel %vm4660_vm13, 65537, %v11146_v38  ;;  %v4942_v54 = vpack.c.b16 %v4910_v39, %v4910_v39  ;;  %v4943_v27 = vpack.c.b16 %v4911_v59, %v4911_v59  ;;  %v4912_v19 = vunpack.c.l.b16 %v4873_v47  ;;  %vm10109_vm6 = vmpackc.low %vm4633_vm4, %vm4633_vm4 }
 0x52d   : > { %v6957_v3 = vunpack.i.l.s16 %v4722_v2  ;;  %v4724_v50 = vunpack.c.l.b16 %v4692_v43  ;;  %v10117_v11 = vor.u32 %v4362_v51, %v4359_v53  ;;  %v4913_v44 = vunpack.c.h.b16 %v4873_v47 }
 0x52e   : > { %v4944_v63 = vpack.c.b16 %v4912_v19, %v4912_v19  ;;  %v4594_v48 = vpop.permute.xlu2 %4593  ;;  %v4369_v0 = vshll.u32 %v10046_v1, 16  ;;  %v6961_v28 = vunpack.i.l.s16 %v4726_v14  ;;  %v4697_v21 = vsel %vm10109_vm6, 65537, %v11146_v38 }
 0x52f   : > { %vm4814_vm8 = vcmp.ne.s32.totalorder %v6957_v3, %v7591_v20  ;;  %4986 = vrot.lane.b32.xlu2 %v4942_v54, %s7284_s12  ;;  %v4573_v34 = vpop.permute.xlu1 %4572  ;;  %v4579_v33 = vpop.permute.xlu0 %4578  ;;  %v6959_v17 = vunpack.i.l.s16 %v4724_v50  ;;  %vm4636_vm7 = vcmp.eq.s32.totalorder %v4594_v48, 1  ;;  %v4945_v1 = vpack.c.b16 %v4913_v44, %v4913_v44 }
 0x530   : > { %vm4816_vm2 = vmpackc.low %vm4815_vm9, %vm4814_vm8  ;;  %4988 = vrot.lane.b32.xlu0 %v4943_v27, %s7284_s12  ;;  %4990 = vrot.lane.b32.xlu1 %v4944_v63, %s7284_s12  ;;  %vm4629_vm1 = vcmp.eq.s32.totalorder %v4573_v34, 1  ;;  %vm4631_vm12 = vcmp.eq.s32.totalorder %v4579_v33, 1  ;;  %v4368_v36 = vrot.slane %v4366_v56, 3  ;;  %v4371_v2 = vrot.slane %v4369_v0, 4 }
 0x531   : > { %v4874_v25 = vsel %vm4816_vm2, %v4346_v18, 0  ;;  %vm4661_vm11 = vmpackc.low %vm4629_vm1, %vm4629_vm1  ;;  %v4355_v43 = vsel %vm4257_vm0, %v10071_v55, %v4354_v57  ;;  %v4364_v54 = vsel %vm4257_vm0, %v4354_v57, %v10117_v11  ;;  %v4375_v19 = vshrl.u32 %v10095_v9, 16 }
 0x532   : > { %v4693_v15 = vsel %vm4661_vm11, 65537, %v11146_v38  ;;  %vm4663_vm5 = vmpackc.low %vm4631_vm12, %vm4631_vm12  ;;  %v4915_v5 = vunpack.c.h.b16 %v4874_v25  ;;  %v4914_v40 = vunpack.c.l.b16 %v4874_v25  ;;  %vm4821_vm15 = vcmp.ne.s32.totalorder %v6959_v17, %v7591_v20 }
 0x533   : > { %v4725_v42 = vunpack.c.l.b16 %v4693_v15  ;;  %v4695_v10 = vsel %vm4663_vm5, 65537, %v11146_v38  ;;  %v4729_v3 = vunpack.c.l.b16 %v4697_v21  ;;  %vm10132_vm14 = vmpackc.low %vm4636_vm7, %vm4636_vm7  ;;  %v4378_v55 = vshll.u32 %v10095_v9, 16 }
 0x534   : > { %v4727_v31 = vunpack.c.l.b16 %v4695_v10  ;;  %v4947_v39 = vpack.c.b16 %v4915_v5, %v4915_v5  ;;  %v4946_v59 = vpack.c.b16 %v4914_v40, %v4914_v40  ;;  %vm4828_vm13 = vcmp.ne.s32.totalorder %v6961_v28, %v7591_v20  ;;  %v11327_v5 = vld [vmem:[#allocation50_spill] sm:$0xff] }
 0x535   : > { %v6960_v47 = vunpack.i.l.s16 %v4725_v42  ;;  %v10142_v8 = vor.u32 %v4371_v2, %v4368_v36  ;;  %v4384_v4 = vshrl.u32 %v10103_v61, 16  ;;  %v4387_v30 = vshll.u32 %v10103_v61, 16 }
 0x536   : > { %v6962_v27 = vunpack.i.l.s16 %v4727_v31  ;;  %v4603_v9 = vpop.permute.xlu2 %4602  ;;  %v7285_v52 = vmov 7   ;;  %v6964_v58 = vunpack.i.l.s16 %v4729_v3  ;;  %v4377_v34 = vrot.slane %v4375_v19, 3 }
 0x537   : > { %vm4822_vm10 = vcmp.ne.s32.totalorder %v6960_v47, %v7602_v26  ;;  %4992 = vrot.lane.b32.xlu2 %v4945_v1, %s7284_s12  ;;  %v4582_v51 = vpop.permute.xlu1 %4581  ;;  %v4588_v46 = vpop.permute.xlu0 %4587  ;;  %7225 = vset.pattern.permute.xlu1 %v7285_v52  ;;  %v4700_v33 = vsel %vm10132_vm14, 65537, %v11146_v38  ;;  %vm4639_vm11 = vcmp.eq.s32.totalorder %v4603_v9, 1  ;;  %v4380_v44 = vrot.slane %v4378_v55, 4 }
 0x538   : > { %vm4823_vm4 = vmpackc.low %vm4822_vm10, %vm4821_vm15  ;;  %vm4829_vm9 = vcmp.ne.s32.totalorder %v6962_v27, %v7602_v26  ;;  %4996 = vrot.lane.b32.xlu1 %v4947_v39, %s7284_s12  ;;  %4994 = vrot.lane.b32.xlu0 %v4946_v59, %s7284_s12  ;;  %vm4632_vm8 = vcmp.eq.s32.totalorder %v4582_v51, 1  ;;  %vm4634_vm6 = vcmp.eq.s32.totalorder %v4588_v46, 1  ;;  %v4386_v28 = vrot.slane %v4384_v4, 3 }
 0x539   : > { %v4875_v49 = vsel %vm4823_vm4, %v4355_v43, 0  ;;  %vm4830_vm2 = vmpackc.low %vm4829_vm9, %vm4828_vm13  ;;  %7226 = vset.pattern.permute.xlu2 %v7285_v52  ;;  %7227 = vset.pattern.permute.xlu0 %v7285_v52  ;;  %v4389_v15 = vrot.slane %v4387_v30, 4  ;;  %v4256_v40 = vpack.c.b16 %v11327_v5, %v11327_v5  ;;  %vm4836_vm5 = vcmp.ne.s32.totalorder %v6964_v58, %v7602_v26 }
 0x53a   : > { %v4876_v14 = vsel %vm4830_vm2, %v4364_v54, 0  ;;  %vm4664_vm1 = vmpackc.low %vm4632_vm8, %vm4632_vm8  ;;  %v4916_v18 = vunpack.c.l.b16 %v4875_v49  ;;  %v4917_v63 = vunpack.c.h.b16 %v4875_v49  ;;  %v4732_v17 = vunpack.c.l.b16 %v4700_v33 }
 0x53b   : > { %v4696_v50 = vsel %vm4664_vm1, 65537, %v11146_v38  ;;  %vm4666_vm12 = vmpackc.low %vm4634_vm6, %vm4634_vm6  ;;  %v4918_v24 = vunpack.c.l.b16 %v4876_v14  ;;  %v4373_v21 = vsel %vm4257_vm0, %v10117_v11, %v10142_v8  ;;  %v4381_v59 = vor.u32 %v4380_v44, %v4377_v34 }
 0x53c   : > { %v4728_v57 = vunpack.c.l.b16 %v4696_v50  ;;  %v4948_v48 = vpack.c.b16 %v4916_v18, %v4916_v18  ;;  %v4949_v56 = vpack.c.b16 %v4917_v63, %v4917_v63  ;;  %v4698_v61 = vsel %vm4666_vm12, 65537, %v11146_v38  ;;  %vm10161_vm15 = vmpackc.low %vm4639_vm11, %vm4639_vm11 }
 0x53d   : > { %v4950_v25 = vpack.c.b16 %v4918_v24, %v4918_v24  ;;  %v4730_v31 = vunpack.c.l.b16 %v4698_v61  ;;  %v4919_v11 = vunpack.c.h.b16 %v4876_v14  ;;  %v4390_v1 = vor.u32 %v4389_v15, %v4386_v28 }
 0x53e   : > { %v6963_v0 = vunpack.i.l.s16 %v4728_v57  ;;  %v4393_v36 = vshrl.u32 %v4256_v40, 16  ;;  %v4396_v2 = vshll.u32 %v4256_v40, 16  ;;  %v6967_v43 = vunpack.i.l.s16 %v4732_v17 }
 0x53f   : > { %4998 = vrot.lane.b32.xlu2 %v4948_v48, %s7284_s12  ;;  %v4591_v42 = vpop.permute.xlu1 %4590  ;;  %v4597_v10 = vpop.permute.xlu0 %4596  ;;  %v6965_v3 = vunpack.i.l.s16 %v4730_v31  ;;  %v4703_v53 = vsel %vm10161_vm15, 65537, %v11146_v38  ;;  %v4951_v49 = vpack.c.b16 %v4919_v11, %v4919_v11  ;;  %v4382_v9 = vsel %vm4257_vm0, %v10142_v8, %v4381_v59 }
 0x540   : > { %vm4835_vm7 = vcmp.ne.s32.totalorder %v6963_v0, %v7591_v20  ;;  %5000 = vrot.lane.b32.xlu0 %v4949_v56, %s7284_s12  ;;  %5002 = vrot.lane.b32.xlu1 %v4950_v25, %s7284_s12  ;;  %vm4635_vm10 = vcmp.eq.s32.totalorder %v4591_v42, 1  ;;  %vm4637_vm14 = vcmp.eq.s32.totalorder %v4597_v10, 1  ;;  %v4391_v63 = vsel %vm4257_vm0, %v4381_v59, %v4390_v1 }
 0x541   : > { %vm4837_vm13 = vmpackc.low %vm4836_vm5, %vm4835_vm7  ;;  %v4395_v52 = vrot.slane %v4393_v36, 3  ;;  %v4398_v58 = vrot.slane %v4396_v2, 4  ;;  %vm4842_vm8 = vcmp.ne.s32.totalorder %v6965_v3, %v7591_v20  ;;  %v4735_v34 = vunpack.c.l.b16 %v4703_v53  ;;  %v5092_v53 = vld [vmem:[%s10979_s3] sm:$0xff] }
 0x542   : > { %v4877_v47 = vsel %vm4837_vm13, %v4373_v21, 0  ;;  %vm4667_vm4 = vmpackc.low %vm4635_vm10, %vm4635_vm10  ;;  %vm4849_vm1 = vcmp.ne.s32.totalorder %v6967_v43, %v7591_v20 }
 0x543   : > { %v4699_v54 = vsel %vm4667_vm4, 65537, %v11146_v38  ;;  %vm4669_vm9 = vmpackc.low %vm4637_vm14, %vm4637_vm14  ;;  %v4921_v27 = vunpack.c.h.b16 %v4877_v47  ;;  %v4920_v19 = vunpack.c.l.b16 %v4877_v47  ;;  %v6970_v56 = vunpack.i.l.s16 %v4735_v34  ;;  %v5099_v34 = vld [vmem:[%s10979_s3 + $0x38] sm:$0xff] }
 0x544   : > { %v4731_v51 = vunpack.c.l.b16 %v4699_v54  ;;  %v4701_v46 = vsel %vm4669_vm9, 65537, %v11146_v38  ;;  %v4399_v61 = vor.u32 %v4398_v58, %v4395_v52 }
 0x545   : > { %v4733_v55 = vunpack.c.l.b16 %v4701_v46  ;;  %v4953_v4 = vpack.c.b16 %v4921_v27, %v4921_v27  ;;  %v4952_v14 = vpack.c.b16 %v4920_v19, %v4920_v19  ;;  %vm4857_vm13 = vcmp.ne.s32.totalorder %v6970_v56, %v7602_v26  ;;  %v5098_v56 = vld [vmem:[%s10979_s3 + $0x30] sm:$0xff] }
 0x546   : > { %v6966_v18 = vunpack.i.l.s16 %v4731_v51  ;;  %v4400_v10 = vsel %vm4257_vm0, %v4390_v1, %v4399_v61  ;;  %v4417_v27 = vsel %vm7710_vm3, %v4395_v52, 0  ;;  %vm5122_vm3 = vcmp.gt.f32.partialorder %v5092_v53, 0.5  ;;  %v5100_v61 = vld [vmem:[%s10979_s3 + $0x40] sm:$0xff] }
 0x547   : > { %v6968_v30 = vunpack.i.l.s16 %v4733_v55  ;;  %5004 = vrot.lane.b32.xlu2 %v4951_v49, %s7284_s12  ;;  %v4600_v50 = vpop.permute.xlu1 %4599  ;;  %v4606_v24 = vpop.permute.xlu0 %4605 }
 0x548   : > { %vm4843_vm6 = vcmp.ne.s32.totalorder %v6966_v18, %v7602_v26  ;;  %5008 = vrot.lane.b32.xlu1 %v4953_v4, %s7284_s12  ;;  %5006 = vrot.lane.b32.xlu0 %v4952_v14, %s7284_s12  ;;  %vm4638_vm2 = vcmp.eq.s32.totalorder %v4600_v50, 1  ;;  %vm4640_vm5 = vcmp.eq.s32.totalorder %v4606_v24, 1  ;;  %v5152_v14 = vsel %vm5122_vm3, 1, %v11146_v38  ;;  %v5095_v18 = vld [vmem:[%s10979_s3 + $0x18] sm:$0xff]  ;;  %v5096_v50 = vld [vmem:[%s10979_s3 + $0x20] sm:$0xff] }
 0x549   : > { %vm4844_vm12 = vmpackc.low %vm4843_vm6, %vm4842_vm8  ;;  %vm4850_vm11 = vcmp.ne.s32.totalorder %v6968_v30, %v7602_v26  ;;  %v5097_v24 = vld [vmem:[%s10979_s3 + $0x28] sm:$0xff] }
 0x54a   : > { %v4878_v8 = vsel %vm4844_vm12, %v4382_v9, 0  ;;  %vm4851_vm7 = vmpackc.low %vm4850_vm11, %vm4849_vm1  ;;  %v5093_v9 = vld [vmem:[%s10979_s3 + $0x8] sm:$0xff]  ;;  %vm5125_vm12 = vcmp.gt.f32.partialorder %v5095_v18, 0.5  ;;  %v5114_v18 = vld [vmem:[%s10979_s3 + $0xb0] sm:$0xff] }
 0x54b   : > { %v4879_v33 = vsel %vm4851_vm7, %v4391_v63, 0  ;;  %vm4670_vm15 = vmpackc.low %vm4638_vm2, %vm4638_vm2  ;;  %v4922_v57 = vunpack.c.l.b16 %v4878_v8  ;;  %v4923_v48 = vunpack.c.h.b16 %v4878_v8  ;;  %v5094_v63 = vld [vmem:[%s10979_s3 + $0x10] sm:$0xff]  ;;  %vm5123_vm1 = vcmp.gt.f32.partialorder %v5093_v9, 0.5  ;;  %v5112_v9 = vld [vmem:[%s10979_s3 + $0xa0] sm:$0xff] }
 0x54c   : > { %v4702_v25 = vsel %vm4670_vm15, 65537, %v11146_v38  ;;  %vm4672_vm10 = vmpackc.low %vm4640_vm5, %vm4640_vm5  ;;  %v4924_v44 = vunpack.c.l.b16 %v4879_v33  ;;  %v4925_v31 = vunpack.c.h.b16 %v4879_v33  ;;  %vm5124_vm11 = vcmp.gt.f32.partialorder %v5094_v63, 0.5 }
 0x54d   : > { %v4734_v0 = vunpack.c.l.b16 %v4702_v25  ;;  %v4704_v28 = vsel %vm4672_vm10, 65537, %v11146_v38  ;;  %v4954_v15 = vpack.c.b16 %v4922_v57, %v4922_v57  ;;  %v4955_v5 = vpack.c.b16 %v4923_v48, %v4923_v48  ;;  %v5102_v25 = vld [vmem:[%s10979_s3 + $0x50] sm:$0xff] }
 0x54e   : > { %v4956_v40 = vpack.c.b16 %v4924_v44, %v4924_v44  ;;  %v4736_v21 = vunpack.c.l.b16 %v4704_v28  ;;  %v4957_v43 = vpack.c.b16 %v4925_v31, %v4925_v31  ;;  %v5153_v30 = vsel %vm5123_vm1, 1, %v11146_v38 }
 0x54f   : > { %v6969_v17 = vunpack.i.l.s16 %v4734_v0  ;;  %5010 = vrot.lane.b32.xlu2 %v4954_v15, %s7284_s12  ;;  %v4609_v42 = vpop.permute.xlu1 %4608  ;;  %v5155_v52 = vsel %vm5125_vm12, 1, %v11146_v38  ;;  %v5154_v58 = vsel %vm5124_vm11, 1, %v11146_v38  ;;  %vm5058_vm5 = vcmask 224448  }
 0x550   : > { %5012 = vrot.lane.b32.xlu0 %v4955_v5, %s7284_s12  ;;  %5014 = vrot.lane.b32.xlu1 %v4956_v40, %s7284_s12  ;;  %vm4641_vm14 = vcmp.eq.s32.totalorder %v4609_v42, 1  ;;  %v6971_v11 = vunpack.i.l.s16 %v4736_v21  ;;  %vm5126_vm7 = vcmp.gt.f32.partialorder %v5096_v50, 0.5  ;;  %vm5127_vm15 = vcmp.gt.f32.partialorder %v5097_v24, 0.5  ;;  %v5101_v5 = vld [vmem:[%s10979_s3 + $0x48] sm:$0xff]  ;;  %v5103_v40 = vld [vmem:[%s10979_s3 + $0x58] sm:$0xff] }
 0x551   : > { %vm4856_vm4 = vcmp.ne.s32.totalorder %v6969_v17, %v7591_v20  ;;  %vm4673_vm9 = vmpackc.low %vm4641_vm14, %vm4641_vm14  ;;  %vm5129_vm10 = vcmp.gt.f32.partialorder %v5099_v34, 0.5  ;;  %v5156_v33 = vsel %vm5126_vm7, 1, %v11146_v38  ;;  %v5157_v57 = vsel %vm5127_vm15, 1, %v11146_v38  ;;  %v5105_v17 = vld [vmem:[%s10979_s3 + $0x68] sm:$0xff] }
 0x552   : > { %vm4858_vm8 = vmpackc.low %vm4857_vm13, %vm4856_vm4  ;;  %v4705_v39 = vsel %vm4673_vm9, 65537, %v11146_v38  ;;  %vm4863_vm0 = vcmp.ne.s32.totalorder %v6971_v11, %v7591_v20  ;;  %v5159_v48 = vsel %vm5129_vm10, 1, %v11146_v38  ;;  %vm5128_vm14 = vcmp.gt.f32.partialorder %v5098_v56, 0.5  ;;  %v5108_v11 = vld [vmem:[%s10979_s3 + $0x80] sm:$0xff]  ;;  %v5113_v34 = vld [vmem:[%s10979_s3 + $0xa8] sm:$0xff] }
 0x553   : > { %v4880_v59 = vsel %vm4858_vm8, %v4400_v10, 0  ;;  %v4737_v47 = vunpack.c.l.b16 %v4705_v39  ;;  %vm5130_vm13 = vcmp.gt.f32.partialorder %v5100_v61, 0.5  ;;  %vm5132_vm4 = vcmp.gt.f32.partialorder %v5102_v25, 0.5  ;;  %v5104_v39 = vld [vmem:[%s10979_s3 + $0x60] sm:$0xff] }
 0x554   : > { %v4927_v36 = vunpack.c.h.b16 %v4880_v59  ;;  %v4926_v2 = vunpack.c.l.b16 %v4880_v59  ;;  %v5158_v0 = vsel %vm5128_vm14, 1, %v11146_v38  ;;  %v10241_v28 = vsel %vm5130_vm13, 1, %v11146_v38  ;;  %v5106_v59 = vld [vmem:[%s10979_s3 + $0x70] sm:$0xff] }
 0x555   : > { %v6972_v1 = vunpack.i.l.s16 %v4737_v47  ;;  %v5162_v15 = vsel %vm5132_vm4, 1, %v11146_v38  ;;  %vm5131_vm9 = vcmp.gt.f32.partialorder %v5101_v5, 0.5  ;;  %vm5133_vm8 = vcmp.gt.f32.partialorder %v5103_v40, 0.5  ;;  %v5120_v5 = vld [vmem:[%s10979_s3 + $0xe0] sm:$0xff] }
 0x556   : > { %v4959_v19 = vpack.c.b16 %v4927_v36, %v4927_v36  ;;  %v4958_v3 = vpack.c.b16 %v4926_v2, %v4926_v2  ;;  %v10256_v42 = vsel %vm5131_vm9, 1, %v11146_v38  ;;  %v5163_v10 = vsel %vm5133_vm8, 1, %v11146_v38 }
 0x557   : > { %vm4864_vm6 = vcmp.ne.s32.totalorder %v6972_v1, %v7602_v26  ;;  %5016 = vrot.lane.b32.xlu2 %v4957_v43, %s7284_s12  ;;  %vm5138_vm3 = vcmp.gt.f32.partialorder %v5108_v11, 0.5  ;;  %vm5142_vm15 = vcmp.gt.f32.partialorder %v5112_v9, 0.5  ;;  %vm5144_vm10 = vcmp.gt.f32.partialorder %v5114_v18, 0.5  ;;  %v5121_v11 = vld [vmem:[%s10979_s3 + $0xe8] sm:$0xff] }
 0x558   : > { %vm4865_vm2 = vmpackc.low %vm4864_vm6, %vm4863_vm0  ;;  %5020 = vrot.lane.b32.xlu1 %v4959_v19, %s7284_s12  ;;  %5018 = vrot.lane.b32.xlu0 %v4958_v3, %s7284_s12  ;;  %vm5135_vm0 = vcmp.gt.f32.partialorder %v5105_v17, 0.5  ;;  %vm5134_vm6 = vcmp.gt.f32.partialorder %v5104_v39, 0.5  ;;  %v10276_v54 = vsel %vm5138_vm3, 1, %v11146_v38  ;;  %v5109_v19 = vld [vmem:[%s10979_s3 + $0x88] sm:$0xff]  ;;  %v5111_v3 = vld [vmem:[%s10979_s3 + $0x98] sm:$0xff]  ;;  %v10316_v50 = vsel %vm5142_vm15, 1, %v11146_v38 }
 0x559   : > { %v4881_v51 = vsel %vm4865_vm2, %v4417_v27, 0  ;;  %v5165_v31 = vsel %vm5135_vm0, 1, %v11146_v38  ;;  %vm5136_vm2 = vcmp.gt.f32.partialorder %v5106_v59, 0.5  ;;  %v5164_v1 = vsel %vm5134_vm6, 1, %v11146_v38  ;;  %v5107_v27 = vld [vmem:[%s10979_s3 + $0x78] sm:$0xff] }
 0x55a   : > { %v4928_v46 = vunpack.c.l.b16 %v4881_v51  ;;  %v4929_v55 = vunpack.c.h.b16 %v4881_v51  ;;  %v5166_v43 = vsel %vm5136_vm2, 1, %v11146_v38  ;;  %vm5137_vm1 = vcmp.gt.f32.partialorder %v5107_v27, 0.5  ;;  %v5119_v59 = vld [vmem:[%s10979_s3 + $0xd8] sm:$0xff] }
 0x55b   : > { %vm5139_vm12 = vcmp.gt.f32.partialorder %v5109_v19, 0.5  ;;  %vm5141_vm11 = vcmp.gt.f32.partialorder %v5111_v3, 0.5  ;;  %v5174_v24 = vsel %vm5144_vm10, 1, %v11146_v38  ;;  %vm5143_vm14 = vcmp.gt.f32.partialorder %v5113_v34, 0.5 }
 0x55c   : > { %v4960_v49 = vpack.c.b16 %v4928_v46, %v4928_v46  ;;  %v4961_v4 = vpack.c.b16 %v4929_v55, %v4929_v55  ;;  %v5167_v55 = vsel %vm5137_vm1, 1, %v11146_v38  ;;  %v10334_v61 = vsel %vm5143_vm14, 1, %v11146_v38 }
 0x55d   : > { %vm5150_vm0 = vcmp.gt.f32.partialorder %v5120_v5, 0.5  ;;  %vm5149_vm6 = vcmp.gt.f32.partialorder %v5119_v59, 0.5  ;;  %vm5151_vm2 = vcmp.gt.f32.partialorder %v5121_v11, 0.5 }
 0x55e   : > { %v10361_v39 = vsel %vm5150_vm0, 1, %v11146_v38 }
 0x55f   : > { %5022 = vrot.lane.b32.xlu2 %v4960_v49, %s7284_s12  ;;  %v10293_v49 = vsel %vm5139_vm12, 1, %v11146_v38 }
 0x560   : > { %5183 = vperm.xlu1 %7225, %v5152_v14   ;;  %5024 = vrot.lane.b32.xlu0 %v4961_v4, %s7284_s12  ;;  %v10296_v4 = vsel %vm5141_vm11, 1, %v11146_v38  ;;  %v5110_v14 = vld [vmem:[%s10979_s3 + $0x90] sm:$0xff] }
 0x561   : > { %vm5140_vm7 = vcmp.gt.f32.partialorder %v5110_v14, 0.5 }
 0x567   : > { %5186 = vperm.xlu2 %7226, %v5153_v30  }
 0x568   : > { %5192 = vperm.xlu1 %7225, %v5155_v52   ;;  %5189 = vperm.xlu0 %7227, %v5154_v58   ;;  %v10313_v58 = vsel %vm5140_vm7, 1, %v11146_v38 }
 0x569   : > { %v4963_v8 = vpop.permute.xlu2 %4962 }
 0x56a   : > { %5059 = vst.msk [vmem:[#allocation2] sm:$0xf] %vm5058_vm5, %v4963_v8  ;;  %v5115_v8 = vld [vmem:[%s10979_s3 + $0xb8] sm:$0xff] }
 0x56b   : > { %vm5145_vm13 = vcmp.gt.f32.partialorder %v5115_v8, 0.5 }
 0x56c   : > { %v5175_v25 = vsel %vm5145_vm13, 1, %v11146_v38 }
 0x56f   : > { %5195 = vperm.xlu2 %7226, %v5156_v33   ;;  %v5117_v33 = vld [vmem:[%s10979_s3 + $0xc8] sm:$0xff] }
 0x570   : > { %5198 = vperm.xlu1 %7225, %v5157_v57   ;;  %5204 = vperm.xlu0 %7227, %v5159_v48   ;;  %vm5147_vm4 = vcmp.gt.f32.partialorder %v5117_v33, 0.5 }
 0x571   : > { %v4969_v44 = vpop.permute.xlu2 %4968 }
 0x572   : > { %5062 = vst.msk [vmem:[#allocation2 + $0xc] sm:$0xf] %vm5058_vm5, %v4969_v44  ;;  %v10338_v44 = vsel %vm5147_vm4, 1, %v11146_v38 }
 0x577   : > { %5201 = vperm.xlu2 %7226, %v5158_v0   ;;  %v5116_v0 = vld [vmem:[%s10979_s3 + $0xc0] sm:$0xff] }
 0x578   : > { %5207 = vperm.xlu1 %7225, %v10241_v28   ;;  %5213 = vperm.xlu0 %7227, %v5162_v15   ;;  %v5118_v15 = vld [vmem:[%s10979_s3 + $0xd0] sm:$0xff]  ;;  %vm5146_vm9 = vcmp.gt.f32.partialorder %v5116_v0, 0.5 }
 0x579   : > { %v4975_v21 = vpop.permute.xlu2 %4974  ;;  %vm5148_vm8 = vcmp.gt.f32.partialorder %v5118_v15, 0.5 }
 0x57a   : > { %5065 = vst.msk [vmem:[#allocation2 + $0x18] sm:$0xf] %vm5058_vm5, %v4975_v21 }
 0x57f   : > { %5210 = vperm.xlu2 %7226, %v10256_v42  }
 0x580   : > { %5216 = vperm.xlu1 %7225, %v5163_v10   ;;  %5222 = vperm.xlu0 %7227, %v5165_v31   ;;  %v4967_v47 = vpop.permute.xlu1 %4966  ;;  %v10355_v10 = vsel %vm5146_vm9, 1, %v11146_v38  ;;  %v10358_v31 = vsel %vm5148_vm8, 1, %v11146_v38 }
 0x581   : > { %v4965_v36 = vpop.permute.xlu0 %4964  ;;  %5061 = vst.msk [vmem:[#allocation2 + $0x8] sm:$0xf] %vm5058_vm5, %v4967_v47  ;;  %v4981_v2 = vpop.permute.xlu2 %4980 }
 0x582   : > { %5060 = vst.msk [vmem:[#allocation2 + $0x4] sm:$0xf] %vm5058_vm5, %v4965_v36 }
 0x583   : > { %5068 = vst.msk [vmem:[#allocation2 + $0x24] sm:$0xf] %vm5058_vm5, %v4981_v2 }
 0x587   : > { %5219 = vperm.xlu2 %7226, %v5164_v1   ;;  %v10376_v1 = vsel %vm5149_vm6, 1, %v11146_v38 }
 0x588   : > { %5225 = vperm.xlu1 %7225, %v5166_v43   ;;  %5231 = vperm.xlu0 %7227, %v10276_v54   ;;  %v10379_v43 = vsel %vm5151_vm2, 1, %v11146_v38 }
 0x589   : > { %v4973_v53 = vpop.permute.xlu1 %4972  ;;  %v4987_v51 = vpop.permute.xlu2 %4986 }
 0x58a   : > { %5064 = vst.msk [vmem:[#allocation2 + $0x14] sm:$0xf] %vm5058_vm5, %v4973_v53  ;;  %v4971_v46 = vpop.permute.xlu0 %4970 }
 0x58b   : > { %5063 = vst.msk [vmem:[#allocation2 + $0x10] sm:$0xf] %vm5058_vm5, %v4971_v46 }
 0x58c   : > { %5071 = vst.msk [vmem:[#allocation2 + $0x30] sm:$0xf] %vm5058_vm5, %v4987_v51 }
 0x58f   : > { %5228 = vperm.xlu2 %7226, %v5167_v55  }
 0x590   : > { %5234 = vperm.xlu1 %7225, %v10293_v49   ;;  %5240 = vperm.xlu0 %7227, %v10296_v4  }
 0x591   : > { %v4993_v63 = vpop.permute.xlu2 %4992 }
 0x592   : > { %v4977_v30 = vpop.permute.xlu0 %4976  ;;  %v4979_v52 = vpop.permute.xlu1 %4978  ;;  %5074 = vst.msk [vmem:[#allocation2 + $0x3c] sm:$0xf] %vm5058_vm5, %v4993_v63 }
 0x593   : > { %5066 = vst.msk [vmem:[#allocation2 + $0x1c] sm:$0xf] %vm5058_vm5, %v4977_v30 }
 0x594   : > { %5067 = vst.msk [vmem:[#allocation2 + $0x20] sm:$0xf] %vm5058_vm5, %v4979_v52 }
 0x597   : > { %5237 = vperm.xlu2 %7226, %v10313_v58  }
 0x598   : > { %5243 = vperm.xlu1 %7225, %v10316_v50   ;;  %5249 = vperm.xlu0 %7227, %v5174_v24  }
 0x599   : > { %v4999_v57 = vpop.permute.xlu2 %4998 }
 0x59a   : > { %v4985_v48 = vpop.permute.xlu1 %4984  ;;  %v4983_v56 = vpop.permute.xlu0 %4982  ;;  %5077 = vst.msk [vmem:[#allocation2 + $0x48] sm:$0xf] %vm5058_vm5, %v4999_v57 }
 0x59b   : > { %5070 = vst.msk [vmem:[#allocation2 + $0x2c] sm:$0xf] %vm5058_vm5, %v4985_v48 }
 0x59c   : > { %5069 = vst.msk [vmem:[#allocation2 + $0x28] sm:$0xf] %vm5058_vm5, %v4983_v56 }
 0x59f   : > { %5246 = vperm.xlu2 %7226, %v10334_v61  }
 0x5a0   : > { %5252 = vperm.xlu1 %7225, %v5175_v25   ;;  %5258 = vperm.xlu0 %7227, %v10338_v44  }
 0x5a1   : > { %v5005_v40 = vpop.permute.xlu2 %5004 }
 0x5a2   : > { %v4989_v17 = vpop.permute.xlu0 %4988  ;;  %v4991_v21 = vpop.permute.xlu1 %4990  ;;  %5080 = vst.msk [vmem:[#allocation2 + $0x54] sm:$0xf] %vm5058_vm5, %v5005_v40 }
 0x5a3   : > { %5072 = vst.msk [vmem:[#allocation2 + $0x34] sm:$0xf] %vm5058_vm5, %v4989_v17 }
 0x5a4   : > { %5073 = vst.msk [vmem:[#allocation2 + $0x38] sm:$0xf] %vm5058_vm5, %v4991_v21  ;;  %v11335_v21 = vld [vmem:[#allocation8_spill] sm:$0xff] }
 0x5a7   : > { %5255 = vperm.xlu2 %7226, %v10355_v10  }
 0x5a8   : > { %5261 = vperm.xlu1 %7225, %v10358_v31   ;;  %5267 = vperm.xlu0 %7227, %v10361_v39  }
 0x5a9   : > { %v5011_v47 = vpop.permute.xlu2 %5010 }
 0x5aa   : > { %v4997_v36 = vpop.permute.xlu1 %4996  ;;  %v4995_v2 = vpop.permute.xlu0 %4994  ;;  %5083 = vst.msk [vmem:[#allocation2 + $0x60] sm:$0xf] %vm5058_vm5, %v5011_v47 }
 0x5ab   : > { %5076 = vst.msk [vmem:[#allocation2 + $0x44] sm:$0xf] %vm5058_vm5, %v4997_v36 }
 0x5ac   : > { %5075 = vst.msk [vmem:[#allocation2 + $0x40] sm:$0xf] %vm5058_vm5, %v4995_v2 }
 0x5af   : > { %5264 = vperm.xlu2 %7226, %v10376_v1  }
 0x5b0   : > { %5270 = vperm.xlu1 %7225, %v10379_v43  }
 0x5b1   : > { %v5017_v27 = vpop.permute.xlu2 %5016 }
 0x5b2   : > { %v5001_v19 = vpop.permute.xlu0 %5000  ;;  %v5003_v3 = vpop.permute.xlu1 %5002  ;;  %5086 = vst.msk [vmem:[#allocation2 + $0x6c] sm:$0xf] %vm5058_vm5, %v5017_v27 }
 0x5b3   : > { %5078 = vst.msk [vmem:[#allocation2 + $0x4c] sm:$0xf] %vm5058_vm5, %v5001_v19 }
 0x5b4   : > { %5079 = vst.msk [vmem:[#allocation2 + $0x50] sm:$0xf] %vm5058_vm5, %v5003_v3 }
 0x5b9   : > { %v5023_v53 = vpop.permute.xlu2 %5022 }
 0x5ba   : > { %v5009_v51 = vpop.permute.xlu1 %5008  ;;  %v5007_v46 = vpop.permute.xlu0 %5006  ;;  %5089 = vst.msk [vmem:[#allocation2 + $0x78] sm:$0xf] %vm5058_vm5, %v5023_v53 }
 0x5bb   : > { %5082 = vst.msk [vmem:[#allocation2 + $0x5c] sm:$0xf] %vm5058_vm5, %v5009_v51 }
 0x5bc   : > { %5081 = vst.msk [vmem:[#allocation2 + $0x58] sm:$0xf] %vm5058_vm5, %v5007_v46 }
 0x5c1   : > { %v5187_v55 = vpop.permute.xlu2 %5186 }
 0x5c2   : > { %v5013_v14 = vpop.permute.xlu0 %5012  ;;  %v5015_v9 = vpop.permute.xlu1 %5014  ;;  %vm5273_vm3 = vcmp.eq.s32.totalorder %v5187_v55, 1 }
 0x5c3   : > { %5084 = vst.msk [vmem:[#allocation2 + $0x64] sm:$0xf] %vm5058_vm5, %v5013_v14  ;;  %vm5303_vm1 = vmpackc.low %vm5273_vm3, %vm5273_vm3 }
 0x5c4   : > { %5085 = vst.msk [vmem:[#allocation2 + $0x68] sm:$0xf] %vm5058_vm5, %v5015_v9  ;;  %v5333_v52 = vsel %vm5303_vm1, 65537, %v11146_v38 }
 0x5c5   : > { %v5363_v24 = vunpack.c.l.b16 %v5333_v52 }
 0x5c7   : > { %v6974_v57 = vunpack.i.l.s16 %v5363_v24  ;;  %v11336_v24 = vld [vmem:[#allocation7_spill] sm:$0xff] }
 0x5c9   : > { %v5196_v18 = vpop.permute.xlu2 %5195  ;;  %vm5412_vm10 = vcmp.ne.s32.totalorder %v6974_v57, %v7602_v26 }
 0x5ca   : > { %v5021_v63 = vpop.permute.xlu1 %5020  ;;  %v5019_v30 = vpop.permute.xlu0 %5018  ;;  %vm5276_vm7 = vcmp.eq.s32.totalorder %v5196_v18, 1 }
 0x5cb   : > { %5088 = vst.msk [vmem:[#allocation2 + $0x74] sm:$0xf] %vm5058_vm5, %v5021_v63  ;;  %vm10397_vm14 = vmpackc.low %vm5276_vm7, %vm5276_vm7 }
 0x5cc   : > { %5087 = vst.msk [vmem:[#allocation2 + $0x70] sm:$0xf] %vm5058_vm5, %v5019_v30  ;;  %v5336_v19 = vsel %vm10397_vm14, 65537, %v11146_v38 }
 0x5cd   : > { %v5366_v18 = vunpack.c.l.b16 %v5336_v19  ;;  %v11339_v19 = vld [vmem:[#allocation16_spill] sm:$0xff] }
 0x5d1   : > { %v5202_v34 = vpop.permute.xlu2 %5201 }
 0x5d2   : > { %v5184_v8 = vpop.permute.xlu1 %5183  ;;  %v5025_v33 = vpop.permute.xlu0 %5024  ;;  %vm5278_vm15 = vcmp.eq.s32.totalorder %v5202_v34, 1 }
 0x5d3   : > { %vm5272_vm12 = vcmp.eq.s32.totalorder %v5184_v8, 1  ;;  %5090 = vst.msk [vmem:[#allocation2 + $0x7c] sm:$0xf] %vm5058_vm5, %v5025_v33  ;;  %vm10402_vm4 = vmpackc.low %vm5278_vm15, %vm5278_vm15  ;;  %v6977_v8 = vunpack.i.l.s16 %v5366_v18 }
 0x5d4   : > { %vm5302_vm11 = vmpackc.low %vm5272_vm12, %vm5272_vm12  ;;  %v5338_v46 = vsel %vm10402_vm4, 65537, %v11146_v38 }
 0x5d5   : > { %v5332_v48 = vsel %vm5302_vm11, 65537, %v11146_v38  ;;  %v5368_v52 = vunpack.c.l.b16 %v5338_v46  ;;  %vm5425_vm4 = vcmp.ne.s32.totalorder %v6977_v8, %v7591_v20  ;;  %v11340_v46 = vld [vmem:[#allocation19_spill] sm:$0xff] }
 0x5d6   : > { %v5362_v56 = vunpack.c.l.b16 %v5332_v48 }
 0x5d8   : > { %v6973_v25 = vunpack.i.l.s16 %v5362_v56  ;;  %v6979_v56 = vunpack.i.l.s16 %v5368_v52 }
 0x5d9   : > { %v5211_v15 = vpop.permute.xlu2 %5210 }
 0x5da   : > { %vm5411_vm13 = vcmp.ne.s32.totalorder %v6973_v25, %v7591_v20  ;;  %v5193_v40 = vpop.permute.xlu1 %5192  ;;  %v5190_v17 = vpop.permute.xlu0 %5189  ;;  %vm5281_vm2 = vcmp.eq.s32.totalorder %v5211_v15, 1 }
 0x5db   : > { %vm5413_vm5 = vmpackc.low %vm5412_vm10, %vm5411_vm13  ;;  %vm5275_vm9 = vcmp.eq.s32.totalorder %v5193_v40, 1  ;;  %vm5274_vm8 = vcmp.eq.s32.totalorder %v5190_v17, 1 }
 0x5dc   : > { %v5512_v59 = vsel %vm5413_vm5, %v11335_v21, 0  ;;  %vm5305_vm0 = vmpackc.low %vm5275_vm9, %vm5275_vm9 }
 0x5dd   : > { %v5542_v11 = vunpack.c.l.b16 %v5512_v59  ;;  %v5543_v47 = vunpack.c.h.b16 %v5512_v59  ;;  %v5335_v36 = vsel %vm5305_vm0, 65537, %v11146_v38  ;;  %vm5304_vm6 = vmpackc.low %vm5274_vm8, %vm5274_vm8  ;;  %vm5432_vm0 = vcmp.ne.s32.totalorder %v6979_v56, %v7591_v20 }
 0x5de   : > { %v5365_v2 = vunpack.c.l.b16 %v5335_v36  ;;  %v5334_v27 = vsel %vm5304_vm6, 65537, %v11146_v38  ;;  %vm5311_vm12 = vmpackc.low %vm5281_vm2, %vm5281_vm2 }
 0x5df   : > { %v5364_v3 = vunpack.c.l.b16 %v5334_v27  ;;  %v5573_v53 = vpack.c.b16 %v5543_v47, %v5543_v47  ;;  %v5572_v51 = vpack.c.b16 %v5542_v11, %v5542_v11  ;;  %v5341_v25 = vsel %vm5311_vm12, 65537, %v11146_v38 }
 0x5e0   : > { %v6976_v55 = vunpack.i.l.s16 %v5365_v2  ;;  %v5371_v2 = vunpack.c.l.b16 %v5341_v25 }
 0x5e1   : > { %v6975_v14 = vunpack.i.l.s16 %v5364_v3  ;;  %5604 = vrot.lane.b32.xlu0 %v5573_v53, %s7286_s26  ;;  %5602 = vrot.lane.b32.xlu2 %v5572_v51, %s7286_s26  ;;  %v5220_v9 = vpop.permute.xlu2 %5219 }
 0x5e2   : > { %vm5419_vm3 = vcmp.ne.s32.totalorder %v6976_v55, %v7602_v26  ;;  %v5199_v63 = vpop.permute.xlu1 %5198  ;;  %v5205_v30 = vpop.permute.xlu0 %5204  ;;  %vm5284_vm13 = vcmp.eq.s32.totalorder %v5220_v9, 1 }
 0x5e3   : > { %vm5418_vm1 = vcmp.ne.s32.totalorder %v6975_v14, %v7591_v20  ;;  %vm5277_vm11 = vcmp.eq.s32.totalorder %v5199_v63, 1  ;;  %vm5279_vm7 = vcmp.eq.s32.totalorder %v5205_v30, 1  ;;  %vm10427_vm9 = vmpackc.low %vm5284_vm13, %vm5284_vm13  ;;  %v6982_v14 = vunpack.i.l.s16 %v5371_v2 }
 0x5e4   : > { %vm5420_vm15 = vmpackc.low %vm5419_vm3, %vm5418_vm1 }
 0x5e5   : > { %v5513_v34 = vsel %vm5420_vm15, %v11336_v24, 0  ;;  %vm5307_vm10 = vmpackc.low %vm5277_vm11, %vm5277_vm11  ;;  %vm5440_vm13 = vcmp.ne.s32.totalorder %v6982_v14, %v7602_v26 }
 0x5e6   : > { %v5544_v33 = vunpack.c.l.b16 %v5513_v34  ;;  %v5545_v57 = vunpack.c.h.b16 %v5513_v34  ;;  %v5337_v48 = vsel %vm5307_vm10, 65537, %v11146_v38  ;;  %vm5309_vm14 = vmpackc.low %vm5279_vm7, %vm5279_vm7  ;;  %v5344_v34 = vsel %vm10427_vm9, 65537, %v11146_v38 }
 0x5e7   : > { %v5367_v0 = vunpack.c.l.b16 %v5337_v48  ;;  %v5339_v15 = vsel %vm5309_vm14, 65537, %v11146_v38 }
 0x5e8   : > { %v5369_v5 = vunpack.c.l.b16 %v5339_v15  ;;  %v5574_v40 = vpack.c.b16 %v5544_v33, %v5544_v33  ;;  %v5575_v17 = vpack.c.b16 %v5545_v57, %v5545_v57  ;;  %v5374_v15 = vunpack.c.l.b16 %v5344_v34 }
 0x5e9   : > { %v6978_v21 = vunpack.i.l.s16 %v5367_v0  ;;  %v5229_v59 = vpop.permute.xlu2 %5228 }
 0x5ea   : > { %v6980_v11 = vunpack.i.l.s16 %v5369_v5  ;;  %5606 = vrot.lane.b32.xlu1 %v5574_v40, %s7286_s26  ;;  %5608 = vrot.lane.b32.xlu2 %v5575_v17, %s7286_s26  ;;  %v5208_v47 = vpop.permute.xlu1 %5207  ;;  %v5214_v36 = vpop.permute.xlu0 %5213  ;;  %vm5287_vm7 = vcmp.eq.s32.totalorder %v5229_v59, 1  ;;  %v11341_v40 = vld [vmem:[#allocation20_spill] sm:$0xff]  ;;  %v6985_v27 = vunpack.i.l.s16 %v5374_v15 }
 0x5eb   : > { %vm5426_vm5 = vcmp.ne.s32.totalorder %v6978_v21, %v7602_v26  ;;  %vm5280_vm8 = vcmp.eq.s32.totalorder %v5208_v47, 1  ;;  %vm5282_vm3 = vcmp.eq.s32.totalorder %v5214_v36, 1  ;;  %vm5317_vm15 = vmpackc.low %vm5287_vm7, %vm5287_vm7 }
 0x5ec   : > { %vm5427_vm6 = vmpackc.low %vm5426_vm5, %vm5425_vm4  ;;  %vm5433_vm2 = vcmp.ne.s32.totalorder %v6980_v11, %v7602_v26  ;;  %v5347_v59 = vsel %vm5317_vm15, 65537, %v11146_v38  ;;  %vm5453_vm7 = vcmp.ne.s32.totalorder %v6985_v27, %v7591_v20 }
 0x5ed   : > { %v5514_v3 = vsel %vm5427_vm6, %v11339_v19, 0  ;;  %vm5434_vm1 = vmpackc.low %vm5433_vm2, %vm5432_vm0  ;;  %v5377_v14 = vunpack.c.l.b16 %v5347_v59 }
 0x5ee   : > { %v5546_v53 = vunpack.c.l.b16 %v5514_v3  ;;  %v5547_v51 = vunpack.c.h.b16 %v5514_v3  ;;  %v5515_v55 = vsel %vm5434_vm1, %v11340_v46, 0  ;;  %vm5310_vm12 = vmpackc.low %vm5280_vm8, %vm5280_vm8 }
 0x5ef   : > { %v5548_v9 = vunpack.c.l.b16 %v5515_v55  ;;  %v5340_v18 = vsel %vm5310_vm12, 65537, %v11146_v38  ;;  %vm5312_vm11 = vmpackc.low %vm5282_vm3, %vm5282_vm3  ;;  %v5549_v0 = vunpack.c.h.b16 %v5515_v55 }
 0x5f0   : > { %v5370_v63 = vunpack.c.l.b16 %v5340_v18  ;;  %v5342_v30 = vsel %vm5312_vm11, 65537, %v11146_v38  ;;  %v5577_v52 = vpack.c.b16 %v5547_v51, %v5547_v51  ;;  %v5576_v24 = vpack.c.b16 %v5546_v53, %v5546_v53 }
 0x5f1   : > { %v5578_v8 = vpack.c.b16 %v5548_v9, %v5548_v9  ;;  %v5238_v33 = vpop.permute.xlu2 %5237  ;;  %v5372_v48 = vunpack.c.l.b16 %v5342_v30  ;;  %v5579_v53 = vpack.c.b16 %v5549_v0, %v5549_v0 }
 0x5f2   : > { %v6981_v57 = vunpack.i.l.s16 %v5370_v63  ;;  %5612 = vrot.lane.b32.xlu1 %v5577_v52, %s7286_s26  ;;  %5610 = vrot.lane.b32.xlu0 %v5576_v24, %s7286_s26  ;;  %v5217_v56 = vpop.permute.xlu1 %5216  ;;  %v5223_v25 = vpop.permute.xlu0 %5222  ;;  %vm5290_vm0 = vcmp.eq.s32.totalorder %v5238_v33, 1  ;;  %v11344_v52 = vld [vmem:[#allocation22_spill] sm:$0xff] }
 0x5f3   : > { %5614 = vrot.lane.b32.xlu2 %v5578_v8, %s7286_s26  ;;  %vm5283_vm10 = vcmp.eq.s32.totalorder %v5217_v56, 1  ;;  %vm5285_vm14 = vcmp.eq.s32.totalorder %v5223_v25, 1  ;;  %v6983_v21 = vunpack.i.l.s16 %v5372_v48  ;;  %vm10451_vm3 = vmpackc.low %vm5290_vm0, %vm5290_vm0  ;;  %v11345_v48 = vld [vmem:[#allocation27_spill] sm:$0xff] }
 0x5f4   : > { %vm5439_vm4 = vcmp.ne.s32.totalorder %v6981_v57, %v7591_v20  ;;  %vm5313_vm5 = vmpackc.low %vm5283_vm10, %vm5283_vm10  ;;  %v6988_v57 = vunpack.i.l.s16 %v5377_v14  ;;  %v5350_v25 = vsel %vm10451_vm3, 65537, %v11146_v38 }
 0x5f5   : > { %vm5441_vm9 = vmpackc.low %vm5440_vm13, %vm5439_vm4  ;;  %v5343_v5 = vsel %vm5313_vm5, 65537, %v11146_v38  ;;  %vm5446_vm6 = vcmp.ne.s32.totalorder %v6983_v21, %v7591_v20  ;;  %v5380_v59 = vunpack.c.l.b16 %v5350_v25 }
 0x5f6   : > { %v5516_v17 = vsel %vm5441_vm9, %v11341_v40, 0  ;;  %v5373_v11 = vunpack.c.l.b16 %v5343_v5  ;;  %vm5315_vm8 = vmpackc.low %vm5285_vm14, %vm5285_vm14  ;;  %vm5461_vm5 = vcmp.ne.s32.totalorder %v6988_v57, %v7602_v26 }
 0x5f7   : > { %v5550_v47 = vunpack.c.l.b16 %v5516_v17  ;;  %v5551_v36 = vunpack.c.h.b16 %v5516_v17  ;;  %v5345_v2 = vsel %vm5315_vm8, 65537, %v11146_v38 }
 0x5f8   : > { %v6984_v19 = vunpack.i.l.s16 %v5373_v11  ;;  %v5375_v3 = vunpack.c.l.b16 %v5345_v2 }
 0x5f9   : > { %v5581_v51 = vpack.c.b16 %v5551_v36, %v5551_v36  ;;  %v5580_v46 = vpack.c.b16 %v5550_v47, %v5550_v47  ;;  %v5247_v55 = vpop.permute.xlu2 %5246 }
 0x5fa   : > { %vm5447_vm2 = vcmp.ne.s32.totalorder %v6984_v19, %v7602_v26  ;;  %v6986_v9 = vunpack.i.l.s16 %v5375_v3  ;;  %5616 = vrot.lane.b32.xlu0 %v5579_v53, %s7286_s26  ;;  %v5226_v63 = vpop.permute.xlu1 %5225  ;;  %v5232_v30 = vpop.permute.xlu0 %5231  ;;  %vm5293_vm4 = vcmp.eq.s32.totalorder %v5247_v55, 1  ;;  %v11348_v53 = vld [vmem:[#allocation28_spill] sm:$0xff] }
 0x5fb   : > { %vm5448_vm1 = vmpackc.low %vm5447_vm2, %vm5446_vm6  ;;  %5620 = vrot.lane.b32.xlu2 %v5581_v51, %s7286_s26  ;;  %5618 = vrot.lane.b32.xlu1 %v5580_v46, %s7286_s26  ;;  %vm5286_vm12 = vcmp.eq.s32.totalorder %v5226_v63, 1  ;;  %vm5288_vm11 = vcmp.eq.s32.totalorder %v5232_v30, 1  ;;  %v6991_v46 = vunpack.i.l.s16 %v5380_v59 }
 0x5fc   : > { %v5517_v24 = vsel %vm5448_vm1, %v11344_v52, 0  ;;  %vm5454_vm15 = vcmp.ne.s32.totalorder %v6986_v9, %v7602_v26  ;;  %vm5316_vm10 = vmpackc.low %vm5286_vm12, %vm5286_vm12 }
 0x5fd   : > { %v5552_v34 = vunpack.c.l.b16 %v5517_v24  ;;  %v5553_v8 = vunpack.c.h.b16 %v5517_v24  ;;  %vm5455_vm14 = vmpackc.low %vm5454_vm15, %vm5453_vm7  ;;  %v5346_v33 = vsel %vm5316_vm10, 65537, %v11146_v38  ;;  %vm5474_vm10 = vcmp.ne.s32.totalorder %v6991_v46, %v7591_v20 }
 0x5fe   : > { %v5518_v56 = vsel %vm5455_vm14, %v11345_v48, 0  ;;  %v5376_v0 = vunpack.c.l.b16 %v5346_v33  ;;  %vm5318_vm13 = vmpackc.low %vm5288_vm11, %vm5288_vm11 }
 0x5ff   : > { %v5554_v15 = vunpack.c.l.b16 %v5518_v56  ;;  %v5348_v5 = vsel %vm5318_vm13, 65537, %v11146_v38  ;;  %v5582_v40 = vpack.c.b16 %v5552_v34, %v5552_v34  ;;  %v5583_v21 = vpack.c.b16 %v5553_v8, %v5553_v8  ;;  %vm10469_vm8 = vmpackc.low %vm5293_vm4, %vm5293_vm4 }
 0x600   : > { %v6987_v17 = vunpack.i.l.s16 %v5376_v0  ;;  %v5378_v47 = vunpack.c.l.b16 %v5348_v5  ;;  %v5555_v3 = vunpack.c.h.b16 %v5518_v56  ;;  %v5353_v63 = vsel %vm10469_vm8, 65537, %v11146_v38  ;;  %v11351_v5 = vld [vmem:[#allocation33_spill] sm:$0xff] }
 0x601   : > { %v5584_v11 = vpack.c.b16 %v5554_v15, %v5554_v15  ;;  %v5256_v19 = vpop.permute.xlu2 %5255  ;;  %v5383_v56 = vunpack.c.l.b16 %v5353_v63 }
 0x602   : > { %vm5460_vm9 = vcmp.ne.s32.totalorder %v6987_v17, %v7591_v20  ;;  %5622 = vrot.lane.b32.xlu0 %v5582_v40, %s7286_s26  ;;  %v5235_v2 = vpop.permute.xlu1 %5234  ;;  %v5241_v27 = vpop.permute.xlu0 %5240  ;;  %v6989_v18 = vunpack.i.l.s16 %v5378_v47  ;;  %vm5296_vm12 = vcmp.eq.s32.totalorder %v5256_v19, 1  ;;  %v5585_v57 = vpack.c.b16 %v5555_v3, %v5555_v3 }
 0x603   : > { %vm5462_vm0 = vmpackc.low %vm5461_vm5, %vm5460_vm9  ;;  %5624 = vrot.lane.b32.xlu1 %v5583_v21, %s7286_s26  ;;  %5626 = vrot.lane.b32.xlu2 %v5584_v11, %s7286_s26  ;;  %vm5289_vm6 = vcmp.eq.s32.totalorder %v5235_v2, 1  ;;  %vm5291_vm2 = vcmp.eq.s32.totalorder %v5241_v27, 1  ;;  %v7287_v17 = vmov 8   ;;  %v11352_v11 = vld [vmem:[#allocation36_spill] sm:$0xff]  ;;  %v6994_v2 = vunpack.i.l.s16 %v5383_v56 }
 0x604   : > { %v5519_v51 = vsel %vm5462_vm0, %v11348_v53, 0  ;;  %vm5319_vm3 = vmpackc.low %vm5289_vm6, %vm5289_vm6  ;;  %vm5467_vm11 = vcmp.ne.s32.totalorder %v6989_v18, %v7591_v20  ;;  %7228 = vset.pattern.permute.xlu2 %v7287_v17  ;;  %7230 = vset.pattern.permute.xlu1 %v7287_v17 }
 0x605   : > { %v5556_v55 = vunpack.c.l.b16 %v5519_v51  ;;  %v5557_v14 = vunpack.c.h.b16 %v5519_v51  ;;  %v5349_v9 = vsel %vm5319_vm3, 65537, %v11146_v38  ;;  %vm5321_vm1 = vmpackc.low %vm5291_vm2, %vm5291_vm2  ;;  %7229 = vset.pattern.permute.xlu0 %v7287_v17  ;;  %vm5482_vm2 = vcmp.ne.s32.totalorder %v6994_v2, %v7602_v26 }
 0x606   : > { %v5379_v30 = vunpack.c.l.b16 %v5349_v9  ;;  %v5351_v52 = vsel %vm5321_vm1, 65537, %v11146_v38  ;;  %vm10484_vm15 = vmpackc.low %vm5296_vm12, %vm5296_vm12 }
 0x607   : > { %v5381_v24 = vunpack.c.l.b16 %v5351_v52  ;;  %v5587_v34 = vpack.c.b16 %v5557_v14, %v5557_v14  ;;  %v5586_v8 = vpack.c.b16 %v5556_v55, %v5556_v55  ;;  %v5356_v3 = vsel %vm10484_vm15, 65537, %v11146_v38 }
 0x608   : > { %v6990_v33 = vunpack.i.l.s16 %v5379_v30  ;;  %v5386_v18 = vunpack.c.l.b16 %v5356_v3 }
 0x609   : > { %v6992_v48 = vunpack.i.l.s16 %v5381_v24  ;;  %v5265_v36 = vpop.permute.xlu2 %5264 }
 0x60a   : > { %vm5468_vm7 = vcmp.ne.s32.totalorder %v6990_v33, %v7602_v26  ;;  %5628 = vrot.lane.b32.xlu0 %v5585_v57, %s7286_s26  ;;  %v5244_v0 = vpop.permute.xlu1 %5243  ;;  %v5250_v15 = vpop.permute.xlu0 %5249  ;;  %vm5299_vm6 = vcmp.eq.s32.totalorder %v5265_v36, 1  ;;  %v6997_v33 = vunpack.i.l.s16 %v5386_v18 }
 0x60b   : > { %vm5469_vm14 = vmpackc.low %vm5468_vm7, %vm5467_vm11  ;;  %vm5475_vm13 = vcmp.ne.s32.totalorder %v6992_v48, %v7602_v26  ;;  %5632 = vrot.lane.b32.xlu2 %v5587_v34, %s7286_s26  ;;  %5630 = vrot.lane.b32.xlu1 %v5586_v8, %s7286_s26  ;;  %vm5292_vm4 = vcmp.eq.s32.totalorder %v5244_v0, 1  ;;  %vm5294_vm5 = vcmp.eq.s32.totalorder %v5250_v15, 1  ;;  %v11353_v34 = vld [vmem:[#allocation39_spill] sm:$0xff] }
 0x60c   : > { %v5520_v40 = vsel %vm5469_vm14, %v11351_v5, 0  ;;  %vm5476_vm9 = vmpackc.low %vm5475_vm13, %vm5474_vm10 }
 0x60d   : > { %v5558_v21 = vunpack.c.l.b16 %v5520_v40  ;;  %v5559_v59 = vunpack.c.h.b16 %v5520_v40  ;;  %v5521_v47 = vsel %vm5476_vm9, %v11352_v11, 0  ;;  %vm5322_vm8 = vmpackc.low %vm5292_vm4, %vm5292_vm4 }
 0x60e   : > { %v5560_v27 = vunpack.c.l.b16 %v5521_v47  ;;  %v5352_v19 = vsel %vm5322_vm8, 65537, %v11146_v38  ;;  %vm5324_vm0 = vmpackc.low %vm5294_vm5, %vm5294_vm5  ;;  %v5561_v24 = vunpack.c.h.b16 %v5521_v47  ;;  %vm5495_vm5 = vcmp.ne.s32.totalorder %v6997_v33, %v7591_v20 }
 0x60f   : > { %v5382_v53 = vunpack.c.l.b16 %v5352_v19  ;;  %v5588_v51 = vpack.c.b16 %v5558_v21, %v5558_v21  ;;  %v5589_v46 = vpack.c.b16 %v5559_v59, %v5559_v59  ;;  %v5354_v55 = vsel %vm5324_vm0, 65537, %v11146_v38  ;;  %vm5329_vm1 = vmpackc.low %vm5299_vm6, %vm5299_vm6  ;;  %v11354_v19 = vld [vmem:[#allocation40_spill] sm:$0xff] }
 0x610   : > { %v5590_v14 = vpack.c.b16 %v5560_v27, %v5560_v27  ;;  %v5384_v52 = vunpack.c.l.b16 %v5354_v55  ;;  %v5359_v0 = vsel %vm5329_vm1, 65537, %v11146_v38  ;;  %v5591_v17 = vpack.c.b16 %v5561_v24, %v5561_v24 }
 0x611   : > { %v6993_v9 = vunpack.i.l.s16 %v5382_v53  ;;  %v5389_v27 = vunpack.c.l.b16 %v5359_v0 }
 0x612   : > { %5634 = vrot.lane.b32.xlu0 %v5588_v51, %s7286_s26  ;;  %v5253_v63 = vpop.permute.xlu1 %5252  ;;  %v5259_v30 = vpop.permute.xlu0 %5258  ;;  %v6995_v25 = vunpack.i.l.s16 %v5384_v52 }
 0x613   : > { %vm5481_vm3 = vcmp.ne.s32.totalorder %v6993_v9, %v7591_v20  ;;  %5636 = vrot.lane.b32.xlu1 %v5589_v46, %s7286_s26  ;;  %5638 = vrot.lane.b32.xlu2 %v5590_v14, %s7286_s26  ;;  %vm5295_vm12 = vcmp.eq.s32.totalorder %v5253_v63, 1  ;;  %vm5297_vm11 = vcmp.eq.s32.totalorder %v5259_v30, 1  ;;  %v11355_v46 = vld [vmem:[#allocation46_spill] sm:$0xff]  ;;  %v7000_v14 = vunpack.i.l.s16 %v5389_v27 }
 0x614   : > { %vm5483_vm7 = vmpackc.low %vm5482_vm2, %vm5481_vm3  ;;  %vm5488_vm14 = vcmp.ne.s32.totalorder %v6995_v25, %v7591_v20  ;;  %v11356_v25 = vld [vmem:[#allocation47_spill] sm:$0xff]  ;;  %v5742_v27 = vld [vmem:[%s10979_s3 + $0x58] sm:$0xff] }
 0x615   : > { %v5522_v8 = vsel %vm5483_vm7, %v11353_v34, 0  ;;  %vm5325_vm15 = vmpackc.low %vm5295_vm12, %vm5295_vm12  ;;  %vm5503_vm12 = vcmp.ne.s32.totalorder %v7000_v14, %v7602_v26 }
 0x616   : > { %v5562_v57 = vunpack.c.l.b16 %v5522_v8  ;;  %v5563_v48 = vunpack.c.h.b16 %v5522_v8  ;;  %v5355_v56 = vsel %vm5325_vm15, 65537, %v11146_v38  ;;  %vm5327_vm10 = vmpackc.low %vm5297_vm11, %vm5297_vm11 }
 0x617   : > { %v5385_v15 = vunpack.c.l.b16 %v5355_v56  ;;  %v5357_v5 = vsel %vm5327_vm10, 65537, %v11146_v38 }
 0x618   : > { %v5387_v40 = vunpack.c.l.b16 %v5357_v5  ;;  %v5593_v21 = vpack.c.b16 %v5563_v48, %v5563_v48  ;;  %v5592_v59 = vpack.c.b16 %v5562_v57, %v5562_v57 }
 0x619   : > { %v6996_v11 = vunpack.i.l.s16 %v5385_v15 }
 0x61a   : > { %v6998_v47 = vunpack.i.l.s16 %v5387_v40  ;;  %5640 = vrot.lane.b32.xlu0 %v5591_v17, %s7286_s26  ;;  %v5262_v36 = vpop.permute.xlu1 %5261  ;;  %v5268_v2 = vpop.permute.xlu0 %5267 }
 0x61b   : > { %vm5489_vm13 = vcmp.ne.s32.totalorder %v6996_v11, %v7602_v26  ;;  %5644 = vrot.lane.b32.xlu2 %v5593_v21, %s7286_s26  ;;  %5642 = vrot.lane.b32.xlu1 %v5592_v59, %s7286_s26  ;;  %vm5298_vm4 = vcmp.eq.s32.totalorder %v5262_v36, 1  ;;  %vm5300_vm0 = vcmp.eq.s32.totalorder %v5268_v2, 1  ;;  %v5731_v36 = vld [vmem:[%s10979_s3] sm:$0xff] }
 0x61c   : > { %vm5490_vm9 = vmpackc.low %vm5489_vm13, %vm5488_vm14  ;;  %vm5496_vm8 = vcmp.ne.s32.totalorder %v6998_v47, %v7602_v26  ;;  %v5732_v47 = vld [vmem:[%s10979_s3 + $0x8] sm:$0xff] }
 0x61d   : > { %v5523_v3 = vsel %vm5490_vm9, %v11354_v19, 0  ;;  %vm5497_vm6 = vmpackc.low %vm5496_vm8, %vm5495_vm5  ;;  %vm5761_vm5 = vcmp.gt.f32.partialorder %v5731_v36, 0.5  ;;  %vm5698_vm9 = vcmask 257248   ;;  %v5741_v19 = vld [vmem:[%s10979_s3 + $0x50] sm:$0xff] }
 0x61e   : > { %v5564_v53 = vunpack.c.l.b16 %v5523_v3  ;;  %v5565_v51 = vunpack.c.h.b16 %v5523_v3  ;;  %v5524_v55 = vsel %vm5497_vm6, %v11355_v46, 0  ;;  %vm5328_vm2 = vmpackc.low %vm5298_vm4, %vm5298_vm4  ;;  %vm5762_vm4 = vcmp.gt.f32.partialorder %v5732_v47, 0.5  ;;  %v5735_v46 = vld [vmem:[%s10979_s3 + $0x20] sm:$0xff] }
 0x61f   : > { %v5566_v9 = vunpack.c.l.b16 %v5524_v55  ;;  %v5358_v18 = vsel %vm5328_vm2, 65537, %v11146_v38  ;;  %vm5330_vm3 = vmpackc.low %vm5300_vm0, %vm5300_vm0  ;;  %v5567_v48 = vunpack.c.h.b16 %v5524_v55  ;;  %v5791_v2 = vsel %vm5761_vm5, 1, %v11146_v38 }
 0x620   : > { %v5388_v63 = vunpack.c.l.b16 %v5358_v18  ;;  %v5360_v30 = vsel %vm5330_vm3, 65537, %v11146_v38  ;;  %v5594_v52 = vpack.c.b16 %v5564_v53, %v5564_v53  ;;  %v5595_v24 = vpack.c.b16 %v5565_v51, %v5565_v51  ;;  %v5753_v18 = vld [vmem:[%s10979_s3 + $0xb0] sm:$0xff] }
 0x621   : > { %v5596_v34 = vpack.c.b16 %v5566_v9, %v5566_v9  ;;  %v5390_v33 = vunpack.c.l.b16 %v5360_v30  ;;  %v5597_v21 = vpack.c.b16 %v5567_v48, %v5567_v48  ;;  %vm5772_vm0 = vcmp.gt.f32.partialorder %v5742_v27, 0.5 }
 0x622   : > { %v6999_v8 = vunpack.i.l.s16 %v5388_v63  ;;  %5646 = vrot.lane.b32.xlu0 %v5594_v52, %s7286_s26  ;;  %v5271_v57 = vpop.permute.xlu1 %5270  ;;  %vm5771_vm6 = vcmp.gt.f32.partialorder %v5741_v19, 0.5 }
 0x623   : > { %5648 = vrot.lane.b32.xlu1 %v5595_v24, %s7286_s26  ;;  %5650 = vrot.lane.b32.xlu2 %v5596_v34, %s7286_s26  ;;  %vm5301_vm1 = vcmp.eq.s32.totalorder %v5271_v57, 1  ;;  %v7001_v15 = vunpack.i.l.s16 %v5390_v33  ;;  %v5801_v3 = vsel %vm5771_vm6, 1, %v11146_v38 }
 0x624   : > { %vm5502_vm11 = vcmp.ne.s32.totalorder %v6999_v8, %v7591_v20  ;;  %vm5331_vm7 = vmpackc.low %vm5301_vm1, %vm5301_vm1  ;;  %vm5765_vm1 = vcmp.gt.f32.partialorder %v5735_v46, 0.5 }
 0x625   : > { %vm5504_vm15 = vmpackc.low %vm5503_vm12, %vm5502_vm11  ;;  %v5361_v56 = vsel %vm5331_vm7, 65537, %v11146_v38  ;;  %vm5509_vm10 = vcmp.ne.s32.totalorder %v7001_v15, %v7591_v20  ;;  %vm5783_vm12 = vcmp.gt.f32.partialorder %v5753_v18, 0.5 }
 0x626   : > { %v10527_v0 = vsel %vm5504_vm15, %v11356_v25, 0  ;;  %v5391_v5 = vunpack.c.l.b16 %v5361_v56  ;;  %v5813_v24 = vsel %vm5783_vm12, 1, %v11146_v38 }
 0x627   : > { %v5568_v40 = vunpack.c.l.b16 %v10527_v0 }
 0x628   : > { %v7002_v17 = vunpack.i.l.s16 %v5391_v5 }
 0x629   : > { %v5598_v59 = vpack.c.b16 %v5568_v40, %v5568_v40 }
 0x62a   : > { %vm5510_vm14 = vcmp.ne.s32.totalorder %v7002_v17, %v7602_v26  ;;  %5652 = vrot.lane.b32.xlu0 %v5597_v21, %s7286_s26 }
 0x62b   : > { %vm10533_vm13 = vmpackc.low %vm5510_vm14, %vm5509_vm10  ;;  %5870 = vperm.xlu2 %7228, %v10276_v54   ;;  %5654 = vrot.lane.b32.xlu1 %v5598_v59, %s7286_s26  ;;  %v5792_v54 = vsel %vm5762_vm4, 1, %v11146_v38 }
 0x632   : > { %5873 = vperm.xlu0 %7229, %v10293_v49  }
 0x633   : > { %5897 = vperm.xlu2 %7228, %v10338_v44   ;;  %5894 = vperm.xlu1 %7230, %v10355_v10   ;;  %v5733_v44 = vld [vmem:[%s10979_s3 + $0x10] sm:$0xff] }
 0x634   : > { %vm5763_vm8 = vcmp.gt.f32.partialorder %v5733_v44, 0.5 }
 0x63a   : > { %5846 = vperm.xlu0 %7229, %v10241_v28   ;;  %v5793_v28 = vsel %vm5763_vm8, 1, %v11146_v38 }
 0x63b   : > { %5825 = vperm.xlu2 %7228, %v5792_v54   ;;  %5822 = vperm.xlu1 %7230, %v5791_v2   ;;  %v5603_v49 = vpop.permute.xlu2 %5602 }
 0x63c   : > { %5699 = vst.msk [vmem:[#allocation2] sm:$0xf] %vm5698_vm9, %v5603_v49 }
 0x642   : > { %5879 = vperm.xlu0 %7229, %v10296_v4   ;;  %v5734_v4 = vld [vmem:[%s10979_s3 + $0x18] sm:$0xff] }
 0x643   : > { %5876 = vperm.xlu2 %7228, %v10313_v58   ;;  %5849 = vperm.xlu1 %7230, %v10256_v42   ;;  %vm5764_vm2 = vcmp.gt.f32.partialorder %v5734_v4, 0.5  ;;  %v5802_v58 = vsel %vm5772_vm0, 1, %v11146_v38 }
 0x644   : > { %v5609_v10 = vpop.permute.xlu2 %5608  ;;  %v5794_v53 = vsel %vm5764_vm2, 1, %v11146_v38 }
 0x645   : > { %5702 = vst.msk [vmem:[#allocation2 + $0xc] sm:$0xf] %vm5698_vm9, %v5609_v10 }
 0x64a   : > { %5828 = vperm.xlu0 %7229, %v5793_v28  }
 0x64b   : > { %5903 = vperm.xlu2 %7228, %v10376_v1   ;;  %5900 = vperm.xlu1 %7230, %v10358_v31   ;;  %v5736_v31 = vld [vmem:[%s10979_s3 + $0x28] sm:$0xff] }
 0x64c   : > { %vm5766_vm3 = vcmp.gt.f32.partialorder %v5736_v31, 0.5 }
 0x64d   : > { %v5615_v42 = vpop.permute.xlu2 %5614  ;;  %v5796_v9 = vsel %vm5766_vm3, 1, %v11146_v38 }
 0x64e   : > { %5705 = vst.msk [vmem:[#allocation2 + $0x18] sm:$0xf] %vm5698_vm9, %v5615_v42 }
 0x652   : > { %5855 = vperm.xlu0 %7229, %v5802_v58  }
 0x653   : > { %5852 = vperm.xlu2 %7228, %v5801_v3   ;;  %5831 = vperm.xlu1 %7230, %v5794_v53   ;;  %v5605_v51 = vpop.permute.xlu0 %5604 }
 0x654   : > { %5700 = vst.msk [vmem:[#allocation2 + $0x4] sm:$0xf] %vm5698_vm9, %v5605_v51 }
 0x655   : > { %v5621_v1 = vpop.permute.xlu2 %5620 }
 0x656   : > { %5708 = vst.msk [vmem:[#allocation2 + $0x24] sm:$0xf] %vm5698_vm9, %v5621_v1 }
 0x65a   : > { %5906 = vperm.xlu0 %7229, %v10361_v39   ;;  %v5795_v39 = vsel %vm5765_vm1, 1, %v11146_v38 }
 0x65b   : > { %5885 = vperm.xlu2 %7228, %v10334_v61   ;;  %5882 = vperm.xlu1 %7230, %v10316_v50   ;;  %v5744_v50 = vld [vmem:[%s10979_s3 + $0x68] sm:$0xff]  ;;  %v5743_v61 = vld [vmem:[%s10979_s3 + $0x60] sm:$0xff] }
 0x65c   : > { %v5607_v55 = vpop.permute.xlu1 %5606  ;;  %vm5774_vm11 = vcmp.gt.f32.partialorder %v5744_v50, 0.5  ;;  %vm5773_vm7 = vcmp.gt.f32.partialorder %v5743_v61, 0.5 }
 0x65d   : > { %5701 = vst.msk [vmem:[#allocation2 + $0x8] sm:$0xf] %vm5698_vm9, %v5607_v55  ;;  %v5627_v14 = vpop.permute.xlu2 %5626  ;;  %v5804_v34 = vsel %vm5774_vm11, 1, %v11146_v38  ;;  %v5803_v8 = vsel %vm5773_vm7, 1, %v11146_v38 }
 0x65e   : > { %5711 = vst.msk [vmem:[#allocation2 + $0x30] sm:$0xf] %vm5698_vm9, %v5627_v14 }
 0x662   : > { %5837 = vperm.xlu0 %7229, %v5796_v9  }
 0x663   : > { %5834 = vperm.xlu2 %7228, %v5795_v39   ;;  %5909 = vperm.xlu1 %7230, %v10379_v43   ;;  %v5754_v43 = vld [vmem:[%s10979_s3 + $0xb8] sm:$0xff] }
 0x664   : > { %v5613_v63 = vpop.permute.xlu1 %5612  ;;  %v5611_v30 = vpop.permute.xlu0 %5610  ;;  %vm5784_vm15 = vcmp.gt.f32.partialorder %v5754_v43, 0.5 }
 0x665   : > { %5704 = vst.msk [vmem:[#allocation2 + $0x14] sm:$0xf] %vm5698_vm9, %v5613_v63  ;;  %v5633_v52 = vpop.permute.xlu2 %5632  ;;  %v5814_v56 = vsel %vm5784_vm15, 1, %v11146_v38 }
 0x666   : > { %5703 = vst.msk [vmem:[#allocation2 + $0x10] sm:$0xf] %vm5698_vm9, %v5611_v30 }
 0x667   : > { %5714 = vst.msk [vmem:[#allocation2 + $0x3c] sm:$0xf] %vm5698_vm9, %v5633_v52 }
 0x66a   : > { %5888 = vperm.xlu0 %7229, %v5813_v24  }
 0x66b   : > { %5861 = vperm.xlu2 %7228, %v5804_v34   ;;  %5858 = vperm.xlu1 %7230, %v5803_v8  }
 0x66c   : > { %v5617_v33 = vpop.permute.xlu0 %5616 }
 0x66d   : > { %5706 = vst.msk [vmem:[#allocation2 + $0x1c] sm:$0xf] %vm5698_vm9, %v5617_v33  ;;  %v5619_v57 = vpop.permute.xlu1 %5618  ;;  %v5639_v48 = vpop.permute.xlu2 %5638 }
 0x66e   : > { %5707 = vst.msk [vmem:[#allocation2 + $0x20] sm:$0xf] %vm5698_vm9, %v5619_v57 }
 0x66f   : > { %5717 = vst.msk [vmem:[#allocation2 + $0x48] sm:$0xf] %vm5698_vm9, %v5639_v48 }
 0x673   : > { %5891 = vperm.xlu1 %7230, %v5814_v56  }
 0x674   : > { %v5623_v25 = vpop.permute.xlu0 %5622 }
 0x675   : > { %5709 = vst.msk [vmem:[#allocation2 + $0x28] sm:$0xf] %vm5698_vm9, %v5623_v25  ;;  %v5625_v15 = vpop.permute.xlu1 %5624  ;;  %v5645_v5 = vpop.permute.xlu2 %5644 }
 0x676   : > { %5710 = vst.msk [vmem:[#allocation2 + $0x2c] sm:$0xf] %vm5698_vm9, %v5625_v15 }
 0x677   : > { %5720 = vst.msk [vmem:[#allocation2 + $0x54] sm:$0xf] %vm5698_vm9, %v5645_v5 }
 0x67c   : > { %v5629_v40 = vpop.permute.xlu0 %5628 }
 0x67d   : > { %5712 = vst.msk [vmem:[#allocation2 + $0x34] sm:$0xf] %vm5698_vm9, %v5629_v40  ;;  %v5631_v17 = vpop.permute.xlu1 %5630  ;;  %v5651_v21 = vpop.permute.xlu2 %5650 }
 0x67e   : > { %5713 = vst.msk [vmem:[#allocation2 + $0x38] sm:$0xf] %vm5698_vm9, %v5631_v17 }
 0x67f   : > { %5723 = vst.msk [vmem:[#allocation2 + $0x60] sm:$0xf] %vm5698_vm9, %v5651_v21 }
 0x684   : > { %v5635_v59 = vpop.permute.xlu0 %5634 }
 0x685   : > { %5715 = vst.msk [vmem:[#allocation2 + $0x40] sm:$0xf] %vm5698_vm9, %v5635_v59  ;;  %v5637_v47 = vpop.permute.xlu1 %5636  ;;  %v5871_v36 = vpop.permute.xlu2 %5870 }
 0x686   : > { %5716 = vst.msk [vmem:[#allocation2 + $0x44] sm:$0xf] %vm5698_vm9, %v5637_v47  ;;  %vm5927_vm10 = vcmp.eq.s32.totalorder %v5871_v36, 1 }
 0x687   : > { %vm5957_vm4 = vmpackc.low %vm5927_vm10, %vm5927_vm10 }
 0x688   : > { %v5987_v4 = vsel %vm5957_vm4, 65537, %v11146_v38 }
 0x689   : > { %v6017_v58 = vunpack.c.l.b16 %v5987_v4 }
 0x68b   : > { %v7019_v31 = vunpack.i.l.s16 %v6017_v58  ;;  %v5746_v58 = vld [vmem:[%s10979_s3 + $0x78] sm:$0xff] }
 0x68c   : > { %v5641_v54 = vpop.permute.xlu0 %5640 }
 0x68d   : > { %5718 = vst.msk [vmem:[#allocation2 + $0x4c] sm:$0xf] %vm5698_vm9, %v5641_v54  ;;  %v5643_v2 = vpop.permute.xlu1 %5642  ;;  %v5898_v49 = vpop.permute.xlu2 %5897  ;;  %vm6106_vm12 = vcmp.ne.s32.totalorder %v7019_v31, %v7591_v20 }
 0x68e   : > { %5719 = vst.msk [vmem:[#allocation2 + $0x50] sm:$0xf] %vm5698_vm9, %v5643_v2  ;;  %vm5936_vm14 = vcmp.eq.s32.totalorder %v5898_v49, 1 }
 0x68f   : > { %vm5966_vm5 = vmpackc.low %vm5936_vm14, %vm5936_vm14 }
 0x690   : > { %v5996_v42 = vsel %vm5966_vm5, 65537, %v11146_v38 }
 0x691   : > { %v6026_v53 = vunpack.c.l.b16 %v5996_v42 }
 0x693   : > { %v7028_v9 = vunpack.i.l.s16 %v6026_v53 }
 0x694   : > { %v5647_v44 = vpop.permute.xlu0 %5646 }
 0x695   : > { %5721 = vst.msk [vmem:[#allocation2 + $0x58] sm:$0xf] %vm5698_vm9, %v5647_v44  ;;  %v5649_v10 = vpop.permute.xlu1 %5648  ;;  %v5826_v19 = vpop.permute.xlu2 %5825  ;;  %vm6135_vm7 = vcmp.ne.s32.totalorder %v7028_v9, %v7602_v26 }
 0x696   : > { %5722 = vst.msk [vmem:[#allocation2 + $0x5c] sm:$0xf] %vm5698_vm9, %v5649_v10  ;;  %vm5912_vm8 = vcmp.eq.s32.totalorder %v5826_v19, 1 }
 0x697   : > { %vm5942_vm1 = vmpackc.low %vm5912_vm8, %vm5912_vm8 }
 0x698   : > { %v5972_v50 = vsel %vm5942_vm1, 65537, %v11146_v38 }
 0x699   : > { %v6002_v52 = vunpack.c.l.b16 %v5972_v50 }
 0x69b   : > { %v7004_v25 = vunpack.i.l.s16 %v6002_v52 }
 0x69c   : > { %v5653_v28 = vpop.permute.xlu0 %5652 }
 0x69d   : > { %5724 = vst.msk [vmem:[#allocation2 + $0x64] sm:$0xf] %vm5698_vm9, %v5653_v28  ;;  %v5655_v27 = vpop.permute.xlu1 %5654  ;;  %v5877_v46 = vpop.permute.xlu2 %5876 }
 0x69e   : > { %5725 = vst.msk [vmem:[#allocation2 + $0x68] sm:$0xf] %vm5698_vm9, %v5655_v27 }
 0x6a4   : > { %v5874_v3 = vpop.permute.xlu0 %5873 }
 0x6a5   : > { %vm5928_vm0 = vcmp.eq.s32.totalorder %v5874_v3, 1  ;;  %v5895_v51 = vpop.permute.xlu1 %5894  ;;  %v5904_v15 = vpop.permute.xlu2 %5903  ;;  %v5745_v3 = vld [vmem:[%s10979_s3 + $0x70] sm:$0xff] }
 0x6a6   : > { %vm5958_vm6 = vmpackc.low %vm5928_vm0, %vm5928_vm0  ;;  %vm5935_vm2 = vcmp.eq.s32.totalorder %v5895_v51, 1 }
 0x6a7   : > { %v5988_v1 = vsel %vm5958_vm6, 65537, %v11146_v38  ;;  %vm5965_vm3 = vmpackc.low %vm5935_vm2, %vm5935_vm2  ;;  %vm5929_vm6 = vcmp.eq.s32.totalorder %v5877_v46, 1 }
 0x6a8   : > { %v6018_v55 = vunpack.c.l.b16 %v5988_v1  ;;  %v5995_v14 = vsel %vm5965_vm3, 65537, %v11146_v38  ;;  %vm10649_vm2 = vmpackc.low %vm5929_vm6, %vm5929_vm6  ;;  %vm5776_vm6 = vcmp.gt.f32.partialorder %v5746_v58, 0.5 }
 0x6a9   : > { %v6025_v39 = vunpack.c.l.b16 %v5995_v14  ;;  %v5989_v19 = vsel %vm10649_vm2, 65537, %v11146_v38  ;;  %vm5775_vm2 = vcmp.gt.f32.partialorder %v5745_v3, 0.5 }
 0x6aa   : > { %v7020_v18 = vunpack.i.l.s16 %v6018_v55  ;;  %v6019_v55 = vunpack.c.l.b16 %v5989_v19 }
 0x6ab   : > { %v7027_v61 = vunpack.i.l.s16 %v6025_v39  ;;  %v5806_v39 = vsel %vm5776_vm6, 1, %v11146_v38 }
 0x6ac   : > { %vm6107_vm11 = vcmp.ne.s32.totalorder %v7020_v18, %v7602_v26  ;;  %v5847_v63 = vpop.permute.xlu0 %5846  ;;  %v5805_v18 = vsel %vm5775_vm2, 1, %v11146_v38 }
 0x6ad   : > { %vm6108_vm15 = vmpackc.low %vm6107_vm11, %vm6106_vm12  ;;  %vm6134_vm10 = vcmp.ne.s32.totalorder %v7027_v61, %v7591_v20  ;;  %vm5919_vm14 = vcmp.eq.s32.totalorder %v5847_v63, 1  ;;  %v5823_v30 = vpop.permute.xlu1 %5822  ;;  %vm6051_vm11 = vcmp.ne.s32.totalorder %v7004_v25, %v7602_v26  ;;  %v5853_v51 = vpop.permute.xlu2 %5852  ;;  %v7021_v63 = vunpack.i.l.s16 %v6019_v55 }
 0x6ae   : > { %v6159_v24 = vsel %vm6108_vm15, %v8819_v41, 0  ;;  %vm6136_vm4 = vmpackc.low %vm6135_vm7, %vm6134_vm10  ;;  %vm5911_vm5 = vcmp.eq.s32.totalorder %v5823_v30, 1  ;;  %v5737_v41 = vld [vmem:[%s10979_s3 + $0x30] sm:$0xff] }
 0x6af   : > { %v6197_v34 = vunpack.c.l.b16 %v6159_v24  ;;  %v6198_v8 = vunpack.c.h.b16 %v6159_v24  ;;  %v6163_v43 = vsel %vm6136_vm4, %v8864_v13, 0  ;;  %vm5949_vm8 = vmpackc.low %vm5919_vm14, %vm5919_vm14  ;;  %v5738_v13 = vld [vmem:[%s10979_s3 + $0x38] sm:$0xff]  ;;  %vm5767_vm1 = vcmp.gt.f32.partialorder %v5737_v41, 0.5 }
 0x6b0   : > { %v6205_v33 = vunpack.c.l.b16 %v6163_v43  ;;  %vm5941_vm0 = vmpackc.low %vm5911_vm5, %vm5911_vm5  ;;  %v5979_v17 = vsel %vm5949_vm8, 65537, %v11146_v38  ;;  %v6206_v36 = vunpack.c.h.b16 %v6163_v43  ;;  %vm5768_vm12 = vcmp.gt.f32.partialorder %v5738_v13, 0.5 }
 0x6b1   : > { %v5971_v57 = vsel %vm5941_vm0, 65537, %v11146_v38  ;;  %v6228_v48 = vpack.c.b16 %v6198_v8, %v6198_v8  ;;  %v6227_v56 = vpack.c.b16 %v6197_v34, %v6197_v34  ;;  %v6009_v2 = vunpack.c.l.b16 %v5979_v17 }
 0x6b2   : > { %v6001_v5 = vunpack.c.l.b16 %v5971_v57  ;;  %v6235_v40 = vpack.c.b16 %v6205_v33, %v6205_v33  ;;  %v5797_v49 = vsel %vm5767_vm1, 1, %v11146_v38  ;;  %v6236_v28 = vpack.c.b16 %v6206_v36, %v6206_v36 }
 0x6b3   : > { %6275 = vrot.lane.b32.xlu0 %v6228_v48, %s7288_s7  ;;  %6273 = vrot.lane.b32.xlu2 %v6227_v56, %s7288_s7  ;;  %v5798_v27 = vsel %vm5768_vm12, 1, %v11146_v38  ;;  %vm5938_vm5 = vcmp.eq.s32.totalorder %v5904_v15, 1  ;;  %v7011_v4 = vunpack.i.l.s16 %v6009_v2 }
 0x6b4   : > { %v7003_v21 = vunpack.i.l.s16 %v6001_v5  ;;  %6289 = vrot.lane.b32.xlu1 %v6235_v40, %s7288_s7  ;;  %v5880_v59 = vpop.permute.xlu0 %5879  ;;  %vm5968_vm8 = vmpackc.low %vm5938_vm5, %vm5938_vm5 }
 0x6b5   : > { %vm5930_vm3 = vcmp.eq.s32.totalorder %v5880_v59, 1  ;;  %v5850_v54 = vpop.permute.xlu1 %5849  ;;  %v5998_v50 = vsel %vm5968_vm8, 65537, %v11146_v38  ;;  %vm6113_vm8 = vcmp.ne.s32.totalorder %v7021_v63, %v7591_v20  ;;  %v5886_v56 = vpop.permute.xlu2 %5885 }
 0x6b6   : > { %vm6050_vm7 = vcmp.ne.s32.totalorder %v7003_v21, %v7591_v20  ;;  %vm5960_vm15 = vmpackc.low %vm5930_vm3, %vm5930_vm3  ;;  %vm5920_vm10 = vcmp.eq.s32.totalorder %v5850_v54, 1  ;;  %vm6078_vm3 = vcmp.ne.s32.totalorder %v7011_v4, %v7591_v20  ;;  %v6028_v8 = vunpack.c.l.b16 %v5998_v50 }
 0x6b7   : > { %vm6052_vm14 = vmpackc.low %vm6051_vm11, %vm6050_vm7  ;;  %v5990_v44 = vsel %vm5960_vm15, 65537, %v11146_v38 }
 0x6b8   : > { %vm5950_vm4 = vmpackc.low %vm5920_vm10, %vm5920_vm10  ;;  %v6151_v53 = vsel %vm6052_vm14, %v8608_v22, 0  ;;  %v6020_v1 = vunpack.c.l.b16 %v5990_v44  ;;  %vm5921_vm10 = vcmp.eq.s32.totalorder %v5853_v51, 1  ;;  %v7030_v5 = vunpack.i.l.s16 %v6028_v8 }
 0x6b9   : > { %v5980_v10 = vsel %vm5950_vm4, 65537, %v11146_v38  ;;  %v6181_v9 = vunpack.c.l.b16 %v6151_v53  ;;  %v6182_v33 = vunpack.c.h.b16 %v6151_v53  ;;  %vm5951_vm4 = vmpackc.low %vm5921_vm10, %vm5921_vm10 }
 0x6ba   : > { %v6010_v42 = vunpack.c.l.b16 %v5980_v10  ;;  %v7022_v22 = vunpack.i.l.s16 %v6020_v1  ;;  %v5981_v40 = vsel %vm5951_vm4, 65537, %v11146_v38 }
 0x6bb   : > { %5840 = vperm.xlu0 %7229, %v5797_v49   ;;  %6291 = vrot.lane.b32.xlu2 %v6236_v28, %s7288_s7  ;;  %v6211_v52 = vpack.c.b16 %v6181_v9, %v6181_v9  ;;  %v6212_v21 = vpack.c.b16 %v6182_v33, %v6182_v33  ;;  %v5569_v49 = vunpack.c.h.b16 %v10527_v0  ;;  %v6011_v28 = vunpack.c.l.b16 %v5981_v40 }
 0x6bc   : > { %v7012_v31 = vunpack.i.l.s16 %v6010_v42  ;;  %5843 = vperm.xlu1 %7230, %v5798_v27   ;;  %v5829_v46 = vpop.permute.xlu0 %5828  ;;  %vm6114_vm14 = vcmp.ne.s32.totalorder %v7022_v22, %v7602_v26 }
 0x6bd   : > { %vm5913_vm0 = vcmp.eq.s32.totalorder %v5829_v46, 1  ;;  %v5901_v14 = vpop.permute.xlu1 %5900  ;;  %vm6115_vm2 = vmpackc.low %vm6114_vm14, %vm6113_vm8  ;;  %v5599_v4 = vpack.c.b16 %v5569_v49, %v5569_v49  ;;  %v7013_v42 = vunpack.i.l.s16 %v6011_v28  ;;  %v5835_v3 = vpop.permute.xlu2 %5834 }
 0x6be   : > { %vm6079_vm1 = vcmp.ne.s32.totalorder %v7012_v31, %v7602_v26  ;;  %vm5943_vm12 = vmpackc.low %vm5913_vm0, %vm5913_vm0  ;;  %vm5937_vm11 = vcmp.eq.s32.totalorder %v5901_v14, 1  ;;  %v6160_v59 = vsel %vm6115_vm2, %v8795_v7, 0 }
 0x6bf   : > { %vm6080_vm7 = vmpackc.low %vm6079_vm1, %vm6078_vm3  ;;  %v5973_v24 = vsel %vm5943_vm12, 65537, %v11146_v38  ;;  %vm5932_vm1 = vcmp.eq.s32.totalorder %v5886_v56, 1  ;;  %v6199_v7 = vunpack.c.l.b16 %v6160_v59  ;;  %v6200_v19 = vunpack.c.h.b16 %v6160_v59 }
 0x6c0   : > { %vm5967_vm15 = vmpackc.low %vm5937_vm11, %vm5937_vm11  ;;  %v6155_v30 = vsel %vm6080_vm7, %v8706_v45, 0  ;;  %v6003_v25 = vunpack.c.l.b16 %v5973_v24  ;;  %vm6142_vm11 = vcmp.ne.s32.totalorder %v7030_v5, %v7602_v26  ;;  %vm6085_vm2 = vcmp.ne.s32.totalorder %v7013_v42, %v7591_v20 }
 0x6c1   : > { %v5997_v61 = vsel %vm5967_vm15, 65537, %v11146_v38  ;;  %v6189_v57 = vunpack.c.l.b16 %v6155_v30  ;;  %v6190_v45 = vunpack.c.h.b16 %v6155_v30  ;;  %vm5962_vm7 = vmpackc.low %vm5932_vm1, %vm5932_vm1  ;;  %v6229_v51 = vpack.c.b16 %v6199_v7, %v6199_v7 }
 0x6c2   : > { %v6027_v34 = vunpack.c.l.b16 %v5997_v61  ;;  %v7005_v47 = vunpack.i.l.s16 %v6003_v25  ;;  %v5992_v58 = vsel %vm5962_vm7, 65537, %v11146_v38  ;;  %v6230_v31 = vpack.c.b16 %v6200_v19, %v6200_v19 }
 0x6c3   : > { %5867 = vperm.xlu0 %7229, %v5806_v39   ;;  %5864 = vperm.xlu2 %7228, %v5805_v18   ;;  %v6219_v17 = vpack.c.b16 %v6189_v57, %v6189_v57  ;;  %v6220_v54 = vpack.c.b16 %v6190_v45, %v6190_v45  ;;  %v6022_v55 = vunpack.c.l.b16 %v5992_v58 }
 0x6c4   : > { %6241 = vrot.lane.b32.xlu1 %v6211_v52, %s7288_s7  ;;  %v5856_v43 = vpop.permute.xlu0 %5855  ;;  %v7029_v15 = vunpack.i.l.s16 %v6027_v34  ;;  %vm6057_vm15 = vcmp.ne.s32.totalorder %v7005_v47, %v7591_v20 }
 0x6c5   : > { %vm5922_vm5 = vcmp.eq.s32.totalorder %v5856_v43, 1  ;;  %v5832_v48 = vpop.permute.xlu1 %5831  ;;  %v5862_v34 = vpop.permute.xlu2 %5861 }
 0x6c6   : > { %vm5952_vm0 = vmpackc.low %vm5922_vm5, %vm5922_vm5  ;;  %vm5914_vm6 = vcmp.eq.s32.totalorder %v5832_v48, 1  ;;  %vm6141_vm12 = vcmp.ne.s32.totalorder %v7029_v15, %v7591_v20  ;;  %v11361_v15 = vld [vmem:[#allocation51_spill] sm:$0xff] }
 0x6c7   : > { %v5982_v41 = vsel %vm5952_vm0, 65537, %v11146_v38  ;;  %vm5944_vm3 = vmpackc.low %vm5914_vm6, %vm5914_vm6  ;;  %v5526_v5 = vsel %vm10533_vm13, %v11361_v15, 0 }
 0x6c8   : > { %v5974_v13 = vsel %vm5944_vm3, 65537, %v11146_v38  ;;  %v6012_v2 = vunpack.c.l.b16 %v5982_v41  ;;  %vm6143_vm10 = vmpackc.low %vm6142_vm11, %vm6141_vm12  ;;  %v5571_v49 = vunpack.c.h.b16 %v5526_v5 }
 0x6c9   : > { %v6004_v36 = vunpack.c.l.b16 %v5974_v13  ;;  %v6164_v1 = vsel %vm6143_vm10, %v9727_v16, 0 }
 0x6ca   : > { %v7014_v0 = vunpack.i.l.s16 %v6012_v2  ;;  %v6207_v9 = vunpack.c.l.b16 %v6164_v1  ;;  %v6208_v22 = vunpack.c.h.b16 %v6164_v1  ;;  %v5570_v2 = vunpack.c.l.b16 %v5526_v5 }
 0x6cb   : > { %6257 = vrot.lane.b32.xlu0 %v6219_v17, %s7288_s7  ;;  %6243 = vrot.lane.b32.xlu2 %v6212_v21, %s7288_s7  ;;  %v7006_v44 = vunpack.i.l.s16 %v6004_v36  ;;  %v5601_v42 = vpack.c.b16 %v5571_v49, %v5571_v49 }
 0x6cc   : > { %6259 = vrot.lane.b32.xlu1 %v6220_v54, %s7288_s7  ;;  %v5907_v10 = vpop.permute.xlu0 %5906  ;;  %vm6086_vm0 = vcmp.ne.s32.totalorder %v7014_v0, %v7602_v26  ;;  %v6238_v63 = vpack.c.b16 %v6208_v22, %v6208_v22  ;;  %v6237_v30 = vpack.c.b16 %v6207_v9, %v6207_v9 }
 0x6cd   : > { %v5883_v27 = vpop.permute.xlu1 %5882  ;;  %vm6058_vm14 = vcmp.ne.s32.totalorder %v7006_v44, %v7602_v26  ;;  %vm5939_vm6 = vcmp.eq.s32.totalorder %v5907_v10, 1  ;;  %vm6087_vm3 = vmpackc.low %vm6086_vm0, %vm6085_vm2 }
 0x6ce   : > { %vm5931_vm4 = vcmp.eq.s32.totalorder %v5883_v27, 1  ;;  %vm6059_vm5 = vmpackc.low %vm6058_vm14, %vm6057_vm15  ;;  %v6156_v52 = vsel %vm6087_vm3, %v8745_v29, 0  ;;  %vm5915_vm15 = vcmp.eq.s32.totalorder %v5835_v3, 1 }
 0x6cf   : > { %vm5961_vm8 = vmpackc.low %vm5931_vm4, %vm5931_vm4  ;;  %v6152_v46 = vsel %vm6059_vm5, %v8641_v62, 0  ;;  %v7024_v62 = vunpack.i.l.s16 %v6022_v55  ;;  %v6191_v33 = vunpack.c.l.b16 %v6156_v52  ;;  %v6192_v48 = vunpack.c.h.b16 %v6156_v52 }
 0x6d0   : > { %v5991_v53 = vsel %vm5961_vm8, 65537, %v11146_v38  ;;  %v6183_v16 = vunpack.c.l.b16 %v6152_v46  ;;  %vm5969_vm12 = vmpackc.low %vm5939_vm6, %vm5939_vm6  ;;  %v6184_v57 = vunpack.c.h.b16 %v6152_v46  ;;  %vm5924_vm8 = vcmp.eq.s32.totalorder %v5862_v34, 1 }
 0x6d1   : > { %v6021_v14 = vunpack.c.l.b16 %v5991_v53  ;;  %v5999_v8 = vsel %vm5969_vm12, 65537, %v11146_v38  ;;  %vm6121_vm4 = vcmp.ne.s32.totalorder %v7024_v62, %v7602_v26  ;;  %vm5945_vm5 = vmpackc.low %vm5915_vm15, %vm5915_vm15  ;;  %v6221_v13 = vpack.c.b16 %v6191_v33, %v6191_v33  ;;  %v11363_v33 = vld [vmem:[#allocation48_spill] sm:$0xff] }
 0x6d2   : > { %v6213_v24 = vpack.c.b16 %v6183_v16, %v6183_v16  ;;  %v6029_v45 = vunpack.c.l.b16 %v5999_v8  ;;  %v5975_v40 = vsel %vm5945_vm5, 65537, %v11146_v38  ;;  %vm5954_vm3 = vmpackc.low %vm5924_vm8, %vm5924_vm8  ;;  %v6214_v41 = vpack.c.b16 %v6184_v57, %v6184_v57 }
 0x6d3   : > { %5656 = vrot.lane.b32.xlu2 %v5599_v4, %s7286_s26  ;;  %6277 = vrot.lane.b32.xlu0 %v6229_v51, %s7288_s7  ;;  %v7023_v50 = vunpack.i.l.s16 %v6021_v14  ;;  %v6222_v47 = vpack.c.b16 %v6192_v48, %v6192_v48  ;;  %v6005_v54 = vunpack.c.l.b16 %v5975_v40  ;;  %v5984_v11 = vsel %vm5954_vm3, 65537, %v11146_v38 }
 0x6d4   : > { %6279 = vrot.lane.b32.xlu1 %v6230_v31, %s7288_s7  ;;  %v5838_v18 = vpop.permute.xlu0 %5837  ;;  %v7031_v17 = vunpack.i.l.s16 %v6029_v45  ;;  %v6014_v7 = vunpack.c.l.b16 %v5984_v11  ;;  %v5600_v4 = vpack.c.b16 %v5570_v2, %v5570_v2 }
 0x6d5   : > { %v5910_v39 = vpop.permute.xlu1 %5909  ;;  %vm5916_vm7 = vcmp.eq.s32.totalorder %v5838_v18, 1  ;;  %vm6120_vm10 = vcmp.ne.s32.totalorder %v7023_v50, %v7591_v20 }
 0x6d6   : > { %vm5940_vm1 = vcmp.eq.s32.totalorder %v5910_v39, 1  ;;  %vm5946_vm14 = vmpackc.low %vm5916_vm7, %vm5916_vm7  ;;  %v7016_v53 = vunpack.i.l.s16 %v6014_v7 }
 0x6d7   : > { %vm5970_vm11 = vmpackc.low %vm5940_vm1, %vm5940_vm1  ;;  %v5976_v56 = vsel %vm5946_vm14, 65537, %v11146_v38  ;;  %vm6148_vm1 = vcmp.ne.s32.totalorder %v7031_v17, %v7591_v20 }
 0x6d8   : > { %v6000_v61 = vsel %vm5970_vm11, 65537, %v11146_v38  ;;  %vm6122_vm6 = vmpackc.low %vm6121_vm4, %vm6120_vm10  ;;  %v6006_v21 = vunpack.c.l.b16 %v5976_v56  ;;  %vm6093_vm8 = vcmp.ne.s32.totalorder %v7016_v53, %v7602_v26 }
 0x6d9   : > { %v6030_v43 = vunpack.c.l.b16 %v6000_v61  ;;  %v6161_v36 = vsel %vm6122_vm6, %v8835_v23, 0  ;;  %v7007_v23 = vunpack.i.l.s16 %v6005_v54 }
 0x6da   : > { %v6201_v10 = vunpack.c.l.b16 %v6161_v36  ;;  %v7008_v28 = vunpack.i.l.s16 %v6006_v21  ;;  %v6202_v51 = vunpack.c.h.b16 %v6161_v36 }
 0x6db   : > { %6295 = vrot.lane.b32.xlu0 %v6238_v63, %s7288_s7  ;;  %6293 = vrot.lane.b32.xlu2 %v6237_v30, %s7288_s7  ;;  %v7032_v25 = vunpack.i.l.s16 %v6030_v43  ;;  %vm6064_vm15 = vcmp.ne.s32.totalorder %v7007_v23, %v7591_v20  ;;  %v11362_v43 = vld [vmem:[#allocation45_spill] sm:$0xff] }
 0x6dc   : > { %6245 = vrot.lane.b32.xlu1 %v6213_v24, %s7288_s7  ;;  %v5889_v19 = vpop.permute.xlu0 %5888  ;;  %vm6065_vm11 = vcmp.ne.s32.totalorder %v7008_v28, %v7602_v26  ;;  %v6231_v3 = vpack.c.b16 %v6201_v10, %v6201_v10  ;;  %v6232_v55 = vpack.c.b16 %v6202_v51, %v6202_v51 }
 0x6dd   : > { %v5859_v29 = vpop.permute.xlu1 %5858  ;;  %vm6149_vm13 = vcmp.ne.s32.totalorder %v7032_v25, %v7602_v26  ;;  %vm5933_vm10 = vcmp.eq.s32.totalorder %v5889_v19, 1  ;;  %vm6066_vm14 = vmpackc.low %vm6065_vm11, %vm6064_vm15 }
 0x6de   : > { %vm5923_vm0 = vcmp.eq.s32.totalorder %v5859_v29, 1  ;;  %vm6150_vm12 = vmpackc.low %vm6149_vm13, %vm6148_vm1  ;;  %v6153_v14 = vsel %vm6066_vm14, %v8681_v6, 0  ;;  %vm6337_vm1 = vcmask 290048  }
 0x6df   : > { %vm5953_vm2 = vmpackc.low %vm5923_vm0, %vm5923_vm0  ;;  %v6165_v58 = vsel %vm6150_vm12, %v11253_v37, 0  ;;  %v6185_v18 = vunpack.c.l.b16 %v6153_v14  ;;  %v6186_v62 = vunpack.c.h.b16 %v6153_v14  ;;  %vm6370_vm12 = vcmask 1043744  }
 0x6e0   : > { %v5983_v59 = vsel %vm5953_vm2, 65537, %v11146_v38  ;;  %v6209_v1 = vunpack.c.l.b16 %v6165_v58  ;;  %v6210_v31 = vunpack.c.h.b16 %v6165_v58  ;;  %vm5963_vm0 = vmpackc.low %vm5933_vm10, %vm5933_vm10 }
 0x6e1   : > { %v6013_v44 = vunpack.c.l.b16 %v5983_v59  ;;  %v5993_v22 = vsel %vm5963_vm0, 65537, %v11146_v38  ;;  %v6216_v30 = vpack.c.b16 %v6186_v62, %v6186_v62  ;;  %v6215_v52 = vpack.c.b16 %v6185_v18, %v6185_v18  ;;  %v7151_v62 = vld [vmem:[%s10977_s1 + $0x20] sm:$0xff] }
 0x6e2   : > { %v6239_v46 = vpack.c.b16 %v6209_v1, %v6209_v1  ;;  %v6240_v9 = vpack.c.b16 %v6210_v31, %v6210_v31  ;;  %v6023_v50 = vunpack.c.l.b16 %v5993_v22  ;;  %v7152_v22 = vld [vmem:[%s10977_s1 + $0x28] sm:$0xff] }
 0x6e3   : > { %6247 = vrot.lane.b32.xlu2 %v6214_v41, %s7288_s7  ;;  %6261 = vrot.lane.b32.xlu0 %v6221_v13, %s7288_s7  ;;  %v7015_v0 = vunpack.i.l.s16 %v6013_v44 }
 0x6e4   : > { %6263 = vrot.lane.b32.xlu1 %v6222_v47, %s7288_s7  ;;  %v7025_v6 = vunpack.i.l.s16 %v6023_v50  ;;  %v7150_v50 = vld [vmem:[%s10977_s1 + $0x18] sm:$0xff] }
 0x6e5   : > { %v5892_v27 = vpop.permute.xlu1 %5891  ;;  %vm6092_vm4 = vcmp.ne.s32.totalorder %v7015_v0, %v7591_v20 }
 0x6e6   : > { %vm5934_vm7 = vcmp.eq.s32.totalorder %v5892_v27, 1  ;;  %vm6094_vm6 = vmpackc.low %vm6093_vm8, %vm6092_vm4  ;;  %vm6127_vm3 = vcmp.ne.s32.totalorder %v7025_v6, %v7591_v20  ;;  %v7148_v6 = vld [vmem:[%s10977_s1 + $0x8] sm:$0xff] }
 0x6e7   : > { %vm5964_vm5 = vmpackc.low %vm5934_vm7, %vm5934_vm7  ;;  %v6157_v39 = vsel %vm6094_vm6, %v8734_v35, 0 }
 0x6e8   : > { %v5994_v37 = vsel %vm5964_vm5, 65537, %v11146_v38  ;;  %v6193_v61 = vunpack.c.l.b16 %v6157_v39  ;;  %v6194_v35 = vunpack.c.h.b16 %v6157_v39 }
 0x6e9   : > { %v6024_v16 = vunpack.c.l.b16 %v5994_v37 }
 0x6ea   : > { %v6223_v24 = vpack.c.b16 %v6193_v61, %v6193_v61  ;;  %v6224_v34 = vpack.c.b16 %v6194_v35, %v6194_v35 }
 0x6eb   : > { %5658 = vrot.lane.b32.xlu2 %v5600_v4, %s7286_s26  ;;  %5660 = vrot.lane.b32.xlu0 %v5601_v42, %s7286_s26  ;;  %v7026_v63 = vunpack.i.l.s16 %v6024_v16 }
 0x6ec   : > { %6281 = vrot.lane.b32.xlu1 %v6231_v3, %s7288_s7 }
 0x6ed   : > { %vm6128_vm2 = vcmp.ne.s32.totalorder %v7026_v63, %v7602_v26 }
 0x6ee   : > { %vm6129_vm13 = vmpackc.low %vm6128_vm2, %vm6127_vm3 }
 0x6ef   : > { %v6162_v8 = vsel %vm6129_vm13, %v8861_v12, 0 }
 0x6f0   : > { %v6203_v57 = vunpack.c.l.b16 %v6162_v8  ;;  %v6204_v29 = vunpack.c.h.b16 %v6162_v8  ;;  %v7147_v8 = vld [vmem:[%s10977_s1] sm:$0xff] }
 0x6f2   : > { %v6234_v48 = vpack.c.b16 %v6204_v29, %v6204_v29  ;;  %v6233_v45 = vpack.c.b16 %v6203_v57, %v6203_v57 }
 0x6f3   : > { %6297 = vrot.lane.b32.xlu0 %v6239_v46, %s7288_s7  ;;  %6283 = vrot.lane.b32.xlu2 %v6232_v55, %s7288_s7 }
 0x6f4   : > { %6299 = vrot.lane.b32.xlu1 %v6240_v9, %s7288_s7  ;;  %v7153_v9 = vld [vmem:[%s10977_s1 + $0x30] sm:$0xff] }
 0x6fb   : > { %6251 = vrot.lane.b32.xlu0 %v6216_v30, %s7288_s7  ;;  %6249 = vrot.lane.b32.xlu2 %v6215_v52, %s7288_s7  ;;  %v7149_v52 = vld [vmem:[%s10977_s1 + $0x10] sm:$0xff] }
 0x6fc   : > { %6265 = vrot.lane.b32.xlu1 %v6223_v24, %s7288_s7 }
 0x703   : > { %5662 = vrot.lane.b32.xlu0 %v11362_v43, %s7286_s26  ;;  %6267 = vrot.lane.b32.xlu2 %v6224_v34, %s7288_s7 }
 0x704   : > { %5664 = vrot.lane.b32.xlu1 %v11363_v33, %s7286_s26 }
 0x70b   : > { %6287 = vrot.lane.b32.xlu0 %v6234_v48, %s7288_s7  ;;  %6285 = vrot.lane.b32.xlu2 %v6233_v45, %s7288_s7 }
 0x70c   : > { %6301 = vrot.lane.b32.xlu1 %v11362_v43, %s7288_s7 }
 0x70d   : > { %v6274_v12 = vpop.permute.xlu2 %6273 }
 0x70e   : > { %6354 = vst.msk [vmem:[#allocation2 + $0x40] sm:$0xf] %vm6337_vm1, %v6274_v12 }
 0x70f   : > { %6387 = vst.msk [vmem:[#allocation2 + $0x40] sm:$0xf] %vm6370_vm12, %v11146_v38 }
 0x713   : > { %6303 = vrot.lane.b32.xlu2 %v11363_v33, %s7288_s7 }
 0x715   : > { %v6292_v56 = vpop.permute.xlu2 %6291 }
 0x716   : > { %6363 = vst.msk [vmem:[#allocation2 + $0x64] sm:$0xf] %vm6337_vm1, %v6292_v56 }
 0x717   : > { %6396 = vst.msk [vmem:[#allocation2 + $0x64] sm:$0xf] %vm6370_vm12, %v11146_v38 }
 0x71d   : > { %v5865_v25 = vpop.permute.xlu2 %5864 }
 0x71e   : > { %vm5925_vm11 = vcmp.eq.s32.totalorder %v5865_v25, 1 }
 0x71f   : > { %vm5955_vm7 = vmpackc.low %vm5925_vm11, %vm5925_vm11 }
 0x720   : > { %v5985_v54 = vsel %vm5955_vm7, 65537, %v11146_v38 }
 0x721   : > { %v6015_v10 = vunpack.c.l.b16 %v5985_v54 }
 0x723   : > { %v7017_v0 = vunpack.i.l.s16 %v6015_v10 }
 0x725   : > { %v6276_v15 = vpop.permute.xlu0 %6275  ;;  %v6244_v5 = vpop.permute.xlu2 %6243  ;;  %vm6099_vm3 = vcmp.ne.s32.totalorder %v7017_v0, %v7591_v20  ;;  %v10902_v0 = vld [vmem:[%s10978_s2] ss:$0 sm:$0xff] }
 0x726   : > { %6355 = vst.msk [vmem:[#allocation2 + $0x44] sm:$0xf] %vm6337_vm1, %v6276_v15  ;;  %v6290_v40 = vpop.permute.xlu1 %6289 }
 0x727   : > { %6388 = vst.msk [vmem:[#allocation2 + $0x44] sm:$0xf] %vm6370_vm12, %v11146_v38 }
 0x728   : > { %6362 = vst.msk [vmem:[#allocation2 + $0x60] sm:$0xf] %vm6337_vm1, %v6290_v40 }
 0x729   : > { %6395 = vst.msk [vmem:[#allocation2 + $0x60] sm:$0xf] %vm6370_vm12, %v11146_v38 }
 0x72a   : > { %6339 = vst.msk [vmem:[#allocation2 + $0x4] sm:$0xf] %vm6337_vm1, %v6244_v5 }
 0x72b   : > { %6372 = vst.msk [vmem:[#allocation2 + $0x4] sm:$0xf] %vm6370_vm12, %v11146_v38 }
 0x72d   : > { %v5841_v41 = vpop.permute.xlu0 %5840  ;;  %v5657_v13 = vpop.permute.xlu2 %5656 }
 0x72e   : > { %vm5917_vm15 = vcmp.eq.s32.totalorder %v5841_v41, 1  ;;  %v5844_v17 = vpop.permute.xlu1 %5843  ;;  %5726 = vst.msk [vmem:[#allocation2 + $0x6c] sm:$0xf] %vm5698_vm9, %v5657_v13  ;;  %v7139_v43 = vld [vmem:[#allocation2 + $0x40] sm:$0xff] }
 0x72f   : > { %vm5947_vm10 = vmpackc.low %vm5917_vm15, %vm5917_vm15  ;;  %vm5918_vm14 = vcmp.eq.s32.totalorder %v5844_v17, 1 }
 0x730   : > { %v5977_v21 = vsel %vm5947_vm10, 65537, %v11146_v38  ;;  %vm5948_vm4 = vmpackc.low %vm5918_vm14, %vm5918_vm14  ;;  %v7143_v33 = vld [vmem:[#allocation2 + $0x60] sm:$0xff] }
 0x731   : > { %v6007_v59 = vunpack.c.l.b16 %v5977_v21  ;;  %v5978_v47 = vsel %vm5948_vm4, 65537, %v11146_v38 }
 0x732   : > { %v6008_v36 = vunpack.c.l.b16 %v5978_v47 }
 0x733   : > { %v7009_v11 = vunpack.i.l.s16 %v6007_v59 }
 0x734   : > { %v7010_v2 = vunpack.i.l.s16 %v6008_v36 }
 0x735   : > { %vm6071_vm5 = vcmp.ne.s32.totalorder %v7009_v11, %v7591_v20  ;;  %v5868_v49 = vpop.permute.xlu0 %5867  ;;  %v6294_v44 = vpop.permute.xlu2 %6293  ;;  %v7154_v20 = vld [vmem:[%s10977_s1 + $0x38] sm:$0xff] }
 0x736   : > { %vm6072_vm8 = vcmp.ne.s32.totalorder %v7010_v2, %v7602_v26  ;;  %vm5926_vm0 = vcmp.eq.s32.totalorder %v5868_v49, 1  ;;  %v6242_v28 = vpop.permute.xlu1 %6241  ;;  %6364 = vst.msk [vmem:[#allocation2 + $0x68] sm:$0xf] %vm6337_vm1, %v6294_v44  ;;  %7156 = vmatpush.bf16.msra.mxu2 %v7154_v20  ;;  %7157 = vmatpush.bf16.msra.mxu3 %v7154_v20 }
 0x737   : > { %vm6073_vm6 = vmpackc.low %vm6072_vm8, %vm6071_vm5  ;;  %6338 = vst.msk [vmem:[#allocation2] sm:$0xf] %vm6337_vm1, %v6242_v28  ;;  %6599 = vmatpush.bf16.msra.mxu0 %v7154_v20  ;;  %7155 = vmatpush.bf16.msra.mxu1 %v7154_v20 }
 0x738   : > { %v6154_v7 = vsel %vm6073_vm6, %v8670_v60, 0  ;;  %vm5956_vm2 = vmpackc.low %vm5926_vm0, %vm5926_vm0  ;;  %6371 = vst.msk [vmem:[#allocation2] sm:$0xf] %vm6370_vm12, %v11146_v38 }
 0x739   : > { %v6187_v23 = vunpack.c.l.b16 %v6154_v7  ;;  %v6188_v27 = vunpack.c.h.b16 %v6154_v7  ;;  %v5986_v19 = vsel %vm5956_vm2, 65537, %v11146_v38  ;;  %6397 = vst.msk [vmem:[#allocation2 + $0x68] sm:$0xf] %vm6370_vm12, %v11146_v38 }
 0x73a   : > { %v6016_v4 = vunpack.c.l.b16 %v5986_v19  ;;  %7159 = vmatpush.bf16.msra.mxu2 %v7153_v9  ;;  %7160 = vmatpush.bf16.msra.mxu3 %v7153_v9 }
 0x73b   : > { %v6217_v42 = vpack.c.b16 %v6187_v23, %v6187_v23  ;;  %v6218_v58 = vpack.c.b16 %v6188_v27, %v6188_v27  ;;  %6600 = vmatpush.bf16.msra.mxu0 %v7153_v9  ;;  %7158 = vmatpush.bf16.msra.mxu1 %v7153_v9 }
 0x73c   : > { %v7018_v3 = vunpack.i.l.s16 %v6016_v4 }
 0x73d   : > { %6253 = vrot.lane.b32.xlu0 %v6217_v42, %s7288_s7  ;;  %6255 = vrot.lane.b32.xlu1 %v6218_v58, %s7288_s7  ;;  %v6258_v60 = vpop.permute.xlu0 %6257  ;;  %v6248_v53 = vpop.permute.xlu2 %6247 }
 0x73e   : > { %vm6100_vm13 = vcmp.ne.s32.totalorder %v7018_v3, %v7602_v26  ;;  %6346 = vst.msk [vmem:[#allocation2 + $0x20] sm:$0xf] %vm6337_vm1, %v6258_v60  ;;  %v6260_v51 = vpop.permute.xlu1 %6259  ;;  %7162 = vmatpush.bf16.msra.mxu2 %v7152_v22  ;;  %7163 = vmatpush.bf16.msra.mxu3 %v7152_v22 }
 0x73f   : > { %vm6101_vm11 = vmpackc.low %vm6100_vm13, %vm6099_vm3  ;;  %6379 = vst.msk [vmem:[#allocation2 + $0x20] sm:$0xf] %vm6370_vm12, %v11146_v38  ;;  %6601 = vmatpush.bf16.msra.mxu0 %v7152_v22  ;;  %7161 = vmatpush.bf16.msra.mxu1 %v7152_v22  ;;  %v7131_v57 = vld [vmem:[#allocation2] sm:$0xff] }
 0x740   : > { %v6158_v1 = vsel %vm6101_vm11, %v8777_v32, 0  ;;  %6347 = vst.msk [vmem:[#allocation2 + $0x24] sm:$0xf] %vm6337_vm1, %v6260_v51 }
 0x741   : > { %v6195_v31 = vunpack.c.l.b16 %v6158_v1  ;;  %v6196_v37 = vunpack.c.h.b16 %v6158_v1  ;;  %6380 = vst.msk [vmem:[#allocation2 + $0x24] sm:$0xf] %vm6370_vm12, %v11146_v38 }
 0x742   : > { %6341 = vst.msk [vmem:[#allocation2 + $0xc] sm:$0xf] %vm6337_vm1, %v6248_v53  ;;  %7165 = vmatpush.bf16.msra.mxu2 %v7151_v62  ;;  %7166 = vmatpush.bf16.msra.mxu3 %v7151_v62 }
 0x743   : > { %6374 = vst.msk [vmem:[#allocation2 + $0xc] sm:$0xf] %vm6370_vm12, %v11146_v38  ;;  %v6226_v26 = vpack.c.b16 %v6196_v37, %v6196_v37  ;;  %v6225_v46 = vpack.c.b16 %v6195_v31, %v6195_v31  ;;  %6602 = vmatpush.bf16.msra.mxu0 %v7151_v62  ;;  %7164 = vmatpush.bf16.msra.mxu1 %v7151_v62 }
 0x745   : > { %6271 = vrot.lane.b32.xlu0 %v6226_v26, %s7288_s7  ;;  %6269 = vrot.lane.b32.xlu2 %v6225_v46, %s7288_s7  ;;  %v6278_v32 = vpop.permute.xlu0 %6277  ;;  %v5659_v55 = vpop.permute.xlu2 %5658 }
 0x746   : > { %v6280_v14 = vpop.permute.xlu1 %6279  ;;  %6356 = vst.msk [vmem:[#allocation2 + $0x48] sm:$0xf] %vm6337_vm1, %v6278_v32  ;;  %7168 = vmatpush.bf16.msra.mxu2 %v7150_v50  ;;  %7169 = vmatpush.bf16.msra.mxu3 %v7150_v50 }
 0x747   : > { %6357 = vst.msk [vmem:[#allocation2 + $0x4c] sm:$0xf] %vm6337_vm1, %v6280_v14  ;;  %6603 = vmatpush.bf16.msra.mxu0 %v7150_v50  ;;  %7167 = vmatpush.bf16.msra.mxu1 %v7150_v50 }
 0x748   : > { %6390 = vst.msk [vmem:[#allocation2 + $0x4c] sm:$0xf] %vm6370_vm12, %v11146_v38  ;;  %v7135_v29 = vld [vmem:[#allocation2 + $0x20] sm:$0xff] }
 0x749   : > { %6389 = vst.msk [vmem:[#allocation2 + $0x48] sm:$0xf] %vm6370_vm12, %v11146_v38 }
 0x74a   : > { %5727 = vst.msk [vmem:[#allocation2 + $0x70] sm:$0xf] %vm5698_vm9, %v5659_v55  ;;  %7171 = vmatpush.bf16.msra.mxu2 %v7149_v52  ;;  %7172 = vmatpush.bf16.msra.mxu3 %v7149_v52 }
 0x74b   : > { %6604 = vmatpush.bf16.msra.mxu0 %v7149_v52  ;;  %7170 = vmatpush.bf16.msra.mxu1 %v7149_v52 }
 0x74d   : > { %v6296_v39 = vpop.permute.xlu0 %6295  ;;  %v6284_v16 = vpop.permute.xlu2 %6283 }
 0x74e   : > { %v6246_v18 = vpop.permute.xlu1 %6245  ;;  %6365 = vst.msk [vmem:[#allocation2 + $0x6c] sm:$0xf] %vm6337_vm1, %v6296_v39  ;;  %7174 = vmatpush.bf16.msra.mxu2 %v7148_v6  ;;  %7175 = vmatpush.bf16.msra.mxu3 %v7148_v6 }
 0x74f   : > { %6340 = vst.msk [vmem:[#allocation2 + $0x8] sm:$0xf] %vm6337_vm1, %v6246_v18  ;;  %6605 = vmatpush.bf16.msra.mxu0 %v7148_v6  ;;  %7173 = vmatpush.bf16.msra.mxu1 %v7148_v6 }
 0x750   : > { %6373 = vst.msk [vmem:[#allocation2 + $0x8] sm:$0xf] %vm6370_vm12, %v11146_v38  ;;  %v7140_v15 = vld [vmem:[#allocation2 + $0x48] sm:$0xff] }
 0x751   : > { %6398 = vst.msk [vmem:[#allocation2 + $0x6c] sm:$0xf] %vm6370_vm12, %v11146_v38 }
 0x752   : > { %6359 = vst.msk [vmem:[#allocation2 + $0x54] sm:$0xf] %vm6337_vm1, %v6284_v16  ;;  %7177 = vmatpush.bf16.msra.mxu2 %v7147_v8  ;;  %7178 = vmatpush.bf16.msra.mxu3 %v7147_v8 }
 0x753   : > { %6392 = vst.msk [vmem:[#allocation2 + $0x54] sm:$0xf] %vm6370_vm12, %v11146_v38  ;;  %6606 = vmatpush.bf16.msra.mxu0 %v7147_v8  ;;  %7176 = vmatpush.bf16.msra.mxu1 %v7147_v8 }
 0x755   : > { %v6262_v61 = vpop.permute.xlu0 %6261  ;;  %v6250_v63 = vpop.permute.xlu2 %6249  ;;  %6647 = vmatmul.bf16.vlgmr.msra.gmra.mxu2 %v7139_v43  ;;  %6667 = vmatmul.bf16.vlgmr.msra.gmra.mxu3 %v7143_v33 }
 0x756   : > { %v6264_v30 = vpop.permute.xlu1 %6263  ;;  %6348 = vst.msk [vmem:[#allocation2 + $0x28] sm:$0xf] %vm6337_vm1, %v6262_v61  ;;  %6607 = vmatmul.bf16.vlgmr.msra.gmra.mxu0 %v7131_v57  ;;  %6627 = vmatmul.bf16.vlgmr.msra.gmra.mxu1 %v7135_v29 }
 0x757   : > { %6349 = vst.msk [vmem:[#allocation2 + $0x2c] sm:$0xf] %vm6337_vm1, %v6264_v30  ;;  %v7132_v40 = vld [vmem:[#allocation2 + $0x8] sm:$0xff] }
 0x758   : > { %6382 = vst.msk [vmem:[#allocation2 + $0x2c] sm:$0xf] %vm6370_vm12, %v11146_v38  ;;  %v7144_v5 = vld [vmem:[#allocation2 + $0x68] sm:$0xff] }
 0x759   : > { %6381 = vst.msk [vmem:[#allocation2 + $0x28] sm:$0xf] %vm6370_vm12, %v11146_v38 }
 0x75a   : > { %6342 = vst.msk [vmem:[#allocation2 + $0x10] sm:$0xf] %vm6337_vm1, %v6250_v63 }
 0x75b   : > { %6375 = vst.msk [vmem:[#allocation2 + $0x10] sm:$0xf] %vm6370_vm12, %v11146_v38 }
 0x75d   : > { %v5661_v24 = vpop.permute.xlu0 %5660  ;;  %v6268_v35 = vpop.permute.xlu2 %6267 }
 0x75e   : > { %5728 = vst.msk [vmem:[#allocation2 + $0x74] sm:$0xf] %vm5698_vm9, %v5661_v24  ;;  %v6282_v34 = vpop.permute.xlu1 %6281 }
 0x75f   : > { %6358 = vst.msk [vmem:[#allocation2 + $0x50] sm:$0xf] %vm6337_vm1, %v6282_v34 }
 0x760   : > { %6391 = vst.msk [vmem:[#allocation2 + $0x50] sm:$0xf] %vm6370_vm12, %v11146_v38  ;;  %v7136_v41 = vld [vmem:[#allocation2 + $0x28] sm:$0xff] }
 0x761   : > { %6351 = vst.msk [vmem:[#allocation2 + $0x34] sm:$0xf] %vm6337_vm1, %v6268_v35 }
 0x762   : > { %6384 = vst.msk [vmem:[#allocation2 + $0x34] sm:$0xf] %vm6370_vm12, %v11146_v38 }
 0x765   : > { %v6298_v48 = vpop.permute.xlu0 %6297  ;;  %v6286_v12 = vpop.permute.xlu2 %6285  ;;  %6652 = vmatmul.bf16.gmra.mxu2 %v7140_v15  ;;  %6672 = vmatmul.bf16.gmra.mxu3 %v7144_v5 }
 0x766   : > { %6366 = vst.msk [vmem:[#allocation2 + $0x70] sm:$0xf] %vm6337_vm1, %v6298_v48  ;;  %v6300_v45 = vpop.permute.xlu1 %6299  ;;  %6612 = vmatmul.bf16.gmra.mxu0 %v7132_v40  ;;  %6632 = vmatmul.bf16.gmra.mxu1 %v7136_v41 }
 0x767   : > { %6399 = vst.msk [vmem:[#allocation2 + $0x70] sm:$0xf] %vm6370_vm12, %v11146_v38  ;;  %v7141_v36 = vld [vmem:[#allocation2 + $0x50] sm:$0xff] }
 0x768   : > { %6367 = vst.msk [vmem:[#allocation2 + $0x74] sm:$0xf] %vm6337_vm1, %v6300_v45 }
 0x769   : > { %6400 = vst.msk [vmem:[#allocation2 + $0x74] sm:$0xf] %vm6370_vm12, %v11146_v38 }
 0x76a   : > { %6360 = vst.msk [vmem:[#allocation2 + $0x58] sm:$0xf] %vm6337_vm1, %v6286_v12 }
 0x76b   : > { %6393 = vst.msk [vmem:[#allocation2 + $0x58] sm:$0xf] %vm6370_vm12, %v11146_v38 }
 0x76d   : > { %v6252_v56 = vpop.permute.xlu0 %6251  ;;  %v6304_v21 = vpop.permute.xlu2 %6303 }
 0x76e   : > { %6343 = vst.msk [vmem:[#allocation2 + $0x14] sm:$0xf] %vm6337_vm1, %v6252_v56  ;;  %v6266_v25 = vpop.permute.xlu1 %6265 }
 0x76f   : > { %6376 = vst.msk [vmem:[#allocation2 + $0x14] sm:$0xf] %vm6370_vm12, %v11146_v38 }
 0x770   : > { %6350 = vst.msk [vmem:[#allocation2 + $0x30] sm:$0xf] %vm6337_vm1, %v6266_v25  ;;  %v7145_v54 = vld [vmem:[#allocation2 + $0x70] sm:$0xff] }
 0x771   : > { %6383 = vst.msk [vmem:[#allocation2 + $0x30] sm:$0xf] %vm6370_vm12, %v11146_v38 }
 0x775   : > { %v5663_v13 = vpop.permute.xlu0 %5662  ;;  %6657 = vmatmul.bf16.gmra.mxu2 %v7141_v36  ;;  %6677 = vmatmul.bf16.gmra.mxu3 %v7145_v54 }
 0x776   : > { %5729 = vst.msk [vmem:[#allocation2 + $0x78] sm:$0xf] %vm5698_vm9, %v5663_v13  ;;  %v5665_v17 = vpop.permute.xlu1 %5664  ;;  %v7133_v11 = vld [vmem:[#allocation2 + $0x10] sm:$0xff] }
 0x777   : > { %5730 = vst.msk [vmem:[#allocation2 + $0x7c] sm:$0xf] %vm5698_vm9, %v5665_v17  ;;  %6617 = vmatmul.bf16.gmra.mxu0 %v7133_v11 }
 0x778   : > { %6369 = vst.msk [vmem:[#allocation2 + $0x7c] sm:$0xf] %vm6337_vm1, %v6304_v21  ;;  %v7137_v2 = vld [vmem:[#allocation2 + $0x30] sm:$0xff] }
 0x779   : > { %6402 = vst.msk [vmem:[#allocation2 + $0x7c] sm:$0xf] %vm6370_vm12, %v11146_v38  ;;  %6637 = vmatmul.bf16.gmra.mxu1 %v7137_v2 }
 0x77d   : > { %v6288_v59 = vpop.permute.xlu0 %6287 }
 0x77e   : > { %6361 = vst.msk [vmem:[#allocation2 + $0x5c] sm:$0xf] %vm6337_vm1, %v6288_v59  ;;  %v6302_v47 = vpop.permute.xlu1 %6301 }
 0x77f   : > { %6394 = vst.msk [vmem:[#allocation2 + $0x5c] sm:$0xf] %vm6370_vm12, %v11146_v38 }
 0x780   : > { %6368 = vst.msk [vmem:[#allocation2 + $0x78] sm:$0xf] %vm6337_vm1, %v6302_v47 }
 0x781   : > { %6401 = vst.msk [vmem:[#allocation2 + $0x78] sm:$0xf] %vm6370_vm12, %v11146_v38 }
 0x786   : > { %v7142_v49 = vld [vmem:[#allocation2 + $0x58] sm:$0xff] }
 0x787   : > { %6662 = vmatmul.bf16.gmra.mxu2 %v7142_v49 }
 0x788   : > { %v7146_v44 = vld [vmem:[#allocation2 + $0x78] sm:$0xff] }
 0x789   : > { %6682 = vmatmul.bf16.gmra.mxu3 %v7146_v44 }
 0x79f   : > { %v6270_v10 = vpop.permute.xlu2 %6269 }
 0x7a0   : > { %6352 = vst.msk [vmem:[#allocation2 + $0x38] sm:$0xf] %vm6337_vm1, %v6270_v10 }
 0x7a1   : > { %6385 = vst.msk [vmem:[#allocation2 + $0x38] sm:$0xf] %vm6370_vm12, %v11146_v38 }
 0x7af   : > { %v6254_v28 = vpop.permute.xlu0 %6253  ;;  %v6256_v7 = vpop.permute.xlu1 %6255 }
 0x7b0   : > { %6344 = vst.msk [vmem:[#allocation2 + $0x18] sm:$0xf] %vm6337_vm1, %v6254_v28 }
 0x7b1   : > { %6377 = vst.msk [vmem:[#allocation2 + $0x18] sm:$0xf] %vm6370_vm12, %v11146_v38 }
 0x7b2   : > { %6345 = vst.msk [vmem:[#allocation2 + $0x1c] sm:$0xf] %vm6337_vm1, %v6256_v7 }
 0x7b3   : > { %6378 = vst.msk [vmem:[#allocation2 + $0x1c] sm:$0xf] %vm6370_vm12, %v11146_v38 }
 0x7b7   : > { %v6272_v23 = vpop.permute.xlu0 %6271 }
 0x7b8   : > { %6353 = vst.msk [vmem:[#allocation2 + $0x3c] sm:$0xf] %vm6337_vm1, %v6272_v23 }
 0x7b9   : > { %6386 = vst.msk [vmem:[#allocation2 + $0x3c] sm:$0xf] %vm6370_vm12, %v11146_v38 }
 0x7ba   : > { %v7134_v27 = vld [vmem:[#allocation2 + $0x18] sm:$0xff] }
 0x7bb   : > { %6622 = vmatmul.bf16.gmra.mxu0 %v7134_v27 }
 0x7c0   : > { %v7138_v19 = vld [vmem:[#allocation2 + $0x38] sm:$0xff] }
 0x7c1   : > { %6642 = vmatmul.bf16.gmra.mxu1 %v7138_v19 }
 0x7d3   : > { %v6608_v38 = vpop.f32.mrf.mxu0  ;;  %v6628_v4 = vpop.f32.mrf.mxu1 }
 0x7d4   : > { %v6609_v42 = vadd.f32 %v10902_v0, %v6608_v38  ;;  %v6629_v58 = vadd.f32 %v10902_v0, %v6628_v4 }
 0x7d6   : > { %6688 = vst [vmem:[%s10907_s9] sm:$0xff] %v6609_v42 }
 0x7d7   : > { %6696 = vst [vmem:[%s10907_s9 + $0x40] sm:$0xff] %v6629_v58 }
 0x7d8   : > { %v6648_v3 = vpop.f32.mrf.mxu2  ;;  %v6668_v60 = vpop.f32.mrf.mxu3 }
 0x7d9   : > { %v6649_v53 = vadd.f32 %v10902_v0, %v6648_v3  ;;  %v6669_v51 = vadd.f32 %v10902_v0, %v6668_v60 }
 0x7db   : > { %6704 = vst [vmem:[%s10907_s9 + $0x80] sm:$0xff] %v6649_v53  ;;  %v6610_v1 = vpop.f32.mrf.mxu0  ;;  %v6630_v31 = vpop.f32.mrf.mxu1 }
 0x7dc   : > { %6712 = vst [vmem:[%s10907_s9 + $0xc0] sm:$0xff] %v6669_v51  ;;  %v6611_v37 = vadd.f32 %v10902_v0, %v6610_v1  ;;  %v6631_v20 = vadd.f32 %v10902_v0, %v6630_v31 }
 0x7de   : > { %6689 = vst [vmem:[%s10907_s9 + $0x8] sm:$0xff] %v6611_v37 }
 0x7df   : > { %6697 = vst [vmem:[%s10907_s9 + $0x48] sm:$0xff] %v6631_v20 }
 0x7e0   : > { %v6650_v26 = vpop.f32.mrf.mxu2  ;;  %v6670_v46 = vpop.f32.mrf.mxu3 }
 0x7e1   : > { %v6651_v32 = vadd.f32 %v10902_v0, %v6650_v26  ;;  %v6671_v55 = vadd.f32 %v10902_v0, %v6670_v46 }
 0x7e3   : > { %6705 = vst [vmem:[%s10907_s9 + $0x88] sm:$0xff] %v6651_v32  ;;  %v6613_v14 = vpop.f32.mrf.mxu0  ;;  %v6633_v9 = vpop.f32.mrf.mxu1 }
 0x7e4   : > { %6713 = vst [vmem:[%s10907_s9 + $0xc8] sm:$0xff] %v6671_v55  ;;  %v6614_v22 = vadd.f32 %v10902_v0, %v6613_v14  ;;  %v6634_v39 = vadd.f32 %v10902_v0, %v6633_v9 }
 0x7e6   : > { %6690 = vst [vmem:[%s10907_s9 + $0x10] sm:$0xff] %v6614_v22 }
 0x7e7   : > { %6698 = vst [vmem:[%s10907_s9 + $0x50] sm:$0xff] %v6634_v39 }
 0x7e8   : > { %v6653_v16 = vpop.f32.mrf.mxu2  ;;  %v6673_v18 = vpop.f32.mrf.mxu3 }
 0x7e9   : > { %v6654_v62 = vadd.f32 %v10902_v0, %v6653_v16  ;;  %v6674_v50 = vadd.f32 %v10902_v0, %v6673_v18 }
 0x7eb   : > { %6706 = vst [vmem:[%s10907_s9 + $0x90] sm:$0xff] %v6654_v62  ;;  %v6615_v61 = vpop.f32.mrf.mxu0  ;;  %v6635_v63 = vpop.f32.mrf.mxu1 }
 0x7ec   : > { %6714 = vst [vmem:[%s10907_s9 + $0xd0] sm:$0xff] %v6674_v50  ;;  %v6616_v30 = vadd.f32 %v10902_v0, %v6615_v61  ;;  %v6636_v52 = vadd.f32 %v10902_v0, %v6635_v63 }
 0x7ee   : > { %6691 = vst [vmem:[%s10907_s9 + $0x18] sm:$0xff] %v6616_v30 }
 0x7ef   : > { %6699 = vst [vmem:[%s10907_s9 + $0x58] sm:$0xff] %v6636_v52 }
 0x7f0   : > { %v6655_v6 = vpop.f32.mrf.mxu2  ;;  %v6675_v24 = vpop.f32.mrf.mxu3 }
 0x7f1   : > { %v6656_v35 = vadd.f32 %v10902_v0, %v6655_v6  ;;  %v6676_v34 = vadd.f32 %v10902_v0, %v6675_v24 }
 0x7f3   : > { %6707 = vst [vmem:[%s10907_s9 + $0x98] sm:$0xff] %v6656_v35 }
 0x7f4   : > { %v6618_v8 = vpop.f32.mrf.mxu0  ;;  %6715 = vst [vmem:[%s10907_s9 + $0xd8] sm:$0xff] %v6676_v34 }
 0x7f5   : > { %v6619_v33 = vadd.f32 %v10902_v0, %v6618_v8 }
 0x7f6   : > { %v6638_v43 = vpop.f32.mrf.mxu1 }
 0x7f7   : > { %v6639_v57 = vadd.f32 %v10902_v0, %v6638_v43  ;;  %6692 = vst [vmem:[%s10907_s9 + $0x20] sm:$0xff] %v6619_v33 }
 0x7f8   : > { %v6658_v29 = vpop.f32.mrf.mxu2  ;;  %v6678_v48 = vpop.f32.mrf.mxu3 }
 0x7f9   : > { %6700 = vst [vmem:[%s10907_s9 + $0x60] sm:$0xff] %v6639_v57  ;;  %v6659_v45 = vadd.f32 %v10902_v0, %v6658_v29  ;;  %v6679_v12 = vadd.f32 %v10902_v0, %v6678_v48 }
 0x7fb   : > { %6708 = vst [vmem:[%s10907_s9 + $0xa0] sm:$0xff] %v6659_v45 }
 0x7fc   : > { %v6620_v56 = vpop.f32.mrf.mxu0  ;;  %6716 = vst [vmem:[%s10907_s9 + $0xe0] sm:$0xff] %v6679_v12 }
 0x7fd   : > { %v6621_v15 = vadd.f32 %v10902_v0, %v6620_v56 }
 0x7fe   : > { %v6640_v25 = vpop.f32.mrf.mxu1 }
 0x7ff   : > { %v6641_v5 = vadd.f32 %v10902_v0, %v6640_v25  ;;  %6693 = vst [vmem:[%s10907_s9 + $0x28] sm:$0xff] %v6621_v15 }
 0x800   : > { %v6660_v40 = vpop.f32.mrf.mxu2  ;;  %v6680_v41 = vpop.f32.mrf.mxu3 }
 0x801   : > { %6701 = vst [vmem:[%s10907_s9 + $0x68] sm:$0xff] %v6641_v5  ;;  %v6661_v13 = vadd.f32 %v10902_v0, %v6660_v40  ;;  %v6681_v17 = vadd.f32 %v10902_v0, %v6680_v41 }
 0x803   : > { %6709 = vst [vmem:[%s10907_s9 + $0xa8] sm:$0xff] %v6661_v13 }
 0x804   : > { %6717 = vst [vmem:[%s10907_s9 + $0xe8] sm:$0xff] %v6681_v17 }
 0x80a   : > { %v6663_v21 = vpop.f32.mrf.mxu2 }
 0x80b   : > { %v6664_v47 = vadd.f32 %v10902_v0, %v6663_v21 }
 0x80c   : > { %v6683_v59 = vpop.f32.mrf.mxu3 }
 0x80d   : > { %v6684_v36 = vadd.f32 %v10902_v0, %v6683_v59  ;;  %6710 = vst [vmem:[%s10907_s9 + $0xb0] sm:$0xff] %v6664_v47 }
 0x80f   : > { %6718 = vst [vmem:[%s10907_s9 + $0xf0] sm:$0xff] %v6684_v36 }
 0x812   : > { %v6665_v54 = vpop.f32.mrf.mxu2 }
 0x813   : > { %v6666_v2 = vadd.f32 %v10902_v0, %v6665_v54 }
 0x814   : > { %v6685_v11 = vpop.f32.mrf.mxu3 }
 0x815   : > { %v6686_v49 = vadd.f32 %v10902_v0, %v6685_v11  ;;  %6711 = vst [vmem:[%s10907_s9 + $0xb8] sm:$0xff] %v6666_v2 }
 0x817   : > { %6719 = vst [vmem:[%s10907_s9 + $0xf8] sm:$0xff] %v6686_v49 }
 0x838   : > { %v6623_v44 = vpop.f32.mrf.mxu0 }
 0x839   : > { %v6624_v10 = vadd.f32 %v10902_v0, %v6623_v44 }
 0x83b   : > { %6694 = vst [vmem:[%s10907_s9 + $0x30] sm:$0xff] %v6624_v10 }
 0x83e   : > { %v6643_v28 = vpop.f32.mrf.mxu1 }
 0x83f   : > { %v6644_v7 = vadd.f32 %v10902_v0, %v6643_v28 }
 0x840   : > { %v6625_v23 = vpop.f32.mrf.mxu0 }
 0x841   : > { %v6626_v27 = vadd.f32 %v10902_v0, %v6625_v23  ;;  %6702 = vst [vmem:[%s10907_s9 + $0x70] sm:$0xff] %v6644_v7 }
 0x843   : > { %6695 = vst [vmem:[%s10907_s9 + $0x38] sm:$0xff] %v6626_v27 }
 0x846   : > { %v6645_v19 = vpop.f32.mrf.mxu1 }
 0x847   : > { %v6646_v38 = vadd.f32 %v10902_v0, %v6645_v19 }
 0x849   : > { %6703 = vst [vmem:[%s10907_s9 + $0x78] sm:$0xff] %v6646_v38 }
 0x84a PF: > { %s14_s15 = sadd.s32 1, %s7270_s15  }
 0x84b   : > { %p11_p4 = scmp.ge.s32.totalorder %s14_s15, 4  }
 0x84d   :  { %13 = sbr.rel (!%p11_p4) target bundleno = 1 (0x1), region = 66 }

</bundles_post_ra>
